<compile_context>
chip_gen: v7x
topology: tpu7x:2x2x1
jax: 0.10.0
libtpu: 0.0.40
codegen_flags: <defaults>
</compile_context>

<pallas_src>
import functools

import jax
import jax.numpy as jnp
from jax import lax
from jax.experimental import pallas as pl
from jax.experimental.pallas import tpu as pltpu

# ----------------------------- config ---------------------------------------
VOCAB = 24          # vocab_len
MAX_LEN = 8         # config['max_len']
EMB_DIM = 16        # config['embedding_dim']
LATENT = 16         # config['latent_dim']
BATCH = 8
OUT_LANES = 256     # lane-dense output slab width

# gpytorch default raw params are 0 -> softplus(0) = ln(2)
_LENGTHSCALE = 0.6931471805599453
_OUTPUTSCALE = 0.6931471805599453
_SQRT5 = 2.23606797749979


# ------------------------- fused Pallas kernel -------------------------------
def _make_fused_kernel(n_to_z, batch):
    """Kernel for fidelity level l = n_to_z."""
    # --- slab A row layout (everything with fan_out == 512, stacked on rows) ---
    a_chunks = []                       # (row_off, rows) per stage
    a_chunks.append((0, 192 + 512))     # encoder: w1_eff(192) + w2(512)
    off = 704
    for _ in range(n_to_z):             # to_z stage: w1(32) + w2(512)
        a_chunks.append((off, 544)); off += 544
    a_chunks.append((off, 544)); off += 544   # decoder: w1_pad(32) + w2(512)
    a_chunks.append((off, 32))                # deep kernel: w1_pad(32)
    n_a = len(a_chunks)                 # = n_to_z + 3

    # --- slab B column layout (narrow-output matrices, stacked on columns) ---
    col_dec = 32 * (1 + n_to_z)         # enc_w3 + to_z w3's come first
    col_dkw2 = col_dec + 192
    col_dkw3 = col_dkw2 + 256

    lv = MAX_LEN * VOCAB
    pad_lanes = OUT_LANES - lv - 2 * LATENT - batch

    def kernel(tok_ref, bias_ref, wa_hbm, wb_hbm, out_ref, wa, wb, sems):
        # ---- issue all weight DMAs up front (prefetch chain, usage order) ----
        o0, r0 = a_chunks[0]
        cps = [pltpu.make_async_copy(wa_hbm.at[pl.ds(o0, r0)],
                                     wa.at[pl.ds(o0, r0)], sems.at[0])]
        cps[0].start()
        cpb = pltpu.make_async_copy(wb_hbm, wb, sems.at[n_a])
        cpb.start()
        for i in range(1, n_a):
            o, r = a_chunks[i]
            cp = pltpu.make_async_copy(wa_hbm.at[pl.ds(o, r)],
                                       wa.at[pl.ds(o, r)], sems.at[i])
            cp.start()
            cps.append(cp)

        def dense(x, w, b_idx, out_dim, relu):
            y = jnp.dot(x.astype(jnp.bfloat16), w,
                        preferred_element_type=jnp.float32)
            y = y + bias_ref[b_idx:b_idx + 1, 0:out_dim]
            return jnp.maximum(y, 0.0) if relu else y

        # ---- single (B, 192) one-hot for the embedding-folded encoder L1 ----
        tok = tok_ref[...]                                       # (B, L) int32
        pos = lax.broadcasted_iota(jnp.int32, (batch, MAX_LEN), 1)
        flat_idx = tok + VOCAB * pos                             # (B, L)
        lane = lax.broadcasted_iota(jnp.int32, (batch, MAX_LEN, lv), 2)
        onehot = jnp.sum((flat_idx[:, :, None] == lane).astype(jnp.float32),
                         axis=1)                                 # (B, 192)
        onehot = onehot.astype(jnp.bfloat16)

        # ---- encoder -------------------------------------------------------
        cps[0].wait()
        h = dense(onehot, wa[0:192, :], 0, 512, True)
        h = dense(h, wa[192:704, :], 1, 512, True)
        cpb.wait()                                               # slab B ready
        t = dense(h, wb[:, 0:32], 2, 32, False)                  # [mu|log_var]

        # ---- fidelity transform chain (to_z2 .. to_z{l+1}) -------------------
        for s in range(n_to_z):
            cps[1 + s].wait()
            o = a_chunks[1 + s][0]
            h = dense(t, wa[o:o + 32, :], 3 + 3 * s, 512, True)
            h = dense(h, wa[o + 32:o + 544, :], 4 + 3 * s, 512, True)
            t = dense(h, wb[:, 32 + 32 * s:64 + 32 * s], 5 + 3 * s, 32, False)

        # ---- decoder{l+1} (z-slice folded into zero-padded w1) ---------------
        cps[1 + n_to_z].wait()
        o = a_chunks[1 + n_to_z][0]
        bi = 3 + 3 * n_to_z
        h = dense(t, wa[o:o + 32, :], bi, 512, True)
        h = dense(h, wa[o + 32:o + 544, :], bi + 1, 512, True)
        dec = dense(h, wb[:, col_dec:col_dec + 192], bi + 2, lv, False)

        # ---- surrogate{l+1}: deep kernel -> ScaleKernel(Matern nu=2.5) -------
        cps[2 + n_to_z].wait()
        o = a_chunks[2 + n_to_z][0]
        bj = 6 + 3 * n_to_z
        f = dense(t, wa[o:o + 32, :], bj, 512, True)
        f = dense(f, wb[:, col_dkw2:col_dkw2 + 256], bj + 1, 256, True)
        f = dense(f, wb[0:256, col_dkw3:col_dkw3 + 32], bj + 2, 32, False)
        f = f * (1.0 / _LENGTHSCALE)
        sq = jnp.sum(f * f, axis=-1, keepdims=True)              # (B, 1)
        gram = lax.dot_general(f, f, (((1,), (1,)), ((), ())),   # f @ f.T
                               preferred_element_type=jnp.float32)
        d2 = jnp.maximum(sq + jnp.transpose(sq) - 2.0 * gram, 0.0)
        d = jnp.sqrt(d2)
        k = (1.0 + _SQRT5 * d + (5.0 / 3.0) * d2) * jnp.exp(-_SQRT5 * d)
        covar = _OUTPUTSCALE * k                                 # (B, B)

        # ---- single lane-dense output store ----------------------------------
        pad = jnp.zeros((batch, pad_lanes), jnp.float32)
        out_ref[...] = jnp.concatenate([dec, t, covar, pad], axis=-1)

    return kernel, n_a


def _fused_forward_call(tokens, bias_slab, wa, wb, n_to_z):
    B = tokens.shape[0]
    kernel, n_a = _make_fused_kernel(n_to_z, B)
    grid_spec = pltpu.PrefetchScalarGridSpec(
        num_scalar_prefetch=0,
        grid=(1,),
        in_specs=[
            pl.BlockSpec(tokens.shape, lambda i: (0, 0)),
            pl.BlockSpec(bias_slab.shape, lambda i: (0, 0)),
            pl.BlockSpec(memory_space=pl.ANY),     # weight slab A (HBM)
            pl.BlockSpec(memory_space=pl.ANY),     # weight slab B (HBM)
        ],
        out_specs=pl.BlockSpec((B, OUT_LANES), lambda i: (0, 0)),
        scratch_shapes=[
            pltpu.VMEM(wa.shape, jnp.bfloat16),
            pltpu.VMEM(wb.shape, jnp.bfloat16),
            pltpu.SemaphoreType.DMA((n_a + 1,)),
        ],
    )
    return pl.pallas_call(
        kernel,
        out_shape=jax.ShapeDtypeStruct((B, OUT_LANES), jnp.float32),
        grid_spec=grid_spec,
        compiler_params=pltpu.CompilerParams(
            dimension_semantics=("arbitrary",)),
    )(tokens, bias_slab, wa, wb)


# ------------------------ parameter construction -----------------------------
def _linear_params(key, fan_in, fan_out):
    kw, kb = jax.random.split(key)
    bound = 1.0 / jnp.sqrt(fan_in)
    w = jax.random.uniform(kw, (fan_in, fan_out), jnp.float32, -bound, bound)
    b = jax.random.uniform(kb, (1, fan_out), jnp.float32, -bound, bound)
    return w, b


def _mlp3_params(key, dims):
    k1, k2, k3 = jax.random.split(key, 3)
    w1, b1 = _linear_params(k1, dims[0], dims[1])
    w2, b2 = _linear_params(k2, dims[1], dims[2])
    w3, b3 = _linear_params(k3, dims[2], dims[3])
    return (w1, b1, w2, b2, w3, b3)


def init_params(key):
    keys = jax.random.split(key, 16)
    emb = jax.random.normal(keys[0], (VOCAB, EMB_DIM), jnp.float32)
    emb = emb.at[0].set(0.0)  # padding_idx=0
    return {
        "emb": emb,
        "encoder": _mlp3_params(keys[1], (EMB_DIM * MAX_LEN, 512, 512, 2 * LATENT)),
        "decoders": [
            _mlp3_params(keys[2 + i], (LATENT, 512, 512, VOCAB * MAX_LEN))
            for i in range(4)
        ],
        "to_z": [
            _mlp3_params(keys[6 + i], (2 * LATENT, 512, 512, 2 * LATENT))
            for i in range(3)
        ],
        "surrogate_dk": [
            _mlp3_params(keys[9 + i], (LATENT, 512, 256, 32))
            for i in range(4)
        ],
    }


def pack_params(params, l):
    """Pack all weights for fidelity `l` into two bf16 slabs + one f32 bias slab.

    Done ONCE outside the jitted forward so the per-call path is just the
    fused pallas_call.
    """
    def pad_rows(w, rows):
        return jnp.pad(w, ((0, rows - w.shape[0]), (0, 0)))

    def bias_row(b):
        b = b.reshape(1, -1).astype(jnp.float32)
        return jnp.pad(b, ((0, 0), (0, 512 - b.shape[1])))

    emb = params["emb"]
    enc_w1, enc_b1, enc_w2, enc_b2, enc_w3, enc_b3 = params["encoder"]

    # Fold embedding into encoder L1: flat @ W1 == onehot(192) @ w1_eff(192,512)
    w1_r = enc_w1.reshape(MAX_LEN, EMB_DIM, 512)
    w1_eff = jnp.einsum("ve,ped->pvd", emb, w1_r).reshape(MAX_LEN * VOCAB, 512)

    a_parts = [w1_eff, enc_w2]
    b_parts = [enc_w3]
    biases = [enc_b1, enc_b2, enc_b3]

    for s in range(l):
        w1, b1, w2, b2, w3, b3 = params["to_z"][s]
        a_parts += [w1, w2]
        b_parts += [w3]
        biases += [b1, b2, b3]

    dw1, db1, dw2, db2, dw3, db3 = params["decoders"][l]
    a_parts += [pad_rows(dw1, 2 * LATENT), dw2]     # fold z = t[:, :LATENT]
    b_parts += [dw3]
    biases += [db1, db2, db3]

    kw1, kb1, kw2, kb2, kw3, kb3 = params["surrogate_dk"][l]
    a_parts += [pad_rows(kw1, 2 * LATENT)]          # fold z = t[:, :LATENT]
    b_parts += [kw2, pad_rows(kw3, 512)]
    biases += [kb1, kb2, kb3]

    wa = jnp.concatenate(a_parts, axis=0).astype(jnp.bfloat16)   # (rows, 512)
    wb = jnp.concatenate(b_parts, axis=1).astype(jnp.bfloat16)   # (512, cols)

    bias_rows = [bias_row(b) for b in biases]
    n = len(bias_rows)
    n_pad = (-n) % 8
    if n_pad:
        bias_rows.append(jnp.zeros((n_pad, 512), jnp.float32))
    bias_slab = jnp.concatenate(bias_rows, axis=0)               # (ceil8(n), 512)
    return wa, wb, bias_slab


# ----------------------------- forward ---------------------------------------
@functools.partial(jax.jit, static_argnums=4)
def mflal_forward(tokens, wa, wb, bias_slab, l):
    """Eval-mode MFLAL.forward: (recon, (gp_mean, gp_covar), z, mu, log_var)."""
    B = tokens.shape[0]
    out = _fused_forward_call(tokens, bias_slab, wa, wb, l)

    lv = MAX_LEN * VOCAB
    dec = out[:, :lv].reshape(B, MAX_LEN, VOCAB)
    mu = out[:, lv:lv + LATENT]
    log_var = out[:, lv + LATENT:lv + 2 * LATENT]
    gp_covar = out[:, lv + 2 * LATENT:lv + 2 * LATENT + B]
    z = mu                                      # eval mode: z = mu
    gp_mean = jnp.zeros((B,), jnp.float32)      # ConstantMean init = 0
    return dec, (gp_mean, gp_covar), z, mu, log_var


# ------------------------------- main ----------------------------------------
if __name__ == "__main__":
    key = jax.random.PRNGKey(0)
    pkey, xkey = jax.random.split(key)
    params = init_params(pkey)

    tokens = jax.random.randint(xkey, (BATCH, MAX_LEN), 0, VOCAB, dtype=jnp.int32)

    l = 2  # fidelity level (static)
    wa, wb, bias_slab = pack_params(params, l)          # packed once
    jax.block_until_ready((wa, wb, bias_slab))

    dec, (gp_mean, gp_covar), z, mu, log_var = mflal_forward(
        tokens, wa, wb, bias_slab, l)
    jax.block_until_ready((dec, gp_mean, gp_covar, z, mu, log_var))

    assert dec.shape == (BATCH, MAX_LEN, VOCAB)
    assert gp_mean.shape == (BATCH,)
    assert gp_covar.shape == (BATCH, BATCH)
    assert z.shape == (BATCH, LATENT)
    assert mu.shape == (BATCH, LATENT)
    assert log_var.shape == (BATCH, LATENT)

    print("KERNEL_OK")
</pallas_src>

<mosaic_0001>
module attributes {stable_mosaic.version = 11 : i64} {
  func.func @kernel(%arg0: i32, %arg1: memref<8x8xi32, #tpu.memory_space<vmem>>, %arg2: memref<16x512xf32, #tpu.memory_space<vmem>>, %arg3: memref<2368x512xbf16, #tpu.memory_space<any>>, %arg4: memref<512x576xbf16, #tpu.memory_space<any>>, %arg5: memref<8x256xf32, #tpu.memory_space<vmem>>, %arg6: memref<2368x512xbf16, #tpu.memory_space<vmem>>, %arg7: memref<512x576xbf16, #tpu.memory_space<vmem>>, %arg8: memref<6x!tpu.dma_semaphore, #tpu.memory_space<semaphore_mem>>) attributes {dimension_semantics = [#tpu.dimension_semantics<arbitrary>], iteration_bounds = array<i64: 1>, scalar_prefetch = 0 : i64, scratch_operands = 3 : i64, tpu.core_type = #tpu.core_type<tc>, window_params = [{pipeline_mode = #tpu.pipeline_mode<synchronous>, transform_indices = @transform_0, window_bounds = array<i64: 8, 8>}, {pipeline_mode = #tpu.pipeline_mode<synchronous>, transform_indices = @transform_1, window_bounds = array<i64: 16, 512>}, {}, {}, {pipeline_mode = #tpu.pipeline_mode<synchronous>, transform_indices = @transform_4, window_bounds = array<i64: 8, 256>}]} {
    %c0_i32 = arith.constant 0 : i32
    %c0_i32_0 = arith.constant 0 : i32
    %c0_i32_1 = arith.constant 0 : i32
    %0 = tpu.memref_slice %arg3[%c0_i32_0, %c0_i32_1] : memref<2368x512xbf16, #tpu.memory_space<any>> -> memref<704x512xbf16, #tpu.memory_space<any>>
    %c0_i32_2 = arith.constant 0 : i32
    %c0_i32_3 = arith.constant 0 : i32
    %1 = tpu.memref_slice %arg6[%c0_i32_2, %c0_i32_3] : memref<2368x512xbf16, #tpu.memory_space<vmem>> -> memref<704x512xbf16, #tpu.memory_space<vmem>>
    %2 = tpu.memref_slice %arg8[%c0_i32] : memref<6x!tpu.dma_semaphore, #tpu.memory_space<semaphore_mem>> -> memref<1x!tpu.dma_semaphore, #tpu.memory_space<semaphore_mem>>
    %3 = tpu.memref_squeeze %2 : memref<1x!tpu.dma_semaphore, #tpu.memory_space<semaphore_mem>> -> memref<!tpu.dma_semaphore, #tpu.memory_space<semaphore_mem>>
    tpu.enqueue_dma source(%0 : memref<704x512xbf16, #tpu.memory_space<any>>) target(%1 : memref<704x512xbf16, #tpu.memory_space<vmem>>) target_semaphore(%3 : memref<!tpu.dma_semaphore, #tpu.memory_space<semaphore_mem>>)
    %c5_i32 = arith.constant 5 : i32
    %4 = tpu.memref_slice %arg8[%c5_i32] : memref<6x!tpu.dma_semaphore, #tpu.memory_space<semaphore_mem>> -> memref<1x!tpu.dma_semaphore, #tpu.memory_space<semaphore_mem>>
    %5 = tpu.memref_squeeze %4 : memref<1x!tpu.dma_semaphore, #tpu.memory_space<semaphore_mem>> -> memref<!tpu.dma_semaphore, #tpu.memory_space<semaphore_mem>>
    tpu.enqueue_dma source(%arg4 : memref<512x576xbf16, #tpu.memory_space<any>>) target(%arg7 : memref<512x576xbf16, #tpu.memory_space<vmem>>) target_semaphore(%5 : memref<!tpu.dma_semaphore, #tpu.memory_space<semaphore_mem>>)
    %c1_i32 = arith.constant 1 : i32
    %c704_i32 = arith.constant 704 : i32
    %c0_i32_4 = arith.constant 0 : i32
    %6 = tpu.memref_slice %arg3[%c704_i32, %c0_i32_4] : memref<2368x512xbf16, #tpu.memory_space<any>> -> memref<544x512xbf16, #tpu.memory_space<any>>
    %c704_i32_5 = arith.constant 704 : i32
    %c0_i32_6 = arith.constant 0 : i32
    %7 = tpu.memref_slice %arg6[%c704_i32_5, %c0_i32_6] : memref<2368x512xbf16, #tpu.memory_space<vmem>> -> memref<544x512xbf16, #tpu.memory_space<vmem>>
    %8 = tpu.memref_slice %arg8[%c1_i32] : memref<6x!tpu.dma_semaphore, #tpu.memory_space<semaphore_mem>> -> memref<1x!tpu.dma_semaphore, #tpu.memory_space<semaphore_mem>>
    %9 = tpu.memref_squeeze %8 : memref<1x!tpu.dma_semaphore, #tpu.memory_space<semaphore_mem>> -> memref<!tpu.dma_semaphore, #tpu.memory_space<semaphore_mem>>
    tpu.enqueue_dma source(%6 : memref<544x512xbf16, #tpu.memory_space<any>>) target(%7 : memref<544x512xbf16, #tpu.memory_space<vmem>>) target_semaphore(%9 : memref<!tpu.dma_semaphore, #tpu.memory_space<semaphore_mem>>)
    %c2_i32 = arith.constant 2 : i32
    %c1248_i32 = arith.constant 1248 : i32
    %c0_i32_7 = arith.constant 0 : i32
    %10 = tpu.memref_slice %arg3[%c1248_i32, %c0_i32_7] : memref<2368x512xbf16, #tpu.memory_space<any>> -> memref<544x512xbf16, #tpu.memory_space<any>>
    %c1248_i32_8 = arith.constant 1248 : i32
    %c0_i32_9 = arith.constant 0 : i32
    %11 = tpu.memref_slice %arg6[%c1248_i32_8, %c0_i32_9] : memref<2368x512xbf16, #tpu.memory_space<vmem>> -> memref<544x512xbf16, #tpu.memory_space<vmem>>
    %12 = tpu.memref_slice %arg8[%c2_i32] : memref<6x!tpu.dma_semaphore, #tpu.memory_space<semaphore_mem>> -> memref<1x!tpu.dma_semaphore, #tpu.memory_space<semaphore_mem>>
    %13 = tpu.memref_squeeze %12 : memref<1x!tpu.dma_semaphore, #tpu.memory_space<semaphore_mem>> -> memref<!tpu.dma_semaphore, #tpu.memory_space<semaphore_mem>>
    tpu.enqueue_dma source(%10 : memref<544x512xbf16, #tpu.memory_space<any>>) target(%11 : memref<544x512xbf16, #tpu.memory_space<vmem>>) target_semaphore(%13 : memref<!tpu.dma_semaphore, #tpu.memory_space<semaphore_mem>>)
    %c3_i32 = arith.constant 3 : i32
    %c1792_i32 = arith.constant 1792 : i32
    %c0_i32_10 = arith.constant 0 : i32
    %14 = tpu.memref_slice %arg3[%c1792_i32, %c0_i32_10] : memref<2368x512xbf16, #tpu.memory_space<any>> -> memref<544x512xbf16, #tpu.memory_space<any>>
    %c1792_i32_11 = arith.constant 1792 : i32
    %c0_i32_12 = arith.constant 0 : i32
    %15 = tpu.memref_slice %arg6[%c1792_i32_11, %c0_i32_12] : memref<2368x512xbf16, #tpu.memory_space<vmem>> -> memref<544x512xbf16, #tpu.memory_space<vmem>>
    %16 = tpu.memref_slice %arg8[%c3_i32] : memref<6x!tpu.dma_semaphore, #tpu.memory_space<semaphore_mem>> -> memref<1x!tpu.dma_semaphore, #tpu.memory_space<semaphore_mem>>
    %17 = tpu.memref_squeeze %16 : memref<1x!tpu.dma_semaphore, #tpu.memory_space<semaphore_mem>> -> memref<!tpu.dma_semaphore, #tpu.memory_space<semaphore_mem>>
    tpu.enqueue_dma source(%14 : memref<544x512xbf16, #tpu.memory_space<any>>) target(%15 : memref<544x512xbf16, #tpu.memory_space<vmem>>) target_semaphore(%17 : memref<!tpu.dma_semaphore, #tpu.memory_space<semaphore_mem>>)
    %c4_i32 = arith.constant 4 : i32
    %c2336_i32 = arith.constant 2336 : i32
    %c0_i32_13 = arith.constant 0 : i32
    %18 = tpu.memref_slice %arg3[%c2336_i32, %c0_i32_13] : memref<2368x512xbf16, #tpu.memory_space<any>> -> memref<32x512xbf16, #tpu.memory_space<any>>
    %c2336_i32_14 = arith.constant 2336 : i32
    %c0_i32_15 = arith.constant 0 : i32
    %19 = tpu.memref_slice %arg6[%c2336_i32_14, %c0_i32_15] : memref<2368x512xbf16, #tpu.memory_space<vmem>> -> memref<32x512xbf16, #tpu.memory_space<vmem>>
    %20 = tpu.memref_slice %arg8[%c4_i32] : memref<6x!tpu.dma_semaphore, #tpu.memory_space<semaphore_mem>> -> memref<1x!tpu.dma_semaphore, #tpu.memory_space<semaphore_mem>>
    %21 = tpu.memref_squeeze %20 : memref<1x!tpu.dma_semaphore, #tpu.memory_space<semaphore_mem>> -> memref<!tpu.dma_semaphore, #tpu.memory_space<semaphore_mem>>
    tpu.enqueue_dma source(%18 : memref<32x512xbf16, #tpu.memory_space<any>>) target(%19 : memref<32x512xbf16, #tpu.memory_space<vmem>>) target_semaphore(%21 : memref<!tpu.dma_semaphore, #tpu.memory_space<semaphore_mem>>)
    %c0 = arith.constant 0 : index
    %c0_16 = arith.constant 0 : index
    %22 = vector.load %arg1[%c0, %c0_16] : memref<8x8xi32, #tpu.memory_space<vmem>>, vector<8x8xi32>
    %23 = tpu.iota {dimensions = array<i32: 1>} : vector<8x8xi32>
    %c24_i32 = arith.constant 24 : i32
    %24 = vector.broadcast %c24_i32 : i32 to vector<8x8xi32>
    %25 = arith.muli %24, %23 : vector<8x8xi32>
    %26 = arith.addi %22, %25 : vector<8x8xi32>
    %27 = tpu.iota {dimensions = array<i32: 2>} : vector<8x8x192xi32>
    %28 = vector.shape_cast %26 : vector<8x8xi32> to vector<8x8x1xi32>
    %29 = vector.broadcast %28 : vector<8x8x1xi32> to vector<8x8x192xi32>
    %30 = arith.cmpi eq, %29, %27 : vector<8x8x192xi32>
    %31 = arith.extui %30 : vector<8x8x192xi1> to vector<8x8x192xi32>
    %32 = arith.sitofp %31 : vector<8x8x192xi32> to vector<8x8x192xf32>
    %cst = arith.constant dense<0.000000e+00> : vector<8x192xf32>
    %33 = vector.multi_reduction <add>, %32, %cst [1] : vector<8x8x192xf32> to vector<8x192xf32>
    %34 = arith.truncf %33 : vector<8x192xf32> to vector<8x192xbf16>
    %c0_i32_17 = arith.constant 0 : i32
    %c0_i32_18 = arith.constant 0 : i32
    %c0_i32_19 = arith.constant 0 : i32
    %35 = tpu.memref_slice %arg3[%c0_i32_18, %c0_i32_19] : memref<2368x512xbf16, #tpu.memory_space<any>> -> memref<704x512xbf16, #tpu.memory_space<any>>
    %c0_i32_20 = arith.constant 0 : i32
    %c0_i32_21 = arith.constant 0 : i32
    %36 = tpu.memref_slice %arg6[%c0_i32_20, %c0_i32_21] : memref<2368x512xbf16, #tpu.memory_space<vmem>> -> memref<704x512xbf16, #tpu.memory_space<vmem>>
    %37 = tpu.memref_slice %arg8[%c0_i32_17] : memref<6x!tpu.dma_semaphore, #tpu.memory_space<semaphore_mem>> -> memref<1x!tpu.dma_semaphore, #tpu.memory_space<semaphore_mem>>
    %38 = tpu.memref_squeeze %37 : memref<1x!tpu.dma_semaphore, #tpu.memory_space<semaphore_mem>> -> memref<!tpu.dma_semaphore, #tpu.memory_space<semaphore_mem>>
    tpu.wait_dma2 semaphore(%38 : memref<!tpu.dma_semaphore, #tpu.memory_space<semaphore_mem>>) src(%35 : memref<704x512xbf16, #tpu.memory_space<any>>) dst(%36 : memref<704x512xbf16, #tpu.memory_space<vmem>>)
    %c0_22 = arith.constant 0 : index
    %c0_23 = arith.constant 0 : index
    %39 = vector.load %arg6[%c0_22, %c0_23] : memref<2368x512xbf16, #tpu.memory_space<vmem>>, vector<192x512xbf16>
    %cst_24 = arith.constant dense<0.000000e+00> : vector<8x512xf32>
    %40 = tpu.matmul %34, %39, %cst_24 {dimension_numbers = #tpu.dot_dimension_numbers<[1], [0], [0], [1], [0, 0, 1, 1], [], []>} : vector<8x192xbf16>, vector<192x512xbf16>, vector<8x512xf32> -> vector<8x512xf32>
    %c0_25 = arith.constant 0 : index
    %c0_26 = arith.constant 0 : index
    %41 = vector.load %arg2[%c0_25, %c0_26] : memref<16x512xf32, #tpu.memory_space<vmem>>, vector<1x512xf32>
    %42 = vector.broadcast %41 : vector<1x512xf32> to vector<8x512xf32>
    %43 = arith.addf %40, %42 : vector<8x512xf32>
    %cst_27 = arith.constant 0.000000e+00 : f32
    %44 = vector.broadcast %cst_27 : f32 to vector<8x512xf32>
    %45 = arith.maximumf %43, %44 : vector<8x512xf32>
    %c192 = arith.constant 192 : index
    %c0_28 = arith.constant 0 : index
    %46 = vector.load %arg6[%c192, %c0_28] : memref<2368x512xbf16, #tpu.memory_space<vmem>>, vector<512x512xbf16>
    %47 = arith.truncf %45 : vector<8x512xf32> to vector<8x512xbf16>
    %cst_29 = arith.constant dense<0.000000e+00> : vector<8x512xf32>
    %48 = tpu.matmul %47, %46, %cst_29 {dimension_numbers = #tpu.dot_dimension_numbers<[1], [0], [0], [1], [0, 0, 1, 1], [], []>} : vector<8x512xbf16>, vector<512x512xbf16>, vector<8x512xf32> -> vector<8x512xf32>
    %c1 = arith.constant 1 : index
    %c0_30 = arith.constant 0 : index
    %49 = vector.load %arg2[%c1, %c0_30] : memref<16x512xf32, #tpu.memory_space<vmem>>, vector<1x512xf32>
    %50 = vector.broadcast %49 : vector<1x512xf32> to vector<8x512xf32>
    %51 = arith.addf %48, %50 : vector<8x512xf32>
    %cst_31 = arith.constant 0.000000e+00 : f32
    %52 = vector.broadcast %cst_31 : f32 to vector<8x512xf32>
    %53 = arith.maximumf %51, %52 : vector<8x512xf32>
    %c5_i32_32 = arith.constant 5 : i32
    %54 = tpu.memref_slice %arg8[%c5_i32_32] : memref<6x!tpu.dma_semaphore, #tpu.memory_space<semaphore_mem>> -> memref<1x!tpu.dma_semaphore, #tpu.memory_space<semaphore_mem>>
    %55 = tpu.memref_squeeze %54 : memref<1x!tpu.dma_semaphore, #tpu.memory_space<semaphore_mem>> -> memref<!tpu.dma_semaphore, #tpu.memory_space<semaphore_mem>>
    tpu.wait_dma2 semaphore(%55 : memref<!tpu.dma_semaphore, #tpu.memory_space<semaphore_mem>>) src(%arg4 : memref<512x576xbf16, #tpu.memory_space<any>>) dst(%arg7 : memref<512x576xbf16, #tpu.memory_space<vmem>>)
    %c0_33 = arith.constant 0 : index
    %c0_34 = arith.constant 0 : index
    %56 = vector.load %arg7[%c0_33, %c0_34] : memref<512x576xbf16, #tpu.memory_space<vmem>>, vector<512x32xbf16>
    %57 = arith.truncf %53 : vector<8x512xf32> to vector<8x512xbf16>
    %cst_35 = arith.constant dense<0.000000e+00> : vector<8x32xf32>
    %58 = tpu.matmul %57, %56, %cst_35 {dimension_numbers = #tpu.dot_dimension_numbers<[1], [0], [0], [1], [0, 0, 1, 1], [], []>} : vector<8x512xbf16>, vector<512x32xbf16>, vector<8x32xf32> -> vector<8x32xf32>
    %c2 = arith.constant 2 : index
    %c0_36 = arith.constant 0 : index
    %59 = vector.load %arg2[%c2, %c0_36] : memref<16x512xf32, #tpu.memory_space<vmem>>, vector<1x32xf32>
    %60 = vector.broadcast %59 : vector<1x32xf32> to vector<8x32xf32>
    %61 = arith.addf %58, %60 : vector<8x32xf32>
    %c1_i32_37 = arith.constant 1 : i32
    %c704_i32_38 = arith.constant 704 : i32
    %c0_i32_39 = arith.constant 0 : i32
    %62 = tpu.memref_slice %arg3[%c704_i32_38, %c0_i32_39] : memref<2368x512xbf16, #tpu.memory_space<any>> -> memref<544x512xbf16, #tpu.memory_space<any>>
    %c704_i32_40 = arith.constant 704 : i32
    %c0_i32_41 = arith.constant 0 : i32
    %63 = tpu.memref_slice %arg6[%c704_i32_40, %c0_i32_41] : memref<2368x512xbf16, #tpu.memory_space<vmem>> -> memref<544x512xbf16, #tpu.memory_space<vmem>>
    %64 = tpu.memref_slice %arg8[%c1_i32_37] : memref<6x!tpu.dma_semaphore, #tpu.memory_space<semaphore_mem>> -> memref<1x!tpu.dma_semaphore, #tpu.memory_space<semaphore_mem>>
    %65 = tpu.memref_squeeze %64 : memref<1x!tpu.dma_semaphore, #tpu.memory_space<semaphore_mem>> -> memref<!tpu.dma_semaphore, #tpu.memory_space<semaphore_mem>>
    tpu.wait_dma2 semaphore(%65 : memref<!tpu.dma_semaphore, #tpu.memory_space<semaphore_mem>>) src(%62 : memref<544x512xbf16, #tpu.memory_space<any>>) dst(%63 : memref<544x512xbf16, #tpu.memory_space<vmem>>)
    %c704 = arith.constant 704 : index
    %c0_42 = arith.constant 0 : index
    %66 = vector.load %arg6[%c704, %c0_42] : memref<2368x512xbf16, #tpu.memory_space<vmem>>, vector<32x512xbf16>
    %67 = arith.truncf %61 : vector<8x32xf32> to vector<8x32xbf16>
    %cst_43 = arith.constant dense<0.000000e+00> : vector<8x512xf32>
    %68 = tpu.matmul %67, %66, %cst_43 {dimension_numbers = #tpu.dot_dimension_numbers<[1], [0], [0], [1], [0, 0, 1, 1], [], []>} : vector<8x32xbf16>, vector<32x512xbf16>, vector<8x512xf32> -> vector<8x512xf32>
    %c3 = arith.constant 3 : index
    %c0_44 = arith.constant 0 : index
    %69 = vector.load %arg2[%c3, %c0_44] : memref<16x512xf32, #tpu.memory_space<vmem>>, vector<1x512xf32>
    %70 = vector.broadcast %69 : vector<1x512xf32> to vector<8x512xf32>
    %71 = arith.addf %68, %70 : vector<8x512xf32>
    %cst_45 = arith.constant 0.000000e+00 : f32
    %72 = vector.broadcast %cst_45 : f32 to vector<8x512xf32>
    %73 = arith.maximumf %71, %72 : vector<8x512xf32>
    %c736 = arith.constant 736 : index
    %c0_46 = arith.constant 0 : index
    %74 = vector.load %arg6[%c736, %c0_46] : memref<2368x512xbf16, #tpu.memory_space<vmem>>, vector<512x512xbf16>
    %75 = arith.truncf %73 : vector<8x512xf32> to vector<8x512xbf16>
    %cst_47 = arith.constant dense<0.000000e+00> : vector<8x512xf32>
    %76 = tpu.matmul %75, %74, %cst_47 {dimension_numbers = #tpu.dot_dimension_numbers<[1], [0], [0], [1], [0, 0, 1, 1], [], []>} : vector<8x512xbf16>, vector<512x512xbf16>, vector<8x512xf32> -> vector<8x512xf32>
    %c4 = arith.constant 4 : index
    %c0_48 = arith.constant 0 : index
    %77 = vector.load %arg2[%c4, %c0_48] : memref<16x512xf32, #tpu.memory_space<vmem>>, vector<1x512xf32>
    %78 = vector.broadcast %77 : vector<1x512xf32> to vector<8x512xf32>
    %79 = arith.addf %76, %78 : vector<8x512xf32>
    %cst_49 = arith.constant 0.000000e+00 : f32
    %80 = vector.broadcast %cst_49 : f32 to vector<8x512xf32>
    %81 = arith.maximumf %79, %80 : vector<8x512xf32>
    %c0_50 = arith.constant 0 : index
    %c32 = arith.constant 32 : index
    %82 = vector.load %arg7[%c0_50, %c32] : memref<512x576xbf16, #tpu.memory_space<vmem>>, vector<512x32xbf16>
    %83 = arith.truncf %81 : vector<8x512xf32> to vector<8x512xbf16>
    %cst_51 = arith.constant dense<0.000000e+00> : vector<8x32xf32>
    %84 = tpu.matmul %83, %82, %cst_51 {dimension_numbers = #tpu.dot_dimension_numbers<[1], [0], [0], [1], [0, 0, 1, 1], [], []>} : vector<8x512xbf16>, vector<512x32xbf16>, vector<8x32xf32> -> vector<8x32xf32>
    %c5 = arith.constant 5 : index
    %c0_52 = arith.constant 0 : index
    %85 = vector.load %arg2[%c5, %c0_52] : memref<16x512xf32, #tpu.memory_space<vmem>>, vector<1x32xf32>
    %86 = vector.broadcast %85 : vector<1x32xf32> to vector<8x32xf32>
    %87 = arith.addf %84, %86 : vector<8x32xf32>
    %c2_i32_53 = arith.constant 2 : i32
    %c1248_i32_54 = arith.constant 1248 : i32
    %c0_i32_55 = arith.constant 0 : i32
    %88 = tpu.memref_slice %arg3[%c1248_i32_54, %c0_i32_55] : memref<2368x512xbf16, #tpu.memory_space<any>> -> memref<544x512xbf16, #tpu.memory_space<any>>
    %c1248_i32_56 = arith.constant 1248 : i32
    %c0_i32_57 = arith.constant 0 : i32
    %89 = tpu.memref_slice %arg6[%c1248_i32_56, %c0_i32_57] : memref<2368x512xbf16, #tpu.memory_space<vmem>> -> memref<544x512xbf16, #tpu.memory_space<vmem>>
    %90 = tpu.memref_slice %arg8[%c2_i32_53] : memref<6x!tpu.dma_semaphore, #tpu.memory_space<semaphore_mem>> -> memref<1x!tpu.dma_semaphore, #tpu.memory_space<semaphore_mem>>
    %91 = tpu.memref_squeeze %90 : memref<1x!tpu.dma_semaphore, #tpu.memory_space<semaphore_mem>> -> memref<!tpu.dma_semaphore, #tpu.memory_space<semaphore_mem>>
    tpu.wait_dma2 semaphore(%91 : memref<!tpu.dma_semaphore, #tpu.memory_space<semaphore_mem>>) src(%88 : memref<544x512xbf16, #tpu.memory_space<any>>) dst(%89 : memref<544x512xbf16, #tpu.memory_space<vmem>>)
    %c1248 = arith.constant 1248 : index
    %c0_58 = arith.constant 0 : index
    %92 = vector.load %arg6[%c1248, %c0_58] : memref<2368x512xbf16, #tpu.memory_space<vmem>>, vector<32x512xbf16>
    %93 = arith.truncf %87 : vector<8x32xf32> to vector<8x32xbf16>
    %cst_59 = arith.constant dense<0.000000e+00> : vector<8x512xf32>
    %94 = tpu.matmul %93, %92, %cst_59 {dimension_numbers = #tpu.dot_dimension_numbers<[1], [0], [0], [1], [0, 0, 1, 1], [], []>} : vector<8x32xbf16>, vector<32x512xbf16>, vector<8x512xf32> -> vector<8x512xf32>
    %c6 = arith.constant 6 : index
    %c0_60 = arith.constant 0 : index
    %95 = vector.load %arg2[%c6, %c0_60] : memref<16x512xf32, #tpu.memory_space<vmem>>, vector<1x512xf32>
    %96 = vector.broadcast %95 : vector<1x512xf32> to vector<8x512xf32>
    %97 = arith.addf %94, %96 : vector<8x512xf32>
    %cst_61 = arith.constant 0.000000e+00 : f32
    %98 = vector.broadcast %cst_61 : f32 to vector<8x512xf32>
    %99 = arith.maximumf %97, %98 : vector<8x512xf32>
    %c1280 = arith.constant 1280 : index
    %c0_62 = arith.constant 0 : index
    %100 = vector.load %arg6[%c1280, %c0_62] : memref<2368x512xbf16, #tpu.memory_space<vmem>>, vector<512x512xbf16>
    %101 = arith.truncf %99 : vector<8x512xf32> to vector<8x512xbf16>
    %cst_63 = arith.constant dense<0.000000e+00> : vector<8x512xf32>
    %102 = tpu.matmul %101, %100, %cst_63 {dimension_numbers = #tpu.dot_dimension_numbers<[1], [0], [0], [1], [0, 0, 1, 1], [], []>} : vector<8x512xbf16>, vector<512x512xbf16>, vector<8x512xf32> -> vector<8x512xf32>
    %c7 = arith.constant 7 : index
    %c0_64 = arith.constant 0 : index
    %103 = vector.load %arg2[%c7, %c0_64] : memref<16x512xf32, #tpu.memory_space<vmem>>, vector<1x512xf32>
    %104 = vector.broadcast %103 : vector<1x512xf32> to vector<8x512xf32>
    %105 = arith.addf %102, %104 : vector<8x512xf32>
    %cst_65 = arith.constant 0.000000e+00 : f32
    %106 = vector.broadcast %cst_65 : f32 to vector<8x512xf32>
    %107 = arith.maximumf %105, %106 : vector<8x512xf32>
    %c0_66 = arith.constant 0 : index
    %c64 = arith.constant 64 : index
    %108 = vector.load %arg7[%c0_66, %c64] : memref<512x576xbf16, #tpu.memory_space<vmem>>, vector<512x32xbf16>
    %109 = arith.truncf %107 : vector<8x512xf32> to vector<8x512xbf16>
    %cst_67 = arith.constant dense<0.000000e+00> : vector<8x32xf32>
    %110 = tpu.matmul %109, %108, %cst_67 {dimension_numbers = #tpu.dot_dimension_numbers<[1], [0], [0], [1], [0, 0, 1, 1], [], []>} : vector<8x512xbf16>, vector<512x32xbf16>, vector<8x32xf32> -> vector<8x32xf32>
    %c8 = arith.constant 8 : index
    %c0_68 = arith.constant 0 : index
    %111 = vector.load %arg2[%c8, %c0_68] : memref<16x512xf32, #tpu.memory_space<vmem>>, vector<1x32xf32>
    %112 = vector.broadcast %111 : vector<1x32xf32> to vector<8x32xf32>
    %113 = arith.addf %110, %112 : vector<8x32xf32>
    %c3_i32_69 = arith.constant 3 : i32
    %c1792_i32_70 = arith.constant 1792 : i32
    %c0_i32_71 = arith.constant 0 : i32
    %114 = tpu.memref_slice %arg3[%c1792_i32_70, %c0_i32_71] : memref<2368x512xbf16, #tpu.memory_space<any>> -> memref<544x512xbf16, #tpu.memory_space<any>>
    %c1792_i32_72 = arith.constant 1792 : i32
    %c0_i32_73 = arith.constant 0 : i32
    %115 = tpu.memref_slice %arg6[%c1792_i32_72, %c0_i32_73] : memref<2368x512xbf16, #tpu.memory_space<vmem>> -> memref<544x512xbf16, #tpu.memory_space<vmem>>
    %116 = tpu.memref_slice %arg8[%c3_i32_69] : memref<6x!tpu.dma_semaphore, #tpu.memory_space<semaphore_mem>> -> memref<1x!tpu.dma_semaphore, #tpu.memory_space<semaphore_mem>>
    %117 = tpu.memref_squeeze %116 : memref<1x!tpu.dma_semaphore, #tpu.memory_space<semaphore_mem>> -> memref<!tpu.dma_semaphore, #tpu.memory_space<semaphore_mem>>
    tpu.wait_dma2 semaphore(%117 : memref<!tpu.dma_semaphore, #tpu.memory_space<semaphore_mem>>) src(%114 : memref<544x512xbf16, #tpu.memory_space<any>>) dst(%115 : memref<544x512xbf16, #tpu.memory_space<vmem>>)
    %c1792 = arith.constant 1792 : index
    %c0_74 = arith.constant 0 : index
    %118 = vector.load %arg6[%c1792, %c0_74] : memref<2368x512xbf16, #tpu.memory_space<vmem>>, vector<32x512xbf16>
    %119 = arith.truncf %113 : vector<8x32xf32> to vector<8x32xbf16>
    %cst_75 = arith.constant dense<0.000000e+00> : vector<8x512xf32>
    %120 = tpu.matmul %119, %118, %cst_75 {dimension_numbers = #tpu.dot_dimension_numbers<[1], [0], [0], [1], [0, 0, 1, 1], [], []>} : vector<8x32xbf16>, vector<32x512xbf16>, vector<8x512xf32> -> vector<8x512xf32>
    %c9 = arith.constant 9 : index
    %c0_76 = arith.constant 0 : index
    %121 = vector.load %arg2[%c9, %c0_76] : memref<16x512xf32, #tpu.memory_space<vmem>>, vector<1x512xf32>
    %122 = vector.broadcast %121 : vector<1x512xf32> to vector<8x512xf32>
    %123 = arith.addf %120, %122 : vector<8x512xf32>
    %cst_77 = arith.constant 0.000000e+00 : f32
    %124 = vector.broadcast %cst_77 : f32 to vector<8x512xf32>
    %125 = arith.maximumf %123, %124 : vector<8x512xf32>
    %c1824 = arith.constant 1824 : index
    %c0_78 = arith.constant 0 : index
    %126 = vector.load %arg6[%c1824, %c0_78] : memref<2368x512xbf16, #tpu.memory_space<vmem>>, vector<512x512xbf16>
    %127 = arith.truncf %125 : vector<8x512xf32> to vector<8x512xbf16>
    %cst_79 = arith.constant dense<0.000000e+00> : vector<8x512xf32>
    %128 = tpu.matmul %127, %126, %cst_79 {dimension_numbers = #tpu.dot_dimension_numbers<[1], [0], [0], [1], [0, 0, 1, 1], [], []>} : vector<8x512xbf16>, vector<512x512xbf16>, vector<8x512xf32> -> vector<8x512xf32>
    %c10 = arith.constant 10 : index
    %c0_80 = arith.constant 0 : index
    %129 = vector.load %arg2[%c10, %c0_80] : memref<16x512xf32, #tpu.memory_space<vmem>>, vector<1x512xf32>
    %130 = vector.broadcast %129 : vector<1x512xf32> to vector<8x512xf32>
    %131 = arith.addf %128, %130 : vector<8x512xf32>
    %cst_81 = arith.constant 0.000000e+00 : f32
    %132 = vector.broadcast %cst_81 : f32 to vector<8x512xf32>
    %133 = arith.maximumf %131, %132 : vector<8x512xf32>
    %c0_82 = arith.constant 0 : index
    %c96 = arith.constant 96 : index
    %134 = vector.load %arg7[%c0_82, %c96] : memref<512x576xbf16, #tpu.memory_space<vmem>>, vector<512x192xbf16>
    %135 = arith.truncf %133 : vector<8x512xf32> to vector<8x512xbf16>
    %cst_83 = arith.constant dense<0.000000e+00> : vector<8x192xf32>
    %136 = tpu.matmul %135, %134, %cst_83 {dimension_numbers = #tpu.dot_dimension_numbers<[1], [0], [0], [1], [0, 0, 1, 1], [], []>} : vector<8x512xbf16>, vector<512x192xbf16>, vector<8x192xf32> -> vector<8x192xf32>
    %c11 = arith.constant 11 : index
    %c0_84 = arith.constant 0 : index
    %137 = vector.load %arg2[%c11, %c0_84] : memref<16x512xf32, #tpu.memory_space<vmem>>, vector<1x192xf32>
    %138 = vector.broadcast %137 : vector<1x192xf32> to vector<8x192xf32>
    %139 = arith.addf %136, %138 : vector<8x192xf32>
    %c4_i32_85 = arith.constant 4 : i32
    %c2336_i32_86 = arith.constant 2336 : i32
    %c0_i32_87 = arith.constant 0 : i32
    %140 = tpu.memref_slice %arg3[%c2336_i32_86, %c0_i32_87] : memref<2368x512xbf16, #tpu.memory_space<any>> -> memref<32x512xbf16, #tpu.memory_space<any>>
    %c2336_i32_88 = arith.constant 2336 : i32
    %c0_i32_89 = arith.constant 0 : i32
    %141 = tpu.memref_slice %arg6[%c2336_i32_88, %c0_i32_89] : memref<2368x512xbf16, #tpu.memory_space<vmem>> -> memref<32x512xbf16, #tpu.memory_space<vmem>>
    %142 = tpu.memref_slice %arg8[%c4_i32_85] : memref<6x!tpu.dma_semaphore, #tpu.memory_space<semaphore_mem>> -> memref<1x!tpu.dma_semaphore, #tpu.memory_space<semaphore_mem>>
    %143 = tpu.memref_squeeze %142 : memref<1x!tpu.dma_semaphore, #tpu.memory_space<semaphore_mem>> -> memref<!tpu.dma_semaphore, #tpu.memory_space<semaphore_mem>>
    tpu.wait_dma2 semaphore(%143 : memref<!tpu.dma_semaphore, #tpu.memory_space<semaphore_mem>>) src(%140 : memref<32x512xbf16, #tpu.memory_space<any>>) dst(%141 : memref<32x512xbf16, #tpu.memory_space<vmem>>)
    %c2336 = arith.constant 2336 : index
    %c0_90 = arith.constant 0 : index
    %144 = vector.load %arg6[%c2336, %c0_90] : memref<2368x512xbf16, #tpu.memory_space<vmem>>, vector<32x512xbf16>
    %145 = arith.truncf %113 : vector<8x32xf32> to vector<8x32xbf16>
    %cst_91 = arith.constant dense<0.000000e+00> : vector<8x512xf32>
    %146 = tpu.matmul %145, %144, %cst_91 {dimension_numbers = #tpu.dot_dimension_numbers<[1], [0], [0], [1], [0, 0, 1, 1], [], []>} : vector<8x32xbf16>, vector<32x512xbf16>, vector<8x512xf32> -> vector<8x512xf32>
    %c12 = arith.constant 12 : index
    %c0_92 = arith.constant 0 : index
    %147 = vector.load %arg2[%c12, %c0_92] : memref<16x512xf32, #tpu.memory_space<vmem>>, vector<1x512xf32>
    %148 = vector.broadcast %147 : vector<1x512xf32> to vector<8x512xf32>
    %149 = arith.addf %146, %148 : vector<8x512xf32>
    %cst_93 = arith.constant 0.000000e+00 : f32
    %150 = vector.broadcast %cst_93 : f32 to vector<8x512xf32>
    %151 = arith.maximumf %149, %150 : vector<8x512xf32>
    %c0_94 = arith.constant 0 : index
    %c288 = arith.constant 288 : index
    %152 = vector.load %arg7[%c0_94, %c288] : memref<512x576xbf16, #tpu.memory_space<vmem>>, vector<512x256xbf16>
    %153 = arith.truncf %151 : vector<8x512xf32> to vector<8x512xbf16>
    %cst_95 = arith.constant dense<0.000000e+00> : vector<8x256xf32>
    %154 = tpu.matmul %153, %152, %cst_95 {dimension_numbers = #tpu.dot_dimension_numbers<[1], [0], [0], [1], [0, 0, 1, 1], [], []>} : vector<8x512xbf16>, vector<512x256xbf16>, vector<8x256xf32> -> vector<8x256xf32>
    %c13 = arith.constant 13 : index
    %c0_96 = arith.constant 0 : index
    %155 = vector.load %arg2[%c13, %c0_96] : memref<16x512xf32, #tpu.memory_space<vmem>>, vector<1x256xf32>
    %156 = vector.broadcast %155 : vector<1x256xf32> to vector<8x256xf32>
    %157 = arith.addf %154, %156 : vector<8x256xf32>
    %cst_97 = arith.constant 0.000000e+00 : f32
    %158 = vector.broadcast %cst_97 : f32 to vector<8x256xf32>
    %159 = arith.maximumf %157, %158 : vector<8x256xf32>
    %c0_98 = arith.constant 0 : index
    %c544 = arith.constant 544 : index
    %160 = vector.load %arg7[%c0_98, %c544] : memref<512x576xbf16, #tpu.memory_space<vmem>>, vector<256x32xbf16>
    %161 = arith.truncf %159 : vector<8x256xf32> to vector<8x256xbf16>
    %cst_99 = arith.constant dense<0.000000e+00> : vector<8x32xf32>
    %162 = tpu.matmul %161, %160, %cst_99 {dimension_numbers = #tpu.dot_dimension_numbers<[1], [0], [0], [1], [0, 0, 1, 1], [], []>} : vector<8x256xbf16>, vector<256x32xbf16>, vector<8x32xf32> -> vector<8x32xf32>
    %c14 = arith.constant 14 : index
    %c0_100 = arith.constant 0 : index
    %163 = vector.load %arg2[%c14, %c0_100] : memref<16x512xf32, #tpu.memory_space<vmem>>, vector<1x32xf32>
    %164 = vector.broadcast %163 : vector<1x32xf32> to vector<8x32xf32>
    %165 = arith.addf %162, %164 : vector<8x32xf32>
    %cst_101 = arith.constant 1.44269502 : f32
    %166 = vector.broadcast %cst_101 : f32 to vector<8x32xf32>
    %167 = arith.mulf %165, %166 : vector<8x32xf32>
    %168 = arith.mulf %167, %167 : vector<8x32xf32>
    %cst_102 = arith.constant dense<0.000000e+00> : vector<8xf32>
    %169 = vector.multi_reduction <add>, %168, %cst_102 [1] : vector<8x32xf32> to vector<8xf32>
    %170 = vector.shape_cast %169 : vector<8xf32> to vector<8x1xf32>
    %cst_103 = arith.constant dense<0.000000e+00> : vector<8x8xf32>
    %171 = tpu.matmul %167, %167, %cst_103 {dimension_numbers = #tpu.dot_dimension_numbers<[1], [1], [0], [0], [0, 0, 1, 0], [], []>} : vector<8x32xf32>, vector<8x32xf32>, vector<8x8xf32> -> vector<8x8xf32>
    %172 = tpu.transpose %170, [1, 0] : vector<8x1xf32> -> vector<1x8xf32>
    %173 = vector.broadcast %170 : vector<8x1xf32> to vector<8x8xf32>
    %174 = vector.broadcast %172 : vector<1x8xf32> to vector<8x8xf32>
    %175 = arith.addf %173, %174 : vector<8x8xf32>
    %cst_104 = arith.constant 2.000000e+00 : f32
    %176 = vector.broadcast %cst_104 : f32 to vector<8x8xf32>
    %177 = arith.mulf %176, %171 : vector<8x8xf32>
    %178 = arith.subf %175, %177 : vector<8x8xf32>
    %cst_105 = arith.constant 0.000000e+00 : f32
    %179 = vector.broadcast %cst_105 : f32 to vector<8x8xf32>
    %180 = arith.maximumf %178, %179 : vector<8x8xf32>
    %181 = math.sqrt %180 : vector<8x8xf32>
    %cst_106 = arith.constant 2.23606801 : f32
    %182 = vector.broadcast %cst_106 : f32 to vector<8x8xf32>
    %183 = arith.mulf %182, %181 : vector<8x8xf32>
    %cst_107 = arith.constant 1.000000e+00 : f32
    %184 = vector.broadcast %cst_107 : f32 to vector<8x8xf32>
    %185 = arith.addf %184, %183 : vector<8x8xf32>
    %cst_108 = arith.constant 1.66666663 : f32
    %186 = vector.broadcast %cst_108 : f32 to vector<8x8xf32>
    %187 = arith.mulf %186, %180 : vector<8x8xf32>
    %188 = arith.addf %185, %187 : vector<8x8xf32>
    %cst_109 = arith.constant -2.23606801 : f32
    %189 = vector.broadcast %cst_109 : f32 to vector<8x8xf32>
    %190 = arith.mulf %189, %181 : vector<8x8xf32>
    %191 = math.exp %190 : vector<8x8xf32>
    %192 = arith.mulf %188, %191 : vector<8x8xf32>
    %cst_110 = arith.constant 0.693147182 : f32
    %193 = vector.broadcast %cst_110 : f32 to vector<8x8xf32>
    %194 = arith.mulf %193, %192 : vector<8x8xf32>
    %cst_111 = arith.constant 0.000000e+00 : f32
    %195 = vector.broadcast %cst_111 : f32 to vector<8x24xf32>
    %196 = tpu.concatenate %139, %113, %194, %195 in 1 : vector<8x192xf32>, vector<8x32xf32>, vector<8x8xf32>, vector<8x24xf32> -> vector<8x256xf32>
    %c0_112 = arith.constant 0 : index
    %c0_113 = arith.constant 0 : index
    %197 = vector.load %arg5[%c0_112, %c0_113] : memref<8x256xf32, #tpu.memory_space<vmem>>, vector<8x256xf32>
    tpu.vector_store %arg5[%c0_112, %c0_113], %196 {strides = array<i32>} : memref<8x256xf32, #tpu.memory_space<vmem>>, vector<8x256xf32>,
    return
  }
  func.func @transform_0(%arg0: i32) -> (i32, i32) {
    %c0_i32 = arith.constant 0 : i32
    %c0_i32_0 = arith.constant 0 : i32
    %c0_i32_1 = arith.constant 0 : i32
    return %c0_i32, %c0_i32_0 : i32, i32
  }
  func.func @transform_1(%arg0: i32) -> (i32, i32) {
    %c0_i32 = arith.constant 0 : i32
    %c0_i32_0 = arith.constant 0 : i32
    %c0_i32_1 = arith.constant 0 : i32
    return %c0_i32, %c0_i32_0 : i32, i32
  }
  func.func @transform_4(%arg0: i32) -> (i32, i32) {
    %c0_i32 = arith.constant 0 : i32
    %c0_i32_0 = arith.constant 0 : i32
    %c0_i32_1 = arith.constant 0 : i32
    return %c0_i32, %c0_i32_0 : i32, i32
  }
}

</mosaic_0001>

<bundles_post_ra>
// kernel: mflal_forward.1
= control target key start
LH: loop header
LB: loop body
LE: loop exit
PB: predicated region body
PF: predicated region fallthrough
CT: control target
= control target key end

     0   :  { %9 = vsyncpa [#allocation6], 0  ;;  %s8225_s0 = inlined_call_operand.hbm [shape: s32[8,8], index: 0, kind: input, shape index: {}]   ;;  %s8226_s1 = inlined_call_operand.hbm [shape: f32[16,512], index: 1, kind: input, shape index: {}]   ;;  %s8227_s2 = inlined_call_operand.hbm [shape: bf16[2368,512], index: 2, kind: input, shape index: {}]   ;;  %s8228_s3 = inlined_call_operand.vmem [shape: bf16[512,576], index: 3, kind: input, shape index: {}]   ;;  %s8229_s4 = inlined_call_operand.vmem [shape: f32[8,256], index: 4, kind: output, shape index: {}]  }
   0x1   :  { %10 = vsyncpa [#allocation8], 0  ;;  %s6314_s15 = smov [#allocation5]   ;;  %s6315_s17 = smov [#allocation7]  }
   0x2   :  { %s17_s16 = sshll.u32 %s6314_s15, 4  ;;  %s26_s18 = sshll.u32 %s6315_s17, 4  ;;  %s18_s16 = int_to_ptr.vmem [resolvable:$true] %s17_s16  ;;  %s6367_s18 = int_to_ptr.vmem [resolvable:$true] %s26_s18 }
   0x3   :  { %s6254_s21 = scalar_lea.hbm %s8225_s0, 128 }
   0x4   :  { %p6255_p0 = scmp.ne.s32.totalorder %s8225_s0, %s6254_s21  ;;  %p6258_p1 = scmp.lt.u32.totalorder %s6254_s21, %s8225_s0 }
   0x6   :  { %p6260_p2 = pnand %p6258_p1, %p6255_p0 }
   0x8   :  { %6263 = shalt.err (!%p6260_p2)
}
   0x9   :  { %s6264_s26 = scalar_lea.vmem %s18_s16, 128  ;;  %p6269_p4 = scmp.lt.s32.totalorder %s18_s16, %s18_s16 }
   0xa   :  { %p6265_p3 = scmp.ne.s32.totalorder %s18_s16, %s6264_s26  ;;  %p6270_p5 = scmp.lt.s32.totalorder %s6264_s26, %s6264_s26 }
   0xc   :  { %p6271_p6 = por %p6270_p5, %p6269_p4 }
   0xe   :  { %p6272_p7 = pnand %p6271_p6, %p6265_p3 }
  0x10   :  { %6275 = shalt.err (!%p6272_p7)
}
  0x11   :  { %20 = dma.hbm_to_vmem [thread:$0]  %s8225_s0, 128, %s18_s16, [#allocation6]  }
  0x12   :  { %s6276_s5 = scalar_lea.hbm %s8226_s1, 1024 }
  0x13   :  { %p6277_p8 = scmp.ne.s32.totalorder %s8226_s1, %s6276_s5  ;;  %p6280_p9 = scmp.lt.u32.totalorder %s6276_s5, %s8226_s1 }
  0x15   :  { %p6282_p10 = pnand %p6280_p9, %p6277_p8 }
  0x17   :  { %6285 = shalt.err (!%p6282_p10)
}
  0x18   :  { %s6286_s10 = scalar_lea.vmem %s6367_s18, 1024  ;;  %p6291_p12 = scmp.lt.s32.totalorder %s6367_s18, %s6367_s18 }
  0x19   :  { %p6287_p11 = scmp.ne.s32.totalorder %s6367_s18, %s6286_s10  ;;  %p6292_p13 = scmp.lt.s32.totalorder %s6286_s10, %s6286_s10 }
  0x1b   :  { %p6293_p0 = por %p6292_p13, %p6291_p12 }
  0x1d   :  { %p6294_p1 = pnand %p6293_p0, %p6287_p11 }
  0x1f   :  { %6297 = shalt.err (!%p6294_p1)
}
  0x20   :  { %s6316_s0 = smov 512   ;;  %s6317_s11 = smov 32  }
  0x21   :  { %32 = dma.hbm_to_vmem [thread:$0]  %s8226_s1, 1024, %s6367_s18, [#allocation8], %s6316_s0, %s6316_s0, %s6317_s11  }
  0x22   :  { %6298 = dma.done.wait [#allocation6], 128  }
  0x23   :  { %6299 = vsyncadd [#allocation6], 4294967168 }
  0x24   :  { %6300 = dma.done.wait [#allocation8], 1024  }
  0x25   :  { %6301 = vsyncadd [#allocation8], 4294966272  ;;  %s44_s14 = sld [smem:[#allocation0]]   ;;  %56 = sst [smem:[#allocation10]] %s6316_s0 }
  0x26   :  { %58 = sst [smem:[#allocation10 + $0x1]] %s6316_s0  ;;  %s6318_s15 = smov 4  }
  0x27   :  { %60 = sst [smem:[#allocation10 + $0x2]] %s6318_s15  ;;  %s6319_s16 = smov 64  }
  0x28   :  { %62 = sst [smem:[#allocation10 + $0x3]] %s6319_s16  ;;  %s6320_s17 = smov 128  }
  0x29   :  { %64 = sst [smem:[#allocation10 + $0x4]] %s6320_s17  ;;  %s6321_s19 = smov 2  }
  0x2a   :  { %66 = sst [smem:[#allocation10 + $0x5]] %s6321_s19  ;;  %s6322_s1 = smov [#allocation2]  }
  0x2b   :  { %s52_s18 = sshll.u32 %s6322_s1, 4  ;;  %s5957_s20 = sshll.u32 %s44_s14, 26  ;;  %s53_s18 = int_to_ptr.vmem [resolvable:$true] %s52_s18 }
  0x2c   :  { %s6323_s21 = smov 256   ;;  %s6408_s22 = sadd.s32 134217728, %s5957_s20 }
  0x2d   :  { %68 = sst [smem:[#allocation10 + $0x6]] %s6323_s21  ;;  %s6324_s23 = smov [#allocation4]  }
  0x2e   :  { %70 = sst [smem:[#allocation10 + $0x7]] %s6319_s16  ;;  %s6325_s24 = smov [#allocation9]  }
  0x2f   :  { %72 = sst [smem:[#allocation10 + $0x8]] %s6318_s15 }
  0x30   :  { %74 = dma.general %s8227_s2, 22528, %s53_s18, %s6324_s23, %s6325_s24, [#allocation10], %s6408_s22, 0  }
  0x31   :  { %v93_v0 = vld [vmem:[%s8228_s3] sm:$0xf]  ;;  %v95_v1 = vld [vmem:[%s8228_s3 + $0x14] sm:$0xf]  ;;  %v97_v2 = vld [vmem:[%s8228_s3 + $0x4] sm:$0xf] }
  0x32   :  { %94 = vst [vmem:[#allocation3] sm:$0xf] %v93_v0  ;;  %96 = vst [vmem:[#allocation3 + $0x4] sm:$0xf] %v95_v1  ;;  %v99_v3 = vld [vmem:[%s8228_s3 + $0x18] sm:$0xf] }
  0x33   :  { %98 = vst [vmem:[#allocation3 + $0x8] sm:$0xf] %v97_v2  ;;  %v101_v4 = vld [vmem:[%s8228_s3 + $0x8] sm:$0xf]  ;;  %v103_v5 = vld [vmem:[%s8228_s3 + $0x1c] sm:$0xf] }
  0x34   :  { %100 = vst [vmem:[#allocation3 + $0xc] sm:$0xf] %v99_v3  ;;  %102 = vst [vmem:[#allocation3 + $0x10] sm:$0xf] %v101_v4  ;;  %v105_v6 = vld [vmem:[%s8228_s3 + $0xc] sm:$0xf] }
  0x35   :  { %104 = vst [vmem:[#allocation3 + $0x14] sm:$0xf] %v103_v5  ;;  %v107_v7 = vld [vmem:[%s8228_s3 + $0x20] sm:$0xf]  ;;  %v109_v8 = vld [vmem:[%s8228_s3 + $0x10] sm:$0xf] }
  0x36   :  { %106 = vst [vmem:[#allocation3 + $0x18] sm:$0xf] %v105_v6  ;;  %108 = vst [vmem:[#allocation3 + $0x1c] sm:$0xf] %v107_v7  ;;  %v111_v9 = vld [vmem:[%s8228_s3 + $0x24] sm:$0xff]   ;;  %v131_v18 = vld [vmem:[%s8228_s3 + $0x4c] sm:$0xff]  }
  0x37   :  { %110 = vst [vmem:[#allocation3 + $0x20] sm:$0xf] %v109_v8  ;;  %v115_v10 = vld [vmem:[%s8228_s3 + $0x3c] sm:$0xf]  ;;  %v117_v11 = vld [vmem:[%s8228_s3 + $0x2c] sm:$0xf] }
  0x38   :  { %112 = vst [vmem:[#allocation3 + $0x24] sm:$0xff] %v111_v9   ;;  %116 = vst [vmem:[#allocation3 + $0x2c] sm:$0xf] %v115_v10  ;;  %v119_v12 = vld [vmem:[%s8228_s3 + $0x40] sm:$0xf]  ;;  %v151_v27 = vld [vmem:[%s8228_s3 + $0x74] sm:$0xff]  }
  0x39   :  { %118 = vst [vmem:[#allocation3 + $0x30] sm:$0xf] %v117_v11  ;;  %v121_v13 = vld [vmem:[%s8228_s3 + $0x30] sm:$0xf]  ;;  %v123_v14 = vld [vmem:[%s8228_s3 + $0x44] sm:$0xf] }
  0x3a   :  { %120 = vst [vmem:[#allocation3 + $0x34] sm:$0xf] %v119_v12  ;;  %122 = vst [vmem:[#allocation3 + $0x38] sm:$0xf] %v121_v13  ;;  %v125_v15 = vld [vmem:[%s8228_s3 + $0x34] sm:$0xf] }
  0x3b   :  { %124 = vst [vmem:[#allocation3 + $0x3c] sm:$0xf] %v123_v14  ;;  %v127_v16 = vld [vmem:[%s8228_s3 + $0x48] sm:$0xf]  ;;  %v129_v17 = vld [vmem:[%s8228_s3 + $0x38] sm:$0xf] }
  0x3c   :  { %126 = vst [vmem:[#allocation3 + $0x40] sm:$0xf] %v125_v15  ;;  %128 = vst [vmem:[#allocation3 + $0x44] sm:$0xf] %v127_v16  ;;  %v135_v19 = vld [vmem:[%s8228_s3 + $0x64] sm:$0xf] }
  0x3d   :  { %130 = vst [vmem:[#allocation3 + $0x48] sm:$0xf] %v129_v17  ;;  %v137_v20 = vld [vmem:[%s8228_s3 + $0x54] sm:$0xf]  ;;  %132 = vst [vmem:[#allocation3 + $0x4c] sm:$0xff] %v131_v18   ;;  %v171_v36 = vld [vmem:[%s8228_s3 + $0x9c] sm:$0xff]  }
  0x3e   :  { %136 = vst [vmem:[#allocation3 + $0x54] sm:$0xf] %v135_v19  ;;  %138 = vst [vmem:[#allocation3 + $0x58] sm:$0xf] %v137_v20  ;;  %v139_v21 = vld [vmem:[%s8228_s3 + $0x68] sm:$0xf] }
  0x3f   :  { %v141_v22 = vld [vmem:[%s8228_s3 + $0x58] sm:$0xf]  ;;  %v143_v23 = vld [vmem:[%s8228_s3 + $0x6c] sm:$0xf]  ;;  %140 = vst [vmem:[#allocation3 + $0x5c] sm:$0xf] %v139_v21 }
  0x40   :  { %142 = vst [vmem:[#allocation3 + $0x60] sm:$0xf] %v141_v22  ;;  %144 = vst [vmem:[#allocation3 + $0x64] sm:$0xf] %v143_v23  ;;  %v145_v24 = vld [vmem:[%s8228_s3 + $0x5c] sm:$0xf] }
  0x41   :  { %v147_v25 = vld [vmem:[%s8228_s3 + $0x70] sm:$0xf]  ;;  %v149_v26 = vld [vmem:[%s8228_s3 + $0x60] sm:$0xf]  ;;  %146 = vst [vmem:[#allocation3 + $0x68] sm:$0xf] %v145_v24 }
  0x42   :  { %148 = vst [vmem:[#allocation3 + $0x6c] sm:$0xf] %v147_v25  ;;  %150 = vst [vmem:[#allocation3 + $0x70] sm:$0xf] %v149_v26  ;;  %v155_v28 = vld [vmem:[%s8228_s3 + $0x8c] sm:$0xf] }
  0x43   :  { %v157_v29 = vld [vmem:[%s8228_s3 + $0x7c] sm:$0xf]  ;;  %152 = vst [vmem:[#allocation3 + $0x74] sm:$0xff] %v151_v27   ;;  %156 = vst [vmem:[#allocation3 + $0x7c] sm:$0xf] %v155_v28  ;;  %v191_v45 = vld [vmem:[%s8228_s3 + $0xc4] sm:$0xff]  }
  0x44   :  { %158 = vst [vmem:[#allocation3 + $0x80] sm:$0xf] %v157_v29  ;;  %v159_v30 = vld [vmem:[%s8228_s3 + $0x90] sm:$0xf]  ;;  %v161_v31 = vld [vmem:[%s8228_s3 + $0x80] sm:$0xf] }
  0x45   :  { %v163_v32 = vld [vmem:[%s8228_s3 + $0x94] sm:$0xf]  ;;  %160 = vst [vmem:[#allocation3 + $0x84] sm:$0xf] %v159_v30  ;;  %162 = vst [vmem:[#allocation3 + $0x88] sm:$0xf] %v161_v31 }
  0x46   :  { %164 = vst [vmem:[#allocation3 + $0x8c] sm:$0xf] %v163_v32  ;;  %v165_v33 = vld [vmem:[%s8228_s3 + $0x84] sm:$0xf]  ;;  %v167_v34 = vld [vmem:[%s8228_s3 + $0x98] sm:$0xf] }
  0x47   :  { %v169_v35 = vld [vmem:[%s8228_s3 + $0x88] sm:$0xf]  ;;  %166 = vst [vmem:[#allocation3 + $0x90] sm:$0xf] %v165_v33  ;;  %168 = vst [vmem:[#allocation3 + $0x94] sm:$0xf] %v167_v34 }
  0x48   :  { %170 = vst [vmem:[#allocation3 + $0x98] sm:$0xf] %v169_v35  ;;  %v175_v37 = vld [vmem:[%s8228_s3 + $0xb4] sm:$0xf]  ;;  %v177_v38 = vld [vmem:[%s8228_s3 + $0xa4] sm:$0xf] }
  0x49   :  { %172 = vst [vmem:[#allocation3 + $0x9c] sm:$0xff] %v171_v36   ;;  %176 = vst [vmem:[#allocation3 + $0xa4] sm:$0xf] %v175_v37  ;;  %v179_v39 = vld [vmem:[%s8228_s3 + $0xb8] sm:$0xf]  ;;  %v211_v54 = vld [vmem:[%s8228_s3 + $0xec] sm:$0xff]  }
  0x4a   :  { %178 = vst [vmem:[#allocation3 + $0xa8] sm:$0xf] %v177_v38  ;;  %v181_v40 = vld [vmem:[%s8228_s3 + $0xa8] sm:$0xf]  ;;  %v183_v41 = vld [vmem:[%s8228_s3 + $0xbc] sm:$0xf] }
  0x4b   :  { %180 = vst [vmem:[#allocation3 + $0xac] sm:$0xf] %v179_v39  ;;  %182 = vst [vmem:[#allocation3 + $0xb0] sm:$0xf] %v181_v40  ;;  %v185_v42 = vld [vmem:[%s8228_s3 + $0xac] sm:$0xf] }
  0x4c   :  { %184 = vst [vmem:[#allocation3 + $0xb4] sm:$0xf] %v183_v41  ;;  %v187_v43 = vld [vmem:[%s8228_s3 + $0xc0] sm:$0xf]  ;;  %v189_v44 = vld [vmem:[%s8228_s3 + $0xb0] sm:$0xf] }
  0x4d   :  { %186 = vst [vmem:[#allocation3 + $0xb8] sm:$0xf] %v185_v42  ;;  %188 = vst [vmem:[#allocation3 + $0xbc] sm:$0xf] %v187_v43  ;;  %v195_v46 = vld [vmem:[%s8228_s3 + $0xdc] sm:$0xf] }
  0x4e   :  { %190 = vst [vmem:[#allocation3 + $0xc0] sm:$0xf] %v189_v44  ;;  %v197_v47 = vld [vmem:[%s8228_s3 + $0xcc] sm:$0xf]  ;;  %192 = vst [vmem:[#allocation3 + $0xc4] sm:$0xff] %v191_v45   ;;  %v231_v63 = vld [vmem:[%s8228_s3 + $0x114] sm:$0xff]  }
  0x4f   :  { %196 = vst [vmem:[#allocation3 + $0xcc] sm:$0xf] %v195_v46  ;;  %198 = vst [vmem:[#allocation3 + $0xd0] sm:$0xf] %v197_v47  ;;  %v199_v48 = vld [vmem:[%s8228_s3 + $0xe0] sm:$0xf] }
  0x50   :  { %v201_v49 = vld [vmem:[%s8228_s3 + $0xd0] sm:$0xf]  ;;  %v203_v50 = vld [vmem:[%s8228_s3 + $0xe4] sm:$0xf]  ;;  %200 = vst [vmem:[#allocation3 + $0xd4] sm:$0xf] %v199_v48 }
  0x51   :  { %202 = vst [vmem:[#allocation3 + $0xd8] sm:$0xf] %v201_v49  ;;  %204 = vst [vmem:[#allocation3 + $0xdc] sm:$0xf] %v203_v50  ;;  %v205_v51 = vld [vmem:[%s8228_s3 + $0xd4] sm:$0xf] }
  0x52   :  { %v207_v52 = vld [vmem:[%s8228_s3 + $0xe8] sm:$0xf]  ;;  %v209_v53 = vld [vmem:[%s8228_s3 + $0xd8] sm:$0xf]  ;;  %206 = vst [vmem:[#allocation3 + $0xe0] sm:$0xf] %v205_v51 }
  0x53   :  { %208 = vst [vmem:[#allocation3 + $0xe4] sm:$0xf] %v207_v52  ;;  %210 = vst [vmem:[#allocation3 + $0xe8] sm:$0xf] %v209_v53  ;;  %v215_v55 = vld [vmem:[%s8228_s3 + $0x104] sm:$0xf] }
  0x54   :  { %v217_v56 = vld [vmem:[%s8228_s3 + $0xf4] sm:$0xf]  ;;  %212 = vst [vmem:[#allocation3 + $0xec] sm:$0xff] %v211_v54   ;;  %216 = vst [vmem:[#allocation3 + $0xf4] sm:$0xf] %v215_v55  ;;  %v251_v8 = vld [vmem:[%s8228_s3 + $0x13c] sm:$0xff]  }
  0x55   :  { %218 = vst [vmem:[#allocation3 + $0xf8] sm:$0xf] %v217_v56  ;;  %v219_v57 = vld [vmem:[%s8228_s3 + $0x108] sm:$0xf]  ;;  %v221_v58 = vld [vmem:[%s8228_s3 + $0xf8] sm:$0xf] }
  0x56   :  { %v223_v59 = vld [vmem:[%s8228_s3 + $0x10c] sm:$0xf]  ;;  %220 = vst [vmem:[#allocation3 + $0xfc] sm:$0xf] %v219_v57  ;;  %222 = vst [vmem:[#allocation3 + $0x100] sm:$0xf] %v221_v58 }
  0x57   :  { %224 = vst [vmem:[#allocation3 + $0x104] sm:$0xf] %v223_v59  ;;  %v225_v60 = vld [vmem:[%s8228_s3 + $0xfc] sm:$0xf]  ;;  %v227_v61 = vld [vmem:[%s8228_s3 + $0x110] sm:$0xf] }
  0x58   :  { %v229_v62 = vld [vmem:[%s8228_s3 + $0x100] sm:$0xf]  ;;  %226 = vst [vmem:[#allocation3 + $0x108] sm:$0xf] %v225_v60  ;;  %228 = vst [vmem:[#allocation3 + $0x10c] sm:$0xf] %v227_v61 }
  0x59   :  { %230 = vst [vmem:[#allocation3 + $0x110] sm:$0xf] %v229_v62  ;;  %v235_v0 = vld [vmem:[%s8228_s3 + $0x12c] sm:$0xf]  ;;  %v237_v1 = vld [vmem:[%s8228_s3 + $0x11c] sm:$0xf] }
  0x5a   :  { %232 = vst [vmem:[#allocation3 + $0x114] sm:$0xff] %v231_v63   ;;  %236 = vst [vmem:[#allocation3 + $0x11c] sm:$0xf] %v235_v0  ;;  %v239_v2 = vld [vmem:[%s8228_s3 + $0x130] sm:$0xf]  ;;  %v271_v17 = vld [vmem:[%s8228_s3 + $0x164] sm:$0xff]  }
  0x5b   :  { %238 = vst [vmem:[#allocation3 + $0x120] sm:$0xf] %v237_v1  ;;  %v241_v3 = vld [vmem:[%s8228_s3 + $0x120] sm:$0xf]  ;;  %v243_v4 = vld [vmem:[%s8228_s3 + $0x134] sm:$0xf] }
  0x5c   :  { %240 = vst [vmem:[#allocation3 + $0x124] sm:$0xf] %v239_v2  ;;  %242 = vst [vmem:[#allocation3 + $0x128] sm:$0xf] %v241_v3  ;;  %v245_v5 = vld [vmem:[%s8228_s3 + $0x124] sm:$0xf] }
  0x5d   :  { %244 = vst [vmem:[#allocation3 + $0x12c] sm:$0xf] %v243_v4  ;;  %v247_v6 = vld [vmem:[%s8228_s3 + $0x138] sm:$0xf]  ;;  %v249_v7 = vld [vmem:[%s8228_s3 + $0x128] sm:$0xf] }
  0x5e   :  { %246 = vst [vmem:[#allocation3 + $0x130] sm:$0xf] %v245_v5  ;;  %248 = vst [vmem:[#allocation3 + $0x134] sm:$0xf] %v247_v6  ;;  %v255_v9 = vld [vmem:[%s8228_s3 + $0x154] sm:$0xf] }
  0x5f   :  { %250 = vst [vmem:[#allocation3 + $0x138] sm:$0xf] %v249_v7  ;;  %v257_v10 = vld [vmem:[%s8228_s3 + $0x144] sm:$0xf]  ;;  %252 = vst [vmem:[#allocation3 + $0x13c] sm:$0xff] %v251_v8   ;;  %v291_v26 = vld [vmem:[%s8228_s3 + $0x18c] sm:$0xff]  }
  0x60   :  { %256 = vst [vmem:[#allocation3 + $0x144] sm:$0xf] %v255_v9  ;;  %258 = vst [vmem:[#allocation3 + $0x148] sm:$0xf] %v257_v10  ;;  %v259_v11 = vld [vmem:[%s8228_s3 + $0x158] sm:$0xf] }
  0x61   :  { %v261_v12 = vld [vmem:[%s8228_s3 + $0x148] sm:$0xf]  ;;  %v263_v13 = vld [vmem:[%s8228_s3 + $0x15c] sm:$0xf]  ;;  %260 = vst [vmem:[#allocation3 + $0x14c] sm:$0xf] %v259_v11 }
  0x62   :  { %262 = vst [vmem:[#allocation3 + $0x150] sm:$0xf] %v261_v12  ;;  %264 = vst [vmem:[#allocation3 + $0x154] sm:$0xf] %v263_v13  ;;  %v265_v14 = vld [vmem:[%s8228_s3 + $0x14c] sm:$0xf] }
  0x63   :  { %v267_v15 = vld [vmem:[%s8228_s3 + $0x160] sm:$0xf]  ;;  %v269_v16 = vld [vmem:[%s8228_s3 + $0x150] sm:$0xf]  ;;  %266 = vst [vmem:[#allocation3 + $0x158] sm:$0xf] %v265_v14 }
  0x64   :  { %268 = vst [vmem:[#allocation3 + $0x15c] sm:$0xf] %v267_v15  ;;  %270 = vst [vmem:[#allocation3 + $0x160] sm:$0xf] %v269_v16  ;;  %v275_v18 = vld [vmem:[%s8228_s3 + $0x17c] sm:$0xf] }
  0x65   :  { %v277_v19 = vld [vmem:[%s8228_s3 + $0x16c] sm:$0xf]  ;;  %272 = vst [vmem:[#allocation3 + $0x164] sm:$0xff] %v271_v17   ;;  %276 = vst [vmem:[#allocation3 + $0x16c] sm:$0xf] %v275_v18  ;;  %v311_v35 = vld [vmem:[%s8228_s3 + $0x1b4] sm:$0xff]  }
  0x66   :  { %278 = vst [vmem:[#allocation3 + $0x170] sm:$0xf] %v277_v19  ;;  %v279_v20 = vld [vmem:[%s8228_s3 + $0x180] sm:$0xf]  ;;  %v281_v21 = vld [vmem:[%s8228_s3 + $0x170] sm:$0xf] }
  0x67   :  { %v283_v22 = vld [vmem:[%s8228_s3 + $0x184] sm:$0xf]  ;;  %280 = vst [vmem:[#allocation3 + $0x174] sm:$0xf] %v279_v20  ;;  %282 = vst [vmem:[#allocation3 + $0x178] sm:$0xf] %v281_v21 }
  0x68   :  { %284 = vst [vmem:[#allocation3 + $0x17c] sm:$0xf] %v283_v22  ;;  %v285_v23 = vld [vmem:[%s8228_s3 + $0x174] sm:$0xf]  ;;  %v287_v24 = vld [vmem:[%s8228_s3 + $0x188] sm:$0xf] }
  0x69   :  { %v289_v25 = vld [vmem:[%s8228_s3 + $0x178] sm:$0xf]  ;;  %286 = vst [vmem:[#allocation3 + $0x180] sm:$0xf] %v285_v23  ;;  %288 = vst [vmem:[#allocation3 + $0x184] sm:$0xf] %v287_v24 }
  0x6a   :  { %290 = vst [vmem:[#allocation3 + $0x188] sm:$0xf] %v289_v25  ;;  %v295_v27 = vld [vmem:[%s8228_s3 + $0x1a4] sm:$0xf]  ;;  %v297_v28 = vld [vmem:[%s8228_s3 + $0x194] sm:$0xf] }
  0x6b   :  { %292 = vst [vmem:[#allocation3 + $0x18c] sm:$0xff] %v291_v26   ;;  %296 = vst [vmem:[#allocation3 + $0x194] sm:$0xf] %v295_v27  ;;  %v299_v29 = vld [vmem:[%s8228_s3 + $0x1a8] sm:$0xf]  ;;  %v331_v44 = vld [vmem:[%s8228_s3 + $0x1dc] sm:$0xff]  }
  0x6c   :  { %298 = vst [vmem:[#allocation3 + $0x198] sm:$0xf] %v297_v28  ;;  %v301_v30 = vld [vmem:[%s8228_s3 + $0x198] sm:$0xf]  ;;  %v303_v31 = vld [vmem:[%s8228_s3 + $0x1ac] sm:$0xf] }
  0x6d   :  { %300 = vst [vmem:[#allocation3 + $0x19c] sm:$0xf] %v299_v29  ;;  %302 = vst [vmem:[#allocation3 + $0x1a0] sm:$0xf] %v301_v30  ;;  %v305_v32 = vld [vmem:[%s8228_s3 + $0x19c] sm:$0xf] }
  0x6e   :  { %304 = vst [vmem:[#allocation3 + $0x1a4] sm:$0xf] %v303_v31  ;;  %v307_v33 = vld [vmem:[%s8228_s3 + $0x1b0] sm:$0xf]  ;;  %v309_v34 = vld [vmem:[%s8228_s3 + $0x1a0] sm:$0xf] }
  0x6f   :  { %306 = vst [vmem:[#allocation3 + $0x1a8] sm:$0xf] %v305_v32  ;;  %308 = vst [vmem:[#allocation3 + $0x1ac] sm:$0xf] %v307_v33  ;;  %v315_v36 = vld [vmem:[%s8228_s3 + $0x1cc] sm:$0xf] }
  0x70   :  { %310 = vst [vmem:[#allocation3 + $0x1b0] sm:$0xf] %v309_v34  ;;  %v317_v37 = vld [vmem:[%s8228_s3 + $0x1bc] sm:$0xf]  ;;  %312 = vst [vmem:[#allocation3 + $0x1b4] sm:$0xff] %v311_v35   ;;  %v351_v53 = vld [vmem:[%s8228_s3 + $0x204] sm:$0xff]  }
  0x71   :  { %316 = vst [vmem:[#allocation3 + $0x1bc] sm:$0xf] %v315_v36  ;;  %318 = vst [vmem:[#allocation3 + $0x1c0] sm:$0xf] %v317_v37  ;;  %v319_v38 = vld [vmem:[%s8228_s3 + $0x1d0] sm:$0xf] }
  0x72   :  { %v321_v39 = vld [vmem:[%s8228_s3 + $0x1c0] sm:$0xf]  ;;  %v323_v40 = vld [vmem:[%s8228_s3 + $0x1d4] sm:$0xf]  ;;  %320 = vst [vmem:[#allocation3 + $0x1c4] sm:$0xf] %v319_v38 }
  0x73   :  { %322 = vst [vmem:[#allocation3 + $0x1c8] sm:$0xf] %v321_v39  ;;  %324 = vst [vmem:[#allocation3 + $0x1cc] sm:$0xf] %v323_v40  ;;  %v325_v41 = vld [vmem:[%s8228_s3 + $0x1c4] sm:$0xf] }
  0x74   :  { %v327_v42 = vld [vmem:[%s8228_s3 + $0x1d8] sm:$0xf]  ;;  %v329_v43 = vld [vmem:[%s8228_s3 + $0x1c8] sm:$0xf]  ;;  %326 = vst [vmem:[#allocation3 + $0x1d0] sm:$0xf] %v325_v41 }
  0x75   :  { %328 = vst [vmem:[#allocation3 + $0x1d4] sm:$0xf] %v327_v42  ;;  %330 = vst [vmem:[#allocation3 + $0x1d8] sm:$0xf] %v329_v43  ;;  %v335_v45 = vld [vmem:[%s8228_s3 + $0x1f4] sm:$0xf] }
  0x76   :  { %v337_v46 = vld [vmem:[%s8228_s3 + $0x1e4] sm:$0xf]  ;;  %332 = vst [vmem:[#allocation3 + $0x1dc] sm:$0xff] %v331_v44   ;;  %336 = vst [vmem:[#allocation3 + $0x1e4] sm:$0xf] %v335_v45  ;;  %v371_v62 = vld [vmem:[%s8228_s3 + $0x22c] sm:$0xff]  }
  0x77   :  { %338 = vst [vmem:[#allocation3 + $0x1e8] sm:$0xf] %v337_v46  ;;  %v339_v47 = vld [vmem:[%s8228_s3 + $0x1f8] sm:$0xf]  ;;  %v341_v48 = vld [vmem:[%s8228_s3 + $0x1e8] sm:$0xf] }
  0x78   :  { %v343_v49 = vld [vmem:[%s8228_s3 + $0x1fc] sm:$0xf]  ;;  %340 = vst [vmem:[#allocation3 + $0x1ec] sm:$0xf] %v339_v47  ;;  %342 = vst [vmem:[#allocation3 + $0x1f0] sm:$0xf] %v341_v48 }
  0x79   :  { %344 = vst [vmem:[#allocation3 + $0x1f4] sm:$0xf] %v343_v49  ;;  %v345_v50 = vld [vmem:[%s8228_s3 + $0x1ec] sm:$0xf]  ;;  %v347_v51 = vld [vmem:[%s8228_s3 + $0x200] sm:$0xf] }
  0x7a   :  { %v349_v52 = vld [vmem:[%s8228_s3 + $0x1f0] sm:$0xf]  ;;  %346 = vst [vmem:[#allocation3 + $0x1f8] sm:$0xf] %v345_v50  ;;  %348 = vst [vmem:[#allocation3 + $0x1fc] sm:$0xf] %v347_v51 }
  0x7b   :  { %350 = vst [vmem:[#allocation3 + $0x200] sm:$0xf] %v349_v52  ;;  %v355_v54 = vld [vmem:[%s8228_s3 + $0x21c] sm:$0xf]  ;;  %v357_v55 = vld [vmem:[%s8228_s3 + $0x20c] sm:$0xf] }
  0x7c   :  { %352 = vst [vmem:[#allocation3 + $0x204] sm:$0xff] %v351_v53   ;;  %356 = vst [vmem:[#allocation3 + $0x20c] sm:$0xf] %v355_v54  ;;  %v359_v56 = vld [vmem:[%s8228_s3 + $0x220] sm:$0xf]  ;;  %v391_v7 = vld [vmem:[%s8228_s3 + $0x254] sm:$0xff]  }
  0x7d   :  { %358 = vst [vmem:[#allocation3 + $0x210] sm:$0xf] %v357_v55  ;;  %v361_v57 = vld [vmem:[%s8228_s3 + $0x210] sm:$0xf]  ;;  %v363_v58 = vld [vmem:[%s8228_s3 + $0x224] sm:$0xf] }
  0x7e   :  { %360 = vst [vmem:[#allocation3 + $0x214] sm:$0xf] %v359_v56  ;;  %362 = vst [vmem:[#allocation3 + $0x218] sm:$0xf] %v361_v57  ;;  %v365_v59 = vld [vmem:[%s8228_s3 + $0x214] sm:$0xf] }
  0x7f   :  { %364 = vst [vmem:[#allocation3 + $0x21c] sm:$0xf] %v363_v58  ;;  %v367_v60 = vld [vmem:[%s8228_s3 + $0x228] sm:$0xf]  ;;  %v369_v61 = vld [vmem:[%s8228_s3 + $0x218] sm:$0xf] }
  0x80   :  { %366 = vst [vmem:[#allocation3 + $0x220] sm:$0xf] %v365_v59  ;;  %368 = vst [vmem:[#allocation3 + $0x224] sm:$0xf] %v367_v60  ;;  %v375_v63 = vld [vmem:[%s8228_s3 + $0x244] sm:$0xf] }
  0x81   :  { %370 = vst [vmem:[#allocation3 + $0x228] sm:$0xf] %v369_v61  ;;  %v377_v0 = vld [vmem:[%s8228_s3 + $0x234] sm:$0xf]  ;;  %372 = vst [vmem:[#allocation3 + $0x22c] sm:$0xff] %v371_v62   ;;  %v411_v16 = vld [vmem:[%s8228_s3 + $0x27c] sm:$0xff]  }
  0x82   :  { %376 = vst [vmem:[#allocation3 + $0x234] sm:$0xf] %v375_v63  ;;  %378 = vst [vmem:[#allocation3 + $0x238] sm:$0xf] %v377_v0  ;;  %v379_v1 = vld [vmem:[%s8228_s3 + $0x248] sm:$0xf] }
  0x83   :  { %v381_v2 = vld [vmem:[%s8228_s3 + $0x238] sm:$0xf]  ;;  %v383_v3 = vld [vmem:[%s8228_s3 + $0x24c] sm:$0xf]  ;;  %380 = vst [vmem:[#allocation3 + $0x23c] sm:$0xf] %v379_v1 }
  0x84   :  { %382 = vst [vmem:[#allocation3 + $0x240] sm:$0xf] %v381_v2  ;;  %384 = vst [vmem:[#allocation3 + $0x244] sm:$0xf] %v383_v3  ;;  %v385_v4 = vld [vmem:[%s8228_s3 + $0x23c] sm:$0xf] }
  0x85   :  { %v387_v5 = vld [vmem:[%s8228_s3 + $0x250] sm:$0xf]  ;;  %v389_v6 = vld [vmem:[%s8228_s3 + $0x240] sm:$0xf]  ;;  %386 = vst [vmem:[#allocation3 + $0x248] sm:$0xf] %v385_v4 }
  0x86   :  { %388 = vst [vmem:[#allocation3 + $0x24c] sm:$0xf] %v387_v5  ;;  %390 = vst [vmem:[#allocation3 + $0x250] sm:$0xf] %v389_v6  ;;  %v395_v8 = vld [vmem:[%s8228_s3 + $0x26c] sm:$0xf] }
  0x87   :  { %v397_v9 = vld [vmem:[%s8228_s3 + $0x25c] sm:$0xf]  ;;  %392 = vst [vmem:[#allocation3 + $0x254] sm:$0xff] %v391_v7   ;;  %396 = vst [vmem:[#allocation3 + $0x25c] sm:$0xf] %v395_v8  ;;  %v431_v25 = vld [vmem:[%s8228_s3 + $0x2a4] sm:$0xff]  }
  0x88   :  { %398 = vst [vmem:[#allocation3 + $0x260] sm:$0xf] %v397_v9  ;;  %v399_v10 = vld [vmem:[%s8228_s3 + $0x270] sm:$0xf]  ;;  %v401_v11 = vld [vmem:[%s8228_s3 + $0x260] sm:$0xf] }
  0x89   :  { %v403_v12 = vld [vmem:[%s8228_s3 + $0x274] sm:$0xf]  ;;  %400 = vst [vmem:[#allocation3 + $0x264] sm:$0xf] %v399_v10  ;;  %402 = vst [vmem:[#allocation3 + $0x268] sm:$0xf] %v401_v11 }
  0x8a   :  { %404 = vst [vmem:[#allocation3 + $0x26c] sm:$0xf] %v403_v12  ;;  %v405_v13 = vld [vmem:[%s8228_s3 + $0x264] sm:$0xf]  ;;  %v407_v14 = vld [vmem:[%s8228_s3 + $0x278] sm:$0xf] }
  0x8b   :  { %v409_v15 = vld [vmem:[%s8228_s3 + $0x268] sm:$0xf]  ;;  %406 = vst [vmem:[#allocation3 + $0x270] sm:$0xf] %v405_v13  ;;  %408 = vst [vmem:[#allocation3 + $0x274] sm:$0xf] %v407_v14 }
  0x8c   :  { %410 = vst [vmem:[#allocation3 + $0x278] sm:$0xf] %v409_v15  ;;  %v415_v17 = vld [vmem:[%s8228_s3 + $0x294] sm:$0xf]  ;;  %v417_v18 = vld [vmem:[%s8228_s3 + $0x284] sm:$0xf] }
  0x8d   :  { %412 = vst [vmem:[#allocation3 + $0x27c] sm:$0xff] %v411_v16   ;;  %416 = vst [vmem:[#allocation3 + $0x284] sm:$0xf] %v415_v17  ;;  %v419_v19 = vld [vmem:[%s8228_s3 + $0x298] sm:$0xf]  ;;  %v451_v34 = vld [vmem:[%s8228_s3 + $0x2cc] sm:$0xff]  }
  0x8e   :  { %418 = vst [vmem:[#allocation3 + $0x288] sm:$0xf] %v417_v18  ;;  %v421_v20 = vld [vmem:[%s8228_s3 + $0x288] sm:$0xf]  ;;  %v423_v21 = vld [vmem:[%s8228_s3 + $0x29c] sm:$0xf] }
  0x8f   :  { %420 = vst [vmem:[#allocation3 + $0x28c] sm:$0xf] %v419_v19  ;;  %422 = vst [vmem:[#allocation3 + $0x290] sm:$0xf] %v421_v20  ;;  %v425_v22 = vld [vmem:[%s8228_s3 + $0x28c] sm:$0xf] }
  0x90   :  { %424 = vst [vmem:[#allocation3 + $0x294] sm:$0xf] %v423_v21  ;;  %v427_v23 = vld [vmem:[%s8228_s3 + $0x2a0] sm:$0xf]  ;;  %v429_v24 = vld [vmem:[%s8228_s3 + $0x290] sm:$0xf] }
  0x91   :  { %426 = vst [vmem:[#allocation3 + $0x298] sm:$0xf] %v425_v22  ;;  %428 = vst [vmem:[#allocation3 + $0x29c] sm:$0xf] %v427_v23  ;;  %v435_v26 = vld [vmem:[%s8228_s3 + $0x2bc] sm:$0xf] }
  0x92   :  { %430 = vst [vmem:[#allocation3 + $0x2a0] sm:$0xf] %v429_v24  ;;  %v437_v27 = vld [vmem:[%s8228_s3 + $0x2ac] sm:$0xf]  ;;  %432 = vst [vmem:[#allocation3 + $0x2a4] sm:$0xff] %v431_v25   ;;  %v471_v43 = vld [vmem:[%s8228_s3 + $0x2f4] sm:$0xff]  }
  0x93   :  { %436 = vst [vmem:[#allocation3 + $0x2ac] sm:$0xf] %v435_v26  ;;  %438 = vst [vmem:[#allocation3 + $0x2b0] sm:$0xf] %v437_v27  ;;  %v439_v28 = vld [vmem:[%s8228_s3 + $0x2c0] sm:$0xf] }
  0x94   :  { %v441_v29 = vld [vmem:[%s8228_s3 + $0x2b0] sm:$0xf]  ;;  %v443_v30 = vld [vmem:[%s8228_s3 + $0x2c4] sm:$0xf]  ;;  %440 = vst [vmem:[#allocation3 + $0x2b4] sm:$0xf] %v439_v28 }
  0x95   :  { %442 = vst [vmem:[#allocation3 + $0x2b8] sm:$0xf] %v441_v29  ;;  %444 = vst [vmem:[#allocation3 + $0x2bc] sm:$0xf] %v443_v30  ;;  %v445_v31 = vld [vmem:[%s8228_s3 + $0x2b4] sm:$0xf] }
  0x96   :  { %v447_v32 = vld [vmem:[%s8228_s3 + $0x2c8] sm:$0xf]  ;;  %v449_v33 = vld [vmem:[%s8228_s3 + $0x2b8] sm:$0xf]  ;;  %446 = vst [vmem:[#allocation3 + $0x2c0] sm:$0xf] %v445_v31 }
  0x97   :  { %448 = vst [vmem:[#allocation3 + $0x2c4] sm:$0xf] %v447_v32  ;;  %450 = vst [vmem:[#allocation3 + $0x2c8] sm:$0xf] %v449_v33  ;;  %v455_v35 = vld [vmem:[%s8228_s3 + $0x2e4] sm:$0xf] }
  0x98   :  { %v457_v36 = vld [vmem:[%s8228_s3 + $0x2d4] sm:$0xf]  ;;  %452 = vst [vmem:[#allocation3 + $0x2cc] sm:$0xff] %v451_v34   ;;  %456 = vst [vmem:[#allocation3 + $0x2d4] sm:$0xf] %v455_v35  ;;  %v491_v52 = vld [vmem:[%s8228_s3 + $0x31c] sm:$0xff]  }
  0x99   :  { %458 = vst [vmem:[#allocation3 + $0x2d8] sm:$0xf] %v457_v36  ;;  %v459_v37 = vld [vmem:[%s8228_s3 + $0x2e8] sm:$0xf]  ;;  %v461_v38 = vld [vmem:[%s8228_s3 + $0x2d8] sm:$0xf] }
  0x9a   :  { %v463_v39 = vld [vmem:[%s8228_s3 + $0x2ec] sm:$0xf]  ;;  %460 = vst [vmem:[#allocation3 + $0x2dc] sm:$0xf] %v459_v37  ;;  %462 = vst [vmem:[#allocation3 + $0x2e0] sm:$0xf] %v461_v38 }
  0x9b   :  { %464 = vst [vmem:[#allocation3 + $0x2e4] sm:$0xf] %v463_v39  ;;  %v465_v40 = vld [vmem:[%s8228_s3 + $0x2dc] sm:$0xf]  ;;  %v467_v41 = vld [vmem:[%s8228_s3 + $0x2f0] sm:$0xf] }
  0x9c   :  { %v469_v42 = vld [vmem:[%s8228_s3 + $0x2e0] sm:$0xf]  ;;  %466 = vst [vmem:[#allocation3 + $0x2e8] sm:$0xf] %v465_v40  ;;  %468 = vst [vmem:[#allocation3 + $0x2ec] sm:$0xf] %v467_v41 }
  0x9d   :  { %470 = vst [vmem:[#allocation3 + $0x2f0] sm:$0xf] %v469_v42  ;;  %v475_v44 = vld [vmem:[%s8228_s3 + $0x30c] sm:$0xf]  ;;  %v477_v45 = vld [vmem:[%s8228_s3 + $0x2fc] sm:$0xf] }
  0x9e   :  { %472 = vst [vmem:[#allocation3 + $0x2f4] sm:$0xff] %v471_v43   ;;  %476 = vst [vmem:[#allocation3 + $0x2fc] sm:$0xf] %v475_v44  ;;  %v479_v46 = vld [vmem:[%s8228_s3 + $0x310] sm:$0xf]  ;;  %v511_v61 = vld [vmem:[%s8228_s3 + $0x344] sm:$0xff]  }
  0x9f   :  { %478 = vst [vmem:[#allocation3 + $0x300] sm:$0xf] %v477_v45  ;;  %v481_v47 = vld [vmem:[%s8228_s3 + $0x300] sm:$0xf]  ;;  %v483_v48 = vld [vmem:[%s8228_s3 + $0x314] sm:$0xf] }
  0xa0   :  { %480 = vst [vmem:[#allocation3 + $0x304] sm:$0xf] %v479_v46  ;;  %482 = vst [vmem:[#allocation3 + $0x308] sm:$0xf] %v481_v47  ;;  %v485_v49 = vld [vmem:[%s8228_s3 + $0x304] sm:$0xf] }
  0xa1   :  { %484 = vst [vmem:[#allocation3 + $0x30c] sm:$0xf] %v483_v48  ;;  %v487_v50 = vld [vmem:[%s8228_s3 + $0x318] sm:$0xf]  ;;  %v489_v51 = vld [vmem:[%s8228_s3 + $0x308] sm:$0xf] }
  0xa2   :  { %486 = vst [vmem:[#allocation3 + $0x310] sm:$0xf] %v485_v49  ;;  %488 = vst [vmem:[#allocation3 + $0x314] sm:$0xf] %v487_v50  ;;  %v495_v53 = vld [vmem:[%s8228_s3 + $0x334] sm:$0xf] }
  0xa3   :  { %490 = vst [vmem:[#allocation3 + $0x318] sm:$0xf] %v489_v51  ;;  %v497_v54 = vld [vmem:[%s8228_s3 + $0x324] sm:$0xf]  ;;  %492 = vst [vmem:[#allocation3 + $0x31c] sm:$0xff] %v491_v52   ;;  %v531_v6 = vld [vmem:[%s8228_s3 + $0x36c] sm:$0xff]  }
  0xa4   :  { %496 = vst [vmem:[#allocation3 + $0x324] sm:$0xf] %v495_v53  ;;  %498 = vst [vmem:[#allocation3 + $0x328] sm:$0xf] %v497_v54  ;;  %v499_v55 = vld [vmem:[%s8228_s3 + $0x338] sm:$0xf] }
  0xa5   :  { %v501_v56 = vld [vmem:[%s8228_s3 + $0x328] sm:$0xf]  ;;  %v503_v57 = vld [vmem:[%s8228_s3 + $0x33c] sm:$0xf]  ;;  %500 = vst [vmem:[#allocation3 + $0x32c] sm:$0xf] %v499_v55 }
  0xa6   :  { %502 = vst [vmem:[#allocation3 + $0x330] sm:$0xf] %v501_v56  ;;  %504 = vst [vmem:[#allocation3 + $0x334] sm:$0xf] %v503_v57  ;;  %v505_v58 = vld [vmem:[%s8228_s3 + $0x32c] sm:$0xf] }
  0xa7   :  { %v507_v59 = vld [vmem:[%s8228_s3 + $0x340] sm:$0xf]  ;;  %v509_v60 = vld [vmem:[%s8228_s3 + $0x330] sm:$0xf]  ;;  %506 = vst [vmem:[#allocation3 + $0x338] sm:$0xf] %v505_v58 }
  0xa8   :  { %508 = vst [vmem:[#allocation3 + $0x33c] sm:$0xf] %v507_v59  ;;  %510 = vst [vmem:[#allocation3 + $0x340] sm:$0xf] %v509_v60  ;;  %v515_v62 = vld [vmem:[%s8228_s3 + $0x35c] sm:$0xf] }
  0xa9   :  { %v517_v63 = vld [vmem:[%s8228_s3 + $0x34c] sm:$0xf]  ;;  %512 = vst [vmem:[#allocation3 + $0x344] sm:$0xff] %v511_v61   ;;  %516 = vst [vmem:[#allocation3 + $0x34c] sm:$0xf] %v515_v62  ;;  %v551_v15 = vld [vmem:[%s8228_s3 + $0x394] sm:$0xff]  }
  0xaa   :  { %518 = vst [vmem:[#allocation3 + $0x350] sm:$0xf] %v517_v63  ;;  %v519_v0 = vld [vmem:[%s8228_s3 + $0x360] sm:$0xf]  ;;  %v521_v1 = vld [vmem:[%s8228_s3 + $0x350] sm:$0xf] }
  0xab   :  { %v523_v2 = vld [vmem:[%s8228_s3 + $0x364] sm:$0xf]  ;;  %520 = vst [vmem:[#allocation3 + $0x354] sm:$0xf] %v519_v0  ;;  %522 = vst [vmem:[#allocation3 + $0x358] sm:$0xf] %v521_v1 }
  0xac   :  { %524 = vst [vmem:[#allocation3 + $0x35c] sm:$0xf] %v523_v2  ;;  %v525_v3 = vld [vmem:[%s8228_s3 + $0x354] sm:$0xf]  ;;  %v527_v4 = vld [vmem:[%s8228_s3 + $0x368] sm:$0xf] }
  0xad   :  { %v529_v5 = vld [vmem:[%s8228_s3 + $0x358] sm:$0xf]  ;;  %526 = vst [vmem:[#allocation3 + $0x360] sm:$0xf] %v525_v3  ;;  %528 = vst [vmem:[#allocation3 + $0x364] sm:$0xf] %v527_v4 }
  0xae   :  { %530 = vst [vmem:[#allocation3 + $0x368] sm:$0xf] %v529_v5  ;;  %v535_v7 = vld [vmem:[%s8228_s3 + $0x384] sm:$0xf]  ;;  %v537_v8 = vld [vmem:[%s8228_s3 + $0x374] sm:$0xf] }
  0xaf   :  { %532 = vst [vmem:[#allocation3 + $0x36c] sm:$0xff] %v531_v6   ;;  %536 = vst [vmem:[#allocation3 + $0x374] sm:$0xf] %v535_v7  ;;  %v539_v9 = vld [vmem:[%s8228_s3 + $0x388] sm:$0xf]  ;;  %v571_v24 = vld [vmem:[%s8228_s3 + $0x3bc] sm:$0xff]  }
  0xb0   :  { %538 = vst [vmem:[#allocation3 + $0x378] sm:$0xf] %v537_v8  ;;  %v541_v10 = vld [vmem:[%s8228_s3 + $0x378] sm:$0xf]  ;;  %v543_v11 = vld [vmem:[%s8228_s3 + $0x38c] sm:$0xf] }
  0xb1   :  { %540 = vst [vmem:[#allocation3 + $0x37c] sm:$0xf] %v539_v9  ;;  %542 = vst [vmem:[#allocation3 + $0x380] sm:$0xf] %v541_v10  ;;  %v545_v12 = vld [vmem:[%s8228_s3 + $0x37c] sm:$0xf] }
  0xb2   :  { %544 = vst [vmem:[#allocation3 + $0x384] sm:$0xf] %v543_v11  ;;  %v547_v13 = vld [vmem:[%s8228_s3 + $0x390] sm:$0xf]  ;;  %v549_v14 = vld [vmem:[%s8228_s3 + $0x380] sm:$0xf] }
  0xb3   :  { %546 = vst [vmem:[#allocation3 + $0x388] sm:$0xf] %v545_v12  ;;  %548 = vst [vmem:[#allocation3 + $0x38c] sm:$0xf] %v547_v13  ;;  %v555_v16 = vld [vmem:[%s8228_s3 + $0x3ac] sm:$0xf] }
  0xb4   :  { %550 = vst [vmem:[#allocation3 + $0x390] sm:$0xf] %v549_v14  ;;  %v557_v17 = vld [vmem:[%s8228_s3 + $0x39c] sm:$0xf]  ;;  %552 = vst [vmem:[#allocation3 + $0x394] sm:$0xff] %v551_v15   ;;  %v591_v33 = vld [vmem:[%s8228_s3 + $0x3e4] sm:$0xff]  }
  0xb5   :  { %556 = vst [vmem:[#allocation3 + $0x39c] sm:$0xf] %v555_v16  ;;  %558 = vst [vmem:[#allocation3 + $0x3a0] sm:$0xf] %v557_v17  ;;  %v559_v18 = vld [vmem:[%s8228_s3 + $0x3b0] sm:$0xf] }
  0xb6   :  { %v561_v19 = vld [vmem:[%s8228_s3 + $0x3a0] sm:$0xf]  ;;  %v563_v20 = vld [vmem:[%s8228_s3 + $0x3b4] sm:$0xf]  ;;  %560 = vst [vmem:[#allocation3 + $0x3a4] sm:$0xf] %v559_v18 }
  0xb7   :  { %562 = vst [vmem:[#allocation3 + $0x3a8] sm:$0xf] %v561_v19  ;;  %564 = vst [vmem:[#allocation3 + $0x3ac] sm:$0xf] %v563_v20  ;;  %v565_v21 = vld [vmem:[%s8228_s3 + $0x3a4] sm:$0xf] }
  0xb8   :  { %v567_v22 = vld [vmem:[%s8228_s3 + $0x3b8] sm:$0xf]  ;;  %v569_v23 = vld [vmem:[%s8228_s3 + $0x3a8] sm:$0xf]  ;;  %566 = vst [vmem:[#allocation3 + $0x3b0] sm:$0xf] %v565_v21 }
  0xb9   :  { %568 = vst [vmem:[#allocation3 + $0x3b4] sm:$0xf] %v567_v22  ;;  %570 = vst [vmem:[#allocation3 + $0x3b8] sm:$0xf] %v569_v23  ;;  %v575_v25 = vld [vmem:[%s8228_s3 + $0x3d4] sm:$0xf] }
  0xba   :  { %v577_v26 = vld [vmem:[%s8228_s3 + $0x3c4] sm:$0xf]  ;;  %572 = vst [vmem:[#allocation3 + $0x3bc] sm:$0xff] %v571_v24   ;;  %576 = vst [vmem:[#allocation3 + $0x3c4] sm:$0xf] %v575_v25  ;;  %v611_v42 = vld [vmem:[%s8228_s3 + $0x40c] sm:$0xff]  }
  0xbb   :  { %578 = vst [vmem:[#allocation3 + $0x3c8] sm:$0xf] %v577_v26  ;;  %v579_v27 = vld [vmem:[%s8228_s3 + $0x3d8] sm:$0xf]  ;;  %v581_v28 = vld [vmem:[%s8228_s3 + $0x3c8] sm:$0xf] }
  0xbc   :  { %v583_v29 = vld [vmem:[%s8228_s3 + $0x3dc] sm:$0xf]  ;;  %580 = vst [vmem:[#allocation3 + $0x3cc] sm:$0xf] %v579_v27  ;;  %582 = vst [vmem:[#allocation3 + $0x3d0] sm:$0xf] %v581_v28 }
  0xbd   :  { %584 = vst [vmem:[#allocation3 + $0x3d4] sm:$0xf] %v583_v29  ;;  %v585_v30 = vld [vmem:[%s8228_s3 + $0x3cc] sm:$0xf]  ;;  %v587_v31 = vld [vmem:[%s8228_s3 + $0x3e0] sm:$0xf] }
  0xbe   :  { %v589_v32 = vld [vmem:[%s8228_s3 + $0x3d0] sm:$0xf]  ;;  %586 = vst [vmem:[#allocation3 + $0x3d8] sm:$0xf] %v585_v30  ;;  %588 = vst [vmem:[#allocation3 + $0x3dc] sm:$0xf] %v587_v31 }
  0xbf   :  { %590 = vst [vmem:[#allocation3 + $0x3e0] sm:$0xf] %v589_v32  ;;  %v595_v34 = vld [vmem:[%s8228_s3 + $0x3fc] sm:$0xf]  ;;  %v597_v35 = vld [vmem:[%s8228_s3 + $0x3ec] sm:$0xf] }
  0xc0   :  { %592 = vst [vmem:[#allocation3 + $0x3e4] sm:$0xff] %v591_v33   ;;  %596 = vst [vmem:[#allocation3 + $0x3ec] sm:$0xf] %v595_v34  ;;  %v599_v36 = vld [vmem:[%s8228_s3 + $0x400] sm:$0xf]  ;;  %v631_v51 = vld [vmem:[%s8228_s3 + $0x434] sm:$0xff]  }
  0xc1   :  { %598 = vst [vmem:[#allocation3 + $0x3f0] sm:$0xf] %v597_v35  ;;  %v601_v37 = vld [vmem:[%s8228_s3 + $0x3f0] sm:$0xf]  ;;  %v603_v38 = vld [vmem:[%s8228_s3 + $0x404] sm:$0xf] }
  0xc2   :  { %600 = vst [vmem:[#allocation3 + $0x3f4] sm:$0xf] %v599_v36  ;;  %602 = vst [vmem:[#allocation3 + $0x3f8] sm:$0xf] %v601_v37  ;;  %v605_v39 = vld [vmem:[%s8228_s3 + $0x3f4] sm:$0xf] }
  0xc3   :  { %604 = vst [vmem:[#allocation3 + $0x3fc] sm:$0xf] %v603_v38  ;;  %v607_v40 = vld [vmem:[%s8228_s3 + $0x408] sm:$0xf]  ;;  %v609_v41 = vld [vmem:[%s8228_s3 + $0x3f8] sm:$0xf] }
  0xc4   :  { %606 = vst [vmem:[#allocation3 + $0x400] sm:$0xf] %v605_v39  ;;  %608 = vst [vmem:[#allocation3 + $0x404] sm:$0xf] %v607_v40  ;;  %v615_v43 = vld [vmem:[%s8228_s3 + $0x424] sm:$0xf] }
  0xc5   :  { %610 = vst [vmem:[#allocation3 + $0x408] sm:$0xf] %v609_v41  ;;  %v617_v44 = vld [vmem:[%s8228_s3 + $0x414] sm:$0xf]  ;;  %612 = vst [vmem:[#allocation3 + $0x40c] sm:$0xff] %v611_v42   ;;  %v651_v60 = vld [vmem:[%s8228_s3 + $0x45c] sm:$0xff]  }
  0xc6   :  { %616 = vst [vmem:[#allocation3 + $0x414] sm:$0xf] %v615_v43  ;;  %618 = vst [vmem:[#allocation3 + $0x418] sm:$0xf] %v617_v44  ;;  %v619_v45 = vld [vmem:[%s8228_s3 + $0x428] sm:$0xf] }
  0xc7   :  { %v621_v46 = vld [vmem:[%s8228_s3 + $0x418] sm:$0xf]  ;;  %v623_v47 = vld [vmem:[%s8228_s3 + $0x42c] sm:$0xf]  ;;  %620 = vst [vmem:[#allocation3 + $0x41c] sm:$0xf] %v619_v45 }
  0xc8   :  { %622 = vst [vmem:[#allocation3 + $0x420] sm:$0xf] %v621_v46  ;;  %624 = vst [vmem:[#allocation3 + $0x424] sm:$0xf] %v623_v47  ;;  %v625_v48 = vld [vmem:[%s8228_s3 + $0x41c] sm:$0xf] }
  0xc9   :  { %v627_v49 = vld [vmem:[%s8228_s3 + $0x430] sm:$0xf]  ;;  %v629_v50 = vld [vmem:[%s8228_s3 + $0x420] sm:$0xf]  ;;  %626 = vst [vmem:[#allocation3 + $0x428] sm:$0xf] %v625_v48 }
  0xca   :  { %628 = vst [vmem:[#allocation3 + $0x42c] sm:$0xf] %v627_v49  ;;  %630 = vst [vmem:[#allocation3 + $0x430] sm:$0xf] %v629_v50  ;;  %v635_v52 = vld [vmem:[%s8228_s3 + $0x44c] sm:$0xf] }
  0xcb   :  { %v637_v53 = vld [vmem:[%s8228_s3 + $0x43c] sm:$0xf]  ;;  %632 = vst [vmem:[#allocation3 + $0x434] sm:$0xff] %v631_v51   ;;  %636 = vst [vmem:[#allocation3 + $0x43c] sm:$0xf] %v635_v52  ;;  %v671_v5 = vld [vmem:[%s8228_s3 + $0x484] sm:$0xff]  }
  0xcc   :  { %638 = vst [vmem:[#allocation3 + $0x440] sm:$0xf] %v637_v53  ;;  %v639_v54 = vld [vmem:[%s8228_s3 + $0x450] sm:$0xf]  ;;  %v641_v55 = vld [vmem:[%s8228_s3 + $0x440] sm:$0xf] }
  0xcd   :  { %v643_v56 = vld [vmem:[%s8228_s3 + $0x454] sm:$0xf]  ;;  %640 = vst [vmem:[#allocation3 + $0x444] sm:$0xf] %v639_v54  ;;  %642 = vst [vmem:[#allocation3 + $0x448] sm:$0xf] %v641_v55 }
  0xce   :  { %644 = vst [vmem:[#allocation3 + $0x44c] sm:$0xf] %v643_v56  ;;  %v645_v57 = vld [vmem:[%s8228_s3 + $0x444] sm:$0xf]  ;;  %v647_v58 = vld [vmem:[%s8228_s3 + $0x458] sm:$0xf] }
  0xcf   :  { %v649_v59 = vld [vmem:[%s8228_s3 + $0x448] sm:$0xf]  ;;  %646 = vst [vmem:[#allocation3 + $0x450] sm:$0xf] %v645_v57  ;;  %648 = vst [vmem:[#allocation3 + $0x454] sm:$0xf] %v647_v58 }
  0xd0   :  { %650 = vst [vmem:[#allocation3 + $0x458] sm:$0xf] %v649_v59  ;;  %v655_v61 = vld [vmem:[%s8228_s3 + $0x474] sm:$0xf]  ;;  %v657_v62 = vld [vmem:[%s8228_s3 + $0x464] sm:$0xf] }
  0xd1   :  { %652 = vst [vmem:[#allocation3 + $0x45c] sm:$0xff] %v651_v60   ;;  %656 = vst [vmem:[#allocation3 + $0x464] sm:$0xf] %v655_v61  ;;  %v659_v63 = vld [vmem:[%s8228_s3 + $0x478] sm:$0xf]  ;;  %v691_v14 = vld [vmem:[%s8228_s3 + $0x4ac] sm:$0xff]  }
  0xd2   :  { %658 = vst [vmem:[#allocation3 + $0x468] sm:$0xf] %v657_v62  ;;  %v661_v0 = vld [vmem:[%s8228_s3 + $0x468] sm:$0xf]  ;;  %v663_v1 = vld [vmem:[%s8228_s3 + $0x47c] sm:$0xf] }
  0xd3   :  { %660 = vst [vmem:[#allocation3 + $0x46c] sm:$0xf] %v659_v63  ;;  %662 = vst [vmem:[#allocation3 + $0x470] sm:$0xf] %v661_v0  ;;  %v665_v2 = vld [vmem:[%s8228_s3 + $0x46c] sm:$0xf] }
  0xd4   :  { %664 = vst [vmem:[#allocation3 + $0x474] sm:$0xf] %v663_v1  ;;  %v667_v3 = vld [vmem:[%s8228_s3 + $0x480] sm:$0xf]  ;;  %v669_v4 = vld [vmem:[%s8228_s3 + $0x470] sm:$0xf] }
  0xd5   :  { %666 = vst [vmem:[#allocation3 + $0x478] sm:$0xf] %v665_v2  ;;  %668 = vst [vmem:[#allocation3 + $0x47c] sm:$0xf] %v667_v3  ;;  %v675_v6 = vld [vmem:[%s8228_s3 + $0x49c] sm:$0xf] }
  0xd6   :  { %670 = vst [vmem:[#allocation3 + $0x480] sm:$0xf] %v669_v4  ;;  %v677_v7 = vld [vmem:[%s8228_s3 + $0x48c] sm:$0xf]  ;;  %672 = vst [vmem:[#allocation3 + $0x484] sm:$0xff] %v671_v5   ;;  %v711_v23 = vld [vmem:[%s8228_s3 + $0x4d4] sm:$0xff]  }
  0xd7   :  { %676 = vst [vmem:[#allocation3 + $0x48c] sm:$0xf] %v675_v6  ;;  %678 = vst [vmem:[#allocation3 + $0x490] sm:$0xf] %v677_v7  ;;  %v679_v8 = vld [vmem:[%s8228_s3 + $0x4a0] sm:$0xf] }
  0xd8   :  { %v681_v9 = vld [vmem:[%s8228_s3 + $0x490] sm:$0xf]  ;;  %v683_v10 = vld [vmem:[%s8228_s3 + $0x4a4] sm:$0xf]  ;;  %680 = vst [vmem:[#allocation3 + $0x494] sm:$0xf] %v679_v8 }
  0xd9   :  { %682 = vst [vmem:[#allocation3 + $0x498] sm:$0xf] %v681_v9  ;;  %684 = vst [vmem:[#allocation3 + $0x49c] sm:$0xf] %v683_v10  ;;  %v685_v11 = vld [vmem:[%s8228_s3 + $0x494] sm:$0xf] }
  0xda   :  { %v687_v12 = vld [vmem:[%s8228_s3 + $0x4a8] sm:$0xf]  ;;  %v689_v13 = vld [vmem:[%s8228_s3 + $0x498] sm:$0xf]  ;;  %686 = vst [vmem:[#allocation3 + $0x4a0] sm:$0xf] %v685_v11 }
  0xdb   :  { %688 = vst [vmem:[#allocation3 + $0x4a4] sm:$0xf] %v687_v12  ;;  %690 = vst [vmem:[#allocation3 + $0x4a8] sm:$0xf] %v689_v13  ;;  %v695_v15 = vld [vmem:[%s8228_s3 + $0x4c4] sm:$0xf] }
  0xdc   :  { %v697_v16 = vld [vmem:[%s8228_s3 + $0x4b4] sm:$0xf]  ;;  %692 = vst [vmem:[#allocation3 + $0x4ac] sm:$0xff] %v691_v14   ;;  %696 = vst [vmem:[#allocation3 + $0x4b4] sm:$0xf] %v695_v15 }
  0xdd   :  { %698 = vst [vmem:[#allocation3 + $0x4b8] sm:$0xf] %v697_v16  ;;  %v699_v17 = vld [vmem:[%s8228_s3 + $0x4c8] sm:$0xf]  ;;  %v701_v18 = vld [vmem:[%s8228_s3 + $0x4b8] sm:$0xf] }
  0xde   :  { %v703_v19 = vld [vmem:[%s8228_s3 + $0x4cc] sm:$0xf]  ;;  %700 = vst [vmem:[#allocation3 + $0x4bc] sm:$0xf] %v699_v17  ;;  %702 = vst [vmem:[#allocation3 + $0x4c0] sm:$0xf] %v701_v18 }
  0xdf   :  { %704 = vst [vmem:[#allocation3 + $0x4c4] sm:$0xf] %v703_v19  ;;  %v705_v20 = vld [vmem:[%s8228_s3 + $0x4bc] sm:$0xf]  ;;  %v707_v21 = vld [vmem:[%s8228_s3 + $0x4d0] sm:$0xf] }
  0xe0   :  { %v709_v22 = vld [vmem:[%s8228_s3 + $0x4c0] sm:$0xf]  ;;  %706 = vst [vmem:[#allocation3 + $0x4c8] sm:$0xf] %v705_v20  ;;  %708 = vst [vmem:[#allocation3 + $0x4cc] sm:$0xf] %v707_v21 }
  0xe1   :  { %710 = vst [vmem:[#allocation3 + $0x4d0] sm:$0xf] %v709_v22  ;;  %v715_v24 = vld [vmem:[%s8228_s3 + $0x4ec] sm:$0xf]  ;;  %v717_v25 = vld [vmem:[%s8228_s3 + $0x4dc] sm:$0xf] }
  0xe2   :  { %712 = vst [vmem:[#allocation3 + $0x4d4] sm:$0xff] %v711_v23   ;;  %716 = vst [vmem:[#allocation3 + $0x4dc] sm:$0xf] %v715_v24  ;;  %v719_v26 = vld [vmem:[%s8228_s3 + $0x4f0] sm:$0xf] }
  0xe3   :  { %718 = vst [vmem:[#allocation3 + $0x4e0] sm:$0xf] %v717_v25  ;;  %v721_v27 = vld [vmem:[%s8228_s3 + $0x4e0] sm:$0xf]  ;;  %v723_v28 = vld [vmem:[%s8228_s3 + $0x4f4] sm:$0xf] }
  0xe4   :  { %720 = vst [vmem:[#allocation3 + $0x4e4] sm:$0xf] %v719_v26  ;;  %722 = vst [vmem:[#allocation3 + $0x4e8] sm:$0xf] %v721_v27  ;;  %v725_v29 = vld [vmem:[%s8228_s3 + $0x4e4] sm:$0xf] }
  0xe5   :  { %724 = vst [vmem:[#allocation3 + $0x4ec] sm:$0xf] %v723_v28  ;;  %v727_v30 = vld [vmem:[%s8228_s3 + $0x4f8] sm:$0xf]  ;;  %v729_v31 = vld [vmem:[%s8228_s3 + $0x4e8] sm:$0xf] }
  0xe6   :  { %726 = vst [vmem:[#allocation3 + $0x4f0] sm:$0xf] %v725_v29  ;;  %728 = vst [vmem:[#allocation3 + $0x4f4] sm:$0xf] %v727_v30  ;;  %v731_v32 = vld [vmem:[%s8228_s3 + $0x4fc] sm:$0xf] }
  0xe7   :  { %730 = vst [vmem:[#allocation3 + $0x4f8] sm:$0xf] %v729_v31  ;;  %732 = vst [vmem:[#allocation3 + $0x4fc] sm:$0xf] %v731_v32 }
  0xe8   :  { %1403 = vsyncadd [#allocation4 + $0x5], 20480  ;;  %1422 = sst [smem:[#allocation13]] %s6316_s0  ;;  %s6326_s25 = smov [#allocation2 + $0x580]   ;;  %v1553_v33 = vlaneseq  ;;  %vm1668_vm0 = vcmask 523264   ;;  %v6338_v58 = vmov 0.0  }
  0xe9   :  { %s1418_s26 = sshll.u32 %s6326_s25, 4  ;;  %1424 = sst [smem:[#allocation13 + $0x1]] %s6316_s0  ;;  %s1419_s26 = int_to_ptr.vmem [resolvable:$true] %s1418_s26 }
  0xea   :  { %1426 = sst [smem:[#allocation13 + $0x2]] %s6318_s15  ;;  %s1404_s29 = scalar_lea.hbm %s8227_s2, 22528  ;;  %v7335_v34 = vand.u32 127, %v1553_v33  ;;  %v1559_v35 = vshrl.u32 %v1553_v33, 7 }
  0xeb   :  { %1428 = sst [smem:[#allocation13 + $0x3]] %s6319_s16  ;;  %s6327_s3 = smov [#allocation4 + $0x1]  }
  0xec   :  { %1430 = sst [smem:[#allocation13 + $0x4]] %s6320_s17  ;;  %s6328_s30 = smov [#allocation12]   ;;  %v1555_v36 = vmul.u32 24, %v7335_v34  ;;  %v7338_v37 = vsub.s32 2, %v1559_v35  ;;  %v7340_v38 = vsub.s32 0, %v1559_v35  ;;  %v7342_v41 = vsub.s32 3, %v1559_v35 }
  0xed   :  { %1432 = sst [smem:[#allocation13 + $0x5]] %s6321_s19  ;;  %s6329_s5 = smov [#allocation2 + $0x9c0]   ;;  %v7344_v42 = vsub.s32 1, %v1559_v35  ;;  %v1595_v47 = vsub.s32 5, %v1559_v35  ;;  %v1588_v48 = vsub.s32 4, %v1559_v35  ;;  %v1609_v51 = vsub.s32 7, %v1559_v35 }
  0xee   :  { %1434 = sst [smem:[#allocation13 + $0x6]] %s6323_s21  ;;  %s1455_s6 = sshll.u32 %s6329_s5, 4  ;;  %v1602_v52 = vsub.s32 6, %v1559_v35  ;;  %v7351_v55 = vadd.s32 128, %v7335_v34  ;;  %s1456_s6 = int_to_ptr.vmem [resolvable:$true] %s1455_s6 }
  0xef   :  { %1436 = sst [smem:[#allocation13 + $0x7]] %s6319_s16  ;;  %s1441_s9 = scalar_lea.hbm %s8227_s2, 39936 }
  0xf0   :  { %1438 = sst [smem:[#allocation13 + $0x8]] %s6318_s15  ;;  %s6330_s10 = smov [#allocation4 + $0x2]  }
  0xf1   :  { %1440 = dma.general %s1404_s29, 17408, %s1419_s26, %s6327_s3, %s6328_s30, [#allocation13], %s6408_s22, 0  }
  0xf2   :  { %1459 = sst [smem:[#allocation15]] %s6316_s0  ;;  %s6331_s12 = smov [#allocation14]  }
  0xf3   :  { %1461 = sst [smem:[#allocation15 + $0x1]] %s6316_s0  ;;  %s6332_s13 = smov [#allocation2 + $0xe00]  }
  0xf4   :  { %1463 = sst [smem:[#allocation15 + $0x2]] %s6318_s15  ;;  %s1492_s14 = sshll.u32 %s6332_s13, 4  ;;  %s1493_s14 = int_to_ptr.vmem [resolvable:$true] %s1492_s14 }
  0xf5   :  { %1465 = sst [smem:[#allocation15 + $0x3]] %s6319_s16  ;;  %s1478_s20 = scalar_lea.hbm %s8227_s2, 57344 }
  0xf6   :  { %1467 = sst [smem:[#allocation15 + $0x4]] %s6320_s17  ;;  %s6333_s23 = smov [#allocation4 + $0x3]  }
  0xf7   :  { %1469 = sst [smem:[#allocation15 + $0x5]] %s6321_s19  ;;  %s6334_s24 = smov [#allocation16]  }
  0xf8   :  { %1471 = sst [smem:[#allocation15 + $0x6]] %s6323_s21  ;;  %s6335_s25 = smov [#allocation2 + $0x1240]  }
  0xf9   :  { %1473 = sst [smem:[#allocation15 + $0x7]] %s6319_s16  ;;  %s1529_s26 = sshll.u32 %s6335_s25, 4  ;;  %s1530_s26 = int_to_ptr.vmem [resolvable:$true] %s1529_s26 }
  0xfa   :  { %1475 = sst [smem:[#allocation15 + $0x8]] %s6318_s15  ;;  %s1515_s29 = scalar_lea.hbm %s8227_s2, 74752 }
  0xfb   :  { %1477 = dma.general %s1441_s9, 17408, %s1456_s6, %s6330_s10, %s6331_s12, [#allocation15], %s6408_s22, 0  }
  0xfc   :  { %1496 = sst [smem:[#allocation17]] %s6316_s0  ;;  %s6337_s3 = smov [#allocation18]  }
  0xfd   :  { %1498 = sst [smem:[#allocation17 + $0x1]] %s6316_s0 }
  0xfe   :  { %1500 = sst [smem:[#allocation17 + $0x2]] %s6318_s15 }
  0xff   :  { %1502 = sst [smem:[#allocation17 + $0x3]] %s6319_s16 }
 0x100   :  { %1504 = sst [smem:[#allocation17 + $0x4]] %s6320_s17 }
 0x101   :  { %1506 = sst [smem:[#allocation17 + $0x5]] %s6321_s19 }
 0x102   :  { %1508 = sst [smem:[#allocation17 + $0x6]] %s6323_s21 }
 0x103   :  { %1510 = sst [smem:[#allocation17 + $0x7]] %s6319_s16 }
 0x104   :  { %1512 = sst [smem:[#allocation17 + $0x8]] %s6318_s15 }
 0x105   :  { %1514 = dma.general %s1478_s20, 17408, %s1493_s14, %s6333_s23, %s6334_s24, [#allocation17], %s6408_s22, 0  }
 0x106   :  { %1533 = sst [smem:[#allocation19]] %s6316_s0 }
 0x107   :  { %1535 = sst [smem:[#allocation19 + $0x1]] %s6316_s0  ;;  %s6336_s0 = smov [#allocation4 + $0x4]  }
 0x108   :  { %1537 = sst [smem:[#allocation19 + $0x2]] %s6318_s15 }
 0x109   :  { %1539 = sst [smem:[#allocation19 + $0x3]] %s6319_s16 }
 0x10a   :  { %1541 = sst [smem:[#allocation19 + $0x4]] %s6320_s17 }
 0x10b   :  { %1543 = sst [smem:[#allocation19 + $0x5]] %s6321_s19 }
 0x10c   :  { %1545 = sst [smem:[#allocation19 + $0x6]] %s6323_s21 }
 0x10d   :  { %1547 = sst [smem:[#allocation19 + $0x7]] %s6319_s16 }
 0x10e   :  { %1549 = sst [smem:[#allocation19 + $0x8]] %s6318_s15 }
 0x10f   :  { %1551 = dma.general %s1515_s29, 1024, %s1530_s26, %s6336_s0, %s6337_s3, [#allocation19], %s6408_s22, 0  }
 0x110   :  { %v1552_v39 = vld [vmem:[#allocation5] sm:$0xff] }
 0x111   :  { %v1556_v40 = vadd.s32 %v1555_v36, %v1552_v39 }
 0x113   :  { %v1575_v43 = vrot.slane %v1556_v40, %v7338_v37  ;;  %v1561_v44 = vrot.slane %v1556_v40, %v7340_v38  ;;  %v1582_v45 = vrot.slane %v1556_v40, %v7342_v41  ;;  %v1568_v46 = vrot.slane %v1556_v40, %v7344_v42 }
 0x114   :  { %v1596_v49 = vrot.slane %v1556_v40, %v1595_v47  ;;  %v1589_v50 = vrot.slane %v1556_v40, %v1588_v48  ;;  %v1610_v53 = vrot.slane %v1556_v40, %v1609_v51  ;;  %v1603_v54 = vrot.slane %v1556_v40, %v1602_v52 }
 0x115   :  { %1577 = vbcast.lane.b32.xlu1 %v1575_v43, 256  ;;  %1563 = vbcast.lane.b32.xlu0 %v1561_v44, 256 }
 0x119   :  { %1584 = vbcast.lane.b32.xlu1 %v1582_v45, 256  ;;  %1570 = vbcast.lane.b32.xlu0 %v1568_v46, 256 }
 0x11d   :  { %1598 = vbcast.lane.b32.xlu1 %v1596_v49, 256  ;;  %1591 = vbcast.lane.b32.xlu0 %v1589_v50, 256 }
 0x121   :  { %1612 = vbcast.lane.b32.xlu1 %v1610_v53, 256  ;;  %1605 = vbcast.lane.b32.xlu0 %v1603_v54, 256 }
 0x187   :  { %v1578_v56 = vpop.permute.xlu1 %1577  ;;  %v1564_v57 = vpop.permute.xlu0 %1563 }
 0x188   :  { %vm1618_vm1 = vcmp.eq.s32.totalorder %v1578_v56, %v7335_v34  ;;  %vm1619_vm2 = vcmp.eq.s32.totalorder %v1578_v56, %v7351_v55  ;;  %vm1614_vm3 = vcmp.eq.s32.totalorder %v1564_v57, %v7335_v34  ;;  %vm1615_vm4 = vcmp.eq.s32.totalorder %v1564_v57, %v7351_v55 }
 0x189   :  { %v5971_v59 = vsel %vm1618_vm1, 1.0, %v6338_v58  ;;  %v5972_v60 = vsel %vm1619_vm2, 1.0, %v6338_v58  ;;  %v5967_v61 = vsel %vm1614_vm3, 1.0, %v6338_v58  ;;  %v5968_v62 = vsel %vm1615_vm4, 1.0, %v6338_v58 }
 0x18a   :  { %v1689_v63 = vrot.slane %v5971_v59, 4  ;;  %v1695_v0 = vsel %vm1668_vm0, %v5972_v60, 0.0  ;;  %v1662_v1 = vrot.slane %v5967_v61, 4  ;;  %v1669_v2 = vsel %vm1668_vm0, %v5968_v62, 0.0 }
 0x18b   :  { %v1696_v3 = vrot.slane %v1695_v0, 4  ;;  %v1670_v4 = vrot.slane %v1669_v2, 4  ;;  %v1585_v5 = vpop.permute.xlu1 %1584  ;;  %v1571_v8 = vpop.permute.xlu0 %1570 }
 0x18c   :  { %v1690_v6 = vadd.f32 %v5971_v59, %v1689_v63  ;;  %v1663_v7 = vadd.f32 %v5967_v61, %v1662_v1  ;;  %vm1620_vm5 = vcmp.eq.s32.totalorder %v1585_v5, %v7335_v34  ;;  %vm1621_vm6 = vcmp.eq.s32.totalorder %v1585_v5, %v7351_v55 }
 0x18d   :  { %v1697_v9 = vadd.f32 %v1696_v3, %v1695_v0  ;;  %v1671_v10 = vadd.f32 %v1670_v4, %v1669_v2  ;;  %v5973_v11 = vsel %vm1620_vm5, 1.0, %v6338_v58  ;;  %v5974_v12 = vsel %vm1621_vm6, 1.0, %v6338_v58 }
 0x18e   :  { %v1691_v13 = vrot.slane %v1690_v6, 2  ;;  %v1664_v14 = vrot.slane %v1663_v7, 2  ;;  %v1702_v15 = vrot.slane %v5973_v11, 4  ;;  %v1708_v16 = vsel %vm1668_vm0, %v5974_v12, 0.0 }
 0x18f   :  { %v1698_v17 = vrot.slane %v1697_v9, 2  ;;  %v1672_v18 = vrot.slane %v1671_v10, 2  ;;  %v1709_v19 = vrot.slane %v1708_v16, 4  ;;  %vm1616_vm7 = vcmp.eq.s32.totalorder %v1571_v8, %v7335_v34  ;;  %v1599_v48 = vpop.permute.xlu1 %1598  ;;  %v1592_v61 = vpop.permute.xlu0 %1591 }
 0x190   :  { %v1692_v20 = vadd.f32 %v1691_v13, %v1690_v6  ;;  %v1665_v21 = vadd.f32 %v1664_v14, %v1663_v7  ;;  %v1703_v22 = vadd.f32 %v5973_v11, %v1702_v15  ;;  %vm1617_vm8 = vcmp.eq.s32.totalorder %v1571_v8, %v7351_v55 }
 0x191   :  { %v1699_v23 = vadd.f32 %v1698_v17, %v1697_v9  ;;  %v1673_v24 = vadd.f32 %v1672_v18, %v1671_v10  ;;  %v1710_v25 = vadd.f32 %v1709_v19, %v1708_v16  ;;  %v5969_v26 = vsel %vm1616_vm7, 1.0, %v6338_v58 }
 0x192   :  { %v1693_v27 = vrot.slane %v1692_v20, 1  ;;  %v1666_v28 = vrot.slane %v1665_v21, 1  ;;  %v1704_v29 = vrot.slane %v1703_v22, 2  ;;  %v5970_v30 = vsel %vm1617_vm8, 1.0, %v6338_v58 }
 0x193   :  { %v1700_v31 = vrot.slane %v1699_v23, 1  ;;  %v1674_v32 = vrot.slane %v1673_v24, 1  ;;  %v1711_v33 = vrot.slane %v1710_v25, 2  ;;  %v1676_v35 = vrot.slane %v5969_v26, 4  ;;  %v1613_v9 = vpop.permute.xlu1 %1612 }
 0x194   :  { %v7372_v36 = vadd.f32 %v1693_v27, %v1692_v20  ;;  %v7374_v39 = vadd.f32 %v1666_v28, %v1665_v21  ;;  %v1705_v40 = vadd.f32 %v1704_v29, %v1703_v22  ;;  %v1682_v43 = vsel %vm1668_vm0, %v5970_v30, 0.0 }
 0x195   :  { %v7377_v44 = vadd.f32 %v1700_v31, %v1699_v23  ;;  %v7379_v45 = vadd.f32 %v1674_v32, %v1673_v24  ;;  %v1712_v46 = vadd.f32 %v1711_v33, %v1710_v25  ;;  %v1677_v47 = vadd.f32 %v5969_v26, %v1676_v35  ;;  %v1606_v31 = vpop.permute.xlu0 %1605 }
 0x196   :  { %v1771_v49 = vpack.c.bf16 %v7372_v36, %v7372_v36  ;;  %v1767_v50 = vpack.c.bf16 %v7374_v39, %v7374_v39  ;;  %v1706_v51 = vrot.slane %v1705_v40, 1  ;;  %v1683_v52 = vrot.slane %v1682_v43, 4 }
 0x197   :  { %v1772_v53 = vpack.c.bf16 %v7377_v44, %v7377_v44  ;;  %v1768_v54 = vpack.c.bf16 %v7379_v45, %v7379_v45  ;;  %v1713_v56 = vrot.slane %v1712_v46, 1  ;;  %v1678_v57 = vrot.slane %v1677_v47, 2 }
 0x198   :  { %v7389_v59 = vadd.f32 %v1706_v51, %v1705_v40  ;;  %v1684_v60 = vadd.f32 %v1683_v52, %v1682_v43  ;;  %vm1624_vm9 = vcmp.eq.s32.totalorder %v1599_v48, %v7335_v34  ;;  %vm1625_vm10 = vcmp.eq.s32.totalorder %v1599_v48, %v7351_v55 }
 0x199   :  { %v7393_v62 = vadd.f32 %v1713_v56, %v1712_v46  ;;  %v1679_v63 = vadd.f32 %v1678_v57, %v1677_v47  ;;  %v5977_v0 = vsel %vm1624_vm9, 1.0, %v6338_v58  ;;  %v5978_v1 = vsel %vm1625_vm10, 1.0, %v6338_v58 }
 0x19a   :  { %v1773_v2 = vpack.c.bf16 %v7389_v59, %v7389_v59  ;;  %v1685_v3 = vrot.slane %v1684_v60, 2  ;;  %v1728_v4 = vrot.slane %v5977_v0, 4  ;;  %v1734_v5 = vsel %vm1668_vm0, %v5978_v1, 0.0 }
 0x19b   :  { %v1774_v6 = vpack.c.bf16 %v7393_v62, %v7393_v62  ;;  %v1680_v7 = vrot.slane %v1679_v63, 1  ;;  %v1735_v8 = vrot.slane %v1734_v5, 4  ;;  %vm1622_vm11 = vcmp.eq.s32.totalorder %v1592_v61, %v7335_v34 }
 0x19c   :  { %v1686_v10 = vadd.f32 %v1685_v3, %v1684_v60  ;;  %v1729_v11 = vadd.f32 %v5977_v0, %v1728_v4  ;;  %vm1623_vm12 = vcmp.eq.s32.totalorder %v1592_v61, %v7351_v55  ;;  %v5975_v12 = vsel %vm1622_vm11, 1.0, %v6338_v58 }
 0x19d   :  { %v7405_v13 = vadd.f32 %v1680_v7, %v1679_v63  ;;  %v1736_v14 = vadd.f32 %v1735_v8, %v1734_v5  ;;  %v5976_v15 = vsel %vm1623_vm12, 1.0, %v6338_v58  ;;  %v1715_v16 = vrot.slane %v5975_v12, 4 }
 0x19e   :  { %v1687_v17 = vrot.slane %v1686_v10, 1  ;;  %v1730_v18 = vrot.slane %v1729_v11, 2  ;;  %v1721_v19 = vsel %vm1668_vm0, %v5976_v15, 0.0  ;;  %vm1628_vm13 = vcmp.eq.s32.totalorder %v1613_v9, %v7335_v34 }
 0x19f   :  { %v1769_v20 = vpack.c.bf16 %v7405_v13, %v7405_v13  ;;  %v1737_v21 = vrot.slane %v1736_v14, 2  ;;  %v1716_v22 = vadd.f32 %v5975_v12, %v1715_v16  ;;  %v1722_v23 = vrot.slane %v1721_v19, 4 }
 0x1a0   :  { %v1688_v24 = vadd.f32 %v1687_v17, %v1686_v10  ;;  %v1731_v25 = vadd.f32 %v1730_v18, %v1729_v11  ;;  %vm1629_vm14 = vcmp.eq.s32.totalorder %v1613_v9, %v7351_v55  ;;  %v5981_v26 = vsel %vm1628_vm13, 1.0, %v6338_v58 }
 0x1a1   :  { %v1738_v27 = vadd.f32 %v1737_v21, %v1736_v14  ;;  %v1717_v28 = vrot.slane %v1716_v22, 2  ;;  %v1723_v29 = vadd.f32 %v1722_v23, %v1721_v19  ;;  %v5982_v30 = vsel %vm1629_vm14, 1.0, %v6338_v58 }
 0x1a2   :  { %v1770_v32 = vpack.c.bf16 %v1688_v24, %v1688_v24  ;;  %v1732_v33 = vrot.slane %v1731_v25, 1  ;;  %v1754_v35 = vrot.slane %v5981_v26, 4  ;;  %v1760_v40 = vsel %vm1668_vm0, %v5982_v30, 0.0 }
 0x1a3   :  { %v1739_v43 = vrot.slane %v1738_v27, 1  ;;  %v1718_v46 = vadd.f32 %v1717_v28, %v1716_v22  ;;  %v1724_v47 = vrot.slane %v1723_v29, 2  ;;  %v1761_v48 = vrot.slane %v1760_v40, 4 }
 0x1a4   :  { %v7416_v51 = vadd.f32 %v1732_v33, %v1731_v25  ;;  %v1755_v52 = vadd.f32 %v5981_v26, %v1754_v35  ;;  %vm1626_vm15 = vcmp.eq.s32.totalorder %v1606_v31, %v7335_v34  ;;  %vm1627_vm1 = vcmp.eq.s32.totalorder %v1606_v31, %v7351_v55 }
 0x1a5   :  { %v1740_v56 = vadd.f32 %v1739_v43, %v1738_v27  ;;  %v1719_v57 = vrot.slane %v1718_v46, 1  ;;  %v1725_v60 = vadd.f32 %v1724_v47, %v1723_v29  ;;  %v1762_v61 = vadd.f32 %v1761_v48, %v1760_v40 }
 0x1a6   :  { %v1777_v63 = vpack.c.bf16 %v7416_v51, %v7416_v51  ;;  %v1756_v0 = vrot.slane %v1755_v52, 2  ;;  %v5979_v1 = vsel %vm1626_vm15, 1.0, %v6338_v58  ;;  %v5980_v3 = vsel %vm1627_vm1, 1.0, %v6338_v58 }
 0x1a7   :  { %v1778_v4 = vpack.c.bf16 %v1740_v56, %v1740_v56  ;;  %v7424_v5 = vadd.f32 %v1719_v57, %v1718_v46  ;;  %v1726_v7 = vrot.slane %v1725_v60, 1  ;;  %v1763_v8 = vrot.slane %v1762_v61, 2 }
 0x1a8   :  { %v1757_v34 = vadd.f32 %v1756_v0, %v1755_v52  ;;  %v1741_v9 = vrot.slane %v5979_v1, 4  ;;  %v1747_v55 = vsel %vm1668_vm0, %v5980_v3, 0.0 }
 0x1a9   :  { %v1727_v10 = vadd.f32 %v1726_v7, %v1725_v60  ;;  %v1775_v11 = vpack.c.bf16 %v7424_v5, %v7424_v5  ;;  %v1764_v12 = vadd.f32 %v1763_v8, %v1762_v61  ;;  %v1748_v14 = vrot.slane %v1747_v55, 4 }
 0x1aa   :  { %v1758_v15 = vrot.slane %v1757_v34, 1  ;;  %v1742_v16 = vadd.f32 %v5979_v1, %v1741_v9 }
 0x1ab   :  { %v1776_v17 = vpack.c.bf16 %v1727_v10, %v1727_v10  ;;  %v1765_v18 = vrot.slane %v1764_v12, 1  ;;  %v1749_v19 = vadd.f32 %v1748_v14, %v1747_v55 }
 0x1ac   :  { %v7429_v21 = vadd.f32 %v1758_v15, %v1757_v34  ;;  %v1743_v22 = vrot.slane %v1742_v16, 2 }
 0x1ad   :  { %v1766_v23 = vadd.f32 %v1765_v18, %v1764_v12  ;;  %v1750_v24 = vrot.slane %v1749_v19, 2 }
 0x1ae   :  { %v1781_v25 = vpack.c.bf16 %v7429_v21, %v7429_v21  ;;  %v1744_v26 = vadd.f32 %v1743_v22, %v1742_v16 }
 0x1af   :  { %v1782_v27 = vpack.c.bf16 %v1766_v23, %v1766_v23  ;;  %v1751_v28 = vadd.f32 %v1750_v24, %v1749_v19 }
 0x1b0   :  { %v1745_v29 = vrot.slane %v1744_v26, 1 }
 0x1b1   :  { %v1752_v30 = vrot.slane %v1751_v28, 1 }
 0x1b2   :  { %v7433_v31 = vadd.f32 %v1745_v29, %v1744_v26 }
 0x1b3   :  { %v1753_v33 = vadd.f32 %v1752_v30, %v1751_v28 }
 0x1b4   :  { %v1779_v35 = vpack.c.bf16 %v7433_v31, %v7433_v31 }
 0x1b5   :  { %v1780_v40 = vpack.c.bf16 %v1753_v33, %v1753_v33 }
 0x1b6   :  { %6302 = dma.done.wait [#allocation4], 22528 }
 0x1b7   :  { %6303 = vsyncadd [#allocation4], 4294944768  ;;  %v1874_v43 = vunpack.c.l.b16 %v1768_v54  ;;  %v1876_v46 = vunpack.c.l.b16 %v1770_v32  ;;  %v1878_v47 = vunpack.c.l.b16 %v1772_v53  ;;  %v1880_v48 = vunpack.c.l.b16 %v1774_v6  ;;  %v1788_v62 = vld [vmem:[#allocation2 + $0x8] sm:$0xff]  ;;  %v1787_v6 = vld [vmem:[#allocation2] sm:$0xff] }
 0x1b8   :  { %v1882_v52 = vunpack.c.l.b16 %v1776_v17  ;;  %vm1889_vm2 = vcmask 1041409   ;;  %vm1891_vm3 = vcmask 1042434   ;;  %vm1893_vm4 = vcmask 1043459   ;;  %v1792_v32 = vld [vmem:[#allocation2 + $0x28] sm:$0xff]  ;;  %1916 = vmatprep.subr.bf16.mxu0 %v1788_v62  ;;  %v1791_v3 = vld [vmem:[#allocation2 + $0x20] sm:$0xff]  ;;  %v1790_v9 = vld [vmem:[#allocation2 + $0x18] sm:$0xff] }
 0x1b9   :  { %v1884_v56 = vunpack.c.l.b16 %v1778_v4  ;;  %vm1895_vm5 = vcmask 1044484   ;;  %v1903_v57 = vsel %vm1889_vm2, %v1876_v46, %v1874_v43  ;;  %v1886_v60 = vunpack.c.l.b16 %v1780_v40  ;;  %1917 = vmatpush1.bf16.msra.mxu0 %v1787_v6  ;;  %v1796_v7 = vld [vmem:[#allocation2 + $0x48] sm:$0xff]  ;;  %v1795_v8 = vld [vmem:[#allocation2 + $0x40] sm:$0xff]  ;;  %v1789_v55 = vld [vmem:[#allocation2 + $0x10] sm:$0xff]  ;;  %1957 = vmatprep.subr.bf16.mxu1 %v1790_v9 }
 0x1ba   :  { %vm1897_vm6 = vcmask 1045509   ;;  %v1904_v45 = vsel %vm1891_vm3, %v1878_v47, %v1903_v57  ;;  %v1888_v54 = vunpack.c.l.b16 %v1782_v27  ;;  %vm1899_vm7 = vcmask 1046534   ;;  %1918 = vmatprep.subr.bf16.mxu0 %v1792_v32  ;;  %v1800_v34 = vld [vmem:[#allocation2 + $0x68] sm:$0xff]  ;;  %v1794_v10 = vld [vmem:[#allocation2 + $0x38] sm:$0xff]  ;;  %1958 = vmatpush1.bf16.msra.mxu1 %v1789_v55  ;;  %v1799_v12 = vld [vmem:[#allocation2 + $0x60] sm:$0xff] }
 0x1bb   :  { %v1905_v44 = vsel %vm1893_vm4, %v1880_v48, %v1904_v45  ;;  %vm1901_vm8 = vcmask 1047559   ;;  %1959 = vmatprep.subr.bf16.mxu1 %v1794_v10  ;;  %v1793_v14 = vld [vmem:[#allocation2 + $0x30] sm:$0xff]  ;;  %v1804_v15 = vld [vmem:[#allocation2 + $0x88] sm:$0xff]  ;;  %v1798_v16 = vld [vmem:[#allocation2 + $0x58] sm:$0xff]  ;;  %v1873_v27 = vunpack.c.l.b16 %v1767_v50  ;;  %v1875_v28 = vunpack.c.l.b16 %v1769_v20 }
 0x1bc   :  { %v1906_v53 = vsel %vm1895_vm5, %v1882_v52, %v1905_v44  ;;  %v1803_v17 = vld [vmem:[#allocation2 + $0x80] sm:$0xff]  ;;  %v1797_v18 = vld [vmem:[#allocation2 + $0x50] sm:$0xff]  ;;  %v1808_v19 = vld [vmem:[#allocation2 + $0xa8] sm:$0xff]  ;;  %v1877_v33 = vunpack.c.l.b16 %v1771_v49  ;;  %v1879_v50 = vunpack.c.l.b16 %v1773_v2  ;;  %v1881_v48 = vunpack.c.l.b16 %v1775_v11 }
 0x1bd   :  { %v1907_v61 = vsel %vm1897_vm6, %v1884_v56, %v1906_v53  ;;  %1919 = vmatpush1.bf16.msra.mxu0 %v1791_v3  ;;  %v1802_v22 = vld [vmem:[#allocation2 + $0x78] sm:$0xff]  ;;  %v1807_v23 = vld [vmem:[#allocation2 + $0xa0] sm:$0xff]  ;;  %v1801_v24 = vld [vmem:[#allocation2 + $0x70] sm:$0xff]  ;;  %v1890_v46 = vsel %vm1889_vm2, %v1875_v28, %v1873_v27  ;;  %v1883_v57 = vunpack.c.l.b16 %v1777_v63  ;;  %v1885_v11 = vunpack.c.l.b16 %v1779_v35 }
 0x1be   :  { %v1908_v0 = vsel %vm1899_vm7, %v1886_v60, %v1907_v61  ;;  %1920 = vmatprep.subr.bf16.mxu0 %v1796_v7  ;;  %1960 = vmatpush1.bf16.msra.mxu1 %v1793_v14  ;;  %v1812_v26 = vld [vmem:[#allocation2 + $0xc8] sm:$0xff]  ;;  %v1806_v29 = vld [vmem:[#allocation2 + $0x98] sm:$0xff]  ;;  %v1811_v30 = vld [vmem:[#allocation2 + $0xc0] sm:$0xff]  ;;  %v1892_v20 = vsel %vm1891_vm3, %v1877_v33, %v1890_v46  ;;  %v1887_v51 = vunpack.c.l.b16 %v1781_v25 }
 0x1bf   :  { %v1909_v1 = vsel %vm1901_vm8, %v1888_v54, %v1908_v0  ;;  %1961 = vmatprep.subr.bf16.mxu1 %v1798_v16  ;;  %v1805_v40 = vld [vmem:[#allocation2 + $0x90] sm:$0xff]  ;;  %v1816_v43 = vld [vmem:[#allocation2 + $0xe8] sm:$0xff]  ;;  %v1810_v39 = vld [vmem:[#allocation2 + $0xb8] sm:$0xff]  ;;  %v1894_v52 = vsel %vm1893_vm4, %v1879_v50, %v1892_v20 }
 0x1c0   :  { %v1911_v4 = vpack.c.b16 %v1909_v1, %v1909_v1  ;;  %v1815_v13 = vld [vmem:[#allocation2 + $0xe0] sm:$0xff]  ;;  %v1809_v47 = vld [vmem:[#allocation2 + $0xb0] sm:$0xff]  ;;  %v1820_v36 = vld [vmem:[#allocation2 + $0x108] sm:$0xff]  ;;  %v1896_v45 = vsel %vm1895_vm5, %v1881_v48, %v1894_v52 }
 0x1c1   :  { %1921 = vmatpush1.bf16.msra.mxu0 %v1795_v8  ;;  %v1814_v49 = vld [vmem:[#allocation2 + $0xd8] sm:$0xff]  ;;  %v1819_v59 = vld [vmem:[#allocation2 + $0x100] sm:$0xff]  ;;  %v1813_v2 = vld [vmem:[#allocation2 + $0xd0] sm:$0xff]  ;;  %v1898_v53 = vsel %vm1897_vm6, %v1883_v57, %v1896_v45 }
 0x1c2   :  { %5983 = vmatprep.mubr.msk.bf16.mxu0 %vm1668_vm0, %v1911_v4  ;;  %5984 = vmatprep.mubr.msk.bf16.mxu1 %vm1668_vm0, %v1911_v4  ;;  %v1824_v56 = vld [vmem:[#allocation2 + $0x128] sm:$0xff]  ;;  %v1818_v60 = vld [vmem:[#allocation2 + $0xf8] sm:$0xff]  ;;  %v1823_v5 = vld [vmem:[#allocation2 + $0x120] sm:$0xff]  ;;  %v1900_v6 = vsel %vm1899_vm7, %v1885_v11, %v1898_v53 }
 0x1c3   :  { %1922 = vmatprep.subr.bf16.mxu0 %v1800_v34  ;;  %1962 = vmatpush1.bf16.msra.mxu1 %v1797_v18  ;;  %v1817_v54 = vld [vmem:[#allocation2 + $0xf0] sm:$0xff]  ;;  %v1828_v44 = vld [vmem:[#allocation2 + $0x148] sm:$0xff]  ;;  %v1822_v62 = vld [vmem:[#allocation2 + $0x118] sm:$0xff]  ;;  %v1902_v61 = vsel %vm1901_vm8, %v1887_v51, %v1900_v6 }
 0x1c4   :  { %1963 = vmatprep.subr.bf16.mxu1 %v1802_v22  ;;  %v1827_v63 = vld [vmem:[#allocation2 + $0x140] sm:$0xff]  ;;  %v1821_v32 = vld [vmem:[#allocation2 + $0x110] sm:$0xff]  ;;  %v1832_v31 = vld [vmem:[#allocation2 + $0x168] sm:$0xff]  ;;  %v1910_v25 = vpack.c.b16 %v1902_v61, %v1902_v61 }
 0x1c5   :  { %1923 = vmatpush1.bf16.msra.mxu0 %v1799_v12  ;;  %v1826_v35 = vld [vmem:[#allocation2 + $0x138] sm:$0xff]  ;;  %v1831_v0 = vld [vmem:[#allocation2 + $0x160] sm:$0xff]  ;;  %v1825_v1 = vld [vmem:[#allocation2 + $0x130] sm:$0xff] }
 0x1c6   :  { %1924 = vmatprep.subr.bf16.mxu0 %v1804_v15  ;;  %v1830_v3 = vld [vmem:[#allocation2 + $0x158] sm:$0xff]  ;;  %v2003_v21 = vld [vmem:[#allocation2 + $0x188] sm:$0xff]  ;;  %v1829_v4 = vld [vmem:[#allocation2 + $0x150] sm:$0xff] }
 0x1c7   :  { %1964 = vmatpush1.bf16.msra.mxu1 %v1801_v24  ;;  %v2002_v7 = vld [vmem:[#allocation2 + $0x180] sm:$0xff]  ;;  %v1834_v8 = vld [vmem:[#allocation2 + $0x178] sm:$0xff]  ;;  %v2007_v34 = vld [vmem:[#allocation2 + $0x1a8] sm:$0xff] }
 0x1c8   :  { %1965 = vmatprep.subr.bf16.mxu1 %v1806_v29  ;;  %v1833_v9 = vld [vmem:[#allocation2 + $0x170] sm:$0xff]  ;;  %v2006_v55 = vld [vmem:[#allocation2 + $0x1a0] sm:$0xff]  ;;  %v2005_v10 = vld [vmem:[#allocation2 + $0x198] sm:$0xff] }
 0x1c9   :  { %1925 = vmatpush1.bf16.msra.mxu0 %v1803_v17  ;;  %v2011_v12 = vld [vmem:[#allocation2 + $0x1c8] sm:$0xff]  ;;  %v2004_v14 = vld [vmem:[#allocation2 + $0x190] sm:$0xff]  ;;  %v2010_v15 = vld [vmem:[#allocation2 + $0x1c0] sm:$0xff] }
 0x1ca   :  { %1926 = vmatprep.subr.bf16.mxu0 %v1808_v19  ;;  %v2009_v16 = vld [vmem:[#allocation2 + $0x1b8] sm:$0xff]  ;;  %v2015_v17 = vld [vmem:[#allocation2 + $0x1e8] sm:$0xff]  ;;  %v2008_v18 = vld [vmem:[#allocation2 + $0x1b0] sm:$0xff] }
 0x1cb   :  { %1966 = vmatpush1.bf16.msra.mxu1 %v1805_v40  ;;  %v2014_v19 = vld [vmem:[#allocation2 + $0x1e0] sm:$0xff]  ;;  %v2013_v22 = vld [vmem:[#allocation2 + $0x1d8] sm:$0xff]  ;;  %v2012_v24 = vld [vmem:[#allocation2 + $0x1d0] sm:$0xff] }
 0x1cc   :  { %1967 = vmatprep.subr.bf16.mxu1 %v1810_v39  ;;  %v2017_v27 = vld [vmem:[#allocation2 + $0x1f8] sm:$0xff]  ;;  %v2023_v28 = vld [vmem:[#allocation2 + $0x228] sm:$0xff]  ;;  %v2016_v29 = vld [vmem:[#allocation2 + $0x1f0] sm:$0xff] }
 0x1cd   :  { %1927 = vmatpush1.bf16.msra.mxu0 %v1807_v23  ;;  %v2019_v23 = vld [vmem:[#allocation2 + $0x208] sm:$0xff]  ;;  %v2021_v33 = vld [vmem:[#allocation2 + $0x218] sm:$0xff]  ;;  %v2026_v46 = vld [vmem:[#allocation2 + $0x240] sm:$0xff] }
 0x1ce   :  { %1928 = vmatprep.subr.bf16.mxu0 %v1812_v26  ;;  %v2018_v26 = vld [vmem:[#allocation2 + $0x200] sm:$0xff]  ;;  %v2027_v40 = vld [vmem:[#allocation2 + $0x248] sm:$0xff]  ;;  %v2025_v39 = vld [vmem:[#allocation2 + $0x238] sm:$0xff] }
 0x1cf   :  { %1968 = vmatpush1.bf16.msra.mxu1 %v1809_v47  ;;  %v2031_v50 = vld [vmem:[#allocation2 + $0x268] sm:$0xff]  ;;  %v2030_v20 = vld [vmem:[#allocation2 + $0x260] sm:$0xff]  ;;  %v2029_v47 = vld [vmem:[#allocation2 + $0x258] sm:$0xff] }
 0x1d0   :  { %1969 = vmatprep.subr.bf16.mxu1 %v1814_v49  ;;  %v2028_v49 = vld [vmem:[#allocation2 + $0x250] sm:$0xff]  ;;  %v2034_v48 = vld [vmem:[#allocation2 + $0x280] sm:$0xff]  ;;  %v2033_v52 = vld [vmem:[#allocation2 + $0x278] sm:$0xff] }
 0x1d1   :  { %1929 = vmatpush1.bf16.msra.mxu0 %v1811_v30  ;;  %v2022_v30 = vld [vmem:[#allocation2 + $0x220] sm:$0xff]  ;;  %v2037_v57 = vld [vmem:[#allocation2 + $0x298] sm:$0xff]  ;;  %v2036_v45 = vld [vmem:[#allocation2 + $0x290] sm:$0xff] }
 0x1d2   :  { %1930 = vmatprep.subr.bf16.mxu0 %v1816_v43  ;;  %v2020_v43 = vld [vmem:[#allocation2 + $0x210] sm:$0xff]  ;;  %v2041_v11 = vld [vmem:[#allocation2 + $0x2b8] sm:$0xff]  ;;  %v2046_v53 = vld [vmem:[#allocation2 + $0x2e0] sm:$0xff] }
 0x1d3   :  { %1970 = vmatpush1.bf16.msra.mxu1 %v1813_v2  ;;  %v2032_v2 = vld [vmem:[#allocation2 + $0x270] sm:$0xff]  ;;  %v2051_v51 = vld [vmem:[#allocation2 + $0x308] sm:$0xff]  ;;  %v2050_v6 = vld [vmem:[#allocation2 + $0x300] sm:$0xff] }
 0x1d4   :  { %1971 = vmatprep.subr.bf16.mxu1 %v1818_v60  ;;  %v2043_v60 = vld [vmem:[#allocation2 + $0x2c8] sm:$0xff]  ;;  %v2054_v61 = vld [vmem:[#allocation2 + $0x320] sm:$0xff] }
 0x1d5   :  { %1931 = vmatpush1.bf16.msra.mxu0 %v1815_v13  ;;  %v2024_v13 = vld [vmem:[#allocation2 + $0x230] sm:$0xff] }
 0x1d6   :  { %1932 = vmatprep.subr.bf16.mxu0 %v1820_v36  ;;  %v2035_v36 = vld [vmem:[#allocation2 + $0x288] sm:$0xff] }
 0x1d7   :  { %1972 = vmatpush1.bf16.msra.mxu1 %v1817_v54  ;;  %v2047_v54 = vld [vmem:[#allocation2 + $0x2e8] sm:$0xff] }
 0x1d8   :  { %1973 = vmatprep.subr.bf16.mxu1 %v1822_v62  ;;  %v2045_v62 = vld [vmem:[#allocation2 + $0x2d8] sm:$0xff] }
 0x1d9   :  { %1933 = vmatpush1.bf16.msra.mxu0 %v1819_v59  ;;  %v2039_v59 = vld [vmem:[#allocation2 + $0x2a8] sm:$0xff] }
 0x1da   :  { %1934 = vmatprep.subr.bf16.mxu0 %v1824_v56  ;;  %v2038_v56 = vld [vmem:[#allocation2 + $0x2a0] sm:$0xff] }
 0x1db   :  { %1974 = vmatpush1.bf16.msra.mxu1 %v1821_v32  ;;  %v2049_v32 = vld [vmem:[#allocation2 + $0x2f8] sm:$0xff] }
 0x1dc   :  { %1975 = vmatprep.subr.bf16.mxu1 %v1826_v35  ;;  %v2048_v35 = vld [vmem:[#allocation2 + $0x2f0] sm:$0xff] }
 0x1dd   :  { %1935 = vmatpush1.bf16.msra.mxu0 %v1823_v5  ;;  %v2042_v5 = vld [vmem:[#allocation2 + $0x2c0] sm:$0xff] }
 0x1de   :  { %1936 = vmatprep.subr.bf16.mxu0 %v1828_v44  ;;  %v2040_v44 = vld [vmem:[#allocation2 + $0x2b0] sm:$0xff] }
 0x1df   :  { %1976 = vmatpush1.bf16.msra.mxu1 %v1825_v1  ;;  %v2052_v1 = vld [vmem:[#allocation2 + $0x310] sm:$0xff] }
 0x1e0   :  { %1977 = vmatprep.subr.bf16.mxu1 %v1830_v3  ;;  %v2057_v3 = vld [vmem:[#allocation2 + $0x338] sm:$0xff] }
 0x1e1   :  { %1937 = vmatpush1.bf16.msra.mxu0 %v1827_v63  ;;  %v2044_v63 = vld [vmem:[#allocation2 + $0x2d0] sm:$0xff] }
 0x1e2   :  { %1938 = vmatprep.subr.bf16.mxu0 %v1832_v31  ;;  %v2055_v31 = vld [vmem:[#allocation2 + $0x328] sm:$0xff] }
 0x1e3   :  { %1978 = vmatpush1.bf16.msra.mxu1 %v1829_v4  ;;  %v2061_v4 = vld [vmem:[#allocation2 + $0x358] sm:$0xff] }
 0x1e4   :  { %1979 = vmatprep.subr.bf16.mxu1 %v1834_v8  ;;  %v2060_v8 = vld [vmem:[#allocation2 + $0x350] sm:$0xff] }
 0x1e5   :  { %1939 = vmatpush1.bf16.msra.mxu0 %v1831_v0  ;;  %v2053_v0 = vld [vmem:[#allocation2 + $0x318] sm:$0xff] }
 0x1e6   :  { %2157 = vmatprep.subr.bf16.mxu0 %v2003_v21  ;;  %v2056_v21 = vld [vmem:[#allocation2 + $0x330] sm:$0xff] }
 0x1e7   :  { %1980 = vmatpush1.bf16.msra.mxu1 %v1833_v9  ;;  %v2065_v9 = vld [vmem:[#allocation2 + $0x378] sm:$0xff] }
 0x1e8   :  { %1949 = vmatmul.mubr.bf16.vlgmr.msra.gmra.mrb[0].mxu0 %v1910_v25  ;;  %2239 = vmatprep.subr.bf16.mxu1 %v2005_v10  ;;  %v2064_v10 = vld [vmem:[#allocation2 + $0x370] sm:$0xff] }
 0x1e9   :  { %2158 = vmatpush1.bf16.msra.mxu0 %v2002_v7  ;;  %v2058_v7 = vld [vmem:[#allocation2 + $0x340] sm:$0xff] }
 0x1ea   :  { %2159 = vmatprep.subr.bf16.mxu0 %v2007_v34  ;;  %1990 = vmatmul.mubr.bf16.vlgmr.msra.gmra.mrb[0].mxu1 %v1910_v25  ;;  %v2059_v25 = vld [vmem:[#allocation2 + $0x348] sm:$0xff] }
 0x1eb   :  { %2240 = vmatpush1.bf16.msra.mxu1 %v2004_v14  ;;  %v2063_v34 = vld [vmem:[#allocation2 + $0x368] sm:$0xff]  ;;  %v2069_v14 = vld [vmem:[#allocation2 + $0x398] sm:$0xff] }
 0x1ec   :  { %2241 = vmatprep.subr.bf16.mxu1 %v2009_v16 }
 0x1ed   :  { %2160 = vmatpush1.bf16.msra.mxu0 %v2006_v55  ;;  %v2062_v55 = vld [vmem:[#allocation2 + $0x360] sm:$0xff] }
 0x1ee   :  { %2161 = vmatprep.subr.bf16.mxu0 %v2011_v12  ;;  %v2067_v12 = vld [vmem:[#allocation2 + $0x388] sm:$0xff] }
 0x1ef   :  { %2242 = vmatpush1.bf16.msra.mxu1 %v2008_v18 }
 0x1f0   :  { %2243 = vmatprep.subr.bf16.mxu1 %v2013_v22 }
 0x1f1   :  { %2162 = vmatpush1.bf16.msra.mxu0 %v2010_v15  ;;  %v7486_v15 = vld [vmem:[#allocation7] ss:$8 sm:$0xf] }
 0x1f2   :  { %2163 = vmatprep.subr.bf16.mxu0 %v2015_v17  ;;  %v1840_v16 = vrot.slane %v7486_v15, %v7340_v38  ;;  %v1844_v17 = vrot.slane %v7486_v15, %v7344_v42 }
 0x1f3   :  { %2244 = vmatpush1.bf16.msra.mxu1 %v2012_v24 }
 0x1f4   :  { %2245 = vmatprep.subr.bf16.mxu1 %v2017_v27 }
 0x1f5   :  { %2164 = vmatpush1.bf16.msra.mxu0 %v2014_v19 }
 0x1f6   :  { %2165 = vmatprep.subr.bf16.mxu0 %v2019_v23 }
 0x1f7   :  { %2246 = vmatpush1.bf16.msra.mxu1 %v2016_v29 }
 0x1f8   :  { %2247 = vmatprep.subr.bf16.mxu1 %v2021_v33 }
 0x1f9   :  { %2166 = vmatpush1.bf16.msra.mxu0 %v2018_v26 }
 0x1fa   :  { %2167 = vmatprep.subr.bf16.mxu0 %v2023_v28 }
 0x1fb   :  { %2248 = vmatpush1.bf16.msra.mxu1 %v2020_v43  ;;  %v2068_v43 = vld [vmem:[#allocation2 + $0x390] sm:$0xff] }
 0x1fc   :  { %2249 = vmatprep.subr.bf16.mxu1 %v2025_v39  ;;  %v2073_v39 = vld [vmem:[#allocation2 + $0x3b8] sm:$0xff] }
 0x1fd   :  { %2168 = vmatpush1.bf16.msra.mxu0 %v2022_v30  ;;  %v1852_v30 = vrot.slane %v7486_v15, %v7342_v41 }
 0x1fe   :  { %2169 = vmatprep.subr.bf16.mxu0 %v2027_v40  ;;  %v2066_v40 = vld [vmem:[#allocation2 + $0x380] sm:$0xff] }
 0x1ff   :  { %2250 = vmatpush1.bf16.msra.mxu1 %v2024_v13 }
 0x200   :  { %2251 = vmatprep.subr.bf16.mxu1 %v2029_v47 }
 0x201   :  { %2170 = vmatpush1.bf16.msra.mxu0 %v2026_v46  ;;  %v2071_v46 = vld [vmem:[#allocation2 + $0x3a8] sm:$0xff] }
 0x202   :  { %2171 = vmatprep.subr.bf16.mxu0 %v2031_v50 }
 0x203   :  { %2252 = vmatpush1.bf16.msra.mxu1 %v2028_v49  ;;  %v2072_v49 = vld [vmem:[#allocation2 + $0x3b0] sm:$0xff] }
 0x204   :  { %2253 = vmatprep.subr.bf16.mxu1 %v2033_v52  ;;  %v2075_v52 = vld [vmem:[#allocation2 + $0x3c8] sm:$0xff] }
 0x205   :  { %2172 = vmatpush1.bf16.msra.mxu0 %v2030_v20 }
 0x206   :  { %2173 = vmatprep.subr.bf16.mxu0 %v2035_v36  ;;  %v2070_v36 = vld [vmem:[#allocation2 + $0x3a0] sm:$0xff] }
 0x207   :  { %2254 = vmatpush1.bf16.msra.mxu1 %v2032_v2 }
 0x208   :  { %2255 = vmatprep.subr.bf16.mxu1 %v2037_v57  ;;  %v2074_v57 = vld [vmem:[#allocation2 + $0x3c0] sm:$0xff] }
 0x209   :  { %2174 = vmatpush1.bf16.msra.mxu0 %v2034_v48 }
 0x20a   :  { %2175 = vmatprep.subr.bf16.mxu0 %v2039_v59  ;;  %v2077_v59 = vld [vmem:[#allocation2 + $0x3d8] sm:$0xff] }
 0x20b   :  { %2256 = vmatpush1.bf16.msra.mxu1 %v2036_v45  ;;  %v2079_v45 = vld [vmem:[#allocation2 + $0x3e8] sm:$0xff] }
 0x20c   :  { %2257 = vmatprep.subr.bf16.mxu1 %v2041_v11  ;;  %v2078_v11 = vld [vmem:[#allocation2 + $0x3e0] sm:$0xff] }
 0x20d   :  { %2176 = vmatpush1.bf16.msra.mxu0 %v2038_v56 }
 0x20e   :  { %2177 = vmatprep.subr.bf16.mxu0 %v2043_v60  ;;  %v2076_v60 = vld [vmem:[#allocation2 + $0x3d0] sm:$0xff] }
 0x20f   :  { %2258 = vmatpush1.bf16.msra.mxu1 %v2040_v44  ;;  %v2083_v44 = vld [vmem:[#allocation2 + $0x408] sm:$0xff] }
 0x210   :  { %2259 = vmatprep.subr.bf16.mxu1 %v2045_v62  ;;  %v2082_v62 = vld [vmem:[#allocation2 + $0x400] sm:$0xff] }
 0x211   :  { %2178 = vmatpush1.bf16.msra.mxu0 %v2042_v5  ;;  %v2081_v5 = vld [vmem:[#allocation2 + $0x3f8] sm:$0xff] }
 0x212   :  { %2179 = vmatprep.subr.bf16.mxu0 %v2047_v54  ;;  %v2080_v54 = vld [vmem:[#allocation2 + $0x3f0] sm:$0xff] }
 0x213   :  { %2260 = vmatpush1.bf16.msra.mxu1 %v2044_v63  ;;  %v2087_v63 = vld [vmem:[#allocation2 + $0x428] sm:$0xff] }
 0x214   :  { %2261 = vmatprep.subr.bf16.mxu1 %v2049_v32  ;;  %v2086_v32 = vld [vmem:[#allocation2 + $0x420] sm:$0xff] }
 0x215   :  { %2180 = vmatpush1.bf16.msra.mxu0 %v2046_v53  ;;  %v2085_v53 = vld [vmem:[#allocation2 + $0x418] sm:$0xff] }
 0x216   :  { %2181 = vmatprep.subr.bf16.mxu0 %v2051_v51  ;;  %v2084_v51 = vld [vmem:[#allocation2 + $0x410] sm:$0xff] }
 0x217   :  { %2262 = vmatpush1.bf16.msra.mxu1 %v2048_v35  ;;  %v2091_v35 = vld [vmem:[#allocation2 + $0x448] sm:$0xff] }
 0x218   :  { %2263 = vmatprep.subr.bf16.mxu1 %v2053_v0  ;;  %v2090_v0 = vld [vmem:[#allocation2 + $0x440] sm:$0xff] }
 0x219   :  { %2182 = vmatpush1.bf16.msra.mxu0 %v2050_v6  ;;  %v2089_v6 = vld [vmem:[#allocation2 + $0x438] sm:$0xff] }
 0x21a   :  { %2183 = vmatprep.subr.bf16.mxu0 %v2055_v31  ;;  %v2088_v31 = vld [vmem:[#allocation2 + $0x430] sm:$0xff] }
 0x21b   :  { %2264 = vmatpush1.bf16.msra.mxu1 %v2052_v1  ;;  %v2092_v1 = vld [vmem:[#allocation2 + $0x450] sm:$0xff] }
 0x21c   :  { %2265 = vmatprep.subr.bf16.mxu1 %v2057_v3  ;;  %v2095_v3 = vld [vmem:[#allocation2 + $0x468] sm:$0xff] }
 0x21d   :  { %2184 = vmatpush1.bf16.msra.mxu0 %v2054_v61  ;;  %v2093_v61 = vld [vmem:[#allocation2 + $0x458] sm:$0xff] }
 0x21e   :  { %2185 = vmatprep.subr.bf16.mxu0 %v2059_v25  ;;  %v2094_v25 = vld [vmem:[#allocation2 + $0x460] sm:$0xff] }
 0x21f   :  { %2266 = vmatpush1.bf16.msra.mxu1 %v2056_v21  ;;  %v2097_v21 = vld [vmem:[#allocation2 + $0x478] sm:$0xff] }
 0x220   :  { %2267 = vmatprep.subr.bf16.mxu1 %v2061_v4  ;;  %v2096_v4 = vld [vmem:[#allocation2 + $0x470] sm:$0xff] }
 0x221   :  { %2186 = vmatpush1.bf16.msra.mxu0 %v2058_v7  ;;  %v2099_v7 = vld [vmem:[#allocation2 + $0x488] sm:$0xff] }
 0x222   :  { %2187 = vmatprep.subr.bf16.mxu0 %v2063_v34  ;;  %v2098_v34 = vld [vmem:[#allocation2 + $0x480] sm:$0xff] }
 0x223   :  { %2268 = vmatpush1.bf16.msra.mxu1 %v2060_v8  ;;  %v2101_v8 = vld [vmem:[#allocation2 + $0x498] sm:$0xff] }
 0x224   :  { %2269 = vmatprep.subr.bf16.mxu1 %v2065_v9  ;;  %v2100_v9 = vld [vmem:[#allocation2 + $0x490] sm:$0xff] }
 0x225   :  { %2188 = vmatpush1.bf16.msra.mxu0 %v2062_v55  ;;  %v2103_v55 = vld [vmem:[#allocation2 + $0x4a8] sm:$0xff] }
 0x226   :  { %2198 = vmatprep.subr.bf16.mxu0 %v2067_v12  ;;  %v2102_v12 = vld [vmem:[#allocation2 + $0x4a0] sm:$0xff] }
 0x227   :  { %2270 = vmatpush1.bf16.msra.mxu1 %v2064_v10  ;;  %v2105_v10 = vld [vmem:[#allocation2 + $0x4b8] sm:$0xff] }
 0x228   :  { %2280 = vmatprep.subr.bf16.mxu1 %v2069_v14  ;;  %v2104_v14 = vld [vmem:[#allocation2 + $0x4b0] sm:$0xff] }
 0x2bb   :  { %v1950_v18 = vpop.f32.mrb[0].mxu0 }
 0x2bc   :  { %v1951_v19 = vadd.f32 %v1950_v18, %v1840_v16  ;;  %v1952_v22 = vpop.f32.mrb[1].mxu0  ;;  %v2107_v16 = vld [vmem:[#allocation2 + $0x4c8] sm:$0xff]  ;;  %v2106_v18 = vld [vmem:[#allocation2 + $0x4c0] sm:$0xff] }
 0x2bd   :  { %v1953_v23 = vadd.f32 %v1952_v22, %v1844_v17  ;;  %v1954_v24 = vpop.f32.mrb[2].mxu0  ;;  %v7494_v50 = vpop.f32.mrb[0].mxu1  ;;  %v2109_v17 = vld [vmem:[#allocation2 + $0x4d8] sm:$0xff]  ;;  %v2111_v22 = vld [vmem:[#allocation2 + $0x4e8] sm:$0xff] }
 0x2be   :  { %v1998_v26 = vmax.f32 %v1951_v19, 0.0  ;;  %v1955_v27 = vpop.f32.mrb[3].mxu0  ;;  %v1993_v13 = vpop.f32.mrb[1].mxu1  ;;  %v2108_v19 = vld [vmem:[#allocation2 + $0x4d0] sm:$0xff]  ;;  %v2110_v24 = vld [vmem:[#allocation2 + $0x4e0] sm:$0xff] }
 0x2bf   :  { %v1999_v28 = vmax.f32 %v1953_v23, 0.0  ;;  %v1994_v20 = vadd.f32 %v1993_v13, %v1852_v30  ;;  %v1995_v47 = vpop.f32.mrb[2].mxu1  ;;  %v2113_v23 = vld [vmem:[#allocation2 + $0x4f8] sm:$0xff]  ;;  %v2115_v27 = vld [vmem:[#allocation2 + $0x508] sm:$0xff]  ;;  %v2116_v30 = vld [vmem:[#allocation2 + $0x510] sm:$0xff] }
 0x2c0   :  { %v2130_v33 = vpack.c.bf16 %v1998_v26, %v1998_v26  ;;  %v1996_v48 = vpop.f32.mrb[3].mxu1  ;;  %v2112_v26 = vld [vmem:[#allocation2 + $0x4f0] sm:$0xff]  ;;  %v2123_v13 = vld [vmem:[#allocation2 + $0x548] sm:$0xff] }
 0x2c1   :  { %v2131_v29 = vpack.c.bf16 %v1999_v28, %v1999_v28  ;;  %v2001_v2 = vmax.f32 %v1994_v20, 0.0  ;;  %v2117_v28 = vld [vmem:[#allocation2 + $0x518] sm:$0xff]  ;;  %v2127_v48 = vld [vmem:[#allocation2 + $0x568] sm:$0xff] }
 0x2c2   :  { %v2125_v20 = vld [vmem:[#allocation2 + $0x558] sm:$0xff] }
 0x2c3   :  { %2189 = vmatprep.mubr.bf16.mxu0 %v2131_v29  ;;  %2271 = vmatprep.mubr.bf16.mxu1 %v2131_v29  ;;  %v2133_v56 = vpack.c.bf16 %v2001_v2, %v2001_v2  ;;  %v2114_v29 = vld [vmem:[#allocation2 + $0x500] sm:$0xff]  ;;  %v2128_v2 = vld [vmem:[#allocation2 + $0x570] sm:$0xff] }
 0x2c4   :  { %2190 = vmatmul.mubr.bf16.vlgmr.msra.gmra.mrb[4].mxu0 %v2130_v33  ;;  %2272 = vmatmul.mubr.bf16.vlgmr.msra.gmra.mrb[4].mxu1 %v2130_v33  ;;  %v2119_v33 = vld [vmem:[#allocation2 + $0x528] sm:$0xff] }
 0x2c5   :  { %2199 = vmatpush1.bf16.msra.mxu0 %v2066_v40  ;;  %2281 = vmatpush1.bf16.msra.mxu1 %v2068_v43  ;;  %v2121_v40 = vld [vmem:[#allocation2 + $0x538] sm:$0xff]  ;;  %v1848_v43 = vrot.slane %v7486_v15, %v7338_v37  ;;  %v2126_v15 = vld [vmem:[#allocation2 + $0x560] sm:$0xff] }
 0x2c6   :  { %2200 = vmatprep.subr.bf16.mxu0 %v2071_v46  ;;  %2282 = vmatprep.subr.bf16.mxu1 %v2073_v39  ;;  %v2118_v46 = vld [vmem:[#allocation2 + $0x520] sm:$0xff]  ;;  %v2120_v39 = vld [vmem:[#allocation2 + $0x530] sm:$0xff] }
 0x2c7   :  { %2230 = vmatprep.mubr.bf16.mxu0 %v2133_v56  ;;  %2312 = vmatprep.mubr.bf16.mxu1 %v2133_v56  ;;  %v1992_v47 = vadd.f32 %v7494_v50, %v1848_v43 }
 0x2c9   :  { %2201 = vmatpush1.bf16.msra.mxu0 %v2070_v36  ;;  %2283 = vmatpush1.bf16.msra.mxu1 %v2072_v49  ;;  %v2122_v36 = vld [vmem:[#allocation2 + $0x540] sm:$0xff]  ;;  %v2124_v49 = vld [vmem:[#allocation2 + $0x550] sm:$0xff] }
 0x2ca   :  { %2202 = vmatprep.subr.bf16.mxu0 %v2075_v52  ;;  %2284 = vmatprep.subr.bf16.mxu1 %v2077_v59  ;;  %v2129_v52 = vld [vmem:[#allocation2 + $0x578] sm:$0xff]  ;;  %v2000_v59 = vmax.f32 %v1992_v47, 0.0 }
 0x2cc   :  { %v2132_v56 = vpack.c.bf16 %v2000_v59, %v2000_v59 }
 0x2cd   :  { %2203 = vmatpush1.bf16.msra.mxu0 %v2074_v57  ;;  %2285 = vmatpush1.bf16.msra.mxu1 %v2076_v60  ;;  %v2135_v57 = vld [vmem:[#allocation7 + $0x1] ss:$8 sm:$0xf] }
 0x2ce   :  { %2204 = vmatprep.subr.bf16.mxu0 %v2079_v45  ;;  %2286 = vmatprep.subr.bf16.mxu1 %v2081_v5  ;;  %v2140_v50 = vrot.slane %v2135_v57, %v7340_v38  ;;  %v2148_v60 = vrot.slane %v2135_v57, %v7338_v37  ;;  %v2144_v45 = vrot.slane %v2135_v57, %v7344_v42 }
 0x2cf   :  { %v2152_v5 = vrot.slane %v2135_v57, %v7342_v41 }
 0x2d1   :  { %2205 = vmatpush1.bf16.msra.mxu0 %v2078_v11  ;;  %2287 = vmatpush1.bf16.msra.mxu1 %v2080_v54 }
 0x2d2   :  { %2206 = vmatprep.subr.bf16.mxu0 %v2083_v44  ;;  %2288 = vmatprep.subr.bf16.mxu1 %v2085_v53 }
 0x2d5   :  { %2207 = vmatpush1.bf16.msra.mxu0 %v2082_v62  ;;  %2289 = vmatpush1.bf16.msra.mxu1 %v2084_v51 }
 0x2d6   :  { %2208 = vmatprep.subr.bf16.mxu0 %v2087_v63  ;;  %2290 = vmatprep.subr.bf16.mxu1 %v2089_v6 }
 0x2d9   :  { %2209 = vmatpush1.bf16.msra.mxu0 %v2086_v32  ;;  %2291 = vmatpush1.bf16.msra.mxu1 %v2088_v31 }
 0x2da   :  { %2210 = vmatprep.subr.bf16.mxu0 %v2091_v35  ;;  %2292 = vmatprep.subr.bf16.mxu1 %v2093_v61 }
 0x2dd   :  { %2211 = vmatpush1.bf16.msra.mxu0 %v2090_v0  ;;  %2293 = vmatpush1.bf16.msra.mxu1 %v2092_v1 }
 0x2de   :  { %2212 = vmatprep.subr.bf16.mxu0 %v2095_v3  ;;  %2294 = vmatprep.subr.bf16.mxu1 %v2097_v21 }
 0x2e1   :  { %2213 = vmatpush1.bf16.msra.mxu0 %v2094_v25  ;;  %2295 = vmatpush1.bf16.msra.mxu1 %v2096_v4 }
 0x2e2   :  { %2214 = vmatprep.subr.bf16.mxu0 %v2099_v7  ;;  %2296 = vmatprep.subr.bf16.mxu1 %v2101_v8 }
 0x2e5   :  { %2215 = vmatpush1.bf16.msra.mxu0 %v2098_v34  ;;  %2297 = vmatpush1.bf16.msra.mxu1 %v2100_v9 }
 0x2e6   :  { %2216 = vmatprep.subr.bf16.mxu0 %v2103_v55  ;;  %2298 = vmatprep.subr.bf16.mxu1 %v2105_v10 }
 0x2e9   :  { %2217 = vmatpush1.bf16.msra.mxu0 %v2102_v12  ;;  %2299 = vmatpush1.bf16.msra.mxu1 %v2104_v14 }
 0x2ea   :  { %2218 = vmatprep.subr.bf16.mxu0 %v2107_v16  ;;  %2300 = vmatprep.subr.bf16.mxu1 %v2109_v17 }
 0x2ed   :  { %2219 = vmatpush1.bf16.msra.mxu0 %v2106_v18  ;;  %2301 = vmatpush1.bf16.msra.mxu1 %v2108_v19 }
 0x2ee   :  { %2220 = vmatprep.subr.bf16.mxu0 %v2111_v22  ;;  %2302 = vmatprep.subr.bf16.mxu1 %v2113_v23 }
 0x2f1   :  { %2221 = vmatpush1.bf16.msra.mxu0 %v2110_v24  ;;  %2303 = vmatpush1.bf16.msra.mxu1 %v2112_v26 }
 0x2f2   :  { %2222 = vmatprep.subr.bf16.mxu0 %v2115_v27  ;;  %2304 = vmatprep.subr.bf16.mxu1 %v2117_v28 }
 0x2f5   :  { %2223 = vmatpush1.bf16.msra.mxu0 %v2114_v29  ;;  %2305 = vmatpush1.bf16.msra.mxu1 %v2116_v30 }
 0x2f6   :  { %2224 = vmatprep.subr.bf16.mxu0 %v2119_v33  ;;  %2306 = vmatprep.subr.bf16.mxu1 %v2121_v40 }
 0x2f9   :  { %2225 = vmatpush1.bf16.msra.mxu0 %v2118_v46  ;;  %2307 = vmatpush1.bf16.msra.mxu1 %v2120_v39 }
 0x2fa   :  { %2226 = vmatprep.subr.bf16.mxu0 %v2123_v13  ;;  %2308 = vmatprep.subr.bf16.mxu1 %v2125_v20 }
 0x2fd   :  { %2227 = vmatpush1.bf16.msra.mxu0 %v2122_v36  ;;  %2309 = vmatpush1.bf16.msra.mxu1 %v2124_v49 }
 0x2fe   :  { %2228 = vmatprep.subr.bf16.mxu0 %v2127_v48  ;;  %2310 = vmatprep.subr.bf16.mxu1 %v2129_v52 }
 0x301   :  { %2229 = vmatpush1.bf16.msra.mxu0 %v2126_v15  ;;  %2311 = vmatpush1.bf16.msra.mxu1 %v2128_v2 }
 0x304   :  { %2231 = vmatmul.mubr.bf16.vlgmr.msra.gmra.mrb[4].mxu0 %v2132_v56  ;;  %2313 = vmatmul.mubr.bf16.vlgmr.msra.gmra.mrb[4].mxu1 %v2132_v56 }
 0x3d7   :  { %v2232_v11 = vpop.f32.mrb[4].mxu0  ;;  %v2314_v54 = vpop.f32.mrb[4].mxu1 }
 0x3d8   :  { %v7503_v44 = vadd.f32 %v2232_v11, %v2140_v50  ;;  %v7505_v53 = vadd.f32 %v2314_v54, %v2148_v60  ;;  %v2234_v62 = vpop.f32.mrb[5].mxu0  ;;  %v2316_v51 = vpop.f32.mrb[5].mxu1 }
 0x3d9   :  { %v6163_v63 = vadd.f32 %v2234_v62, %v2144_v45  ;;  %v6165_v6 = vadd.f32 %v2316_v51, %v2152_v5  ;;  %v2236_v32 = vpop.f32.mrb[6].mxu0  ;;  %v2318_v31 = vpop.f32.mrb[6].mxu1 }
 0x3da   :  { %v2321_v35 = vmax.f32 %v7503_v44, 0.0  ;;  %v2323_v61 = vmax.f32 %v7505_v53, 0.0  ;;  %v2237_v0 = vpop.f32.mrb[7].mxu0  ;;  %v2319_v1 = vpop.f32.mrb[7].mxu1 }
 0x3db   :  { %v2322_v3 = vmax.f32 %v6163_v63, 0.0  ;;  %v2324_v21 = vmax.f32 %v6165_v6, 0.0 }
 0x3dc   :  { %6304 = dma.done.wait [#allocation4 + $0x5], 20480 }
 0x3dd   :  { %6305 = vsyncadd [#allocation4 + $0x5], 4294946816  ;;  %v2362_v25 = vpack.c.bf16 %v2322_v3, %v2322_v3  ;;  %v2364_v4 = vpack.c.bf16 %v2324_v21, %v2324_v21  ;;  %v2337_v7 = vld [vmem:[#allocation3 + $0x140] sm:$0xff]  ;;  %v2338_v55 = vld [vmem:[#allocation3 + $0x168] sm:$0xff]  ;;  %v2361_v59 = vpack.c.bf16 %v2321_v35, %v2321_v35  ;;  %v2363_v15 = vpack.c.bf16 %v2323_v61, %v2323_v61 }
 0x3de   :  { %v2353_v8 = vld [vmem:[#allocation3 + $0x3c0] sm:$0xff]  ;;  %6001 = vmatprep.subr.bf16.mxu0 %v2337_v7  ;;  %v2354_v10 = vld [vmem:[#allocation3 + $0x3e8] sm:$0xff]  ;;  %v2339_v16 = vld [vmem:[#allocation3 + $0x190] sm:$0xff] }
 0x3df   :  { %2398 = vmatprep.mubr.bf16.mxu0 %v2362_v25  ;;  %2438 = vmatprep.mubr.bf16.mxu1 %v2364_v4  ;;  %v2329_v34 = vld [vmem:[#allocation3] sm:$0xff]  ;;  %v2330_v12 = vld [vmem:[#allocation3 + $0x28] sm:$0xff]  ;;  %v2355_v17 = vld [vmem:[#allocation3 + $0x410] sm:$0xff] }
 0x3e0   :  { %6023 = vmatprep.subr.bf16.mxu1 %v2353_v8  ;;  %v2345_v9 = vld [vmem:[#allocation3 + $0x280] sm:$0xff]  ;;  %6002 = vmatpush3.bf16.msra.mxu0 %v2329_v34  ;;  %v2346_v14 = vld [vmem:[#allocation3 + $0x2a8] sm:$0xff]  ;;  %v2331_v18 = vld [vmem:[#allocation3 + $0x50] sm:$0xff] }
 0x3e1   :  { %6024 = vmatpush3.bf16.msra.mxu1 %v2345_v9  ;;  %6003 = vmatprep.subr.bf16.mxu0 %v2338_v55  ;;  %v2347_v19 = vld [vmem:[#allocation3 + $0x2d0] sm:$0xff]  ;;  %v2340_v22 = vld [vmem:[#allocation3 + $0x1b8] sm:$0xff]  ;;  %v2341_v27 = vld [vmem:[#allocation3 + $0x1e0] sm:$0xff] }
 0x3e2   :  { %6025 = vmatprep.subr.bf16.mxu1 %v2354_v10  ;;  %v2356_v23 = vld [vmem:[#allocation3 + $0x438] sm:$0xff]  ;;  %v2357_v28 = vld [vmem:[#allocation3 + $0x460] sm:$0xff]  ;;  %v2342_v33 = vld [vmem:[#allocation3 + $0x208] sm:$0xff] }
 0x3e3   :  { %v2332_v24 = vld [vmem:[#allocation3 + $0x78] sm:$0xff]  ;;  %v2333_v29 = vld [vmem:[#allocation3 + $0xa0] sm:$0xff]  ;;  %v2358_v40 = vld [vmem:[#allocation3 + $0x488] sm:$0xff] }
 0x3e4   :  { %6004 = vmatpush3.bf16.msra.mxu0 %v2330_v12  ;;  %v2348_v26 = vld [vmem:[#allocation3 + $0x2f8] sm:$0xff]  ;;  %v2349_v30 = vld [vmem:[#allocation3 + $0x320] sm:$0xff]  ;;  %v2334_v43 = vld [vmem:[#allocation3 + $0xc8] sm:$0xff] }
 0x3e5   :  { %6026 = vmatpush3.bf16.msra.mxu1 %v2346_v14  ;;  %6005 = vmatprep.subr.bf16.mxu0 %v2339_v16  ;;  %v2350_v46 = vld [vmem:[#allocation3 + $0x348] sm:$0xff]  ;;  %v2343_v39 = vld [vmem:[#allocation3 + $0x230] sm:$0xff]  ;;  %v2344_v36 = vld [vmem:[#allocation3 + $0x258] sm:$0xff] }
 0x3e6   :  { %6027 = vmatprep.subr.bf16.mxu1 %v2355_v17  ;;  %v2359_v13 = vld [vmem:[#allocation3 + $0x4b0] sm:$0xff]  ;;  %v2360_v49 = vld [vmem:[#allocation3 + $0x4d8] sm:$0xff]  ;;  %v2365_v57 = vld [vmem:[#allocation7 + $0x2] ss:$0 sm:$0xff] }
 0x3e7   :  { %v2335_v20 = vld [vmem:[#allocation3 + $0xf0] sm:$0xff]  ;;  %v2336_v48 = vld [vmem:[#allocation3 + $0x118] sm:$0xff] }
 0x3e8   :  { %6006 = vmatpush3.bf16.msra.mxu0 %v2331_v18  ;;  %v2351_v47 = vld [vmem:[#allocation3 + $0x370] sm:$0xff]  ;;  %v2352_v52 = vld [vmem:[#allocation3 + $0x398] sm:$0xff] }
 0x3e9   :  { %6028 = vmatpush3.bf16.msra.mxu1 %v2347_v19  ;;  %6007 = vmatprep.subr.bf16.mxu0 %v2340_v22 }
 0x3ea   :  { %6029 = vmatprep.subr.bf16.mxu1 %v2356_v23 }
 0x3ec   :  { %6008 = vmatpush3.bf16.msra.mxu0 %v2332_v24 }
 0x3ed   :  { %6030 = vmatpush3.bf16.msra.mxu1 %v2348_v26  ;;  %6009 = vmatprep.subr.bf16.mxu0 %v2341_v27 }
 0x3ee   :  { %6031 = vmatprep.subr.bf16.mxu1 %v2357_v28 }
 0x3f0   :  { %6010 = vmatpush3.bf16.msra.mxu0 %v2333_v29 }
 0x3f1   :  { %6032 = vmatpush3.bf16.msra.mxu1 %v2349_v30  ;;  %6011 = vmatprep.subr.bf16.mxu0 %v2342_v33 }
 0x3f2   :  { %6033 = vmatprep.subr.bf16.mxu1 %v2358_v40 }
 0x3f4   :  { %6012 = vmatpush3.bf16.msra.mxu0 %v2334_v43 }
 0x3f5   :  { %6034 = vmatpush3.bf16.msra.mxu1 %v2350_v46  ;;  %6013 = vmatprep.subr.bf16.mxu0 %v2343_v39 }
 0x3f6   :  { %6035 = vmatprep.subr.bf16.mxu1 %v2359_v13 }
 0x3f8   :  { %6014 = vmatpush3.bf16.msra.mxu0 %v2335_v20 }
 0x3f9   :  { %6036 = vmatpush3.bf16.msra.mxu1 %v2351_v47  ;;  %6015 = vmatprep.subr.bf16.mxu0 %v2344_v36 }
 0x3fa   :  { %6037 = vmatprep.subr.bf16.mxu1 %v2360_v49 }
 0x3fc   :  { %6016 = vmatpush3.bf16.msra.mxu0 %v2336_v48 }
 0x3fd   :  { %6038 = vmatpush3.bf16.msra.mxu1 %v2352_v52 }
 0x3ff   :  { %2399 = vmatmul.mubr.bf16.vlgmr.msra.gmra.mrb[8].mxu0 %v2361_v59 }
 0x400   :  { %2439 = vmatmul.mubr.bf16.vlgmr.msra.gmra.mrb[8].mxu1 %v2363_v15 }
 0x4d2   :  { %v6017_v2 = vpop.f32.mrb[8].mxu0 }
 0x4d3   :  { %v6039_v56 = vpop.f32.mrb[8].mxu1  ;;  %v6018_v50 = vpop.f32.mrb[9].mxu0 }
 0x4d4   :  { %v6040_v60 = vpop.f32.mrb[9].mxu1  ;;  %v6019_v45 = vadd.f32 %v6018_v50, %v6017_v2  ;;  %v6020_v11 = vpop.f32.mrb[10].mxu0 }
 0x4d5   :  { %v6041_v5 = vadd.f32 %v6040_v60, %v6039_v56  ;;  %v6042_v54 = vpop.f32.mrb[10].mxu1  ;;  %v6021_v44 = vpop.f32.mrb[11].mxu0 }
 0x4d6   :  { %v6043_v62 = vpop.f32.mrb[11].mxu1  ;;  %v2401_v51 = vadd.f32 %v6019_v45, %v2365_v57 }
 0x4d8   :  { %v2441_v63 = vadd.f32 %v6041_v5, %v2401_v51 }
 0x4d9   :  { %6306 = dma.done.wait [#allocation4 + $0x1], 17408 }
 0x4da   :  { %6307 = vsyncadd [#allocation4 + $0x1], 4294949888  ;;  %v6339_v53 = vmov 0   ;;  %v2451_v6 = vld [vmem:[#allocation2 + $0x588] sm:$0xff]  ;;  %v2450_v32 = vld [vmem:[#allocation2 + $0x580] sm:$0xff]  ;;  %v2458_v21 = vpack.c.bf16 %v2441_v63, %v2441_v63  ;;  %vm2482_vm9 = vcmask 261120  }
 0x4db   :  { %2518 = vmatprep.mubr.bf16.mxu1 %v6339_v53  ;;  %v2455_v31 = vld [vmem:[#allocation2 + $0x5a8] sm:$0xff]  ;;  %2486 = vmatprep.subr.bf16.mxu1 %v2451_v6  ;;  %v2454_v61 = vld [vmem:[#allocation2 + $0x5a0] sm:$0xff]  ;;  %v2453_v1 = vld [vmem:[#allocation2 + $0x598] sm:$0xff]  ;;  %s6340_s2 = smov 96  }
 0x4dc   :  { %2487 = vmatpush1.bf16.msra.mxu1 %v2450_v32  ;;  %v2573_v35 = vld [vmem:[#allocation2 + $0x5c8] sm:$0xff]  ;;  %v2572_v0 = vld [vmem:[#allocation2 + $0x5c0] sm:$0xff]  ;;  %v2452_v7 = vld [vmem:[#allocation2 + $0x590] sm:$0xff] }
 0x4dd   :  { %2488 = vmatprep.subr.bf16.mxu1 %v2455_v31  ;;  %2727 = vmatprep.subr.bf16.mxu0 %v2573_v35  ;;  %v2577_v3 = vld [vmem:[#allocation2 + $0x5e8] sm:$0xff]  ;;  %v2576_v25 = vld [vmem:[#allocation2 + $0x5e0] sm:$0xff]  ;;  %v2457_v8 = vld [vmem:[#allocation2 + $0x5b8] sm:$0xff] }
 0x4de   :  { %2728 = vmatpush1.bf16.msra.mxu0 %v2572_v0  ;;  %v2581_v4 = vld [vmem:[#allocation2 + $0x608] sm:$0xff]  ;;  %v2580_v34 = vld [vmem:[#allocation2 + $0x600] sm:$0xff]  ;;  %v2456_v55 = vld [vmem:[#allocation2 + $0x5b0] sm:$0xff] }
 0x4df   :  { %2729 = vmatprep.subr.bf16.mxu0 %v2577_v3  ;;  %v2585_v9 = vld [vmem:[#allocation2 + $0x628] sm:$0xff]  ;;  %v2575_v10 = vld [vmem:[#allocation2 + $0x5d8] sm:$0xff]  ;;  %v2584_v12 = vld [vmem:[#allocation2 + $0x620] sm:$0xff] }
 0x4e0   :  { %2489 = vmatpush1.bf16.msra.mxu1 %v2454_v61  ;;  %v2589_v14 = vld [vmem:[#allocation2 + $0x648] sm:$0xff]  ;;  %v2574_v16 = vld [vmem:[#allocation2 + $0x5d0] sm:$0xff]  ;;  %v2579_v17 = vld [vmem:[#allocation2 + $0x5f8] sm:$0xff] }
 0x4e1   :  { %2527 = vmatprep.subr.bf16.mxu1 %v2453_v1  ;;  %v2588_v18 = vld [vmem:[#allocation2 + $0x640] sm:$0xff]  ;;  %v2593_v19 = vld [vmem:[#allocation2 + $0x668] sm:$0xff]  ;;  %v2578_v22 = vld [vmem:[#allocation2 + $0x5f0] sm:$0xff] }
 0x4e2   :  { %2730 = vmatpush1.bf16.msra.mxu0 %v2576_v25  ;;  %v2583_v23 = vld [vmem:[#allocation2 + $0x618] sm:$0xff]  ;;  %v2592_v24 = vld [vmem:[#allocation2 + $0x660] sm:$0xff]  ;;  %v2597_v26 = vld [vmem:[#allocation2 + $0x688] sm:$0xff] }
 0x4e3   :  { %5985 = vmatmul.mubr.msk.bf16.vlgmr.msra.gmra.mrb[12].mxu1 %vm2482_vm9, %v2458_v21  ;;  %2731 = vmatprep.subr.bf16.mxu0 %v2581_v4  ;;  %v2582_v27 = vld [vmem:[#allocation2 + $0x610] sm:$0xff]  ;;  %v2587_v28 = vld [vmem:[#allocation2 + $0x638] sm:$0xff]  ;;  %v2596_v29 = vld [vmem:[#allocation2 + $0x680] sm:$0xff] }
 0x4e4   :  { %2528 = vmatpush1.bf16.msra.mxu1 %v2452_v7  ;;  %2559 = vmatprep.mubr.bf16.mxu1 %v6339_v53  ;;  %v2601_v30 = vld [vmem:[#allocation2 + $0x6a8] sm:$0xff]  ;;  %v2586_v33 = vld [vmem:[#allocation2 + $0x630] sm:$0xff]  ;;  %v2591_v40 = vld [vmem:[#allocation2 + $0x658] sm:$0xff] }
 0x4e5   :  { %2529 = vmatprep.subr.bf16.mxu1 %v2457_v8  ;;  %v2600_v43 = vld [vmem:[#allocation2 + $0x6a0] sm:$0xff]  ;;  %v2605_v46 = vld [vmem:[#allocation2 + $0x6c8] sm:$0xff]  ;;  %v2590_v39 = vld [vmem:[#allocation2 + $0x650] sm:$0xff] }
 0x4e6   :  { %2732 = vmatpush1.bf16.msra.mxu0 %v2580_v34  ;;  %v2595_v13 = vld [vmem:[#allocation2 + $0x678] sm:$0xff]  ;;  %v2604_v20 = vld [vmem:[#allocation2 + $0x6c0] sm:$0xff]  ;;  %v2609_v47 = vld [vmem:[#allocation2 + $0x6e8] sm:$0xff] }
 0x4e7   :  { %2733 = vmatprep.subr.bf16.mxu0 %v2585_v9  ;;  %v2594_v36 = vld [vmem:[#allocation2 + $0x670] sm:$0xff]  ;;  %v2599_v49 = vld [vmem:[#allocation2 + $0x698] sm:$0xff]  ;;  %v2608_v48 = vld [vmem:[#allocation2 + $0x6e0] sm:$0xff] }
 0x4e8   :  { %2530 = vmatpush1.bf16.msra.mxu1 %v2456_v55  ;;  %v2613_v52 = vld [vmem:[#allocation2 + $0x708] sm:$0xff]  ;;  %v2598_v59 = vld [vmem:[#allocation2 + $0x690] sm:$0xff]  ;;  %v2603_v15 = vld [vmem:[#allocation2 + $0x6b8] sm:$0xff] }
 0x4e9   :  { %2809 = vmatprep.subr.bf16.mxu1 %v2575_v10  ;;  %v2612_v2 = vld [vmem:[#allocation2 + $0x700] sm:$0xff]  ;;  %v2617_v56 = vld [vmem:[#allocation2 + $0x728] sm:$0xff]  ;;  %v2602_v57 = vld [vmem:[#allocation2 + $0x6b0] sm:$0xff] }
 0x4ea   :  { %2734 = vmatpush1.bf16.msra.mxu0 %v2584_v12  ;;  %v2607_v50 = vld [vmem:[#allocation2 + $0x6d8] sm:$0xff]  ;;  %v2616_v60 = vld [vmem:[#allocation2 + $0x720] sm:$0xff]  ;;  %v2621_v45 = vld [vmem:[#allocation2 + $0x748] sm:$0xff] }
 0x4eb   :  { %5986 = vmatmul.mubr.msk.bf16.vlgmr.msra.gmra.mrb[16].mxu1 %vm2482_vm9, %v2458_v21  ;;  %2735 = vmatprep.subr.bf16.mxu0 %v2589_v14  ;;  %v2606_v5 = vld [vmem:[#allocation2 + $0x6d0] sm:$0xff]  ;;  %v2611_v11 = vld [vmem:[#allocation2 + $0x6f8] sm:$0xff]  ;;  %v2620_v54 = vld [vmem:[#allocation2 + $0x740] sm:$0xff] }
 0x4ec   :  { %2810 = vmatpush1.bf16.msra.mxu1 %v2574_v16  ;;  %v2625_v44 = vld [vmem:[#allocation2 + $0x768] sm:$0xff]  ;;  %v2610_v62 = vld [vmem:[#allocation2 + $0x6f0] sm:$0xff]  ;;  %v2615_v51 = vld [vmem:[#allocation2 + $0x718] sm:$0xff] }
 0x4ed   :  { %2811 = vmatprep.subr.bf16.mxu1 %v2579_v17  ;;  %v2624_v63 = vld [vmem:[#allocation2 + $0x760] sm:$0xff]  ;;  %v2614_v6 = vld [vmem:[#allocation2 + $0x710] sm:$0xff]  ;;  %v2619_v32 = vld [vmem:[#allocation2 + $0x738] sm:$0xff] }
 0x4ee   :  { %2736 = vmatpush1.bf16.msra.mxu0 %v2588_v18  ;;  %v2618_v31 = vld [vmem:[#allocation2 + $0x730] sm:$0xff]  ;;  %v2623_v35 = vld [vmem:[#allocation2 + $0x758] sm:$0xff]  ;;  %v2629_v3 = vld [vmem:[#allocation2 + $0x788] sm:$0xff] }
 0x4ef   :  { %2737 = vmatprep.subr.bf16.mxu0 %v2593_v19  ;;  %v2622_v61 = vld [vmem:[#allocation2 + $0x750] sm:$0xff]  ;;  %v2627_v0 = vld [vmem:[#allocation2 + $0x778] sm:$0xff]  ;;  %v2628_v25 = vld [vmem:[#allocation2 + $0x780] sm:$0xff] }
 0x4f0   :  { %2812 = vmatpush1.bf16.msra.mxu1 %v2578_v22  ;;  %v2626_v1 = vld [vmem:[#allocation2 + $0x770] sm:$0xff]  ;;  %v2631_v21 = vld [vmem:[#allocation2 + $0x798] sm:$0xff]  ;;  %v2633_v7 = vld [vmem:[#allocation2 + $0x7a8] sm:$0xff] }
 0x4f1   :  { %2813 = vmatprep.subr.bf16.mxu1 %v2583_v23  ;;  %v2630_v4 = vld [vmem:[#allocation2 + $0x790] sm:$0xff]  ;;  %v2635_v8 = vld [vmem:[#allocation2 + $0x7b8] sm:$0xff]  ;;  %v2632_v34 = vld [vmem:[#allocation2 + $0x7a0] sm:$0xff] }
 0x4f2   :  { %2738 = vmatpush1.bf16.msra.mxu0 %v2592_v24  ;;  %v2634_v9 = vld [vmem:[#allocation2 + $0x7b0] sm:$0xff]  ;;  %v2637_v55 = vld [vmem:[#allocation2 + $0x7c8] sm:$0xff]  ;;  %v2639_v10 = vld [vmem:[#allocation2 + $0x7d8] sm:$0xff] }
 0x4f3   :  { %2739 = vmatprep.subr.bf16.mxu0 %v2597_v26  ;;  %v2903_v12 = vld [vmem:[#allocation3 + $0x140] sm:$0xff]  ;;  %v2904_v18 = vld [vmem:[#allocation3 + $0x168] sm:$0xff]  ;;  %v2905_v24 = vld [vmem:[#allocation3 + $0x190] sm:$0xff] }
 0x4f4   :  { %2814 = vmatpush1.bf16.msra.mxu1 %v2582_v27  ;;  %v2919_v14 = vld [vmem:[#allocation3 + $0x3c0] sm:$0xff]  ;;  %2980 = vrot.lane.b32.xlu0 %v2903_v12, %s6340_s2  ;;  %v2896_v19 = vld [vmem:[#allocation3 + $0x28] sm:$0xff]  ;;  %v2897_v26 = vld [vmem:[#allocation3 + $0x50] sm:$0xff] }
 0x4f5   :  { %2815 = vmatprep.subr.bf16.mxu1 %v2587_v28  ;;  %3012 = vrot.lane.b32.xlu1 %v2919_v14, %s6340_s2  ;;  %v2895_v16 = vld [vmem:[#allocation3] sm:$0xff]  ;;  %v2920_v22 = vld [vmem:[#allocation3 + $0x3e8] sm:$0xff]  ;;  %v2921_v27 = vld [vmem:[#allocation3 + $0x410] sm:$0xff] }
 0x4f6   :  { %2740 = vmatpush1.bf16.msra.mxu0 %v2596_v29  ;;  %v2911_v17 = vld [vmem:[#allocation3 + $0x280] sm:$0xff]  ;;  %v2912_v23 = vld [vmem:[#allocation3 + $0x2a8] sm:$0xff]  ;;  %v2913_v28 = vld [vmem:[#allocation3 + $0x2d0] sm:$0xff] }
 0x4f7   :  { %2741 = vmatprep.subr.bf16.mxu0 %v2601_v30  ;;  %v2906_v29 = vld [vmem:[#allocation3 + $0x1b8] sm:$0xff] }
 0x4f8   :  { %2816 = vmatpush1.bf16.msra.mxu1 %v2586_v33  ;;  %2964 = vrot.lane.b32.xlu0 %v2895_v16, %s6340_s2  ;;  %v2898_v30 = vld [vmem:[#allocation3 + $0x78] sm:$0xff] }
 0x4f9   :  { %2817 = vmatprep.subr.bf16.mxu1 %v2591_v40  ;;  %2996 = vrot.lane.b32.xlu1 %v2911_v17, %s6340_s2  ;;  %v2922_v33 = vld [vmem:[#allocation3 + $0x438] sm:$0xff]  ;;  %v2644_v17 = vld [vmem:[#allocation2 + $0x800] sm:$0xff] }
 0x4fa   :  { %2742 = vmatpush1.bf16.msra.mxu0 %v2600_v43  ;;  %v2914_v40 = vld [vmem:[#allocation3 + $0x2f8] sm:$0xff]  ;;  %v2907_v43 = vld [vmem:[#allocation3 + $0x1e0] sm:$0xff] }
 0x4fb   :  { %2743 = vmatprep.subr.bf16.mxu0 %v2605_v46  ;;  %v2899_v46 = vld [vmem:[#allocation3 + $0xa0] sm:$0xff]  ;;  %v2647_v12 = vld [vmem:[#allocation2 + $0x818] sm:$0xff] }
 0x4fc   :  { %2818 = vmatpush1.bf16.msra.mxu1 %v2590_v39  ;;  %2982 = vrot.lane.b32.xlu0 %v2904_v18, %s6340_s2  ;;  %v2923_v39 = vld [vmem:[#allocation3 + $0x460] sm:$0xff]  ;;  %v2646_v18 = vld [vmem:[#allocation2 + $0x810] sm:$0xff] }
 0x4fd   :  { %2819 = vmatprep.subr.bf16.mxu1 %v2595_v13  ;;  %2966 = vrot.lane.b32.xlu1 %v2896_v19, %s6340_s2  ;;  %v2915_v13 = vld [vmem:[#allocation3 + $0x320] sm:$0xff]  ;;  %v2649_v19 = vld [vmem:[#allocation2 + $0x828] sm:$0xff] }
 0x4fe   :  { %2744 = vmatpush1.bf16.msra.mxu0 %v2604_v20  ;;  %v2908_v20 = vld [vmem:[#allocation3 + $0x208] sm:$0xff] }
 0x4ff   :  { %2745 = vmatprep.subr.bf16.mxu0 %v2609_v47  ;;  %v2900_v47 = vld [vmem:[#allocation3 + $0xc8] sm:$0xff] }
 0x500   :  { %2820 = vmatpush1.bf16.msra.mxu1 %v2594_v36  ;;  %3014 = vrot.lane.b32.xlu0 %v2920_v22, %s6340_s2  ;;  %v2924_v36 = vld [vmem:[#allocation3 + $0x488] sm:$0xff]  ;;  %v2651_v22 = vld [vmem:[#allocation2 + $0x838] sm:$0xff] }
 0x501   :  { %2821 = vmatprep.subr.bf16.mxu1 %v2599_v49  ;;  %2998 = vrot.lane.b32.xlu1 %v2912_v23, %s6340_s2  ;;  %v2916_v49 = vld [vmem:[#allocation3 + $0x348] sm:$0xff]  ;;  %v2648_v23 = vld [vmem:[#allocation2 + $0x820] sm:$0xff] }
 0x502   :  { %2746 = vmatpush1.bf16.msra.mxu0 %v2608_v48  ;;  %v2909_v48 = vld [vmem:[#allocation3 + $0x230] sm:$0xff] }
 0x503   :  { %2747 = vmatprep.subr.bf16.mxu0 %v2613_v52  ;;  %v2901_v52 = vld [vmem:[#allocation3 + $0xf0] sm:$0xff] }
 0x504   :  { %2822 = vmatpush1.bf16.msra.mxu1 %v2598_v59  ;;  %2984 = vrot.lane.b32.xlu0 %v2905_v24, %s6340_s2  ;;  %v7543_v59 = vld [vmem:[#allocation7 + $0x3] ss:$8 sm:$0xf] }
 0x505   :  { %2823 = vmatprep.subr.bf16.mxu1 %v2603_v15  ;;  %2968 = vrot.lane.b32.xlu1 %v2897_v26, %s6340_s2  ;;  %v2925_v15 = vld [vmem:[#allocation3 + $0x4b0] sm:$0xff]  ;;  %v2653_v26 = vld [vmem:[#allocation2 + $0x848] sm:$0xff] }
 0x506   :  { %2748 = vmatpush1.bf16.msra.mxu0 %v2612_v2  ;;  %v2917_v2 = vld [vmem:[#allocation3 + $0x370] sm:$0xff] }
 0x507   :  { %2749 = vmatprep.subr.bf16.mxu0 %v2617_v56  ;;  %v2465_v56 = vrot.slane %v7543_v59, %v7340_v38  ;;  %v2650_v24 = vld [vmem:[#allocation2 + $0x830] sm:$0xff] }
 0x508   :  { %2824 = vmatpush1.bf16.msra.mxu1 %v2602_v57  ;;  %3016 = vrot.lane.b32.xlu0 %v2921_v27, %s6340_s2  ;;  %v2469_v57 = vrot.slane %v7543_v59, %v7344_v42  ;;  %v2655_v27 = vld [vmem:[#allocation2 + $0x858] sm:$0xff] }
 0x509   :  { %2825 = vmatprep.subr.bf16.mxu1 %v2607_v50  ;;  %3000 = vrot.lane.b32.xlu1 %v2913_v28, %s6340_s2  ;;  %v2910_v50 = vld [vmem:[#allocation3 + $0x258] sm:$0xff]  ;;  %v2652_v28 = vld [vmem:[#allocation2 + $0x840] sm:$0xff] }
 0x50a   :  { %2750 = vmatpush1.bf16.msra.mxu0 %v2616_v60  ;;  %v2902_v60 = vld [vmem:[#allocation3 + $0x118] sm:$0xff] }
 0x50b   :  { %2751 = vmatprep.subr.bf16.mxu0 %v2621_v45 }
 0x50c   :  { %2826 = vmatpush1.bf16.msra.mxu1 %v2606_v5  ;;  %2986 = vrot.lane.b32.xlu0 %v2906_v29, %s6340_s2  ;;  %v2654_v29 = vld [vmem:[#allocation2 + $0x850] sm:$0xff] }
 0x50d   :  { %2827 = vmatprep.subr.bf16.mxu1 %v2611_v11  ;;  %2970 = vrot.lane.b32.xlu1 %v2898_v30, %s6340_s2  ;;  %v2657_v30 = vld [vmem:[#allocation2 + $0x868] sm:$0xff] }
 0x50e   :  { %2752 = vmatpush1.bf16.msra.mxu0 %v2620_v54 }
 0x50f   :  { %2753 = vmatprep.subr.bf16.mxu0 %v2625_v44 }
 0x510   :  { %2828 = vmatpush1.bf16.msra.mxu1 %v2610_v62  ;;  %3018 = vrot.lane.b32.xlu0 %v2922_v33, %s6340_s2  ;;  %v2659_v33 = vld [vmem:[#allocation2 + $0x878] sm:$0xff] }
 0x511   :  { %2829 = vmatprep.subr.bf16.mxu1 %v2615_v51  ;;  %3002 = vrot.lane.b32.xlu1 %v2914_v40, %s6340_s2  ;;  %v2656_v40 = vld [vmem:[#allocation2 + $0x860] sm:$0xff] }
 0x512   :  { %2754 = vmatpush1.bf16.msra.mxu0 %v2624_v63  ;;  %v2926_v63 = vld [vmem:[#allocation3 + $0x4d8] sm:$0xff] }
 0x513   :  { %2755 = vmatprep.subr.bf16.mxu0 %v2629_v3  ;;  %v2641_v3 = vld [vmem:[#allocation2 + $0x7e8] sm:$0xff] }
 0x514   :  { %2830 = vmatpush1.bf16.msra.mxu1 %v2614_v6  ;;  %2988 = vrot.lane.b32.xlu0 %v2907_v43, %s6340_s2  ;;  %v2918_v6 = vld [vmem:[#allocation3 + $0x398] sm:$0xff]  ;;  %v2658_v43 = vld [vmem:[#allocation2 + $0x870] sm:$0xff] }
 0x515   :  { %2831 = vmatprep.subr.bf16.mxu1 %v2619_v32  ;;  %2972 = vrot.lane.b32.xlu1 %v2899_v46, %s6340_s2  ;;  %v2661_v46 = vld [vmem:[#allocation2 + $0x888] sm:$0xff] }
 0x516   :  { %2756 = vmatpush1.bf16.msra.mxu0 %v2628_v25 }
 0x517   :  { %2757 = vmatprep.subr.bf16.mxu0 %v2633_v7 }
 0x518   :  { %2832 = vmatpush1.bf16.msra.mxu1 %v2618_v31  ;;  %3020 = vrot.lane.b32.xlu0 %v2923_v39, %s6340_s2  ;;  %v2663_v39 = vld [vmem:[#allocation2 + $0x898] sm:$0xff] }
 0x519   :  { %2833 = vmatprep.subr.bf16.mxu1 %v2623_v35  ;;  %3004 = vrot.lane.b32.xlu1 %v2915_v13, %s6340_s2  ;;  %v2477_v35 = vrot.slane %v7543_v59, %v7342_v41  ;;  %v2660_v13 = vld [vmem:[#allocation2 + $0x880] sm:$0xff] }
 0x51a   :  { %2758 = vmatpush1.bf16.msra.mxu0 %v2632_v34  ;;  %v2640_v34 = vld [vmem:[#allocation2 + $0x7e0] sm:$0xff] }
 0x51b   :  { %2768 = vmatprep.subr.bf16.mxu0 %v2637_v55 }
 0x51c   :  { %2834 = vmatpush1.bf16.msra.mxu1 %v2622_v61  ;;  %2990 = vrot.lane.b32.xlu0 %v2908_v20, %s6340_s2  ;;  %v2662_v20 = vld [vmem:[#allocation2 + $0x890] sm:$0xff] }
 0x51d   :  { %2835 = vmatprep.subr.bf16.mxu1 %v2627_v0  ;;  %2974 = vrot.lane.b32.xlu1 %v2900_v47, %s6340_s2  ;;  %v2636_v0 = vld [vmem:[#allocation2 + $0x7c0] sm:$0xff]  ;;  %v2665_v47 = vld [vmem:[#allocation2 + $0x8a8] sm:$0xff] }
 0x520   :  { %2836 = vmatpush1.bf16.msra.mxu1 %v2626_v1  ;;  %3022 = vrot.lane.b32.xlu0 %v2924_v36, %s6340_s2  ;;  %v2638_v1 = vld [vmem:[#allocation2 + $0x7d0] sm:$0xff]  ;;  %v2667_v36 = vld [vmem:[#allocation2 + $0x8b8] sm:$0xff] }
 0x521   :  { %2837 = vmatprep.subr.bf16.mxu1 %v2631_v21  ;;  %3006 = vrot.lane.b32.xlu1 %v2916_v49, %s6340_s2  ;;  %v2643_v21 = vld [vmem:[#allocation2 + $0x7f8] sm:$0xff]  ;;  %v2664_v49 = vld [vmem:[#allocation2 + $0x8a0] sm:$0xff] }
 0x524   :  { %2838 = vmatpush1.bf16.msra.mxu1 %v2630_v4  ;;  %2992 = vrot.lane.b32.xlu0 %v2909_v48, %s6340_s2  ;;  %v2666_v48 = vld [vmem:[#allocation2 + $0x8b0] sm:$0xff] }
 0x525   :  { %2839 = vmatprep.subr.bf16.mxu1 %v2635_v8  ;;  %2976 = vrot.lane.b32.xlu1 %v2901_v52, %s6340_s2  ;;  %v2669_v52 = vld [vmem:[#allocation2 + $0x8c8] sm:$0xff] }
 0x528   :  { %2840 = vmatpush1.bf16.msra.mxu1 %v2634_v9  ;;  %3024 = vrot.lane.b32.xlu0 %v2925_v15, %s6340_s2  ;;  %v2642_v9 = vld [vmem:[#allocation2 + $0x7f0] sm:$0xff]  ;;  %v2671_v15 = vld [vmem:[#allocation2 + $0x8d8] sm:$0xff] }
 0x529   :  { %2850 = vmatprep.subr.bf16.mxu1 %v2639_v10  ;;  %3008 = vrot.lane.b32.xlu1 %v2917_v2, %s6340_s2  ;;  %v2645_v10 = vld [vmem:[#allocation2 + $0x808] sm:$0xff]  ;;  %v2668_v2 = vld [vmem:[#allocation2 + $0x8c0] sm:$0xff] }
 0x52c   :  { %2994 = vrot.lane.b32.xlu0 %v2910_v50, %s6340_s2  ;;  %v2675_v50 = vld [vmem:[#allocation2 + $0x8f8] sm:$0xff] }
 0x52d   :  { %2978 = vrot.lane.b32.xlu1 %v2902_v60, %s6340_s2  ;;  %v2672_v60 = vld [vmem:[#allocation2 + $0x8e0] sm:$0xff] }
 0x530   :  { %3026 = vrot.lane.b32.xlu0 %v2926_v63, %s6340_s2  ;;  %v2680_v63 = vld [vmem:[#allocation2 + $0x920] sm:$0xff] }
 0x531   :  { %3010 = vrot.lane.b32.xlu1 %v2918_v6, %s6340_s2  ;;  %v2682_v6 = vld [vmem:[#allocation2 + $0x930] sm:$0xff] }
 0x5b6   :  { %v2520_v45 = vpop.f32.mrb[12].mxu1 }
 0x5b7   :  { %v2521_v5 = vadd.f32 %v2520_v45, %v2465_v56  ;;  %v2522_v11 = vpop.f32.mrb[13].mxu1  ;;  %v2670_v56 = vld [vmem:[#allocation2 + $0x8d0] sm:$0xff] }
 0x5b8   :  { %v2523_v54 = vadd.f32 %v2522_v11, %v2469_v57  ;;  %v2524_v44 = vpop.f32.mrb[14].mxu1  ;;  %v2673_v57 = vld [vmem:[#allocation2 + $0x8e8] sm:$0xff]  ;;  %v2674_v45 = vld [vmem:[#allocation2 + $0x8f0] sm:$0xff]  ;;  %v2679_v11 = vld [vmem:[#allocation2 + $0x918] sm:$0xff] }
 0x5b9   :  { %v2568_v62 = vmax.f32 %v2521_v5, 0.0  ;;  %v2525_v51 = vpop.f32.mrb[15].mxu1  ;;  %v2677_v5 = vld [vmem:[#allocation2 + $0x908] sm:$0xff]  ;;  %v2678_v44 = vld [vmem:[#allocation2 + $0x910] sm:$0xff] }
 0x5ba   :  { %v2569_v32 = vmax.f32 %v2523_v54, 0.0  ;;  %v2676_v54 = vld [vmem:[#allocation2 + $0x900] sm:$0xff]  ;;  %v2683_v51 = vld [vmem:[#allocation2 + $0x938] sm:$0xff] }
 0x5bb   :  { %v2700_v61 = vpack.c.bf16 %v2568_v62, %v2568_v62  ;;  %v2681_v62 = vld [vmem:[#allocation2 + $0x928] sm:$0xff] }
 0x5bc   :  { %v2701_v31 = vpack.c.bf16 %v2569_v32, %v2569_v32  ;;  %v2685_v32 = vld [vmem:[#allocation2 + $0x948] sm:$0xff] }
 0x5be   :  { %2759 = vmatprep.mubr.bf16.mxu0 %v2701_v31  ;;  %2841 = vmatprep.mubr.bf16.mxu1 %v2701_v31  ;;  %v7559_v25 = vpop.f32.mrb[16].mxu1  ;;  %v2687_v31 = vld [vmem:[#allocation2 + $0x958] sm:$0xff] }
 0x5bf   :  { %2760 = vmatmul.mubr.bf16.vlgmr.msra.gmra.mrb[12].mxu0 %v2700_v61  ;;  %2842 = vmatmul.mubr.bf16.vlgmr.msra.gmra.mrb[20].mxu1 %v2700_v61  ;;  %v2563_v4 = vpop.f32.mrb[17].mxu1  ;;  %v2686_v61 = vld [vmem:[#allocation2 + $0x950] sm:$0xff] }
 0x5c0   :  { %2769 = vmatpush1.bf16.msra.mxu0 %v2636_v0  ;;  %2851 = vmatpush1.bf16.msra.mxu1 %v2638_v1  ;;  %v2564_v7 = vadd.f32 %v2563_v4, %v2477_v35  ;;  %v2565_v8 = vpop.f32.mrb[18].mxu1  ;;  %v2684_v35 = vld [vmem:[#allocation2 + $0x940] sm:$0xff]  ;;  %v2689_v0 = vld [vmem:[#allocation2 + $0x968] sm:$0xff]  ;;  %v2691_v1 = vld [vmem:[#allocation2 + $0x978] sm:$0xff] }
 0x5c1   :  { %2770 = vmatprep.subr.bf16.mxu0 %v2641_v3  ;;  %2852 = vmatprep.subr.bf16.mxu1 %v2643_v21  ;;  %v2566_v55 = vpop.f32.mrb[19].mxu1  ;;  %v2473_v3 = vrot.slane %v7543_v59, %v7338_v37  ;;  %v2688_v21 = vld [vmem:[#allocation2 + $0x960] sm:$0xff]  ;;  %v2690_v4 = vld [vmem:[#allocation2 + $0x970] sm:$0xff]  ;;  %v2695_v8 = vld [vmem:[#allocation2 + $0x998] sm:$0xff] }
 0x5c2   :  { %v2571_v14 = vmax.f32 %v2564_v7, 0.0  ;;  %v2693_v7 = vld [vmem:[#allocation2 + $0x988] sm:$0xff] }
 0x5c3   :  { %v2562_v55 = vadd.f32 %v7559_v25, %v2473_v3 }
 0x5c4   :  { %2771 = vmatpush1.bf16.msra.mxu0 %v2640_v34  ;;  %2853 = vmatpush1.bf16.msra.mxu1 %v2642_v9  ;;  %v2703_v16 = vpack.c.bf16 %v2571_v14, %v2571_v14  ;;  %v2981_v34 = vpop.permute.xlu0 %2980  ;;  %v3013_v9 = vpop.permute.xlu1 %3012  ;;  %v2697_v14 = vld [vmem:[#allocation2 + $0x9a8] sm:$0xff] }
 0x5c5   :  { %2772 = vmatprep.subr.bf16.mxu0 %v2645_v10  ;;  %2854 = vmatprep.subr.bf16.mxu1 %v2647_v12  ;;  %v2692_v10 = vld [vmem:[#allocation2 + $0x980] sm:$0xff]  ;;  %v2694_v12 = vld [vmem:[#allocation2 + $0x990] sm:$0xff] }
 0x5c6   :  { %2800 = vmatprep.mubr.bf16.mxu0 %v2703_v16  ;;  %2882 = vmatprep.mubr.bf16.mxu1 %v2703_v16  ;;  %v2699_v16 = vld [vmem:[#allocation2 + $0x9b8] sm:$0xff] }
 0x5c8   :  { %2773 = vmatpush1.bf16.msra.mxu0 %v2644_v17  ;;  %2855 = vmatpush1.bf16.msra.mxu1 %v2646_v18  ;;  %v2965_v17 = vpop.permute.xlu0 %2964  ;;  %v2997_v59 = vpop.permute.xlu1 %2996  ;;  %v2570_v18 = vmax.f32 %v2562_v55, 0.0 }
 0x5c9   :  { %2774 = vmatprep.subr.bf16.mxu0 %v2649_v19  ;;  %2856 = vmatprep.subr.bf16.mxu1 %v2651_v22  ;;  %v2696_v19 = vld [vmem:[#allocation2 + $0x9a0] sm:$0xff]  ;;  %v2698_v22 = vld [vmem:[#allocation2 + $0x9b0] sm:$0xff] }
 0x5ca   :  { %v2702_v25 = vpack.c.bf16 %v2570_v18, %v2570_v18 }
 0x5cc   :  { %2775 = vmatpush1.bf16.msra.mxu0 %v2648_v23  ;;  %2857 = vmatpush1.bf16.msra.mxu1 %v2650_v24  ;;  %v2983_v23 = vpop.permute.xlu0 %2982  ;;  %v2967_v24 = vpop.permute.xlu1 %2966 }
 0x5cd   :  { %2776 = vmatprep.subr.bf16.mxu0 %v2653_v26  ;;  %2858 = vmatprep.subr.bf16.mxu1 %v2655_v27 }
 0x5d0   :  { %2777 = vmatpush1.bf16.msra.mxu0 %v2652_v28  ;;  %2859 = vmatpush1.bf16.msra.mxu1 %v2654_v29  ;;  %v3015_v26 = vpop.permute.xlu0 %3014  ;;  %v2999_v27 = vpop.permute.xlu1 %2998 }
 0x5d1   :  { %2778 = vmatprep.subr.bf16.mxu0 %v2657_v30  ;;  %2860 = vmatprep.subr.bf16.mxu1 %v2659_v33 }
 0x5d4   :  { %2779 = vmatpush1.bf16.msra.mxu0 %v2656_v40  ;;  %2861 = vmatpush1.bf16.msra.mxu1 %v2658_v43  ;;  %v2985_v28 = vpop.permute.xlu0 %2984  ;;  %v2969_v29 = vpop.permute.xlu1 %2968 }
 0x5d5   :  { %2780 = vmatprep.subr.bf16.mxu0 %v2661_v46  ;;  %2862 = vmatprep.subr.bf16.mxu1 %v2663_v39 }
 0x5d8   :  { %2781 = vmatpush1.bf16.msra.mxu0 %v2660_v13  ;;  %2863 = vmatpush1.bf16.msra.mxu1 %v2662_v20  ;;  %v3017_v30 = vpop.permute.xlu0 %3016  ;;  %v3001_v33 = vpop.permute.xlu1 %3000 }
 0x5d9   :  { %2782 = vmatprep.subr.bf16.mxu0 %v2665_v47  ;;  %2864 = vmatprep.subr.bf16.mxu1 %v2667_v36 }
 0x5dc   :  { %2783 = vmatpush1.bf16.msra.mxu0 %v2664_v49  ;;  %2865 = vmatpush1.bf16.msra.mxu1 %v2666_v48  ;;  %v2987_v40 = vpop.permute.xlu0 %2986  ;;  %v2971_v43 = vpop.permute.xlu1 %2970 }
 0x5dd   :  { %2784 = vmatprep.subr.bf16.mxu0 %v2669_v52  ;;  %2866 = vmatprep.subr.bf16.mxu1 %v2671_v15 }
 0x5e0   :  { %2785 = vmatpush1.bf16.msra.mxu0 %v2668_v2  ;;  %2867 = vmatpush1.bf16.msra.mxu1 %v2670_v56  ;;  %v3019_v46 = vpop.permute.xlu0 %3018  ;;  %v3003_v39 = vpop.permute.xlu1 %3002 }
 0x5e1   :  { %2786 = vmatprep.subr.bf16.mxu0 %v2673_v57  ;;  %2868 = vmatprep.subr.bf16.mxu1 %v2675_v50 }
 0x5e4   :  { %2787 = vmatpush1.bf16.msra.mxu0 %v2672_v60  ;;  %2869 = vmatpush1.bf16.msra.mxu1 %v2674_v45  ;;  %v2989_v13 = vpop.permute.xlu0 %2988  ;;  %v2973_v20 = vpop.permute.xlu1 %2972 }
 0x5e5   :  { %2788 = vmatprep.subr.bf16.mxu0 %v2677_v5  ;;  %2870 = vmatprep.subr.bf16.mxu1 %v2679_v11 }
 0x5e8   :  { %2789 = vmatpush1.bf16.msra.mxu0 %v2676_v54  ;;  %2871 = vmatpush1.bf16.msra.mxu1 %v2678_v44  ;;  %v3021_v47 = vpop.permute.xlu0 %3020  ;;  %v3005_v36 = vpop.permute.xlu1 %3004  ;;  %v2705_v54 = vld [vmem:[#allocation7 + $0x4] ss:$8 sm:$0xf] }
 0x5e9   :  { %2790 = vmatprep.subr.bf16.mxu0 %v2681_v62  ;;  %2872 = vmatprep.subr.bf16.mxu1 %v2683_v51  ;;  %v2710_v44 = vrot.slane %v2705_v54, %v7340_v38  ;;  %v2718_v62 = vrot.slane %v2705_v54, %v7338_v37  ;;  %v2714_v51 = vrot.slane %v2705_v54, %v7344_v42 }
 0x5ec   :  { %2791 = vmatpush1.bf16.msra.mxu0 %v2680_v63  ;;  %2873 = vmatpush1.bf16.msra.mxu1 %v2682_v6  ;;  %v2991_v49 = vpop.permute.xlu0 %2990  ;;  %v2975_v48 = vpop.permute.xlu1 %2974  ;;  %v2722_v63 = vrot.slane %v2705_v54, %v7342_v41 }
 0x5ed   :  { %2792 = vmatprep.subr.bf16.mxu0 %v2685_v32  ;;  %2874 = vmatprep.subr.bf16.mxu1 %v2687_v31 }
 0x5f0   :  { %2793 = vmatpush1.bf16.msra.mxu0 %v2684_v35  ;;  %2875 = vmatpush1.bf16.msra.mxu1 %v2686_v61  ;;  %v3023_v52 = vpop.permute.xlu0 %3022  ;;  %v3007_v15 = vpop.permute.xlu1 %3006 }
 0x5f1   :  { %2794 = vmatprep.subr.bf16.mxu0 %v2689_v0  ;;  %2876 = vmatprep.subr.bf16.mxu1 %v2691_v1 }
 0x5f4   :  { %2795 = vmatpush1.bf16.msra.mxu0 %v2688_v21  ;;  %2877 = vmatpush1.bf16.msra.mxu1 %v2690_v4  ;;  %v2993_v2 = vpop.permute.xlu0 %2992  ;;  %v2977_v56 = vpop.permute.xlu1 %2976 }
 0x5f5   :  { %2796 = vmatprep.subr.bf16.mxu0 %v2693_v7  ;;  %2878 = vmatprep.subr.bf16.mxu1 %v2695_v8 }
 0x5f8   :  { %2797 = vmatpush1.bf16.msra.mxu0 %v2692_v10  ;;  %2879 = vmatpush1.bf16.msra.mxu1 %v2694_v12  ;;  %v3025_v57 = vpop.permute.xlu0 %3024  ;;  %v3009_v50 = vpop.permute.xlu1 %3008 }
 0x5f9   :  { %2798 = vmatprep.subr.bf16.mxu0 %v2697_v14  ;;  %2880 = vmatprep.subr.bf16.mxu1 %v2699_v16 }
 0x5fc   :  { %2799 = vmatpush1.bf16.msra.mxu0 %v2696_v19  ;;  %2881 = vmatpush1.bf16.msra.mxu1 %v2698_v22  ;;  %v2995_v60 = vpop.permute.xlu0 %2994  ;;  %v2979_v45 = vpop.permute.xlu1 %2978  ;;  %v2931_v19 = vld [vmem:[#allocation7 + $0x5] ss:$0 sm:$0xff] }
 0x5fd   :  { %6045 = vmatprep.subr.bf16.mxu0 %v2981_v34  ;;  %6067 = vmatprep.subr.bf16.mxu1 %v3013_v9 }
 0x5ff   :  { %2801 = vmatmul.mubr.bf16.vlgmr.msra.gmra.mrb[12].mxu0 %v2702_v25  ;;  %2883 = vmatmul.mubr.bf16.vlgmr.msra.gmra.mrb[20].mxu1 %v2702_v25 }
 0x600   :  { %6046 = vmatpush3.bf16.msra.mxu0 %v2965_v17  ;;  %6068 = vmatpush3.bf16.msra.mxu1 %v2997_v59  ;;  %v3027_v5 = vpop.permute.xlu0 %3026  ;;  %v3011_v11 = vpop.permute.xlu1 %3010 }
 0x601   :  { %6047 = vmatprep.subr.bf16.mxu0 %v2983_v23  ;;  %6069 = vmatprep.subr.bf16.mxu1 %v3015_v26 }
 0x604   :  { %6048 = vmatpush3.bf16.msra.mxu0 %v2967_v24  ;;  %6070 = vmatpush3.bf16.msra.mxu1 %v2999_v27 }
 0x605   :  { %6049 = vmatprep.subr.bf16.mxu0 %v2985_v28  ;;  %6071 = vmatprep.subr.bf16.mxu1 %v3017_v30 }
 0x608   :  { %6050 = vmatpush3.bf16.msra.mxu0 %v2969_v29  ;;  %6072 = vmatpush3.bf16.msra.mxu1 %v3001_v33 }
 0x609   :  { %6051 = vmatprep.subr.bf16.mxu0 %v2987_v40  ;;  %6073 = vmatprep.subr.bf16.mxu1 %v3019_v46 }
 0x60c   :  { %6052 = vmatpush3.bf16.msra.mxu0 %v2971_v43  ;;  %6074 = vmatpush3.bf16.msra.mxu1 %v3003_v39 }
 0x60d   :  { %6053 = vmatprep.subr.bf16.mxu0 %v2989_v13  ;;  %6075 = vmatprep.subr.bf16.mxu1 %v3021_v47 }
 0x610   :  { %6054 = vmatpush3.bf16.msra.mxu0 %v2973_v20  ;;  %6076 = vmatpush3.bf16.msra.mxu1 %v3005_v36 }
 0x611   :  { %6055 = vmatprep.subr.bf16.mxu0 %v2991_v49  ;;  %6077 = vmatprep.subr.bf16.mxu1 %v3023_v52 }
 0x614   :  { %6056 = vmatpush3.bf16.msra.mxu0 %v2975_v48  ;;  %6078 = vmatpush3.bf16.msra.mxu1 %v3007_v15 }
 0x615   :  { %6057 = vmatprep.subr.bf16.mxu0 %v2993_v2  ;;  %6079 = vmatprep.subr.bf16.mxu1 %v3025_v57 }
 0x618   :  { %6058 = vmatpush3.bf16.msra.mxu0 %v2977_v56  ;;  %6080 = vmatpush3.bf16.msra.mxu1 %v3009_v50 }
 0x619   :  { %6059 = vmatprep.subr.bf16.mxu0 %v2995_v60  ;;  %6081 = vmatprep.subr.bf16.mxu1 %v3027_v5 }
 0x61c   :  { %6060 = vmatpush3.bf16.msra.mxu0 %v2979_v45  ;;  %6082 = vmatpush3.bf16.msra.mxu1 %v3011_v11 }
 0x6d2   :  { %v2802_v6 = vpop.f32.mrb[12].mxu0  ;;  %v2884_v32 = vpop.f32.mrb[20].mxu1 }
 0x6d3   :  { %v6166_v31 = vadd.f32 %v2802_v6, %v2710_v44  ;;  %v6168_v35 = vadd.f32 %v2884_v32, %v2718_v62  ;;  %v2804_v61 = vpop.f32.mrb[13].mxu0  ;;  %v2886_v0 = vpop.f32.mrb[21].mxu1 }
 0x6d4   :  { %v6167_v1 = vadd.f32 %v2804_v61, %v2714_v51  ;;  %v6169_v3 = vadd.f32 %v2886_v0, %v2722_v63  ;;  %v2806_v21 = vpop.f32.mrb[14].mxu0  ;;  %v2888_v4 = vpop.f32.mrb[22].mxu1 }
 0x6d5   :  { %v2891_v7 = vmax.f32 %v6166_v31, 0.0  ;;  %v2893_v8 = vmax.f32 %v6168_v35, 0.0  ;;  %v2807_v34 = vpop.f32.mrb[15].mxu0  ;;  %v2889_v9 = vpop.f32.mrb[23].mxu1 }
 0x6d6   :  { %v2892_v55 = vmax.f32 %v6167_v1, 0.0  ;;  %v2894_v10 = vmax.f32 %v6169_v3, 0.0 }
 0x6d7   :  { %v2927_v16 = vpack.c.bf16 %v2891_v7, %v2891_v7  ;;  %v2929_v17 = vpack.c.bf16 %v2893_v8, %v2893_v8 }
 0x6d8   :  { %v2928_v12 = vpack.c.bf16 %v2892_v55, %v2892_v55  ;;  %v2930_v14 = vpack.c.bf16 %v2894_v10, %v2894_v10 }
 0x6da   :  { %3092 = vmatprep.mubr.bf16.mxu0 %v2928_v12  ;;  %3132 = vmatprep.mubr.bf16.mxu1 %v2930_v14 }
 0x6db   :  { %3093 = vmatmul.mubr.bf16.vlgmr.msra.gmra.mrb[16].mxu0 %v2927_v16  ;;  %3133 = vmatmul.mubr.bf16.vlgmr.msra.gmra.mrb[24].mxu1 %v2929_v17 }
 0x7ae   :  { %v6061_v59 = vpop.f32.mrb[16].mxu0  ;;  %v6083_v18 = vpop.f32.mrb[24].mxu1 }
 0x7af   :  { %v6062_v22 = vpop.f32.mrb[17].mxu0  ;;  %v6084_v23 = vpop.f32.mrb[25].mxu1 }
 0x7b0   :  { %v6063_v24 = vadd.f32 %v6062_v22, %v6061_v59  ;;  %v6085_v25 = vadd.f32 %v6084_v23, %v6083_v18  ;;  %v6064_v26 = vpop.f32.mrb[18].mxu0  ;;  %v6086_v27 = vpop.f32.mrb[26].mxu1 }
 0x7b1   :  { %v6065_v28 = vpop.f32.mrb[19].mxu0  ;;  %v6087_v29 = vpop.f32.mrb[27].mxu1 }
 0x7b2   :  { %v3095_v30 = vadd.f32 %v6063_v24, %v2931_v19 }
 0x7b4   :  { %v3135_v33 = vadd.f32 %v6085_v25, %v3095_v30 }
 0x7b5   :  { %6308 = dma.done.wait [#allocation4 + $0x2], 17408 }
 0x7b6   :  { %6309 = vsyncadd [#allocation4 + $0x2], 4294949888  ;;  %3209 = vmatprep.mubr.bf16.mxu0 %v6339_v53  ;;  %3250 = vmatprep.mubr.bf16.mxu1 %v6339_v53  ;;  %v3143_v40 = vld [vmem:[#allocation2 + $0x9c8] sm:$0xff]  ;;  %v3142_v43 = vld [vmem:[#allocation2 + $0x9c0] sm:$0xff]  ;;  %v3150_v48 = vpack.c.bf16 %v3135_v33, %v3135_v33 }
 0x7b7   :  { %v3147_v46 = vld [vmem:[#allocation2 + $0x9e8] sm:$0xff]  ;;  %3177 = vmatprep.subr.bf16.mxu0 %v3143_v40  ;;  %v3145_v39 = vld [vmem:[#allocation2 + $0x9d8] sm:$0xff]  ;;  %v3144_v13 = vld [vmem:[#allocation2 + $0x9d0] sm:$0xff] }
 0x7b8   :  { %3178 = vmatpush1.bf16.msra.mxu0 %v3142_v43  ;;  %3218 = vmatprep.subr.bf16.mxu1 %v3145_v39  ;;  %v3149_v20 = vld [vmem:[#allocation2 + $0x9f8] sm:$0xff]  ;;  %v3146_v47 = vld [vmem:[#allocation2 + $0x9e0] sm:$0xff]  ;;  %v3148_v36 = vld [vmem:[#allocation2 + $0x9f0] sm:$0xff] }
 0x7b9   :  { %3179 = vmatprep.subr.bf16.mxu0 %v3147_v46  ;;  %3219 = vmatpush1.bf16.msra.mxu1 %v3144_v13  ;;  %v3264_v49 = vld [vmem:[#allocation2 + $0xa08] sm:$0xff]  ;;  %v3266_v52 = vld [vmem:[#allocation2 + $0xa18] sm:$0xff]  ;;  %v3263_v15 = vld [vmem:[#allocation2 + $0xa00] sm:$0xff] }
 0x7ba   :  { %3220 = vmatprep.subr.bf16.mxu1 %v3149_v20  ;;  %v3265_v2 = vld [vmem:[#allocation2 + $0xa10] sm:$0xff]  ;;  %v3268_v56 = vld [vmem:[#allocation2 + $0xa28] sm:$0xff]  ;;  %v3270_v57 = vld [vmem:[#allocation2 + $0xa38] sm:$0xff] }
 0x7bb   :  { %v3267_v50 = vld [vmem:[#allocation2 + $0xa20] sm:$0xff]  ;;  %v3269_v60 = vld [vmem:[#allocation2 + $0xa30] sm:$0xff]  ;;  %v3272_v45 = vld [vmem:[#allocation2 + $0xa48] sm:$0xff] }
 0x7bc   :  { %3180 = vmatpush1.bf16.msra.mxu0 %v3146_v47  ;;  %v3274_v5 = vld [vmem:[#allocation2 + $0xa58] sm:$0xff]  ;;  %v3271_v11 = vld [vmem:[#allocation2 + $0xa40] sm:$0xff]  ;;  %v3273_v54 = vld [vmem:[#allocation2 + $0xa50] sm:$0xff] }
 0x7bd   :  { %3221 = vmatpush1.bf16.msra.mxu1 %v3148_v36  ;;  %3418 = vmatprep.subr.bf16.mxu0 %v3264_v49  ;;  %v3276_v44 = vld [vmem:[#allocation2 + $0xa68] sm:$0xff]  ;;  %v3278_v62 = vld [vmem:[#allocation2 + $0xa78] sm:$0xff]  ;;  %v3275_v51 = vld [vmem:[#allocation2 + $0xa60] sm:$0xff] }
 0x7be   :  { %3500 = vmatprep.subr.bf16.mxu1 %v3266_v52  ;;  %v3277_v63 = vld [vmem:[#allocation2 + $0xa70] sm:$0xff]  ;;  %v3280_v6 = vld [vmem:[#allocation2 + $0xa88] sm:$0xff]  ;;  %v3282_v32 = vld [vmem:[#allocation2 + $0xa98] sm:$0xff] }
 0x7bf   :  { %5987 = vmatmul.mubr.msk.bf16.vlgmr.msra.gmra.mrb[20].mxu0 %vm2482_vm9, %v3150_v48  ;;  %v3279_v31 = vld [vmem:[#allocation2 + $0xa80] sm:$0xff]  ;;  %v3281_v35 = vld [vmem:[#allocation2 + $0xa90] sm:$0xff]  ;;  %v3284_v61 = vld [vmem:[#allocation2 + $0xaa8] sm:$0xff] }
 0x7c0   :  { %5988 = vmatmul.mubr.msk.bf16.vlgmr.msra.gmra.mrb[28].mxu1 %vm2482_vm9, %v3150_v48  ;;  %3419 = vmatpush1.bf16.msra.mxu0 %v3263_v15  ;;  %v3286_v0 = vld [vmem:[#allocation2 + $0xab8] sm:$0xff]  ;;  %v3283_v1 = vld [vmem:[#allocation2 + $0xaa0] sm:$0xff]  ;;  %v3285_v3 = vld [vmem:[#allocation2 + $0xab0] sm:$0xff] }
 0x7c1   :  { %3501 = vmatpush1.bf16.msra.mxu1 %v3265_v2  ;;  %3420 = vmatprep.subr.bf16.mxu0 %v3268_v56  ;;  %v3288_v21 = vld [vmem:[#allocation2 + $0xac8] sm:$0xff]  ;;  %v3290_v4 = vld [vmem:[#allocation2 + $0xad8] sm:$0xff]  ;;  %v3287_v7 = vld [vmem:[#allocation2 + $0xac0] sm:$0xff] }
 0x7c2   :  { %3502 = vmatprep.subr.bf16.mxu1 %v3270_v57  ;;  %v3289_v8 = vld [vmem:[#allocation2 + $0xad0] sm:$0xff]  ;;  %v3292_v34 = vld [vmem:[#allocation2 + $0xae8] sm:$0xff]  ;;  %v3294_v9 = vld [vmem:[#allocation2 + $0xaf8] sm:$0xff] }
 0x7c3   :  { %v3291_v55 = vld [vmem:[#allocation2 + $0xae0] sm:$0xff]  ;;  %v3293_v10 = vld [vmem:[#allocation2 + $0xaf0] sm:$0xff]  ;;  %v3296_v12 = vld [vmem:[#allocation2 + $0xb08] sm:$0xff] }
 0x7c4   :  { %3421 = vmatpush1.bf16.msra.mxu0 %v3267_v50  ;;  %v3298_v14 = vld [vmem:[#allocation2 + $0xb18] sm:$0xff]  ;;  %v3295_v16 = vld [vmem:[#allocation2 + $0xb00] sm:$0xff]  ;;  %v3297_v17 = vld [vmem:[#allocation2 + $0xb10] sm:$0xff] }
 0x7c5   :  { %3503 = vmatpush1.bf16.msra.mxu1 %v3269_v60  ;;  %3422 = vmatprep.subr.bf16.mxu0 %v3272_v45  ;;  %v3300_v59 = vld [vmem:[#allocation2 + $0xb28] sm:$0xff]  ;;  %v3302_v18 = vld [vmem:[#allocation2 + $0xb38] sm:$0xff]  ;;  %v3299_v19 = vld [vmem:[#allocation2 + $0xb20] sm:$0xff] }
 0x7c6   :  { %3504 = vmatprep.subr.bf16.mxu1 %v3274_v5  ;;  %v3301_v22 = vld [vmem:[#allocation2 + $0xb30] sm:$0xff]  ;;  %v3304_v23 = vld [vmem:[#allocation2 + $0xb48] sm:$0xff]  ;;  %v3306_v24 = vld [vmem:[#allocation2 + $0xb58] sm:$0xff] }
 0x7c7   :  { %v3303_v25 = vld [vmem:[#allocation2 + $0xb40] sm:$0xff]  ;;  %v3305_v26 = vld [vmem:[#allocation2 + $0xb50] sm:$0xff]  ;;  %v3308_v27 = vld [vmem:[#allocation2 + $0xb68] sm:$0xff] }
 0x7c8   :  { %3423 = vmatpush1.bf16.msra.mxu0 %v3271_v11  ;;  %v3310_v28 = vld [vmem:[#allocation2 + $0xb78] sm:$0xff]  ;;  %v3307_v29 = vld [vmem:[#allocation2 + $0xb60] sm:$0xff]  ;;  %v3309_v30 = vld [vmem:[#allocation2 + $0xb70] sm:$0xff] }
 0x7c9   :  { %3505 = vmatpush1.bf16.msra.mxu1 %v3273_v54  ;;  %3424 = vmatprep.subr.bf16.mxu0 %v3276_v44  ;;  %v3312_v33 = vld [vmem:[#allocation2 + $0xb88] sm:$0xff]  ;;  %v3314_v40 = vld [vmem:[#allocation2 + $0xb98] sm:$0xff]  ;;  %v3311_v43 = vld [vmem:[#allocation2 + $0xb80] sm:$0xff] }
 0x7ca   :  { %3506 = vmatprep.subr.bf16.mxu1 %v3278_v62  ;;  %v3313_v46 = vld [vmem:[#allocation2 + $0xb90] sm:$0xff]  ;;  %v3316_v39 = vld [vmem:[#allocation2 + $0xba8] sm:$0xff]  ;;  %v3318_v13 = vld [vmem:[#allocation2 + $0xbb8] sm:$0xff] }
 0x7cb   :  { %v3315_v20 = vld [vmem:[#allocation2 + $0xba0] sm:$0xff]  ;;  %v3317_v47 = vld [vmem:[#allocation2 + $0xbb0] sm:$0xff]  ;;  %v3320_v36 = vld [vmem:[#allocation2 + $0xbc8] sm:$0xff] }
 0x7cc   :  { %3425 = vmatpush1.bf16.msra.mxu0 %v3275_v51  ;;  %v3322_v49 = vld [vmem:[#allocation2 + $0xbd8] sm:$0xff]  ;;  %v3319_v48 = vld [vmem:[#allocation2 + $0xbc0] sm:$0xff]  ;;  %v3321_v52 = vld [vmem:[#allocation2 + $0xbd0] sm:$0xff] }
 0x7cd   :  { %3507 = vmatpush1.bf16.msra.mxu1 %v3277_v63  ;;  %3426 = vmatprep.subr.bf16.mxu0 %v3280_v6  ;;  %v3324_v15 = vld [vmem:[#allocation2 + $0xbe8] sm:$0xff]  ;;  %v3326_v2 = vld [vmem:[#allocation2 + $0xbf8] sm:$0xff]  ;;  %v3323_v56 = vld [vmem:[#allocation2 + $0xbe0] sm:$0xff] }
 0x7ce   :  { %3508 = vmatprep.subr.bf16.mxu1 %v3282_v32  ;;  %v3325_v57 = vld [vmem:[#allocation2 + $0xbf0] sm:$0xff]  ;;  %v3328_v50 = vld [vmem:[#allocation2 + $0xc08] sm:$0xff]  ;;  %v3330_v60 = vld [vmem:[#allocation2 + $0xc18] sm:$0xff] }
 0x7cf   :  { %v3594_v45 = vld [vmem:[#allocation3 + $0x140] sm:$0xff]  ;;  %v3595_v44 = vld [vmem:[#allocation3 + $0x168] sm:$0xff]  ;;  %v3596_v6 = vld [vmem:[#allocation3 + $0x190] sm:$0xff] }
 0x7d0   :  { %3427 = vmatpush1.bf16.msra.mxu0 %v3279_v31  ;;  %v3610_v5 = vld [vmem:[#allocation3 + $0x3c0] sm:$0xff]  ;;  %3671 = vrot.lane.b32.xlu0 %v3594_v45, %s6319_s16  ;;  %v3587_v62 = vld [vmem:[#allocation3 + $0x28] sm:$0xff]  ;;  %v3588_v32 = vld [vmem:[#allocation3 + $0x50] sm:$0xff] }
 0x7d1   :  { %3509 = vmatpush1.bf16.msra.mxu1 %v3281_v35  ;;  %3428 = vmatprep.subr.bf16.mxu0 %v3284_v61  ;;  %v3586_v11 = vld [vmem:[#allocation3] sm:$0xff]  ;;  %v3611_v51 = vld [vmem:[#allocation3 + $0x3e8] sm:$0xff]  ;;  %v3612_v31 = vld [vmem:[#allocation3 + $0x410] sm:$0xff] }
 0x7d2   :  { %3510 = vmatprep.subr.bf16.mxu1 %v3286_v0  ;;  %3703 = vrot.lane.b32.xlu1 %v3610_v5, %s6319_s16  ;;  %v3602_v54 = vld [vmem:[#allocation3 + $0x280] sm:$0xff]  ;;  %v3603_v63 = vld [vmem:[#allocation3 + $0x2a8] sm:$0xff]  ;;  %v3604_v35 = vld [vmem:[#allocation3 + $0x2d0] sm:$0xff] }
 0x7d3   :  { %v3597_v61 = vld [vmem:[#allocation3 + $0x1b8] sm:$0xff]  ;;  %v3333_v45 = vld [vmem:[#allocation2 + $0xc30] sm:$0xff]  ;;  %v3336_v5 = vld [vmem:[#allocation2 + $0xc48] sm:$0xff] }
 0x7d4   :  { %3429 = vmatpush1.bf16.msra.mxu0 %v3283_v1  ;;  %3655 = vrot.lane.b32.xlu0 %v3586_v11, %s6319_s16  ;;  %v3589_v0 = vld [vmem:[#allocation3 + $0x78] sm:$0xff] }
 0x7d5   :  { %3511 = vmatpush1.bf16.msra.mxu1 %v3285_v3  ;;  %3430 = vmatprep.subr.bf16.mxu0 %v3288_v21  ;;  %v3613_v1 = vld [vmem:[#allocation3 + $0x438] sm:$0xff]  ;;  %v3598_v21 = vld [vmem:[#allocation3 + $0x1e0] sm:$0xff] }
 0x7d6   :  { %3512 = vmatprep.subr.bf16.mxu1 %v3290_v4  ;;  %3687 = vrot.lane.b32.xlu1 %v3602_v54, %s6319_s16  ;;  %v3605_v3 = vld [vmem:[#allocation3 + $0x2f8] sm:$0xff]  ;;  %v3590_v4 = vld [vmem:[#allocation3 + $0xa0] sm:$0xff] }
 0x7d7   :  { %v3338_v11 = vld [vmem:[#allocation2 + $0xc58] sm:$0xff]  ;;  %v3335_v54 = vld [vmem:[#allocation2 + $0xc40] sm:$0xff] }
 0x7d8   :  { %3431 = vmatpush1.bf16.msra.mxu0 %v3287_v7  ;;  %3673 = vrot.lane.b32.xlu0 %v3595_v44, %s6319_s16  ;;  %v3614_v7 = vld [vmem:[#allocation3 + $0x460] sm:$0xff]  ;;  %v3337_v44 = vld [vmem:[#allocation2 + $0xc50] sm:$0xff] }
 0x7d9   :  { %3513 = vmatpush1.bf16.msra.mxu1 %v3289_v8  ;;  %3432 = vmatprep.subr.bf16.mxu0 %v3292_v34  ;;  %v3606_v8 = vld [vmem:[#allocation3 + $0x320] sm:$0xff]  ;;  %v3599_v34 = vld [vmem:[#allocation3 + $0x208] sm:$0xff] }
 0x7da   :  { %3514 = vmatprep.subr.bf16.mxu1 %v3294_v9  ;;  %3657 = vrot.lane.b32.xlu1 %v3587_v62, %s6319_s16  ;;  %v3591_v9 = vld [vmem:[#allocation3 + $0xc8] sm:$0xff] }
 0x7db   :  { %v3340_v62 = vld [vmem:[#allocation2 + $0xc68] sm:$0xff] }
 0x7dc   :  { %3433 = vmatpush1.bf16.msra.mxu0 %v3291_v55  ;;  %3705 = vrot.lane.b32.xlu0 %v3611_v51, %s6319_s16  ;;  %v3615_v55 = vld [vmem:[#allocation3 + $0x488] sm:$0xff]  ;;  %v3342_v51 = vld [vmem:[#allocation2 + $0xc78] sm:$0xff] }
 0x7dd   :  { %3515 = vmatpush1.bf16.msra.mxu1 %v3293_v10  ;;  %3434 = vmatprep.subr.bf16.mxu0 %v3296_v12  ;;  %v3607_v10 = vld [vmem:[#allocation3 + $0x348] sm:$0xff]  ;;  %v3600_v12 = vld [vmem:[#allocation3 + $0x230] sm:$0xff] }
 0x7de   :  { %3516 = vmatprep.subr.bf16.mxu1 %v3298_v14  ;;  %3689 = vrot.lane.b32.xlu1 %v3603_v63, %s6319_s16  ;;  %v3592_v14 = vld [vmem:[#allocation3 + $0xf0] sm:$0xff]  ;;  %v3339_v63 = vld [vmem:[#allocation2 + $0xc60] sm:$0xff] }
 0x7e0   :  { %3435 = vmatpush1.bf16.msra.mxu0 %v3295_v16  ;;  %3675 = vrot.lane.b32.xlu0 %v3596_v6, %s6319_s16  ;;  %v7596_v16 = vld [vmem:[#allocation7 + $0x6] ss:$8 sm:$0xf] }
 0x7e1   :  { %3517 = vmatpush1.bf16.msra.mxu1 %v3297_v17  ;;  %3436 = vmatprep.subr.bf16.mxu0 %v3300_v59  ;;  %v3616_v17 = vld [vmem:[#allocation3 + $0x4b0] sm:$0xff] }
 0x7e2   :  { %3518 = vmatprep.subr.bf16.mxu1 %v3302_v18  ;;  %3659 = vrot.lane.b32.xlu1 %v3588_v32, %s6319_s16  ;;  %v3608_v59 = vld [vmem:[#allocation3 + $0x370] sm:$0xff]  ;;  %v3157_v18 = vrot.slane %v7596_v16, %v7340_v38  ;;  %v3344_v32 = vld [vmem:[#allocation2 + $0xc88] sm:$0xff] }
 0x7e3   :  { %v3341_v6 = vld [vmem:[#allocation2 + $0xc70] sm:$0xff] }
 0x7e4   :  { %3437 = vmatpush1.bf16.msra.mxu0 %v3299_v19  ;;  %3707 = vrot.lane.b32.xlu0 %v3612_v31, %s6319_s16  ;;  %v3161_v19 = vrot.slane %v7596_v16, %v7344_v42  ;;  %v3346_v31 = vld [vmem:[#allocation2 + $0xc98] sm:$0xff] }
 0x7e5   :  { %3519 = vmatpush1.bf16.msra.mxu1 %v3301_v22  ;;  %3438 = vmatprep.subr.bf16.mxu0 %v3304_v23  ;;  %v3169_v22 = vrot.slane %v7596_v16, %v7342_v41  ;;  %v3601_v23 = vld [vmem:[#allocation3 + $0x258] sm:$0xff] }
 0x7e6   :  { %3520 = vmatprep.subr.bf16.mxu1 %v3306_v24  ;;  %3691 = vrot.lane.b32.xlu1 %v3604_v35, %s6319_s16  ;;  %v3593_v24 = vld [vmem:[#allocation3 + $0x118] sm:$0xff]  ;;  %v3343_v35 = vld [vmem:[#allocation2 + $0xc80] sm:$0xff] }
 0x7e8   :  { %3439 = vmatpush1.bf16.msra.mxu0 %v3303_v25  ;;  %3677 = vrot.lane.b32.xlu0 %v3597_v61, %s6319_s16  ;;  %v3345_v61 = vld [vmem:[#allocation2 + $0xc90] sm:$0xff] }
 0x7e9   :  { %3521 = vmatpush1.bf16.msra.mxu1 %v3305_v26  ;;  %3440 = vmatprep.subr.bf16.mxu0 %v3308_v27 }
 0x7ea   :  { %3522 = vmatprep.subr.bf16.mxu1 %v3310_v28  ;;  %3661 = vrot.lane.b32.xlu1 %v3589_v0, %s6319_s16  ;;  %v3348_v0 = vld [vmem:[#allocation2 + $0xca8] sm:$0xff] }
 0x7ec   :  { %3441 = vmatpush1.bf16.msra.mxu0 %v3307_v29  ;;  %3709 = vrot.lane.b32.xlu0 %v3613_v1, %s6319_s16  ;;  %v3350_v1 = vld [vmem:[#allocation2 + $0xcb8] sm:$0xff] }
 0x7ed   :  { %3523 = vmatpush1.bf16.msra.mxu1 %v3309_v30  ;;  %3442 = vmatprep.subr.bf16.mxu0 %v3312_v33 }
 0x7ee   :  { %3524 = vmatprep.subr.bf16.mxu1 %v3314_v40  ;;  %3693 = vrot.lane.b32.xlu1 %v3605_v3, %s6319_s16  ;;  %v3347_v3 = vld [vmem:[#allocation2 + $0xca0] sm:$0xff] }
 0x7f0   :  { %3443 = vmatpush1.bf16.msra.mxu0 %v3311_v43  ;;  %3679 = vrot.lane.b32.xlu0 %v3598_v21, %s6319_s16  ;;  %v3349_v21 = vld [vmem:[#allocation2 + $0xcb0] sm:$0xff] }
 0x7f1   :  { %3525 = vmatpush1.bf16.msra.mxu1 %v3313_v46  ;;  %3444 = vmatprep.subr.bf16.mxu0 %v3316_v39 }
 0x7f2   :  { %3526 = vmatprep.subr.bf16.mxu1 %v3318_v13  ;;  %3663 = vrot.lane.b32.xlu1 %v3590_v4, %s6319_s16  ;;  %v3617_v13 = vld [vmem:[#allocation3 + $0x4d8] sm:$0xff]  ;;  %v3352_v4 = vld [vmem:[#allocation2 + $0xcc8] sm:$0xff] }
 0x7f4   :  { %3445 = vmatpush1.bf16.msra.mxu0 %v3315_v20  ;;  %3711 = vrot.lane.b32.xlu0 %v3614_v7, %s6319_s16  ;;  %v3609_v20 = vld [vmem:[#allocation3 + $0x398] sm:$0xff] }
 0x7f5   :  { %3527 = vmatpush1.bf16.msra.mxu1 %v3317_v47  ;;  %3446 = vmatprep.subr.bf16.mxu0 %v3320_v36  ;;  %v3354_v7 = vld [vmem:[#allocation2 + $0xcd8] sm:$0xff] }
 0x7f6   :  { %3528 = vmatprep.subr.bf16.mxu1 %v3322_v49  ;;  %3695 = vrot.lane.b32.xlu1 %v3606_v8, %s6319_s16  ;;  %v3351_v8 = vld [vmem:[#allocation2 + $0xcc0] sm:$0xff] }
 0x7f8   :  { %3447 = vmatpush1.bf16.msra.mxu0 %v3319_v48  ;;  %3681 = vrot.lane.b32.xlu0 %v3599_v34, %s6319_s16  ;;  %v3353_v34 = vld [vmem:[#allocation2 + $0xcd0] sm:$0xff] }
 0x7f9   :  { %3529 = vmatpush1.bf16.msra.mxu1 %v3321_v52  ;;  %3448 = vmatprep.subr.bf16.mxu0 %v3324_v15  ;;  %v3327_v15 = vld [vmem:[#allocation2 + $0xc00] sm:$0xff] }
 0x7fa   :  { %3530 = vmatprep.subr.bf16.mxu1 %v3326_v2  ;;  %3665 = vrot.lane.b32.xlu1 %v3591_v9, %s6319_s16  ;;  %v3329_v2 = vld [vmem:[#allocation2 + $0xc10] sm:$0xff]  ;;  %v3356_v9 = vld [vmem:[#allocation2 + $0xce8] sm:$0xff] }
 0x7fc   :  { %3449 = vmatpush1.bf16.msra.mxu0 %v3323_v56  ;;  %3713 = vrot.lane.b32.xlu0 %v3615_v55, %s6319_s16  ;;  %v3332_v56 = vld [vmem:[#allocation2 + $0xc28] sm:$0xff]  ;;  %v3358_v55 = vld [vmem:[#allocation2 + $0xcf8] sm:$0xff] }
 0x7fd   :  { %3531 = vmatpush1.bf16.msra.mxu1 %v3325_v57  ;;  %3459 = vmatprep.subr.bf16.mxu0 %v3328_v50  ;;  %v3334_v57 = vld [vmem:[#allocation2 + $0xc38] sm:$0xff] }
 0x7fe   :  { %3541 = vmatprep.subr.bf16.mxu1 %v3330_v60  ;;  %3697 = vrot.lane.b32.xlu1 %v3607_v10, %s6319_s16  ;;  %v3331_v60 = vld [vmem:[#allocation2 + $0xc20] sm:$0xff] }
 0x7ff   :  { %v3355_v10 = vld [vmem:[#allocation2 + $0xce0] sm:$0xff] }
 0x800   :  { %3683 = vrot.lane.b32.xlu0 %v3600_v12, %s6319_s16  ;;  %v3357_v12 = vld [vmem:[#allocation2 + $0xcf0] sm:$0xff] }
 0x802   :  { %3667 = vrot.lane.b32.xlu1 %v3592_v14, %s6319_s16  ;;  %v3360_v14 = vld [vmem:[#allocation2 + $0xd08] sm:$0xff] }
 0x804   :  { %3715 = vrot.lane.b32.xlu0 %v3616_v17, %s6319_s16  ;;  %v3362_v17 = vld [vmem:[#allocation2 + $0xd18] sm:$0xff] }
 0x806   :  { %3699 = vrot.lane.b32.xlu1 %v3608_v59, %s6319_s16  ;;  %v3359_v59 = vld [vmem:[#allocation2 + $0xd00] sm:$0xff] }
 0x808   :  { %3685 = vrot.lane.b32.xlu0 %v3601_v23, %s6319_s16  ;;  %v3363_v23 = vld [vmem:[#allocation2 + $0xd20] sm:$0xff] }
 0x80a   :  { %3669 = vrot.lane.b32.xlu1 %v3593_v24, %s6319_s16  ;;  %v3365_v24 = vld [vmem:[#allocation2 + $0xd30] sm:$0xff] }
 0x80c   :  { %3717 = vrot.lane.b32.xlu0 %v3617_v13, %s6319_s16  ;;  %v3375_v13 = vld [vmem:[#allocation2 + $0xd80] sm:$0xff] }
 0x80e   :  { %3701 = vrot.lane.b32.xlu1 %v3609_v20, %s6319_s16  ;;  %v3377_v20 = vld [vmem:[#allocation2 + $0xd90] sm:$0xff] }
 0x892   :  { %v3211_v25 = vpop.f32.mrb[20].mxu0 }
 0x893   :  { %v3212_v26 = vadd.f32 %v3211_v25, %v3157_v18  ;;  %v3213_v27 = vpop.f32.mrb[21].mxu0  ;;  %v7608_v28 = vpop.f32.mrb[28].mxu1  ;;  %v3361_v18 = vld [vmem:[#allocation2 + $0xd10] sm:$0xff]  ;;  %v3368_v25 = vld [vmem:[#allocation2 + $0xd48] sm:$0xff] }
 0x894   :  { %v3214_v29 = vadd.f32 %v3213_v27, %v3161_v19  ;;  %v3215_v30 = vpop.f32.mrb[22].mxu0  ;;  %v3254_v33 = vpop.f32.mrb[29].mxu1  ;;  %v3364_v19 = vld [vmem:[#allocation2 + $0xd28] sm:$0xff]  ;;  %v3367_v27 = vld [vmem:[#allocation2 + $0xd40] sm:$0xff] }
 0x895   :  { %v3259_v40 = vmax.f32 %v3212_v26, 0.0  ;;  %v3216_v43 = vpop.f32.mrb[23].mxu0  ;;  %v3255_v46 = vadd.f32 %v3254_v33, %v3169_v22  ;;  %v3256_v39 = vpop.f32.mrb[30].mxu1  ;;  %v3366_v22 = vld [vmem:[#allocation2 + $0xd38] sm:$0xff]  ;;  %v3372_v30 = vld [vmem:[#allocation2 + $0xd68] sm:$0xff] }
 0x896   :  { %v3260_v47 = vmax.f32 %v3214_v29, 0.0  ;;  %v3257_v36 = vpop.f32.mrb[31].mxu1  ;;  %v3370_v26 = vld [vmem:[#allocation2 + $0xd58] sm:$0xff]  ;;  %v3369_v29 = vld [vmem:[#allocation2 + $0xd50] sm:$0xff] }
 0x897   :  { %v3262_v49 = vmax.f32 %v3255_v46, 0.0  ;;  %v3391_v52 = vpack.c.bf16 %v3259_v40, %v3259_v40  ;;  %v3374_v33 = vld [vmem:[#allocation2 + $0xd78] sm:$0xff]  ;;  %v3371_v40 = vld [vmem:[#allocation2 + $0xd60] sm:$0xff]  ;;  %v3373_v43 = vld [vmem:[#allocation2 + $0xd70] sm:$0xff] }
 0x898   :  { %v3392_v48 = vpack.c.bf16 %v3260_v47, %v3260_v47  ;;  %v3376_v46 = vld [vmem:[#allocation2 + $0xd88] sm:$0xff]  ;;  %v3378_v39 = vld [vmem:[#allocation2 + $0xd98] sm:$0xff] }
 0x899   :  { %v3394_v50 = vpack.c.bf16 %v3262_v49, %v3262_v49  ;;  %v3380_v47 = vld [vmem:[#allocation2 + $0xda8] sm:$0xff]  ;;  %v3382_v36 = vld [vmem:[#allocation2 + $0xdb8] sm:$0xff]  ;;  %v3165_v49 = vrot.slane %v7596_v16, %v7338_v37 }
 0x89a   :  { %3450 = vmatprep.mubr.bf16.mxu0 %v3392_v48  ;;  %3532 = vmatprep.mubr.bf16.mxu1 %v3392_v48  ;;  %v3379_v48 = vld [vmem:[#allocation2 + $0xda0] sm:$0xff] }
 0x89b   :  { %3451 = vmatmul.mubr.bf16.vlgmr.msra.gmra.mrb[24].mxu0 %v3391_v52  ;;  %3533 = vmatmul.mubr.bf16.vlgmr.msra.gmra.mrb[32].mxu1 %v3391_v52  ;;  %v3381_v52 = vld [vmem:[#allocation2 + $0xdb0] sm:$0xff] }
 0x89c   :  { %3460 = vmatpush1.bf16.msra.mxu0 %v3327_v15  ;;  %3542 = vmatpush1.bf16.msra.mxu1 %v3329_v2  ;;  %v3384_v15 = vld [vmem:[#allocation2 + $0xdc8] sm:$0xff]  ;;  %v3386_v2 = vld [vmem:[#allocation2 + $0xdd8] sm:$0xff] }
 0x89d   :  { %3461 = vmatprep.subr.bf16.mxu0 %v3332_v56  ;;  %3543 = vmatprep.subr.bf16.mxu1 %v3334_v57  ;;  %v3672_v56 = vpop.permute.xlu0 %3671  ;;  %v3704_v57 = vpop.permute.xlu1 %3703 }
 0x89e   :  { %3491 = vmatprep.mubr.bf16.mxu0 %v3394_v50  ;;  %3573 = vmatprep.mubr.bf16.mxu1 %v3394_v50  ;;  %v3253_v50 = vadd.f32 %v7608_v28, %v3165_v49 }
 0x8a0   :  { %3462 = vmatpush1.bf16.msra.mxu0 %v3331_v60  ;;  %3544 = vmatpush1.bf16.msra.mxu1 %v3333_v45  ;;  %v3383_v60 = vld [vmem:[#allocation2 + $0xdc0] sm:$0xff]  ;;  %v3385_v45 = vld [vmem:[#allocation2 + $0xdd0] sm:$0xff] }
 0x8a1   :  { %3463 = vmatprep.subr.bf16.mxu0 %v3336_v5  ;;  %3545 = vmatprep.subr.bf16.mxu1 %v3338_v11  ;;  %v3388_v5 = vld [vmem:[#allocation2 + $0xde8] sm:$0xff]  ;;  %v3390_v11 = vld [vmem:[#allocation2 + $0xdf8] sm:$0xff]  ;;  %v3688_v16 = vpop.permute.xlu1 %3687 }
 0x8a4   :  { %3464 = vmatpush1.bf16.msra.mxu0 %v3335_v54  ;;  %3546 = vmatpush1.bf16.msra.mxu1 %v3337_v44  ;;  %v3656_v54 = vpop.permute.xlu0 %3655  ;;  %v3261_v44 = vmax.f32 %v3253_v50, 0.0 }
 0x8a5   :  { %3465 = vmatprep.subr.bf16.mxu0 %v3340_v62  ;;  %3547 = vmatprep.subr.bf16.mxu1 %v3342_v51  ;;  %v3387_v62 = vld [vmem:[#allocation2 + $0xde0] sm:$0xff]  ;;  %v3389_v51 = vld [vmem:[#allocation2 + $0xdf0] sm:$0xff] }
 0x8a6   :  { %v3393_v28 = vpack.c.bf16 %v3261_v44, %v3261_v44 }
 0x8a8   :  { %3466 = vmatpush1.bf16.msra.mxu0 %v3339_v63  ;;  %3548 = vmatpush1.bf16.msra.mxu1 %v3341_v6  ;;  %v3674_v63 = vpop.permute.xlu0 %3673  ;;  %v3658_v6 = vpop.permute.xlu1 %3657 }
 0x8a9   :  { %3467 = vmatprep.subr.bf16.mxu0 %v3344_v32  ;;  %3549 = vmatprep.subr.bf16.mxu1 %v3346_v31 }
 0x8ac   :  { %3468 = vmatpush1.bf16.msra.mxu0 %v3343_v35  ;;  %3550 = vmatpush1.bf16.msra.mxu1 %v3345_v61  ;;  %v3706_v32 = vpop.permute.xlu0 %3705  ;;  %v3690_v31 = vpop.permute.xlu1 %3689 }
 0x8ad   :  { %3469 = vmatprep.subr.bf16.mxu0 %v3348_v0  ;;  %3551 = vmatprep.subr.bf16.mxu1 %v3350_v1 }
 0x8b0   :  { %3470 = vmatpush1.bf16.msra.mxu0 %v3347_v3  ;;  %3552 = vmatpush1.bf16.msra.mxu1 %v3349_v21  ;;  %v3676_v35 = vpop.permute.xlu0 %3675  ;;  %v3660_v61 = vpop.permute.xlu1 %3659 }
 0x8b1   :  { %3471 = vmatprep.subr.bf16.mxu0 %v3352_v4  ;;  %3553 = vmatprep.subr.bf16.mxu1 %v3354_v7 }
 0x8b4   :  { %3472 = vmatpush1.bf16.msra.mxu0 %v3351_v8  ;;  %3554 = vmatpush1.bf16.msra.mxu1 %v3353_v34  ;;  %v3708_v0 = vpop.permute.xlu0 %3707  ;;  %v3692_v1 = vpop.permute.xlu1 %3691 }
 0x8b5   :  { %3473 = vmatprep.subr.bf16.mxu0 %v3356_v9  ;;  %3555 = vmatprep.subr.bf16.mxu1 %v3358_v55 }
 0x8b8   :  { %3474 = vmatpush1.bf16.msra.mxu0 %v3355_v10  ;;  %3556 = vmatpush1.bf16.msra.mxu1 %v3357_v12  ;;  %v3678_v3 = vpop.permute.xlu0 %3677  ;;  %v3662_v21 = vpop.permute.xlu1 %3661 }
 0x8b9   :  { %3475 = vmatprep.subr.bf16.mxu0 %v3360_v14  ;;  %3557 = vmatprep.subr.bf16.mxu1 %v3362_v17 }
 0x8bc   :  { %3476 = vmatpush1.bf16.msra.mxu0 %v3359_v59  ;;  %3558 = vmatpush1.bf16.msra.mxu1 %v3361_v18  ;;  %v3710_v4 = vpop.permute.xlu0 %3709  ;;  %v3694_v7 = vpop.permute.xlu1 %3693 }
 0x8bd   :  { %3477 = vmatprep.subr.bf16.mxu0 %v3364_v19  ;;  %3559 = vmatprep.subr.bf16.mxu1 %v3366_v22 }
 0x8c0   :  { %3478 = vmatpush1.bf16.msra.mxu0 %v3363_v23  ;;  %3560 = vmatpush1.bf16.msra.mxu1 %v3365_v24  ;;  %v3680_v8 = vpop.permute.xlu0 %3679  ;;  %v3664_v34 = vpop.permute.xlu1 %3663 }
 0x8c1   :  { %3479 = vmatprep.subr.bf16.mxu0 %v3368_v25  ;;  %3561 = vmatprep.subr.bf16.mxu1 %v3370_v26 }
 0x8c4   :  { %3480 = vmatpush1.bf16.msra.mxu0 %v3367_v27  ;;  %3562 = vmatpush1.bf16.msra.mxu1 %v3369_v29  ;;  %v3712_v9 = vpop.permute.xlu0 %3711  ;;  %v3696_v55 = vpop.permute.xlu1 %3695  ;;  %v3396_v27 = vld [vmem:[#allocation7 + $0x7] ss:$8 sm:$0xf] }
 0x8c5   :  { %3481 = vmatprep.subr.bf16.mxu0 %v3372_v30  ;;  %3563 = vmatprep.subr.bf16.mxu1 %v3374_v33  ;;  %v3401_v29 = vrot.slane %v3396_v27, %v7340_v38  ;;  %v3409_v30 = vrot.slane %v3396_v27, %v7338_v37  ;;  %v3405_v33 = vrot.slane %v3396_v27, %v7344_v42 }
 0x8c8   :  { %3482 = vmatpush1.bf16.msra.mxu0 %v3371_v40  ;;  %3564 = vmatpush1.bf16.msra.mxu1 %v3373_v43  ;;  %v3682_v10 = vpop.permute.xlu0 %3681  ;;  %v3666_v12 = vpop.permute.xlu1 %3665  ;;  %v3413_v40 = vrot.slane %v3396_v27, %v7342_v41 }
 0x8c9   :  { %3483 = vmatprep.subr.bf16.mxu0 %v3376_v46  ;;  %3565 = vmatprep.subr.bf16.mxu1 %v3378_v39 }
 0x8cc   :  { %3484 = vmatpush1.bf16.msra.mxu0 %v3375_v13  ;;  %3566 = vmatpush1.bf16.msra.mxu1 %v3377_v20  ;;  %v3714_v14 = vpop.permute.xlu0 %3713  ;;  %v3698_v17 = vpop.permute.xlu1 %3697 }
 0x8cd   :  { %3485 = vmatprep.subr.bf16.mxu0 %v3380_v47  ;;  %3567 = vmatprep.subr.bf16.mxu1 %v3382_v36 }
 0x8d0   :  { %3486 = vmatpush1.bf16.msra.mxu0 %v3379_v48  ;;  %3568 = vmatpush1.bf16.msra.mxu1 %v3381_v52  ;;  %v3684_v59 = vpop.permute.xlu0 %3683  ;;  %v3668_v18 = vpop.permute.xlu1 %3667 }
 0x8d1   :  { %3487 = vmatprep.subr.bf16.mxu0 %v3384_v15  ;;  %3569 = vmatprep.subr.bf16.mxu1 %v3386_v2 }
 0x8d4   :  { %3488 = vmatpush1.bf16.msra.mxu0 %v3383_v60  ;;  %3570 = vmatpush1.bf16.msra.mxu1 %v3385_v45  ;;  %v3716_v19 = vpop.permute.xlu0 %3715  ;;  %v3700_v22 = vpop.permute.xlu1 %3699 }
 0x8d5   :  { %3489 = vmatprep.subr.bf16.mxu0 %v3388_v5  ;;  %3571 = vmatprep.subr.bf16.mxu1 %v3390_v11 }
 0x8d8   :  { %3490 = vmatpush1.bf16.msra.mxu0 %v3387_v62  ;;  %3572 = vmatpush1.bf16.msra.mxu1 %v3389_v51  ;;  %v3686_v23 = vpop.permute.xlu0 %3685  ;;  %v3670_v24 = vpop.permute.xlu1 %3669  ;;  %v3622_v62 = vld [vmem:[#allocation7 + $0x20] ss:$0 sm:$0xff] }
 0x8d9   :  { %6089 = vmatprep.subr.bf16.mxu0 %v3672_v56  ;;  %6111 = vmatprep.subr.bf16.mxu1 %v3704_v57 }
 0x8db   :  { %3492 = vmatmul.mubr.bf16.vlgmr.msra.gmra.mrb[24].mxu0 %v3393_v28  ;;  %3574 = vmatmul.mubr.bf16.vlgmr.msra.gmra.mrb[32].mxu1 %v3393_v28 }
 0x8dc   :  { %6090 = vmatpush3.bf16.msra.mxu0 %v3656_v54  ;;  %6112 = vmatpush3.bf16.msra.mxu1 %v3688_v16  ;;  %v3718_v25 = vpop.permute.xlu0 %3717  ;;  %v3702_v26 = vpop.permute.xlu1 %3701 }
 0x8dd   :  { %6091 = vmatprep.subr.bf16.mxu0 %v3674_v63  ;;  %6113 = vmatprep.subr.bf16.mxu1 %v3706_v32 }
 0x8e0   :  { %6092 = vmatpush3.bf16.msra.mxu0 %v3658_v6  ;;  %6114 = vmatpush3.bf16.msra.mxu1 %v3690_v31 }
 0x8e1   :  { %6093 = vmatprep.subr.bf16.mxu0 %v3676_v35  ;;  %6115 = vmatprep.subr.bf16.mxu1 %v3708_v0 }
 0x8e4   :  { %6094 = vmatpush3.bf16.msra.mxu0 %v3660_v61  ;;  %6116 = vmatpush3.bf16.msra.mxu1 %v3692_v1 }
 0x8e5   :  { %6095 = vmatprep.subr.bf16.mxu0 %v3678_v3  ;;  %6117 = vmatprep.subr.bf16.mxu1 %v3710_v4 }
 0x8e8   :  { %6096 = vmatpush3.bf16.msra.mxu0 %v3662_v21  ;;  %6118 = vmatpush3.bf16.msra.mxu1 %v3694_v7 }
 0x8e9   :  { %6097 = vmatprep.subr.bf16.mxu0 %v3680_v8  ;;  %6119 = vmatprep.subr.bf16.mxu1 %v3712_v9 }
 0x8ec   :  { %6098 = vmatpush3.bf16.msra.mxu0 %v3664_v34  ;;  %6120 = vmatpush3.bf16.msra.mxu1 %v3696_v55 }
 0x8ed   :  { %6099 = vmatprep.subr.bf16.mxu0 %v3682_v10  ;;  %6121 = vmatprep.subr.bf16.mxu1 %v3714_v14 }
 0x8f0   :  { %6100 = vmatpush3.bf16.msra.mxu0 %v3666_v12  ;;  %6122 = vmatpush3.bf16.msra.mxu1 %v3698_v17 }
 0x8f1   :  { %6101 = vmatprep.subr.bf16.mxu0 %v3684_v59  ;;  %6123 = vmatprep.subr.bf16.mxu1 %v3716_v19 }
 0x8f4   :  { %6102 = vmatpush3.bf16.msra.mxu0 %v3668_v18  ;;  %6124 = vmatpush3.bf16.msra.mxu1 %v3700_v22 }
 0x8f5   :  { %6103 = vmatprep.subr.bf16.mxu0 %v3686_v23  ;;  %6125 = vmatprep.subr.bf16.mxu1 %v3718_v25 }
 0x8f8   :  { %6104 = vmatpush3.bf16.msra.mxu0 %v3670_v24  ;;  %6126 = vmatpush3.bf16.msra.mxu1 %v3702_v26 }
 0x9ae   :  { %v3493_v43 = vpop.f32.mrb[24].mxu0  ;;  %v3575_v46 = vpop.f32.mrb[32].mxu1 }
 0x9af   :  { %v6170_v39 = vadd.f32 %v3493_v43, %v3401_v29  ;;  %v6172_v13 = vadd.f32 %v3575_v46, %v3409_v30  ;;  %v3495_v20 = vpop.f32.mrb[25].mxu0  ;;  %v3577_v47 = vpop.f32.mrb[33].mxu1 }
 0x9b0   :  { %v6171_v36 = vadd.f32 %v3495_v20, %v3405_v33  ;;  %v6173_v49 = vadd.f32 %v3577_v47, %v3413_v40  ;;  %v3497_v48 = vpop.f32.mrb[26].mxu0  ;;  %v3579_v52 = vpop.f32.mrb[34].mxu1 }
 0x9b1   :  { %v3582_v15 = vmax.f32 %v6170_v39, 0.0  ;;  %v3584_v2 = vmax.f32 %v6172_v13, 0.0  ;;  %v3498_v56 = vpop.f32.mrb[27].mxu0  ;;  %v3580_v57 = vpop.f32.mrb[35].mxu1 }
 0x9b2   :  { %v3583_v50 = vmax.f32 %v6171_v36, 0.0  ;;  %v3585_v60 = vmax.f32 %v6173_v49, 0.0 }
 0x9b3   :  { %v3618_v11 = vpack.c.bf16 %v3582_v15, %v3582_v15  ;;  %v3620_v54 = vpack.c.bf16 %v3584_v2, %v3584_v2 }
 0x9b4   :  { %v3619_v45 = vpack.c.bf16 %v3583_v50, %v3583_v50  ;;  %v3621_v5 = vpack.c.bf16 %v3585_v60, %v3585_v60 }
 0x9b6   :  { %3783 = vmatprep.mubr.bf16.mxu0 %v3619_v45  ;;  %3823 = vmatprep.mubr.bf16.mxu1 %v3621_v5 }
 0x9b7   :  { %3784 = vmatmul.mubr.bf16.vlgmr.msra.gmra.mrb[28].mxu0 %v3618_v11  ;;  %3824 = vmatmul.mubr.bf16.vlgmr.msra.gmra.mrb[36].mxu1 %v3620_v54 }
 0xa8a   :  { %v6105_v16 = vpop.f32.mrb[28].mxu0  ;;  %v6127_v44 = vpop.f32.mrb[36].mxu1 }
 0xa8b   :  { %v6106_v51 = vpop.f32.mrb[29].mxu0  ;;  %v6128_v63 = vpop.f32.mrb[37].mxu1 }
 0xa8c   :  { %v6107_v6 = vadd.f32 %v6106_v51, %v6105_v16  ;;  %v6129_v28 = vadd.f32 %v6128_v63, %v6127_v44  ;;  %v6108_v32 = vpop.f32.mrb[30].mxu0  ;;  %v6130_v31 = vpop.f32.mrb[38].mxu1 }
 0xa8d   :  { %v6109_v35 = vpop.f32.mrb[31].mxu0  ;;  %v6131_v61 = vpop.f32.mrb[39].mxu1 }
 0xa8e   :  { %v3786_v0 = vadd.f32 %v6107_v6, %v3622_v62 }
 0xa90   :  { %v7621_v1 = vadd.f32 %v6129_v28, %v3786_v0 }
 0xa91   :  { %6310 = dma.done.wait [#allocation4 + $0x3], 17408 }
 0xa92   :  { %6311 = vsyncadd [#allocation4 + $0x3], 4294949888  ;;  %3900 = vmatprep.mubr.bf16.mxu0 %v6339_v53  ;;  %3941 = vmatprep.mubr.bf16.mxu1 %v6339_v53  ;;  %v3834_v3 = vld [vmem:[#allocation2 + $0xe08] sm:$0xff]  ;;  %v3833_v21 = vld [vmem:[#allocation2 + $0xe00] sm:$0xff]  ;;  %v7627_v12 = vpack.c.bf16 %v7621_v1, %v7621_v1 }
 0xa93   :  { %v3838_v4 = vld [vmem:[#allocation2 + $0xe28] sm:$0xff]  ;;  %3868 = vmatprep.subr.bf16.mxu0 %v3834_v3  ;;  %v3836_v7 = vld [vmem:[#allocation2 + $0xe18] sm:$0xff]  ;;  %v3835_v8 = vld [vmem:[#allocation2 + $0xe10] sm:$0xff] }
 0xa94   :  { %3869 = vmatpush1.bf16.msra.mxu0 %v3833_v21  ;;  %3909 = vmatprep.subr.bf16.mxu1 %v3836_v7  ;;  %v3840_v34 = vld [vmem:[#allocation2 + $0xe38] sm:$0xff]  ;;  %v3837_v9 = vld [vmem:[#allocation2 + $0xe20] sm:$0xff]  ;;  %v3839_v55 = vld [vmem:[#allocation2 + $0xe30] sm:$0xff] }
 0xa95   :  { %3870 = vmatprep.subr.bf16.mxu0 %v3838_v4  ;;  %3910 = vmatpush1.bf16.msra.mxu1 %v3835_v8  ;;  %v3955_v10 = vld [vmem:[#allocation2 + $0xe48] sm:$0xff]  ;;  %v3957_v14 = vld [vmem:[#allocation2 + $0xe58] sm:$0xff]  ;;  %v3954_v17 = vld [vmem:[#allocation2 + $0xe40] sm:$0xff] }
 0xa96   :  { %3911 = vmatprep.subr.bf16.mxu1 %v3840_v34  ;;  %v3956_v59 = vld [vmem:[#allocation2 + $0xe50] sm:$0xff]  ;;  %v3959_v18 = vld [vmem:[#allocation2 + $0xe68] sm:$0xff]  ;;  %v3961_v19 = vld [vmem:[#allocation2 + $0xe78] sm:$0xff] }
 0xa97   :  { %v3958_v22 = vld [vmem:[#allocation2 + $0xe60] sm:$0xff]  ;;  %v3960_v23 = vld [vmem:[#allocation2 + $0xe70] sm:$0xff]  ;;  %v3963_v24 = vld [vmem:[#allocation2 + $0xe88] sm:$0xff] }
 0xa98   :  { %3871 = vmatpush1.bf16.msra.mxu0 %v3837_v9  ;;  %v3965_v25 = vld [vmem:[#allocation2 + $0xe98] sm:$0xff]  ;;  %v3962_v26 = vld [vmem:[#allocation2 + $0xe80] sm:$0xff]  ;;  %v3964_v27 = vld [vmem:[#allocation2 + $0xe90] sm:$0xff] }
 0xa99   :  { %3912 = vmatpush1.bf16.msra.mxu1 %v3839_v55  ;;  %4109 = vmatprep.subr.bf16.mxu0 %v3955_v10  ;;  %v3967_v29 = vld [vmem:[#allocation2 + $0xea8] sm:$0xff]  ;;  %v3969_v30 = vld [vmem:[#allocation2 + $0xeb8] sm:$0xff]  ;;  %v3966_v33 = vld [vmem:[#allocation2 + $0xea0] sm:$0xff] }
 0xa9a   :  { %4191 = vmatprep.subr.bf16.mxu1 %v3957_v14  ;;  %v3968_v40 = vld [vmem:[#allocation2 + $0xeb0] sm:$0xff]  ;;  %v3971_v43 = vld [vmem:[#allocation2 + $0xec8] sm:$0xff]  ;;  %v3973_v46 = vld [vmem:[#allocation2 + $0xed8] sm:$0xff] }
 0xa9b   :  { %5989 = vmatmul.mubr.msk.bf16.vlgmr.msra.gmra.mrb[32].mxu0 %vm2482_vm9, %v7627_v12  ;;  %v3970_v39 = vld [vmem:[#allocation2 + $0xec0] sm:$0xff]  ;;  %v3972_v13 = vld [vmem:[#allocation2 + $0xed0] sm:$0xff]  ;;  %v3975_v20 = vld [vmem:[#allocation2 + $0xee8] sm:$0xff] }
 0xa9c   :  { %5990 = vmatmul.mubr.msk.bf16.vlgmr.msra.gmra.mrb[40].mxu1 %vm2482_vm9, %v7627_v12  ;;  %4110 = vmatpush1.bf16.msra.mxu0 %v3954_v17  ;;  %v3977_v47 = vld [vmem:[#allocation2 + $0xef8] sm:$0xff]  ;;  %v3974_v36 = vld [vmem:[#allocation2 + $0xee0] sm:$0xff]  ;;  %v3976_v49 = vld [vmem:[#allocation2 + $0xef0] sm:$0xff] }
 0xa9d   :  { %4192 = vmatpush1.bf16.msra.mxu1 %v3956_v59  ;;  %4111 = vmatprep.subr.bf16.mxu0 %v3959_v18  ;;  %v3979_v48 = vld [vmem:[#allocation2 + $0xf08] sm:$0xff]  ;;  %v3981_v52 = vld [vmem:[#allocation2 + $0xf18] sm:$0xff]  ;;  %v3978_v15 = vld [vmem:[#allocation2 + $0xf00] sm:$0xff] }
 0xa9e   :  { %4193 = vmatprep.subr.bf16.mxu1 %v3961_v19  ;;  %v3980_v2 = vld [vmem:[#allocation2 + $0xf10] sm:$0xff]  ;;  %v3983_v56 = vld [vmem:[#allocation2 + $0xf28] sm:$0xff]  ;;  %v3985_v57 = vld [vmem:[#allocation2 + $0xf38] sm:$0xff] }
 0xa9f   :  { %v3982_v50 = vld [vmem:[#allocation2 + $0xf20] sm:$0xff]  ;;  %v3984_v60 = vld [vmem:[#allocation2 + $0xf30] sm:$0xff]  ;;  %v3987_v45 = vld [vmem:[#allocation2 + $0xf48] sm:$0xff] }
 0xaa0   :  { %4112 = vmatpush1.bf16.msra.mxu0 %v3958_v22  ;;  %v3989_v5 = vld [vmem:[#allocation2 + $0xf58] sm:$0xff]  ;;  %v3986_v11 = vld [vmem:[#allocation2 + $0xf40] sm:$0xff]  ;;  %v3988_v54 = vld [vmem:[#allocation2 + $0xf50] sm:$0xff] }
 0xaa1   :  { %4194 = vmatpush1.bf16.msra.mxu1 %v3960_v23  ;;  %4113 = vmatprep.subr.bf16.mxu0 %v3963_v24  ;;  %v3991_v16 = vld [vmem:[#allocation2 + $0xf68] sm:$0xff]  ;;  %v3993_v44 = vld [vmem:[#allocation2 + $0xf78] sm:$0xff]  ;;  %v3990_v62 = vld [vmem:[#allocation2 + $0xf60] sm:$0xff] }
 0xaa2   :  { %4195 = vmatprep.subr.bf16.mxu1 %v3965_v25  ;;  %v3992_v51 = vld [vmem:[#allocation2 + $0xf70] sm:$0xff]  ;;  %v3995_v63 = vld [vmem:[#allocation2 + $0xf88] sm:$0xff]  ;;  %v3997_v6 = vld [vmem:[#allocation2 + $0xf98] sm:$0xff] }
 0xaa3   :  { %v3994_v28 = vld [vmem:[#allocation2 + $0xf80] sm:$0xff]  ;;  %v3996_v32 = vld [vmem:[#allocation2 + $0xf90] sm:$0xff]  ;;  %v3999_v31 = vld [vmem:[#allocation2 + $0xfa8] sm:$0xff] }
 0xaa4   :  { %4114 = vmatpush1.bf16.msra.mxu0 %v3962_v26  ;;  %v4001_v35 = vld [vmem:[#allocation2 + $0xfb8] sm:$0xff]  ;;  %v3998_v61 = vld [vmem:[#allocation2 + $0xfa0] sm:$0xff]  ;;  %v4000_v0 = vld [vmem:[#allocation2 + $0xfb0] sm:$0xff] }
 0xaa5   :  { %4196 = vmatpush1.bf16.msra.mxu1 %v3964_v27  ;;  %4115 = vmatprep.subr.bf16.mxu0 %v3967_v29  ;;  %v4003_v3 = vld [vmem:[#allocation2 + $0xfc8] sm:$0xff]  ;;  %v4005_v21 = vld [vmem:[#allocation2 + $0xfd8] sm:$0xff]  ;;  %v4002_v4 = vld [vmem:[#allocation2 + $0xfc0] sm:$0xff] }
 0xaa6   :  { %4197 = vmatprep.subr.bf16.mxu1 %v3969_v30  ;;  %v4004_v7 = vld [vmem:[#allocation2 + $0xfd0] sm:$0xff]  ;;  %v4007_v8 = vld [vmem:[#allocation2 + $0xfe8] sm:$0xff]  ;;  %v4009_v34 = vld [vmem:[#allocation2 + $0xff8] sm:$0xff] }
 0xaa7   :  { %v4006_v9 = vld [vmem:[#allocation2 + $0xfe0] sm:$0xff]  ;;  %v4008_v55 = vld [vmem:[#allocation2 + $0xff0] sm:$0xff]  ;;  %v4011_v10 = vld [vmem:[#allocation2 + $0x1008] sm:$0xff] }
 0xaa8   :  { %4116 = vmatpush1.bf16.msra.mxu0 %v3966_v33  ;;  %v4013_v14 = vld [vmem:[#allocation2 + $0x1018] sm:$0xff]  ;;  %v4010_v17 = vld [vmem:[#allocation2 + $0x1000] sm:$0xff]  ;;  %v4012_v59 = vld [vmem:[#allocation2 + $0x1010] sm:$0xff] }
 0xaa9   :  { %4198 = vmatpush1.bf16.msra.mxu1 %v3968_v40  ;;  %4117 = vmatprep.subr.bf16.mxu0 %v3971_v43  ;;  %v4015_v18 = vld [vmem:[#allocation2 + $0x1028] sm:$0xff]  ;;  %v4017_v19 = vld [vmem:[#allocation2 + $0x1038] sm:$0xff]  ;;  %v4014_v22 = vld [vmem:[#allocation2 + $0x1020] sm:$0xff] }
 0xaaa   :  { %4199 = vmatprep.subr.bf16.mxu1 %v3973_v46  ;;  %v4016_v23 = vld [vmem:[#allocation2 + $0x1030] sm:$0xff]  ;;  %v4019_v24 = vld [vmem:[#allocation2 + $0x1048] sm:$0xff]  ;;  %v4021_v25 = vld [vmem:[#allocation2 + $0x1058] sm:$0xff] }
 0xaab   :  { %v4278_v26 = vld [vmem:[#allocation3 + $0x8] sm:$0xff]  ;;  %v4277_v27 = vld [vmem:[#allocation3] sm:$0xff]  ;;  %v4279_v29 = vld [vmem:[#allocation3 + $0x10] sm:$0xff] }
 0xaac   :  { %4118 = vmatpush1.bf16.msra.mxu0 %v3970_v39  ;;  %4488 = vrot.lane.b32.xlu0 %v4278_v26, %s6317_s11  ;;  %v4281_v30 = vld [vmem:[#allocation3 + $0x30] sm:$0xff]  ;;  %v4282_v33 = vld [vmem:[#allocation3 + $0x38] sm:$0xff]  ;;  %v4280_v40 = vld [vmem:[#allocation3 + $0x28] sm:$0xff] }
 0xaad   :  { %4200 = vmatpush1.bf16.msra.mxu1 %v3972_v13  ;;  %4119 = vmatprep.subr.bf16.mxu0 %v3975_v20  ;;  %v4284_v43 = vld [vmem:[#allocation3 + $0x58] sm:$0xff]  ;;  %v4285_v46 = vld [vmem:[#allocation3 + $0x60] sm:$0xff]  ;;  %v4283_v39 = vld [vmem:[#allocation3 + $0x50] sm:$0xff] }
 0xaae   :  { %4201 = vmatprep.subr.bf16.mxu1 %v3977_v47  ;;  %4486 = vrot.lane.b32.xlu1 %v4277_v27, %s6317_s11  ;;  %v4287_v13 = vld [vmem:[#allocation3 + $0x80] sm:$0xff]  ;;  %v4288_v20 = vld [vmem:[#allocation3 + $0x88] sm:$0xff]  ;;  %v4286_v47 = vld [vmem:[#allocation3 + $0x78] sm:$0xff] }
 0xab0   :  { %4120 = vmatpush1.bf16.msra.mxu0 %v3974_v36  ;;  %4490 = vrot.lane.b32.xlu0 %v4279_v29, %s6317_s11  ;;  %v4290_v36 = vld [vmem:[#allocation3 + $0xa8] sm:$0xff] }
 0xab1   :  { %4202 = vmatpush1.bf16.msra.mxu1 %v3976_v49  ;;  %4121 = vmatprep.subr.bf16.mxu0 %v3979_v48  ;;  %v4291_v49 = vld [vmem:[#allocation3 + $0xb0] sm:$0xff]  ;;  %v4289_v48 = vld [vmem:[#allocation3 + $0xa0] sm:$0xff] }
 0xab2   :  { %4203 = vmatprep.subr.bf16.mxu1 %v3981_v52  ;;  %4494 = vrot.lane.b32.xlu1 %v4281_v30, %s6317_s11  ;;  %v4293_v52 = vld [vmem:[#allocation3 + $0xd0] sm:$0xff] }
 0xab4   :  { %4122 = vmatpush1.bf16.msra.mxu0 %v3978_v15  ;;  %4496 = vrot.lane.b32.xlu0 %v4282_v33, %s6317_s11  ;;  %v4294_v15 = vld [vmem:[#allocation3 + $0xd8] sm:$0xff] }
 0xab5   :  { %4204 = vmatpush1.bf16.msra.mxu1 %v3980_v2  ;;  %4123 = vmatprep.subr.bf16.mxu0 %v3983_v56  ;;  %v4292_v2 = vld [vmem:[#allocation3 + $0xc8] sm:$0xff]  ;;  %v4296_v56 = vld [vmem:[#allocation3 + $0xf8] sm:$0xff] }
 0xab6   :  { %4205 = vmatprep.subr.bf16.mxu1 %v3985_v57  ;;  %4492 = vrot.lane.b32.xlu1 %v4280_v40, %s6317_s11  ;;  %v4297_v57 = vld [vmem:[#allocation3 + $0x100] sm:$0xff] }
 0xab8   :  { %4124 = vmatpush1.bf16.msra.mxu0 %v3982_v50  ;;  %4500 = vrot.lane.b32.xlu0 %v4284_v43, %s6317_s11  ;;  %v4295_v50 = vld [vmem:[#allocation3 + $0xf0] sm:$0xff] }
 0xab9   :  { %4206 = vmatpush1.bf16.msra.mxu1 %v3984_v60  ;;  %4125 = vmatprep.subr.bf16.mxu0 %v3987_v45  ;;  %v4299_v60 = vld [vmem:[#allocation3 + $0x120] sm:$0xff]  ;;  %v4300_v45 = vld [vmem:[#allocation3 + $0x128] sm:$0xff] }
 0xaba   :  { %4207 = vmatprep.subr.bf16.mxu1 %v3989_v5  ;;  %4502 = vrot.lane.b32.xlu1 %v4285_v46, %s6317_s11  ;;  %v4298_v5 = vld [vmem:[#allocation3 + $0x118] sm:$0xff]  ;;  %v4324_v46 = vld [vmem:[#allocation3 + $0x268] sm:$0xff] }
 0xabc   :  { %4126 = vmatpush1.bf16.msra.mxu0 %v3986_v11  ;;  %4498 = vrot.lane.b32.xlu0 %v4283_v39, %s6317_s11  ;;  %v4302_v11 = vld [vmem:[#allocation3 + $0x148] sm:$0xff]  ;;  %v4322_v39 = vld [vmem:[#allocation3 + $0x258] sm:$0xff] }
 0xabd   :  { %4208 = vmatpush1.bf16.msra.mxu1 %v3988_v54  ;;  %4127 = vmatprep.subr.bf16.mxu0 %v3991_v16  ;;  %v4303_v54 = vld [vmem:[#allocation3 + $0x150] sm:$0xff]  ;;  %v4301_v16 = vld [vmem:[#allocation3 + $0x140] sm:$0xff] }
 0xabe   :  { %4209 = vmatprep.subr.bf16.mxu1 %v3993_v44  ;;  %4506 = vrot.lane.b32.xlu1 %v4287_v13, %s6317_s11  ;;  %v4305_v44 = vld [vmem:[#allocation3 + $0x170] sm:$0xff] }
 0xac0   :  { %4128 = vmatpush1.bf16.msra.mxu0 %v3990_v62  ;;  %4508 = vrot.lane.b32.xlu0 %v4288_v20, %s6317_s11  ;;  %v4306_v62 = vld [vmem:[#allocation3 + $0x178] sm:$0xff] }
 0xac1   :  { %4210 = vmatpush1.bf16.msra.mxu1 %v3992_v51  ;;  %4129 = vmatprep.subr.bf16.mxu0 %v3995_v63  ;;  %v4304_v51 = vld [vmem:[#allocation3 + $0x168] sm:$0xff]  ;;  %v4308_v63 = vld [vmem:[#allocation3 + $0x198] sm:$0xff] }
 0xac2   :  { %4211 = vmatprep.subr.bf16.mxu1 %v3997_v6  ;;  %4504 = vrot.lane.b32.xlu1 %v4286_v47, %s6317_s11  ;;  %v4309_v6 = vld [vmem:[#allocation3 + $0x1a0] sm:$0xff] }
 0xac4   :  { %4130 = vmatpush1.bf16.msra.mxu0 %v3994_v28  ;;  %4512 = vrot.lane.b32.xlu0 %v4290_v36, %s6317_s11  ;;  %v4307_v28 = vld [vmem:[#allocation3 + $0x190] sm:$0xff]  ;;  %v4018_v36 = vld [vmem:[#allocation2 + $0x1040] sm:$0xff] }
 0xac5   :  { %4212 = vmatpush1.bf16.msra.mxu1 %v3996_v32  ;;  %4131 = vmatprep.subr.bf16.mxu0 %v3999_v31  ;;  %v4311_v32 = vld [vmem:[#allocation3 + $0x1c0] sm:$0xff]  ;;  %v4312_v31 = vld [vmem:[#allocation3 + $0x1c8] sm:$0xff] }
 0xac6   :  { %4213 = vmatprep.subr.bf16.mxu1 %v4001_v35  ;;  %4514 = vrot.lane.b32.xlu1 %v4291_v49, %s6317_s11  ;;  %v4310_v35 = vld [vmem:[#allocation3 + $0x1b8] sm:$0xff]  ;;  %v4020_v49 = vld [vmem:[#allocation2 + $0x1050] sm:$0xff] }
 0xac8   :  { %4132 = vmatpush1.bf16.msra.mxu0 %v3998_v61  ;;  %4510 = vrot.lane.b32.xlu0 %v4289_v48, %s6317_s11  ;;  %v4314_v61 = vld [vmem:[#allocation3 + $0x1e8] sm:$0xff] }
 0xac9   :  { %4214 = vmatpush1.bf16.msra.mxu1 %v4000_v0  ;;  %4133 = vmatprep.subr.bf16.mxu0 %v4003_v3  ;;  %v4315_v0 = vld [vmem:[#allocation3 + $0x1f0] sm:$0xff]  ;;  %v4313_v3 = vld [vmem:[#allocation3 + $0x1e0] sm:$0xff]  ;;  %v4023_v48 = vld [vmem:[#allocation2 + $0x1068] sm:$0xff] }
 0xaca   :  { %4215 = vmatprep.subr.bf16.mxu1 %v4005_v21  ;;  %4518 = vrot.lane.b32.xlu1 %v4293_v52, %s6317_s11  ;;  %v4317_v21 = vld [vmem:[#allocation3 + $0x210] sm:$0xff]  ;;  %v4025_v52 = vld [vmem:[#allocation2 + $0x1078] sm:$0xff] }
 0xacc   :  { %4134 = vmatpush1.bf16.msra.mxu0 %v4002_v4  ;;  %4520 = vrot.lane.b32.xlu0 %v4294_v15, %s6317_s11  ;;  %v4318_v4 = vld [vmem:[#allocation3 + $0x218] sm:$0xff] }
 0xacd   :  { %4216 = vmatpush1.bf16.msra.mxu1 %v4004_v7  ;;  %4135 = vmatprep.subr.bf16.mxu0 %v4007_v8  ;;  %v4316_v7 = vld [vmem:[#allocation3 + $0x208] sm:$0xff] }
 0xace   :  { %4217 = vmatprep.subr.bf16.mxu1 %v4009_v34  ;;  %4516 = vrot.lane.b32.xlu1 %v4292_v2, %s6317_s11  ;;  %v7673_v8 = vld [vmem:[#allocation7 + $0x21] ss:$8 sm:$0xf] }
 0xacf   :  { %v4320_v34 = vld [vmem:[#allocation3 + $0x238] sm:$0xff]  ;;  %v4326_v2 = vld [vmem:[#allocation3 + $0x288] sm:$0xff] }
 0xad0   :  { %4136 = vmatpush1.bf16.msra.mxu0 %v4006_v9  ;;  %4524 = vrot.lane.b32.xlu0 %v4296_v56, %s6317_s11  ;;  %v4321_v9 = vld [vmem:[#allocation3 + $0x240] sm:$0xff]  ;;  %v4327_v56 = vld [vmem:[#allocation3 + $0x290] sm:$0xff] }
 0xad1   :  { %4218 = vmatpush1.bf16.msra.mxu1 %v4008_v55  ;;  %4137 = vmatprep.subr.bf16.mxu0 %v4011_v10  ;;  %v3848_v55 = vrot.slane %v7673_v8, %v7340_v38  ;;  %v3852_v10 = vrot.slane %v7673_v8, %v7344_v42 }
 0xad2   :  { %4219 = vmatprep.subr.bf16.mxu1 %v4013_v14  ;;  %4526 = vrot.lane.b32.xlu1 %v4297_v57, %s6317_s11  ;;  %v3860_v14 = vrot.slane %v7673_v8, %v7342_v41  ;;  %v4022_v57 = vld [vmem:[#allocation2 + $0x1060] sm:$0xff] }
 0xad4   :  { %4138 = vmatpush1.bf16.msra.mxu0 %v4010_v17  ;;  %4522 = vrot.lane.b32.xlu0 %v4295_v50, %s6317_s11  ;;  %v4024_v50 = vld [vmem:[#allocation2 + $0x1070] sm:$0xff] }
 0xad5   :  { %4220 = vmatpush1.bf16.msra.mxu1 %v4012_v59  ;;  %4139 = vmatprep.subr.bf16.mxu0 %v4015_v18  ;;  %v4319_v59 = vld [vmem:[#allocation3 + $0x230] sm:$0xff]  ;;  %v4323_v18 = vld [vmem:[#allocation3 + $0x260] sm:$0xff] }
 0xad6   :  { %4221 = vmatprep.subr.bf16.mxu1 %v4017_v19  ;;  %4530 = vrot.lane.b32.xlu1 %v4299_v60, %s6317_s11  ;;  %v4027_v60 = vld [vmem:[#allocation2 + $0x1088] sm:$0xff] }
 0xad8   :  { %4140 = vmatpush1.bf16.msra.mxu0 %v4014_v22  ;;  %4532 = vrot.lane.b32.xlu0 %v4300_v45, %s6317_s11  ;;  %v4029_v45 = vld [vmem:[#allocation2 + $0x1098] sm:$0xff] }
 0xad9   :  { %4222 = vmatpush1.bf16.msra.mxu1 %v4016_v23  ;;  %4150 = vmatprep.subr.bf16.mxu0 %v4019_v24 }
 0xada   :  { %4232 = vmatprep.subr.bf16.mxu1 %v4021_v25  ;;  %4528 = vrot.lane.b32.xlu1 %v4298_v5, %s6317_s11  ;;  %v4325_v5 = vld [vmem:[#allocation3 + $0x280] sm:$0xff] }
 0xadc   :  { %4536 = vrot.lane.b32.xlu0 %v4302_v11, %s6317_s11  ;;  %v4329_v11 = vld [vmem:[#allocation3 + $0x2b0] sm:$0xff] }
 0xade   :  { %4538 = vrot.lane.b32.xlu1 %v4303_v54, %s6317_s11  ;;  %v4026_v54 = vld [vmem:[#allocation2 + $0x1080] sm:$0xff] }
 0xae0   :  { %4534 = vrot.lane.b32.xlu0 %v4301_v16, %s6317_s11  ;;  %v4028_v16 = vld [vmem:[#allocation2 + $0x1090] sm:$0xff] }
 0xae2   :  { %4542 = vrot.lane.b32.xlu1 %v4305_v44, %s6317_s11  ;;  %v4031_v44 = vld [vmem:[#allocation2 + $0x10a8] sm:$0xff] }
 0xae4   :  { %4544 = vrot.lane.b32.xlu0 %v4306_v62, %s6317_s11  ;;  %v4033_v62 = vld [vmem:[#allocation2 + $0x10b8] sm:$0xff] }
 0xae6   :  { %4540 = vrot.lane.b32.xlu1 %v4304_v51, %s6317_s11  ;;  %v4330_v51 = vld [vmem:[#allocation3 + $0x2b8] sm:$0xff] }
 0xae8   :  { %4548 = vrot.lane.b32.xlu0 %v4308_v63, %s6317_s11  ;;  %v4328_v63 = vld [vmem:[#allocation3 + $0x2a8] sm:$0xff] }
 0xaea   :  { %4550 = vrot.lane.b32.xlu1 %v4309_v6, %s6317_s11  ;;  %v4030_v6 = vld [vmem:[#allocation2 + $0x10a0] sm:$0xff] }
 0xaec   :  { %4546 = vrot.lane.b32.xlu0 %v4307_v28, %s6317_s11  ;;  %v4032_v28 = vld [vmem:[#allocation2 + $0x10b0] sm:$0xff] }
 0xaee   :  { %4554 = vrot.lane.b32.xlu1 %v4311_v32, %s6317_s11  ;;  %v4035_v32 = vld [vmem:[#allocation2 + $0x10c8] sm:$0xff] }
 0xaf0   :  { %4556 = vrot.lane.b32.xlu0 %v4312_v31, %s6317_s11  ;;  %v4037_v31 = vld [vmem:[#allocation2 + $0x10d8] sm:$0xff] }
 0xaf2   :  { %4552 = vrot.lane.b32.xlu1 %v4310_v35, %s6317_s11  ;;  %v4332_v35 = vld [vmem:[#allocation3 + $0x2d8] sm:$0xff] }
 0xaf4   :  { %4560 = vrot.lane.b32.xlu0 %v4314_v61, %s6317_s11  ;;  %v4333_v61 = vld [vmem:[#allocation3 + $0x2e0] sm:$0xff] }
 0xaf6   :  { %4562 = vrot.lane.b32.xlu1 %v4315_v0, %s6317_s11  ;;  %v4034_v0 = vld [vmem:[#allocation2 + $0x10c0] sm:$0xff] }
 0xaf8   :  { %4558 = vrot.lane.b32.xlu0 %v4313_v3, %s6317_s11  ;;  %v4036_v3 = vld [vmem:[#allocation2 + $0x10d0] sm:$0xff] }
 0xafa   :  { %4566 = vrot.lane.b32.xlu1 %v4317_v21, %s6317_s11  ;;  %v4039_v21 = vld [vmem:[#allocation2 + $0x10e8] sm:$0xff] }
 0xafc   :  { %4568 = vrot.lane.b32.xlu0 %v4318_v4, %s6317_s11  ;;  %v4041_v4 = vld [vmem:[#allocation2 + $0x10f8] sm:$0xff] }
 0xafe   :  { %4564 = vrot.lane.b32.xlu1 %v4316_v7, %s6317_s11  ;;  %v4331_v7 = vld [vmem:[#allocation3 + $0x2d0] sm:$0xff] }
 0xb00   :  { %4572 = vrot.lane.b32.xlu0 %v4320_v34, %s6317_s11  ;;  %v4335_v34 = vld [vmem:[#allocation3 + $0x300] sm:$0xff] }
 0xb02   :  { %4574 = vrot.lane.b32.xlu1 %v4321_v9, %s6317_s11  ;;  %v4038_v9 = vld [vmem:[#allocation2 + $0x10e0] sm:$0xff] }
 0xb04   :  { %4570 = vrot.lane.b32.xlu0 %v4319_v59, %s6317_s11 }
 0xb06   :  { %4578 = vrot.lane.b32.xlu1 %v4323_v18, %s6317_s11  ;;  %v4336_v18 = vld [vmem:[#allocation3 + $0x308] sm:$0xff] }
 0xb08   :  { %4580 = vrot.lane.b32.xlu0 %v4324_v46, %s6317_s11  ;;  %v4051_v46 = vld [vmem:[#allocation2 + $0x1148] sm:$0xff] }
 0xb0a   :  { %4576 = vrot.lane.b32.xlu1 %v4322_v39, %s6317_s11  ;;  %v4053_v39 = vld [vmem:[#allocation2 + $0x1158] sm:$0xff] }
 0xb0c   :  { %4584 = vrot.lane.b32.xlu0 %v4326_v2, %s6317_s11 }
 0xb0e   :  { %4586 = vrot.lane.b32.xlu1 %v4327_v56, %s6317_s11 }
 0xb10   :  { %4582 = vrot.lane.b32.xlu0 %v4325_v5, %s6317_s11  ;;  %v4059_v5 = vld [vmem:[#allocation2 + $0x1188] sm:$0xff] }
 0xb12   :  { %4590 = vrot.lane.b32.xlu1 %v4329_v11, %s6317_s11  ;;  %v4061_v11 = vld [vmem:[#allocation2 + $0x1198] sm:$0xff] }
 0xb14   :  { %4592 = vrot.lane.b32.xlu0 %v4330_v51, %s6317_s11  ;;  %v4058_v51 = vld [vmem:[#allocation2 + $0x1180] sm:$0xff] }
 0xb16   :  { %4588 = vrot.lane.b32.xlu1 %v4328_v63, %s6317_s11  ;;  %v4060_v63 = vld [vmem:[#allocation2 + $0x1190] sm:$0xff] }
 0xb18   :  { %4596 = vrot.lane.b32.xlu0 %v4332_v35, %s6317_s11  ;;  %v4343_v35 = vld [vmem:[#allocation3 + $0x370] sm:$0xff] }
 0xb1a   :  { %4598 = vrot.lane.b32.xlu1 %v4333_v61, %s6317_s11  ;;  %v4347_v61 = vld [vmem:[#allocation3 + $0x3a0] sm:$0xff] }
 0xb1c   :  { %4594 = vrot.lane.b32.xlu0 %v4331_v7, %s6317_s11 }
 0xb1e   :  { %4602 = vrot.lane.b32.xlu1 %v4335_v34, %s6317_s11 }
 0xb20   :  { %v7703_v59 = vpop.permute.xlu1 %4486  ;;  %4604 = vrot.lane.b32.xlu0 %v4336_v18, %s6317_s11  ;;  %v4071_v18 = vld [vmem:[#allocation2 + $0x11e8] sm:$0xff] }
 0xb6e   :  { %v3902_v17 = vpop.f32.mrb[32].mxu0 }
 0xb6f   :  { %v3903_v19 = vadd.f32 %v3902_v17, %v3848_v55  ;;  %v3904_v22 = vpop.f32.mrb[33].mxu0  ;;  %v7685_v23 = vpop.f32.mrb[40].mxu1  ;;  %v4040_v55 = vld [vmem:[#allocation2 + $0x10f0] sm:$0xff] }
 0xb70   :  { %v3905_v24 = vadd.f32 %v3904_v22, %v3852_v10  ;;  %v3906_v25 = vpop.f32.mrb[34].mxu0  ;;  %v3945_v26 = vpop.f32.mrb[41].mxu1  ;;  %v4043_v10 = vld [vmem:[#allocation2 + $0x1108] sm:$0xff]  ;;  %v4042_v22 = vld [vmem:[#allocation2 + $0x1100] sm:$0xff] }
 0xb71   :  { %v3950_v27 = vmax.f32 %v3903_v19, 0.0  ;;  %v3907_v29 = vpop.f32.mrb[35].mxu0  ;;  %v3946_v30 = vadd.f32 %v3945_v26, %v3860_v14  ;;  %v3947_v33 = vpop.f32.mrb[42].mxu1  ;;  %v4045_v14 = vld [vmem:[#allocation2 + $0x1118] sm:$0xff]  ;;  %v4047_v25 = vld [vmem:[#allocation2 + $0x1128] sm:$0xff] }
 0xb72   :  { %v3951_v40 = vmax.f32 %v3905_v24, 0.0  ;;  %v3948_v43 = vpop.f32.mrb[43].mxu1  ;;  %v7700_v17 = vpop.permute.xlu0 %4488  ;;  %v4334_v19 = vld [vmem:[#allocation3 + $0x2f8] sm:$0xff]  ;;  %v4044_v24 = vld [vmem:[#allocation2 + $0x1110] sm:$0xff] }
 0xb73   :  { %v3953_v13 = vmax.f32 %v3946_v30, 0.0  ;;  %v4082_v47 = vpack.c.bf16 %v3950_v27, %v3950_v27  ;;  %v4049_v26 = vld [vmem:[#allocation2 + $0x1138] sm:$0xff]  ;;  %4600 = vrot.lane.b32.xlu1 %v4334_v19, %s6317_s11  ;;  %v7709_v29 = vpop.permute.xlu1 %4494  ;;  %v4338_v30 = vld [vmem:[#allocation3 + $0x328] sm:$0xff]  ;;  %v4339_v33 = vld [vmem:[#allocation3 + $0x330] sm:$0xff] }
 0xb74   :  { %v4083_v20 = vpack.c.bf16 %v3951_v40, %v3951_v40  ;;  %v4046_v40 = vld [vmem:[#allocation2 + $0x1120] sm:$0xff]  ;;  %v4048_v43 = vld [vmem:[#allocation2 + $0x1130] sm:$0xff]  ;;  %4608 = vrot.lane.b32.xlu0 %v4338_v30, %s6317_s11  ;;  %v4073_v19 = vld [vmem:[#allocation2 + $0x11f8] sm:$0xff]  ;;  %v3856_v30 = vrot.slane %v7673_v8, %v7338_v37 }
 0xb75   :  { %v4085_v15 = vpack.c.bf16 %v3953_v13, %v3953_v13 }
 0xb76   :  { %4141 = vmatprep.mubr.bf16.mxu0 %v4083_v20  ;;  %4223 = vmatprep.mubr.bf16.mxu1 %v4083_v20  ;;  %v7706_v27 = vpop.permute.xlu0 %4490  ;;  %v3944_v8 = vadd.f32 %v7685_v23, %v3856_v30  ;;  %v4078_v23 = vld [vmem:[#allocation2 + $0x1220] sm:$0xff]  ;;  %v4365_v30 = vld [vmem:[#allocation3 + $0x490] sm:$0xff] }
 0xb77   :  { %4142 = vmatmul.mubr.bf16.vlgmr.msra.gmra.mrb[36].mxu0 %v4082_v47  ;;  %4224 = vmatmul.mubr.bf16.vlgmr.msra.gmra.mrb[44].mxu1 %v4082_v47  ;;  %v7715_v20 = vpop.permute.xlu1 %4492  ;;  %v4337_v47 = vld [vmem:[#allocation3 + $0x320] sm:$0xff] }
 0xb78   :  { %4151 = vmatpush1.bf16.msra.mxu0 %v4018_v36  ;;  %4233 = vmatpush1.bf16.msra.mxu1 %v4020_v49  ;;  %v4341_v36 = vld [vmem:[#allocation3 + $0x350] sm:$0xff]  ;;  %v4050_v49 = vld [vmem:[#allocation2 + $0x1140] sm:$0xff] }
 0xb79   :  { %4152 = vmatprep.subr.bf16.mxu0 %v4023_v48  ;;  %4234 = vmatprep.subr.bf16.mxu1 %v4025_v52  ;;  %v4052_v48 = vld [vmem:[#allocation2 + $0x1150] sm:$0xff]  ;;  %v4055_v52 = vld [vmem:[#allocation2 + $0x1168] sm:$0xff] }
 0xb7a   :  { %4182 = vmatprep.mubr.bf16.mxu0 %v4085_v15  ;;  %4264 = vmatprep.mubr.bf16.mxu1 %v4085_v15  ;;  %v7713_v13 = vpop.permute.xlu0 %4496  ;;  %v4057_v15 = vld [vmem:[#allocation2 + $0x1178] sm:$0xff] }
 0xb7b   :  { %4610 = vrot.lane.b32.xlu1 %v4339_v33, %s6317_s11  ;;  %4606 = vrot.lane.b32.xlu0 %v4337_v47, %s6317_s11  ;;  %v7721_v56 = vpop.permute.xlu1 %4502  ;;  %v4070_v33 = vld [vmem:[#allocation2 + $0x11e0] sm:$0xff] }
 0xb7c   :  { %4153 = vmatpush1.bf16.msra.mxu0 %v4022_v57  ;;  %4235 = vmatpush1.bf16.msra.mxu1 %v4024_v50  ;;  %v4342_v57 = vld [vmem:[#allocation3 + $0x358] sm:$0xff]  ;;  %v4340_v50 = vld [vmem:[#allocation3 + $0x348] sm:$0xff] }
 0xb7d   :  { %4154 = vmatprep.subr.bf16.mxu0 %v4027_v60  ;;  %4236 = vmatprep.subr.bf16.mxu1 %v4029_v45  ;;  %v4054_v60 = vld [vmem:[#allocation2 + $0x1160] sm:$0xff]  ;;  %v4056_v45 = vld [vmem:[#allocation2 + $0x1170] sm:$0xff] }
 0xb7e   :  { %v7719_v2 = vpop.permute.xlu0 %4500 }
 0xb7f   :  { %4614 = vrot.lane.b32.xlu1 %v4341_v36, %s6317_s11  ;;  %4616 = vrot.lane.b32.xlu0 %v4342_v57, %s6317_s11  ;;  %v4349_v36 = vld [vmem:[#allocation3 + $0x3c0] sm:$0xff]  ;;  %v4081_v57 = vld [vmem:[#allocation2 + $0x1238] sm:$0xff] }
 0xb80   :  { %4155 = vmatpush1.bf16.msra.mxu0 %v4026_v54  ;;  %4237 = vmatpush1.bf16.msra.mxu1 %v4028_v16  ;;  %v7727_v16 = vpop.permute.xlu1 %4506 }
 0xb81   :  { %4156 = vmatprep.subr.bf16.mxu0 %v4031_v44  ;;  %4238 = vmatprep.subr.bf16.mxu1 %v4033_v62  ;;  %v4344_v44 = vld [vmem:[#allocation3 + $0x378] sm:$0xff]  ;;  %v4345_v62 = vld [vmem:[#allocation3 + $0x380] sm:$0xff] }
 0xb82   :  { %v7725_v54 = vpop.permute.xlu0 %4498 }
 0xb83   :  { %4612 = vrot.lane.b32.xlu1 %v4340_v50, %s6317_s11  ;;  %4620 = vrot.lane.b32.xlu0 %v4344_v44, %s6317_s11  ;;  %v4080_v44 = vld [vmem:[#allocation2 + $0x1230] sm:$0xff] }
 0xb84   :  { %4157 = vmatpush1.bf16.msra.mxu0 %v4030_v6  ;;  %4239 = vmatpush1.bf16.msra.mxu1 %v4032_v28  ;;  %v4063_v6 = vld [vmem:[#allocation2 + $0x11a8] sm:$0xff]  ;;  %v4065_v28 = vld [vmem:[#allocation2 + $0x11b8] sm:$0xff] }
 0xb85   :  { %4158 = vmatprep.subr.bf16.mxu0 %v4035_v32  ;;  %4240 = vmatprep.subr.bf16.mxu1 %v4037_v31  ;;  %v7733_v31 = vpop.permute.xlu1 %4504 }
 0xb86   :  { %v7731_v32 = vpop.permute.xlu0 %4508 }
 0xb87   :  { %4622 = vrot.lane.b32.xlu1 %v4345_v62, %s6317_s11  ;;  %4618 = vrot.lane.b32.xlu0 %v4343_v35, %s6317_s11  ;;  %v4680_v62 = vsel %vm2482_vm9, %v7700_v17, %v7706_v27  ;;  %v4356_v35 = vld [vmem:[#allocation3 + $0x418] sm:$0xff]  ;;  %v4682_v27 = vsel %vm2482_vm9, %v7709_v29, %v7713_v13  ;;  %v4359_v13 = vld [vmem:[#allocation3 + $0x440] sm:$0xff] }
 0xb88   :  { %4159 = vmatpush1.bf16.msra.mxu0 %v4034_v0  ;;  %4241 = vmatpush1.bf16.msra.mxu1 %v4036_v3  ;;  %v4062_v0 = vld [vmem:[#allocation2 + $0x11a0] sm:$0xff]  ;;  %v4064_v3 = vld [vmem:[#allocation2 + $0x11b0] sm:$0xff] }
 0xb89   :  { %4160 = vmatprep.subr.bf16.mxu0 %v4039_v21  ;;  %4242 = vmatprep.subr.bf16.mxu1 %v4041_v4  ;;  %v4067_v21 = vld [vmem:[#allocation2 + $0x11c8] sm:$0xff]  ;;  %v4069_v4 = vld [vmem:[#allocation2 + $0x11d8] sm:$0xff]  ;;  %v7739_v34 = vpop.permute.xlu1 %4514 }
 0xb8a   :  { %v7737_v7 = vpop.permute.xlu0 %4512 }
 0xb8b   :  { %4626 = vrot.lane.b32.xlu1 %v4347_v61, %s6317_s11  ;;  %v4357_v61 = vld [vmem:[#allocation3 + $0x420] sm:$0xff] }
 0xb8c   :  { %4161 = vmatpush1.bf16.msra.mxu0 %v4038_v9  ;;  %4243 = vmatpush1.bf16.msra.mxu1 %v4040_v55  ;;  %v4348_v9 = vld [vmem:[#allocation3 + $0x3a8] sm:$0xff]  ;;  %v4346_v55 = vld [vmem:[#allocation3 + $0x398] sm:$0xff] }
 0xb8d   :  { %4162 = vmatprep.subr.bf16.mxu0 %v4043_v10  ;;  %4244 = vmatprep.subr.bf16.mxu1 %v4045_v14  ;;  %v4066_v10 = vld [vmem:[#allocation2 + $0x11c0] sm:$0xff]  ;;  %v4068_v14 = vld [vmem:[#allocation2 + $0x11d0] sm:$0xff] }
 0xb8e   :  { %4628 = vrot.lane.b32.xlu0 %v4348_v9, %s6317_s11 }
 0xb8f   :  { %4624 = vrot.lane.b32.xlu1 %v4346_v55, %s6317_s11  ;;  %v4683_v55 = vsel %vm2482_vm9, %v7725_v54, %v7719_v2  ;;  %v4688_v54 = vsel %vm2482_vm9, %v7737_v7, %v7739_v34 }
 0xb90   :  { %4163 = vmatpush1.bf16.msra.mxu0 %v4042_v22  ;;  %4245 = vmatpush1.bf16.msra.mxu1 %v4044_v24  ;;  %v7743_v22 = vpop.permute.xlu0 %4510  ;;  %v7745_v24 = vpop.permute.xlu1 %4518 }
 0xb91   :  { %4164 = vmatprep.subr.bf16.mxu0 %v4047_v25  ;;  %4246 = vmatprep.subr.bf16.mxu1 %v4049_v26  ;;  %v4350_v25 = vld [vmem:[#allocation3 + $0x3c8] sm:$0xff]  ;;  %v4351_v26 = vld [vmem:[#allocation3 + $0x3d0] sm:$0xff] }
 0xb92   :  { %4632 = vrot.lane.b32.xlu0 %v4350_v25, %s6317_s11 }
 0xb93   :  { %4634 = vrot.lane.b32.xlu1 %v4351_v26, %s6317_s11  ;;  %v4687_v26 = vsel %vm2482_vm9, %v7743_v22, %v7737_v7  ;;  %v4366_v7 = vld [vmem:[#allocation3 + $0x498] sm:$0xff] }
 0xb94   :  { %4165 = vmatpush1.bf16.msra.mxu0 %v4046_v40  ;;  %4247 = vmatpush1.bf16.msra.mxu1 %v4048_v43  ;;  %v4072_v40 = vld [vmem:[#allocation2 + $0x11f0] sm:$0xff]  ;;  %v4075_v43 = vld [vmem:[#allocation2 + $0x1208] sm:$0xff]  ;;  %v7753_v47 = vpop.permute.xlu1 %4516 }
 0xb95   :  { %4166 = vmatprep.subr.bf16.mxu0 %v4051_v46  ;;  %4248 = vmatprep.subr.bf16.mxu1 %v4053_v39  ;;  %v4077_v46 = vld [vmem:[#allocation2 + $0x1218] sm:$0xff]  ;;  %v7751_v39 = vpop.permute.xlu0 %4520 }
 0xb96   :  { %4630 = vrot.lane.b32.xlu0 %v4349_v36, %s6317_s11 }
 0xb98   :  { %4167 = vmatpush1.bf16.msra.mxu0 %v4050_v49  ;;  %4249 = vmatpush1.bf16.msra.mxu1 %v4052_v48  ;;  %v4353_v49 = vld [vmem:[#allocation3 + $0x3f0] sm:$0xff]  ;;  %v4074_v48 = vld [vmem:[#allocation2 + $0x1200] sm:$0xff] }
 0xb99   :  { %4168 = vmatprep.subr.bf16.mxu0 %v4055_v52  ;;  %4250 = vmatprep.subr.bf16.mxu1 %v4057_v15  ;;  %v4076_v52 = vld [vmem:[#allocation2 + $0x1210] sm:$0xff]  ;;  %v4079_v15 = vld [vmem:[#allocation2 + $0x1228] sm:$0xff]  ;;  %v7758_v50 = vpop.permute.xlu0 %4524 }
 0xb9a   :  { %4638 = vrot.lane.b32.xlu1 %v4353_v49, %s6317_s11  ;;  %v4369_v49 = vld [vmem:[#allocation3 + $0x4c0] sm:$0xff] }
 0xb9c   :  { %4169 = vmatpush1.bf16.msra.mxu0 %v4054_v60  ;;  %4251 = vmatpush1.bf16.msra.mxu1 %v4056_v45  ;;  %v7760_v60 = vpop.permute.xlu1 %4526  ;;  %v4354_v45 = vld [vmem:[#allocation3 + $0x3f8] sm:$0xff] }
 0xb9d   :  { %4170 = vmatprep.subr.bf16.mxu0 %v4059_v5  ;;  %4252 = vmatprep.subr.bf16.mxu1 %v4061_v11  ;;  %v4352_v5 = vld [vmem:[#allocation3 + $0x3e8] sm:$0xff]  ;;  %v3952_v11 = vmax.f32 %v3944_v8, 0.0  ;;  %v4692_v22 = vsel %vm2482_vm9, %v7758_v50, %v7760_v60 }
 0xb9e   :  { %4640 = vrot.lane.b32.xlu0 %v4354_v45, %s6317_s11  ;;  %4636 = vrot.lane.b32.xlu1 %v4352_v5, %s6317_s11 }
 0xba0   :  { %4171 = vmatpush1.bf16.msra.mxu0 %v4058_v51  ;;  %4253 = vmatpush1.bf16.msra.mxu1 %v4060_v63  ;;  %v7767_v51 = vpop.permute.xlu0 %4522  ;;  %v7769_v63 = vpop.permute.xlu1 %4530 }
 0xba1   :  { %4172 = vmatprep.subr.bf16.mxu0 %v4063_v6  ;;  %4254 = vmatprep.subr.bf16.mxu1 %v4065_v28  ;;  %v4084_v6 = vpack.c.bf16 %v3952_v11, %v3952_v11  ;;  %v4679_v28 = vsel %vm2482_vm9, %v7703_v59, %v7700_v17  ;;  %v4355_v17 = vld [vmem:[#allocation3 + $0x410] sm:$0xff]  ;;  %v4684_v59 = vsel %vm2482_vm9, %v7719_v2, %v7721_v56  ;;  %v4358_v56 = vld [vmem:[#allocation3 + $0x438] sm:$0xff]  ;;  %v4362_v2 = vld [vmem:[#allocation3 + $0x468] sm:$0xff] }
 0xba2   :  { %4644 = vrot.lane.b32.xlu0 %v4356_v35, %s6317_s11  ;;  %4646 = vrot.lane.b32.xlu1 %v4357_v61, %s6317_s11  ;;  %v4691_v36 = vsel %vm2482_vm9, %v7767_v51, %v7758_v50  ;;  %v4371_v50 = vld [vmem:[#allocation3 + $0x4e0] sm:$0xff]  ;;  %v4372_v11 = vld [vmem:[#allocation3 + $0x4e8] sm:$0xff] }
 0xba4   :  { %4173 = vmatpush1.bf16.msra.mxu0 %v4062_v0  ;;  %4255 = vmatpush1.bf16.msra.mxu1 %v4064_v3  ;;  %v4533_v0 = vpop.permute.xlu0 %4532  ;;  %v7777_v3 = vpop.permute.xlu1 %4528 }
 0xba5   :  { %4174 = vmatprep.subr.bf16.mxu0 %v4067_v21  ;;  %4256 = vmatprep.subr.bf16.mxu1 %v4069_v4  ;;  %v4681_v21 = vsel %vm2482_vm9, %v7715_v20, %v7709_v29  ;;  %v4360_v29 = vld [vmem:[#allocation3 + $0x448] sm:$0xff]  ;;  %v4686_v20 = vsel %vm2482_vm9, %v7727_v16, %v7731_v32  ;;  %v4363_v32 = vld [vmem:[#allocation3 + $0x470] sm:$0xff] }
 0xba6   :  { %4642 = vrot.lane.b32.xlu0 %v4355_v17, %s6317_s11  ;;  %4650 = vrot.lane.b32.xlu1 %v4359_v13, %s6317_s11 }
 0xba8   :  { %4175 = vmatpush1.bf16.msra.mxu0 %v4066_v10  ;;  %4257 = vmatpush1.bf16.msra.mxu1 %v4068_v14  ;;  %v7787_v4 = vpop.permute.xlu0 %4536  ;;  %v4539_v9 = vpop.permute.xlu1 %4538 }
 0xba9   :  { %4176 = vmatprep.subr.bf16.mxu0 %v4071_v18  ;;  %4258 = vmatprep.subr.bf16.mxu1 %v4073_v19  ;;  %v4685_v18 = vsel %vm2482_vm9, %v7733_v31, %v7727_v16  ;;  %v4361_v16 = vld [vmem:[#allocation3 + $0x460] sm:$0xff]  ;;  %v4690_v31 = vsel %vm2482_vm9, %v7745_v24, %v7751_v39 }
 0xbaa   :  { %4652 = vrot.lane.b32.xlu0 %v4360_v29, %s6317_s11  ;;  %4648 = vrot.lane.b32.xlu1 %v4358_v56, %s6317_s11 }
 0xbac   :  { %4177 = vmatpush1.bf16.msra.mxu0 %v4070_v33  ;;  %4259 = vmatpush1.bf16.msra.mxu1 %v4072_v40  ;;  %v4535_v10 = vpop.permute.xlu0 %4534  ;;  %v7797_v14 = vpop.permute.xlu1 %4542  ;;  %v4689_v40 = vsel %vm2482_vm9, %v7753_v47, %v7745_v24  ;;  %v4368_v24 = vld [vmem:[#allocation3 + $0x4b8] sm:$0xff]  ;;  %v4694_v47 = vsel %vm2482_vm9, %v7769_v63, %v4533_v0 }
 0xbad   :  { %4178 = vmatprep.subr.bf16.mxu0 %v4075_v43  ;;  %4260 = vmatprep.subr.bf16.mxu1 %v4077_v46  ;;  %v4364_v43 = vld [vmem:[#allocation3 + $0x488] sm:$0xff]  ;;  %v4695_v5 = vsel %vm2482_vm9, %v4535_v10, %v7787_v4 }
 0xbae   :  { %4656 = vrot.lane.b32.xlu0 %v4362_v2, %s6317_s11  ;;  %4658 = vrot.lane.b32.xlu1 %v4363_v32, %s6317_s11 }
 0xbb0   :  { %4179 = vmatpush1.bf16.msra.mxu0 %v4074_v48  ;;  %4261 = vmatpush1.bf16.msra.mxu1 %v4076_v52  ;;  %v4545_v19 = vpop.permute.xlu0 %4544  ;;  %v4541_v25 = vpop.permute.xlu1 %4540  ;;  %v4693_v52 = vsel %vm2482_vm9, %v7777_v3, %v7769_v63 }
 0xbb1   :  { %4180 = vmatprep.subr.bf16.mxu0 %v4079_v15  ;;  %4262 = vmatprep.subr.bf16.mxu1 %v4081_v57  ;;  %v4367_v15 = vld [vmem:[#allocation3 + $0x4b0] sm:$0xff]  ;;  %v4696_v57 = vsel %vm2482_vm9, %v7787_v4, %v4539_v9  ;;  %v4697_v63 = vsel %vm2482_vm9, %v4541_v25, %v7797_v14 }
 0xbb2   :  { %4654 = vrot.lane.b32.xlu0 %v4361_v16, %s6317_s11  ;;  %4662 = vrot.lane.b32.xlu1 %v4365_v30, %s6317_s11 }
 0xbb4   :  { %4181 = vmatpush1.bf16.msra.mxu0 %v4078_v23  ;;  %4263 = vmatpush1.bf16.msra.mxu1 %v4080_v44  ;;  %v4549_v34 = vpop.permute.xlu0 %4548  ;;  %v4551_v33 = vpop.permute.xlu1 %4550  ;;  %v4698_v23 = vsel %vm2482_vm9, %v7797_v14, %v4545_v19  ;;  %v4370_v44 = vld [vmem:[#allocation3 + $0x4d8] sm:$0xff] }
 0xbb5   :  { %4807 = vmatprep.subr.bf16.mxu0 %v4680_v62 }
 0xbb6   :  { %4664 = vrot.lane.b32.xlu0 %v4366_v7, %s6317_s11  ;;  %4660 = vrot.lane.b32.xlu1 %v4364_v43, %s6317_s11 }
 0xbb7   :  { %4183 = vmatmul.mubr.bf16.vlgmr.msra.gmra.mrb[36].mxu0 %v4084_v6  ;;  %4265 = vmatmul.mubr.bf16.vlgmr.msra.gmra.mrb[44].mxu1 %v4084_v6  ;;  %v4700_v6 = vsel %vm2482_vm9, %v4549_v34, %v4551_v33 }
 0xbb8   :  { %4808 = vmatpush1.bf16.msra.mxu0 %v4679_v28  ;;  %v4547_v46 = vpop.permute.xlu0 %4546  ;;  %v4555_v39 = vpop.permute.xlu1 %4554 }
 0xbb9   :  { %4809 = vmatprep.subr.bf16.mxu0 %v4682_v27  ;;  %v4699_v27 = vsel %vm2482_vm9, %v4547_v46, %v4549_v34 }
 0xbba   :  { %4668 = vrot.lane.b32.xlu0 %v4368_v24, %s6317_s11  ;;  %4670 = vrot.lane.b32.xlu1 %v4369_v49, %s6317_s11 }
 0xbbc   :  { %4810 = vmatpush1.bf16.msra.mxu0 %v4681_v21  ;;  %v4557_v8 = vpop.permute.xlu0 %4556  ;;  %v4553_v48 = vpop.permute.xlu1 %4552 }
 0xbbd   :  { %4811 = vmatprep.subr.bf16.mxu0 %v4684_v59  ;;  %v4702_v61 = vsel %vm2482_vm9, %v4555_v39, %v4557_v8  ;;  %v4701_v21 = vsel %vm2482_vm9, %v4553_v48, %v4555_v39 }
 0xbbe   :  { %4666 = vrot.lane.b32.xlu0 %v4367_v15, %s6317_s11  ;;  %4674 = vrot.lane.b32.xlu1 %v4371_v50, %s6317_s11  ;;  %v7878_v50 = vld [vmem:[#allocation7 + $0x22] ss:$8 sm:$0xf] }
 0xbc0   :  { %4812 = vmatpush1.bf16.msra.mxu0 %v4683_v55  ;;  %v4561_v60 = vpop.permute.xlu0 %4560  ;;  %v4563_v45 = vpop.permute.xlu1 %4562 }
 0xbc1   :  { %4813 = vmatprep.subr.bf16.mxu0 %v4686_v20  ;;  %v4704_v17 = vsel %vm2482_vm9, %v4561_v60, %v4563_v45  ;;  %v4096_v45 = vrot.slane %v7878_v50, %v7344_v42 }
 0xbc2   :  { %4676 = vrot.lane.b32.xlu0 %v4372_v11, %s6317_s11  ;;  %4672 = vrot.lane.b32.xlu1 %v4370_v44, %s6317_s11 }
 0xbc4   :  { %4814 = vmatpush1.bf16.msra.mxu0 %v4685_v18  ;;  %v4559_v62 = vpop.permute.xlu0 %4558  ;;  %v4567_v51 = vpop.permute.xlu1 %4566 }
 0xbc5   :  { %4815 = vmatprep.subr.bf16.mxu0 %v4688_v54  ;;  %v4703_v59 = vsel %vm2482_vm9, %v4559_v62, %v4561_v60  ;;  %v4092_v60 = vrot.slane %v7878_v50, %v7340_v38 }
 0xbc8   :  { %4816 = vmatpush1.bf16.msra.mxu0 %v4687_v26  ;;  %v4569_v28 = vpop.permute.xlu0 %4568  ;;  %v4565_v35 = vpop.permute.xlu1 %4564 }
 0xbc9   :  { %4817 = vmatprep.subr.bf16.mxu0 %v4690_v31  ;;  %v4706_v9 = vsel %vm2482_vm9, %v4567_v51, %v4569_v28  ;;  %v4705_v55 = vsel %vm2482_vm9, %v4565_v35, %v4567_v51 }
 0xbcc   :  { %4818 = vmatpush1.bf16.msra.mxu0 %v4689_v40  ;;  %v4573_v0 = vpop.permute.xlu0 %4572  ;;  %v4575_v3 = vpop.permute.xlu1 %4574 }
 0xbcd   :  { %4819 = vmatprep.subr.bf16.mxu0 %v4692_v22  ;;  %v4708_v29 = vsel %vm2482_vm9, %v4573_v0, %v4575_v3 }
 0xbd0   :  { %4820 = vmatpush1.bf16.msra.mxu0 %v4691_v36  ;;  %v4571_v13 = vpop.permute.xlu0 %4570  ;;  %v4579_v4 = vpop.permute.xlu1 %4578 }
 0xbd1   :  { %4821 = vmatprep.subr.bf16.mxu0 %v4694_v47  ;;  %v4707_v10 = vsel %vm2482_vm9, %v4571_v13, %v4573_v0 }
 0xbd4   :  { %4822 = vmatpush1.bf16.msra.mxu0 %v4693_v52  ;;  %v4581_v20 = vpop.permute.xlu0 %4580  ;;  %v4577_v56 = vpop.permute.xlu1 %4576 }
 0xbd5   :  { %4823 = vmatprep.subr.bf16.mxu0 %v4696_v57  ;;  %v4710_v14 = vsel %vm2482_vm9, %v4579_v4, %v4581_v20  ;;  %v4709_v18 = vsel %vm2482_vm9, %v4577_v56, %v4579_v4 }
 0xbd8   :  { %4824 = vmatpush1.bf16.msra.mxu0 %v4695_v5  ;;  %v4585_v2 = vpop.permute.xlu0 %4584  ;;  %v4587_v54 = vpop.permute.xlu1 %4586  ;;  %v4104_v5 = vrot.slane %v7878_v50, %v7342_v41 }
 0xbd9   :  { %4825 = vmatprep.subr.bf16.mxu0 %v4698_v23  ;;  %v4712_v32 = vsel %vm2482_vm9, %v4585_v2, %v4587_v54 }
 0xbdc   :  { %4826 = vmatpush1.bf16.msra.mxu0 %v4697_v63  ;;  %v4583_v19 = vpop.permute.xlu0 %4582  ;;  %v4591_v25 = vpop.permute.xlu1 %4590 }
 0xbdd   :  { %4827 = vmatprep.subr.bf16.mxu0 %v4700_v6  ;;  %v4711_v20 = vsel %vm2482_vm9, %v4583_v19, %v4585_v2 }
 0xbe0   :  { %4828 = vmatpush1.bf16.msra.mxu0 %v4699_v27  ;;  %v4593_v26 = vpop.permute.xlu0 %4592  ;;  %v4589_v16 = vpop.permute.xlu1 %4588 }
 0xbe1   :  { %4829 = vmatprep.subr.bf16.mxu0 %v4702_v61  ;;  %v4714_v56 = vsel %vm2482_vm9, %v4591_v25, %v4593_v26 }
 0xbe4   :  { %4830 = vmatpush1.bf16.msra.mxu0 %v4701_v21  ;;  %v4597_v31 = vpop.permute.xlu0 %4596  ;;  %v4599_v30 = vpop.permute.xlu1 %4598 }
 0xbe5   :  { %4831 = vmatprep.subr.bf16.mxu0 %v4704_v17  ;;  %v4716_v54 = vsel %vm2482_vm9, %v4597_v31, %v4599_v30 }
 0xbe8   :  { %4832 = vmatpush1.bf16.msra.mxu0 %v4703_v59  ;;  %v4595_v34 = vpop.permute.xlu0 %4594  ;;  %v4603_v33 = vpop.permute.xlu1 %4602 }
 0xbe9   :  { %4833 = vmatprep.subr.bf16.mxu0 %v4706_v9 }
 0xbec   :  { %4834 = vmatpush1.bf16.msra.mxu0 %v4705_v55  ;;  %v4605_v40 = vpop.permute.xlu0 %4604  ;;  %v4601_v7 = vpop.permute.xlu1 %4600 }
 0xbed   :  { %4835 = vmatprep.subr.bf16.mxu0 %v4708_v29  ;;  %v4717_v26 = vsel %vm2482_vm9, %v4601_v7, %v4603_v33 }
 0xbf0   :  { %4836 = vmatpush1.bf16.msra.mxu0 %v4707_v10  ;;  %v7860_v22 = vpop.permute.xlu0 %4608  ;;  %v4611_v43 = vpop.permute.xlu1 %4610 }
 0xbf1   :  { %4837 = vmatprep.subr.bf16.mxu0 %v4710_v14  ;;  %v4713_v14 = vsel %vm2482_vm9, %v4589_v16, %v4591_v25 }
 0xbf4   :  { %4838 = vmatpush1.bf16.msra.mxu0 %v4709_v18  ;;  %v4607_v46 = vpop.permute.xlu0 %4606  ;;  %v7862_v39 = vpop.permute.xlu1 %4614 }
 0xbf5   :  { %4848 = vmatprep.subr.bf16.mxu0 %v4712_v32  ;;  %v4715_v32 = vsel %vm2482_vm9, %v4595_v34, %v4597_v31  ;;  %v4719_v16 = vsel %vm2482_vm9, %v4607_v46, %v7860_v22 }
 0xbf8   :  { %v4617_v36 = vpop.permute.xlu0 %4616  ;;  %v7864_v24 = vpop.permute.xlu1 %4612 }
 0xbf9   :  { %v4722_v31 = vsel %vm2482_vm9, %v7862_v39, %v4617_v36  ;;  %v4721_v34 = vsel %vm2482_vm9, %v7864_v24, %v7862_v39 }
 0xbfc   :  { %v7866_v47 = vpop.permute.xlu0 %4620  ;;  %v4623_v49 = vpop.permute.xlu1 %4622 }
 0xc00   :  { %v7868_v8 = vpop.permute.xlu0 %4618  ;;  %v7870_v48 = vpop.permute.xlu1 %4626 }
 0xc04   :  { %v7872_v52 = vpop.permute.xlu0 %4628  ;;  %v7874_v15 = vpop.permute.xlu1 %4624 }
 0xc05   :  { %v4725_v39 = vsel %vm2482_vm9, %v7874_v15, %v7870_v48 }
 0xc08   :  { %v7876_v57 = vpop.permute.xlu0 %4632  ;;  %v7886_v11 = vpop.permute.xlu1 %4634 }
 0xc09   :  { %v4728_v24 = vsel %vm2482_vm9, %v7876_v57, %v7886_v11 }
 0xc0c   :  { %v7888_v23 = vpop.permute.xlu0 %4630  ;;  %v4639_v4 = vpop.permute.xlu1 %4638 }
 0xc10   :  { %v4641_v55 = vpop.permute.xlu0 %4640  ;;  %v4637_v10 = vpop.permute.xlu1 %4636 }
 0xc14   :  { %v4645_v18 = vpop.permute.xlu0 %4644  ;;  %v4647_v2 = vpop.permute.xlu1 %4646 }
 0xc18   :  { %v4643_v19 = vpop.permute.xlu0 %4642  ;;  %v4651_v25 = vpop.permute.xlu1 %4650 }
 0xc19   :  { %v4731_v11 = vsel %vm2482_vm9, %v4643_v19, %v4645_v18 }
 0xc1c   :  { %v4653_v30 = vpop.permute.xlu0 %4652 }
 0xc20   :  { %v4657_v7 = vpop.permute.xlu0 %4656 }
 0xc24   :  { %v4655_v36 = vpop.permute.xlu0 %4654 }
 0xc8a   :  { %v4184_v44 = vpop.f32.mrb[36].mxu0  ;;  %v7890_v62 = vpop.f32.mrb[44].mxu1 }
 0xc8b   :  { %v6174_v51 = vadd.f32 %v4184_v44, %v4092_v60  ;;  %v4186_v63 = vpop.f32.mrb[37].mxu0  ;;  %v4268_v6 = vpop.f32.mrb[45].mxu1  ;;  %v4718_v60 = vsel %vm2482_vm9, %v4603_v33, %v4605_v40  ;;  %v4724_v33 = vsel %vm2482_vm9, %v7866_v47, %v4623_v49  ;;  %v4730_v49 = vsel %vm2482_vm9, %v4639_v4, %v4641_v55 }
 0xc8c   :  { %v6175_v28 = vadd.f32 %v4186_v63, %v4096_v45  ;;  %v6177_v35 = vadd.f32 %v4268_v6, %v4104_v5  ;;  %v4188_v27 = vpop.f32.mrb[38].mxu0  ;;  %v4270_v61 = vpop.f32.mrb[46].mxu1  ;;  %v4720_v45 = vsel %vm2482_vm9, %v7860_v22, %v4611_v43  ;;  %v4723_v22 = vsel %vm2482_vm9, %v7868_v8, %v7866_v47 }
 0xc8d   :  { %v4273_v0 = vmax.f32 %v6174_v51, 0.0  ;;  %v4189_v3 = vpop.f32.mrb[39].mxu0  ;;  %v4271_v21 = vpop.f32.mrb[47].mxu1  ;;  %v4726_v43 = vsel %vm2482_vm9, %v7870_v48, %v7872_v52  ;;  %v4727_v47 = vsel %vm2482_vm9, %v7888_v23, %v7876_v57  ;;  %v4729_v5 = vsel %vm2482_vm9, %v4637_v10, %v4639_v4 }
 0xc8e   :  { %v4274_v17 = vmax.f32 %v6175_v28, 0.0  ;;  %v4276_v59 = vmax.f32 %v6177_v35, 0.0  ;;  %v4649_v40 = vpop.permute.xlu1 %4648  ;;  %v4665_v52 = vpop.permute.xlu0 %4664  ;;  %v4732_v48 = vsel %vm2482_vm9, %v4645_v18, %v4647_v2  ;;  %v4734_v51 = vsel %vm2482_vm9, %v4651_v25, %v4653_v30 }
 0xc8f   :  { %v4373_v9 = vpack.c.bf16 %v4273_v0, %v4273_v0  ;;  %v4733_v57 = vsel %vm2482_vm9, %v4649_v40, %v4651_v25  ;;  %v4735_v28 = vsel %vm2482_vm9, %v4655_v36, %v4657_v7  ;;  %v4100_v27 = vrot.slane %v7878_v50, %v7338_v37 }
 0xc90   :  { %v4374_v13 = vpack.c.bf16 %v4274_v17, %v4274_v17  ;;  %v4376_v29 = vpack.c.bf16 %v4276_v59, %v4276_v59 }
 0xc91   :  { %v6176_v17 = vadd.f32 %v7890_v62, %v4100_v27 }
 0xc92   :  { %4839 = vmatprep.mubr.bf16.mxu0 %v4374_v13  ;;  %v4659_v46 = vpop.permute.xlu1 %4658  ;;  %v4669_v44 = vpop.permute.xlu0 %4668 }
 0xc93   :  { %4840 = vmatmul.mubr.bf16.vlgmr.msra.gmra.mrb[40].mxu0 %v4373_v9  ;;  %v4736_v23 = vsel %vm2482_vm9, %v4657_v7, %v4659_v46  ;;  %v4275_v9 = vmax.f32 %v6176_v17, 0.0 }
 0xc94   :  { %4849 = vmatpush1.bf16.msra.mxu0 %v4711_v20  ;;  %4880 = vmatprep.mubr.bf16.mxu0 %v4376_v29  ;;  %v4378_v29 = vld [vmem:[#allocation7 + $0x23] ss:$8 sm:$0x3] }
 0xc95   :  { %4850 = vmatprep.subr.bf16.mxu0 %v4714_v56  ;;  %v4375_v55 = vpack.c.bf16 %v4275_v9, %v4275_v9  ;;  %v4383_v20 = vrot.slane %v4378_v29, %v7340_v38  ;;  %v4387_v56 = vrot.slane %v4378_v29, %v7344_v42 }
 0xc96   :  { %v4663_v8 = vpop.permute.xlu1 %4662  ;;  %v4667_v6 = vpop.permute.xlu0 %4666 }
 0xc97   :  { %v4738_v35 = vsel %vm2482_vm9, %v4663_v8, %v4665_v52  ;;  %v4739_v13 = vsel %vm2482_vm9, %v4667_v6, %v4669_v44 }
 0xc98   :  { %4851 = vmatpush1.bf16.msra.mxu0 %v4713_v14 }
 0xc99   :  { %4852 = vmatprep.subr.bf16.mxu0 %v4716_v54 }
 0xc9a   :  { %v4661_v15 = vpop.permute.xlu1 %4660  ;;  %v4677_v3 = vpop.permute.xlu0 %4676 }
 0xc9b   :  { %v4737_v0 = vsel %vm2482_vm9, %v4661_v15, %v4663_v8 }
 0xc9c   :  { %4853 = vmatpush1.bf16.msra.mxu0 %v4715_v32 }
 0xc9d   :  { %4854 = vmatprep.subr.bf16.mxu0 %v4718_v60 }
 0xc9e   :  { %v4671_v63 = vpop.permute.xlu1 %4670 }
 0xc9f   :  { %v4740_v21 = vsel %vm2482_vm9, %v4669_v44, %v4671_v63 }
 0xca0   :  { %4855 = vmatpush1.bf16.msra.mxu0 %v4717_v26 }
 0xca1   :  { %4856 = vmatprep.subr.bf16.mxu0 %v4720_v45 }
 0xca2   :  { %v4675_v61 = vpop.permute.xlu1 %4674 }
 0xca3   :  { %v4742_v59 = vsel %vm2482_vm9, %v4675_v61, %v4677_v3 }
 0xca4   :  { %4857 = vmatpush1.bf16.msra.mxu0 %v4719_v16 }
 0xca5   :  { %4858 = vmatprep.subr.bf16.mxu0 %v4722_v31 }
 0xca6   :  { %v4673_v4 = vpop.permute.xlu1 %4672 }
 0xca7   :  { %v4741_v50 = vsel %vm2482_vm9, %v4673_v4, %v4675_v61 }
 0xca8   :  { %4859 = vmatpush1.bf16.msra.mxu0 %v4721_v34 }
 0xca9   :  { %4860 = vmatprep.subr.bf16.mxu0 %v4724_v33 }
 0xcac   :  { %4861 = vmatpush1.bf16.msra.mxu0 %v4723_v22 }
 0xcad   :  { %4862 = vmatprep.subr.bf16.mxu0 %v4726_v43 }
 0xcb0   :  { %4863 = vmatpush1.bf16.msra.mxu0 %v4725_v39 }
 0xcb1   :  { %4864 = vmatprep.subr.bf16.mxu0 %v4728_v24 }
 0xcb4   :  { %4865 = vmatpush1.bf16.msra.mxu0 %v4727_v47 }
 0xcb5   :  { %4866 = vmatprep.subr.bf16.mxu0 %v4730_v49 }
 0xcb8   :  { %4867 = vmatpush1.bf16.msra.mxu0 %v4729_v5 }
 0xcb9   :  { %4868 = vmatprep.subr.bf16.mxu0 %v4732_v48 }
 0xcbc   :  { %4869 = vmatpush1.bf16.msra.mxu0 %v4731_v11 }
 0xcbd   :  { %4870 = vmatprep.subr.bf16.mxu0 %v4734_v51 }
 0xcc0   :  { %4871 = vmatpush1.bf16.msra.mxu0 %v4733_v57 }
 0xcc1   :  { %4872 = vmatprep.subr.bf16.mxu0 %v4736_v23 }
 0xcc4   :  { %4873 = vmatpush1.bf16.msra.mxu0 %v4735_v28 }
 0xcc5   :  { %4874 = vmatprep.subr.bf16.mxu0 %v4738_v35 }
 0xcc8   :  { %4875 = vmatpush1.bf16.msra.mxu0 %v4737_v0 }
 0xcc9   :  { %4876 = vmatprep.subr.bf16.mxu0 %v4740_v21 }
 0xccc   :  { %4877 = vmatpush1.bf16.msra.mxu0 %v4739_v13 }
 0xccd   :  { %4878 = vmatprep.subr.bf16.mxu0 %v4742_v59 }
 0xcd0   :  { %4879 = vmatpush1.bf16.msra.mxu0 %v4741_v50 }
 0xcd3   :  { %4881 = vmatmul.mubr.bf16.vlgmr.msra.gmra.mrb[40].mxu0 %v4375_v55 }
 0xda6   :  { %v4882_v62 = vpop.f32.mrb[40].mxu0 }
 0xda7   :  { %v6178_v10 = vadd.f32 %v4882_v62, %v4383_v20  ;;  %v4884_v14 = vpop.f32.mrb[41].mxu0 }
 0xda8   :  { %v7944_v18 = vadd.f32 %v4884_v14, %v4387_v56  ;;  %v4886_v54 = vpop.f32.mrb[42].mxu0 }
 0xda9   :  { %v4887_v32 = vpop.f32.mrb[43].mxu0 }
 0xdaa   :  { %6312 = dma.done.wait [#allocation4 + $0x4], 1024 }
 0xdab   :  { %6313 = vsyncadd [#allocation4 + $0x4], 4294966272  ;;  %4956 = vmatprep.mubr.bf16.mxu1 %v6339_v53  ;;  %5894 = vst [vmem:[%s8229_s4] sm:$0xff] %v6178_v10  ;;  %v5011_v60 = vld [vmem:[#allocation3 + $0x18] sm:$0xff]  ;;  %v5010_v2 = vld [vmem:[#allocation3 + $0x10] sm:$0xff]  ;;  %vm5411_vm10 = vcmask 785408   ;;  %vm6341_vm11 = vmmov 0  }
 0xdac   :  { %v4894_v19 = vld [vmem:[#allocation2 + $0x1248] sm:$0xff]  ;;  %5221 = vrot.lane.b32.xlu0 %v5011_v60, %s6340_s2  ;;  %5219 = vrot.lane.b32.xlu1 %v5010_v2, %s6340_s2  ;;  %v4893_v26 = vld [vmem:[#allocation2 + $0x1240] sm:$0xff]  ;;  %v5013_v34 = vld [vmem:[#allocation3 + $0x38] sm:$0xff]  ;;  %vm5892_vm14 = vcmask 850944  }
 0xdad   :  { %4924 = vmatprep.subr.bf16.mxu1 %v4894_v19  ;;  %v7952_v45 = vld [vmem:[#allocation3 + $0x20] sm:$0xff]  ;;  %v4898_v16 = vld [vmem:[#allocation2 + $0x1268] sm:$0xff]  ;;  %v7964_v40 = vld [vmem:[#allocation3 + $0x70] sm:$0xff] }
 0xdae   :  { %v5014_v25 = vld [vmem:[#allocation3 + $0x40] sm:$0xff]  ;;  %4925 = vmatpush1.bf16.msra.mxu1 %v4893_v26  ;;  %v7957_v31 = vld [vmem:[#allocation3 + $0x48] sm:$0xff]  ;;  %v5020_v22 = vld [vmem:[#allocation3 + $0x90] sm:$0xff] }
 0xdaf   :  { %4926 = vmatprep.subr.bf16.mxu1 %v4898_v16  ;;  %v4897_v30 = vld [vmem:[#allocation2 + $0x1260] sm:$0xff]  ;;  %v5017_v33 = vld [vmem:[#allocation3 + $0x68] sm:$0xff]  ;;  %v4896_v43 = vld [vmem:[#allocation2 + $0x1258] sm:$0xff] }
 0xdb0   :  { %5223 = vrot.lane.b32.xlu0 %v7952_v45, %s6340_s2  ;;  %5227 = vrot.lane.b32.xlu1 %v5014_v25, %s6340_s2  ;;  %v5016_v7 = vld [vmem:[#allocation3 + $0x60] sm:$0xff]  ;;  %v4895_v46 = vld [vmem:[#allocation2 + $0x1250] sm:$0xff]  ;;  %v4900_v39 = vld [vmem:[#allocation2 + $0x1278] sm:$0xff] }
 0xdb1   :  { %v4899_v36 = vld [vmem:[#allocation2 + $0x1270] sm:$0xff]  ;;  %v7972_v24 = vld [vmem:[#allocation3 + $0x98] sm:$0xff]  ;;  %v7977_v49 = vld [vmem:[#allocation3 + $0xc0] sm:$0xff] }
 0xdb2   :  { %4927 = vmatpush1.bf16.msra.mxu1 %v4897_v30  ;;  %v5023_v47 = vld [vmem:[#allocation3 + $0xb8] sm:$0xff]  ;;  %v5022_v8 = vld [vmem:[#allocation3 + $0xb0] sm:$0xff]  ;;  %v5026_v52 = vld [vmem:[#allocation3 + $0xe0] sm:$0xff] }
 0xdb3   :  { %4965 = vmatprep.subr.bf16.mxu1 %v4896_v43  ;;  %v7986_v5 = vld [vmem:[#allocation3 + $0xe8] sm:$0xff]  ;;  %v5025_v48 = vld [vmem:[#allocation3 + $0xd8] sm:$0xff]  ;;  %v7991_v15 = vld [vmem:[#allocation3 + $0x110] sm:$0xff] }
 0xdb4   :  { %5229 = vrot.lane.b32.xlu0 %v7957_v31, %s6340_s2  ;;  %5225 = vrot.lane.b32.xlu1 %v5013_v34, %s6340_s2  ;;  %v5028_v11 = vld [vmem:[#allocation3 + $0x100] sm:$0xff]  ;;  %v5032_v44 = vld [vmem:[#allocation3 + $0x130] sm:$0xff]  ;;  %v7998_v51 = vld [vmem:[#allocation3 + $0x138] sm:$0xff] }
 0xdb5   :  { %5991 = vmatmul.mubr.msk.bf16.vlgmr.msra.gmra.mrb[48].mxu1 %vm2482_vm9, %v7627_v12  ;;  %v5031_v57 = vld [vmem:[#allocation3 + $0x128] sm:$0xff]  ;;  %v5035_v23 = vld [vmem:[#allocation3 + $0x158] sm:$0xff]  ;;  %v8003_v63 = vld [vmem:[#allocation3 + $0x160] sm:$0xff] }
 0xdb6   :  { %4997 = vmatprep.mubr.bf16.mxu1 %v6339_v53  ;;  %4966 = vmatpush1.bf16.msra.mxu1 %v4895_v46  ;;  %v5019_v53 = vld [vmem:[#allocation3 + $0x88] sm:$0xff]  ;;  %v5034_v6 = vld [vmem:[#allocation3 + $0x150] sm:$0xff]  ;;  %v5038_v28 = vld [vmem:[#allocation3 + $0x180] sm:$0xff] }
 0xdb7   :  { %4967 = vmatprep.subr.bf16.mxu1 %v4900_v39  ;;  %v8010_v35 = vld [vmem:[#allocation3 + $0x188] sm:$0xff]  ;;  %v5037_v27 = vld [vmem:[#allocation3 + $0x178] sm:$0xff]  ;;  %v8015_v0 = vld [vmem:[#allocation3 + $0x1b0] sm:$0xff] }
 0xdb8   :  { %5233 = vrot.lane.b32.xlu0 %v5017_v33, %s6340_s2  ;;  %5235 = vrot.lane.b32.xlu1 %v7964_v40, %s6340_s2  ;;  %v5041_v61 = vld [vmem:[#allocation3 + $0x1a8] sm:$0xff]  ;;  %v5040_v3 = vld [vmem:[#allocation3 + $0x1a0] sm:$0xff]  ;;  %v5044_v21 = vld [vmem:[#allocation3 + $0x1d0] sm:$0xff] }
 0xdb9   :  { %v8022_v17 = vld [vmem:[#allocation3 + $0x1d8] sm:$0xff]  ;;  %v5043_v59 = vld [vmem:[#allocation3 + $0x1c8] sm:$0xff]  ;;  %v8027_v4 = vld [vmem:[#allocation3 + $0x200] sm:$0xff] }
 0xdba   :  { %4968 = vmatpush1.bf16.msra.mxu1 %v4899_v36  ;;  %v5047_v13 = vld [vmem:[#allocation3 + $0x1f8] sm:$0xff]  ;;  %v5046_v9 = vld [vmem:[#allocation3 + $0x1f0] sm:$0xff]  ;;  %v5050_v50 = vld [vmem:[#allocation3 + $0x220] sm:$0xff] }
 0xdbb   :  { %v8034_v55 = vld [vmem:[#allocation3 + $0x228] sm:$0xff]  ;;  %v5049_v29 = vld [vmem:[#allocation3 + $0x218] sm:$0xff]  ;;  %v8039_v56 = vld [vmem:[#allocation3 + $0x250] sm:$0xff] }
 0xdbc   :  { %5231 = vrot.lane.b32.xlu0 %v5016_v7, %s6340_s2  ;;  %5239 = vrot.lane.b32.xlu1 %v5020_v22, %s6340_s2  ;;  %v5053_v20 = vld [vmem:[#allocation3 + $0x248] sm:$0xff]  ;;  %v5052_v62 = vld [vmem:[#allocation3 + $0x240] sm:$0xff]  ;;  %v5056_v10 = vld [vmem:[#allocation3 + $0x270] sm:$0xff] }
 0xdbd   :  { %5992 = vmatmul.mubr.msk.bf16.vlgmr.msra.gmra.mrb[52].mxu1 %vm2482_vm9, %v7627_v12  ;;  %v5029_v12 = vld [vmem:[#allocation3 + $0x108] sm:$0xff]  ;;  %v8046_v14 = vld [vmem:[#allocation3 + $0x278] sm:$0xff]  ;;  %v5060_v60 = vld [vmem:[#allocation3 + $0x2a0] sm:$0xff] }
 0xdbe   :  { %v5055_v54 = vld [vmem:[#allocation3 + $0x268] sm:$0xff]  ;;  %v5059_v32 = vld [vmem:[#allocation3 + $0x298] sm:$0xff]  ;;  %v5058_v2 = vld [vmem:[#allocation3 + $0x290] sm:$0xff] }
 0xdbf   :  { %v5062_v19 = vld [vmem:[#allocation3 + $0x2c0] sm:$0xff]  ;;  %v5063_v26 = vld [vmem:[#allocation3 + $0x2c8] sm:$0xff]  ;;  %v5061_v25 = vld [vmem:[#allocation3 + $0x2b8] sm:$0xff] }
 0xdc0   :  { %5241 = vrot.lane.b32.xlu0 %v7972_v24, %s6340_s2  ;;  %5237 = vrot.lane.b32.xlu1 %v5019_v53, %s6340_s2  ;;  %v5065_v16 = vld [vmem:[#allocation3 + $0x2e8] sm:$0xff]  ;;  %v5066_v30 = vld [vmem:[#allocation3 + $0x2f0] sm:$0xff]  ;;  %v5064_v34 = vld [vmem:[#allocation3 + $0x2e0] sm:$0xff] }
 0xdc1   :  { %v5068_v33 = vld [vmem:[#allocation3 + $0x310] sm:$0xff]  ;;  %v5069_v7 = vld [vmem:[#allocation3 + $0x318] sm:$0xff]  ;;  %v5067_v22 = vld [vmem:[#allocation3 + $0x308] sm:$0xff] }
 0xdc2   :  { %v5071_v39 = vld [vmem:[#allocation3 + $0x338] sm:$0xff]  ;;  %v5072_v36 = vld [vmem:[#allocation3 + $0x340] sm:$0xff] }
 0xdc4   :  { %5245 = vrot.lane.b32.xlu0 %v5023_v47, %s6340_s2  ;;  %5247 = vrot.lane.b32.xlu1 %v7977_v49, %s6340_s2 }
 0xdc8   :  { %5243 = vrot.lane.b32.xlu0 %v5022_v8, %s6340_s2  ;;  %5251 = vrot.lane.b32.xlu1 %v5026_v52, %s6340_s2 }
 0xdcc   :  { %5253 = vrot.lane.b32.xlu0 %v7986_v5, %s6340_s2  ;;  %5249 = vrot.lane.b32.xlu1 %v5025_v48, %s6340_s2  ;;  %v5070_v48 = vld [vmem:[#allocation3 + $0x330] sm:$0xff] }
 0xdd0   :  { %5257 = vrot.lane.b32.xlu0 %v5029_v12, %s6340_s2  ;;  %5259 = vrot.lane.b32.xlu1 %v7991_v15, %s6340_s2  ;;  %v5074_v12 = vld [vmem:[#allocation3 + $0x360] sm:$0xff] }
 0xdd4   :  { %5255 = vrot.lane.b32.xlu0 %v5028_v11, %s6340_s2  ;;  %5263 = vrot.lane.b32.xlu1 %v5032_v44, %s6340_s2 }
 0xdd8   :  { %5265 = vrot.lane.b32.xlu0 %v7998_v51, %s6340_s2  ;;  %5261 = vrot.lane.b32.xlu1 %v5031_v57, %s6340_s2 }
 0xddc   :  { %5269 = vrot.lane.b32.xlu0 %v5035_v23, %s6340_s2  ;;  %5271 = vrot.lane.b32.xlu1 %v8003_v63, %s6340_s2 }
 0xde0   :  { %5267 = vrot.lane.b32.xlu0 %v5034_v6, %s6340_s2  ;;  %5275 = vrot.lane.b32.xlu1 %v5038_v28, %s6340_s2  ;;  %v5075_v6 = vld [vmem:[#allocation3 + $0x368] sm:$0xff]  ;;  %v5073_v28 = vld [vmem:[#allocation3 + $0x358] sm:$0xff] }
 0xde4   :  { %5277 = vrot.lane.b32.xlu0 %v8010_v35, %s6340_s2  ;;  %5273 = vrot.lane.b32.xlu1 %v5037_v27, %s6340_s2 }
 0xde8   :  { %5281 = vrot.lane.b32.xlu0 %v5041_v61, %s6340_s2  ;;  %5283 = vrot.lane.b32.xlu1 %v8015_v0, %s6340_s2 }
 0xdec   :  { %5279 = vrot.lane.b32.xlu0 %v5040_v3, %s6340_s2  ;;  %5287 = vrot.lane.b32.xlu1 %v5044_v21, %s6340_s2  ;;  %v5077_v21 = vld [vmem:[#allocation3 + $0x388] sm:$0xff] }
 0xdf0   :  { %5289 = vrot.lane.b32.xlu0 %v8022_v17, %s6340_s2  ;;  %5285 = vrot.lane.b32.xlu1 %v5043_v59, %s6340_s2  ;;  %v5078_v59 = vld [vmem:[#allocation3 + $0x390] sm:$0xff] }
 0xdf4   :  { %5293 = vrot.lane.b32.xlu0 %v5047_v13, %s6340_s2  ;;  %5295 = vrot.lane.b32.xlu1 %v8027_v4, %s6340_s2 }
 0xdf8   :  { %5291 = vrot.lane.b32.xlu0 %v5046_v9, %s6340_s2  ;;  %5299 = vrot.lane.b32.xlu1 %v5050_v50, %s6340_s2 }
 0xdfc   :  { %5301 = vrot.lane.b32.xlu0 %v8034_v55, %s6340_s2  ;;  %5297 = vrot.lane.b32.xlu1 %v5049_v29, %s6340_s2  ;;  %v5076_v29 = vld [vmem:[#allocation3 + $0x380] sm:$0xff] }
 0xe00   :  { %5305 = vrot.lane.b32.xlu0 %v5053_v20, %s6340_s2  ;;  %5307 = vrot.lane.b32.xlu1 %v8039_v56, %s6340_s2  ;;  %v5080_v20 = vld [vmem:[#allocation3 + $0x3b0] sm:$0xff] }
 0xe04   :  { %5303 = vrot.lane.b32.xlu0 %v5052_v62, %s6340_s2  ;;  %5311 = vrot.lane.b32.xlu1 %v5056_v10, %s6340_s2 }
 0xe08   :  { %5313 = vrot.lane.b32.xlu0 %v8046_v14, %s6340_s2  ;;  %5309 = vrot.lane.b32.xlu1 %v5055_v54, %s6340_s2 }
 0xe0c   :  { %5317 = vrot.lane.b32.xlu0 %v5059_v32, %s6340_s2  ;;  %5319 = vrot.lane.b32.xlu1 %v5060_v60, %s6340_s2  ;;  %v5081_v60 = vld [vmem:[#allocation3 + $0x3b8] sm:$0xff] }
 0xe10   :  { %5315 = vrot.lane.b32.xlu0 %v5058_v2, %s6340_s2  ;;  %5323 = vrot.lane.b32.xlu1 %v5062_v19, %s6340_s2  ;;  %v5079_v2 = vld [vmem:[#allocation3 + $0x3a8] sm:$0xff] }
 0xe14   :  { %5325 = vrot.lane.b32.xlu0 %v5063_v26, %s6340_s2  ;;  %5321 = vrot.lane.b32.xlu1 %v5061_v25, %s6340_s2 }
 0xe18   :  { %5329 = vrot.lane.b32.xlu0 %v5065_v16, %s6340_s2  ;;  %5331 = vrot.lane.b32.xlu1 %v5066_v30, %s6340_s2  ;;  %v5083_v16 = vld [vmem:[#allocation3 + $0x3d8] sm:$0xff]  ;;  %v5084_v30 = vld [vmem:[#allocation3 + $0x3e0] sm:$0xff] }
 0xe1c   :  { %5327 = vrot.lane.b32.xlu0 %v5064_v34, %s6340_s2  ;;  %5335 = vrot.lane.b32.xlu1 %v5068_v33, %s6340_s2 }
 0xe1e   :  { %v5222_v43 = vpop.permute.xlu0 %5221  ;;  %v5220_v46 = vpop.permute.xlu1 %5219 }
 0xe1f   :  { %v5412_v52 = vsel %vm5411_vm10, %v5220_v46, %v5222_v43 }
 0xe20   :  { %5337 = vrot.lane.b32.xlu0 %v5069_v7, %s6340_s2  ;;  %5333 = vrot.lane.b32.xlu1 %v5067_v22, %s6340_s2  ;;  %v5082_v22 = vld [vmem:[#allocation3 + $0x3d0] sm:$0xff] }
 0xe22   :  { %v5224_v53 = vpop.permute.xlu0 %5223  ;;  %v5228_v47 = vpop.permute.xlu1 %5227 }
 0xe23   :  { %v5413_v8 = vsel %vm5411_vm10, %v5222_v43, %v5224_v53  ;;  %v5086_v43 = vld [vmem:[#allocation3 + $0x400] sm:$0xff] }
 0xe24   :  { %5341 = vrot.lane.b32.xlu0 %v5071_v39, %s6340_s2  ;;  %5343 = vrot.lane.b32.xlu1 %v5072_v36, %s6340_s2 }
 0xe25   :  { %5540 = vmatprep.subr.bf16.mxu1 %v5413_v8  ;;  %v5085_v8 = vld [vmem:[#allocation3 + $0x3f8] sm:$0xff] }
 0xe26   :  { %5541 = vmatpush1.bf16.msra.mxu1 %v5412_v52  ;;  %v5230_v11 = vpop.permute.xlu0 %5229  ;;  %v5226_v44 = vpop.permute.xlu1 %5225 }
 0xe27   :  { %v5414_v57 = vsel %vm5411_vm10, %v5226_v44, %v5228_v47  ;;  %v5415_v23 = vsel %vm5411_vm10, %v5228_v47, %v5230_v11  ;;  %v5087_v47 = vld [vmem:[#allocation3 + $0x408] sm:$0xff]  ;;  %v5090_v44 = vld [vmem:[#allocation3 + $0x430] sm:$0xff] }
 0xe28   :  { %5339 = vrot.lane.b32.xlu0 %v5070_v48, %s6340_s2  ;;  %5347 = vrot.lane.b32.xlu1 %v5074_v12, %s6340_s2  ;;  %v5089_v11 = vld [vmem:[#allocation3 + $0x428] sm:$0xff] }
 0xe29   :  { %5542 = vmatprep.subr.bf16.mxu1 %v5415_v23 }
 0xe2a   :  { %5543 = vmatpush1.bf16.msra.mxu1 %v5414_v57  ;;  %v5234_v27 = vpop.permute.xlu0 %5233  ;;  %v5236_v61 = vpop.permute.xlu1 %5235 }
 0xe2b   :  { %v5417_v3 = vsel %vm5411_vm10, %v5234_v27, %v5236_v61 }
 0xe2c   :  { %5349 = vrot.lane.b32.xlu0 %v5075_v6, %s6340_s2  ;;  %5345 = vrot.lane.b32.xlu1 %v5073_v28, %s6340_s2  ;;  %v5088_v28 = vld [vmem:[#allocation3 + $0x420] sm:$0xff] }
 0xe2d   :  { %5544 = vmatprep.subr.bf16.mxu1 %v5417_v3 }
 0xe2e   :  { %v5232_v13 = vpop.permute.xlu0 %5231  ;;  %v5240_v9 = vpop.permute.xlu1 %5239 }
 0xe2f   :  { %v5416_v50 = vsel %vm5411_vm10, %v5232_v13, %v5234_v27  ;;  %v5092_v27 = vld [vmem:[#allocation3 + $0x450] sm:$0xff]  ;;  %v5093_v13 = vld [vmem:[#allocation3 + $0x458] sm:$0xff] }
 0xe30   :  { %5353 = vrot.lane.b32.xlu0 %v5077_v21, %s6340_s2  ;;  %5355 = vrot.lane.b32.xlu1 %v5078_v59, %s6340_s2 }
 0xe31   :  { %5545 = vmatpush1.bf16.msra.mxu1 %v5416_v50 }
 0xe32   :  { %v5242_v62 = vpop.permute.xlu0 %5241  ;;  %v5238_v10 = vpop.permute.xlu1 %5237 }
 0xe33   :  { %v5418_v54 = vsel %vm5411_vm10, %v5238_v10, %v5240_v9  ;;  %v5419_v32 = vsel %vm5411_vm10, %v5240_v9, %v5242_v62  ;;  %v5091_v9 = vld [vmem:[#allocation3 + $0x448] sm:$0xff]  ;;  %v5095_v62 = vld [vmem:[#allocation3 + $0x478] sm:$0xff]  ;;  %v5096_v10 = vld [vmem:[#allocation3 + $0x480] sm:$0xff] }
 0xe34   :  { %5351 = vrot.lane.b32.xlu0 %v5076_v29, %s6340_s2  ;;  %5359 = vrot.lane.b32.xlu1 %v5080_v20, %s6340_s2 }
 0xe35   :  { %5546 = vmatprep.subr.bf16.mxu1 %v5419_v32 }
 0xe36   :  { %5547 = vmatpush1.bf16.msra.mxu1 %v5418_v54  ;;  %v5246_v19 = vpop.permute.xlu0 %5245  ;;  %v5248_v26 = vpop.permute.xlu1 %5247 }
 0xe37   :  { %v5421_v25 = vsel %vm5411_vm10, %v5246_v19, %v5248_v26 }
 0xe38   :  { %5361 = vrot.lane.b32.xlu0 %v5081_v60, %s6340_s2  ;;  %5357 = vrot.lane.b32.xlu1 %v5079_v2, %s6340_s2  ;;  %v5094_v2 = vld [vmem:[#allocation3 + $0x470] sm:$0xff] }
 0xe39   :  { %5548 = vmatprep.subr.bf16.mxu1 %v5421_v25 }
 0xe3a   :  { %v5244_v34 = vpop.permute.xlu0 %5243  ;;  %v5252_v33 = vpop.permute.xlu1 %5251 }
 0xe3b   :  { %v5420_v7 = vsel %vm5411_vm10, %v5244_v34, %v5246_v19  ;;  %v5098_v19 = vld [vmem:[#allocation3 + $0x4a0] sm:$0xff]  ;;  %v5099_v34 = vld [vmem:[#allocation3 + $0x4a8] sm:$0xff] }
 0xe3c   :  { %5365 = vrot.lane.b32.xlu0 %v5083_v16, %s6340_s2  ;;  %5367 = vrot.lane.b32.xlu1 %v5084_v30, %s6340_s2 }
 0xe3d   :  { %5549 = vmatpush1.bf16.msra.mxu1 %v5420_v7 }
 0xe3e   :  { %v5254_v46 = vpop.permute.xlu0 %5253  ;;  %v5250_v39 = vpop.permute.xlu1 %5249 }
 0xe3f   :  { %v5422_v36 = vsel %vm5411_vm10, %v5250_v39, %v5252_v33  ;;  %v5423_v53 = vsel %vm5411_vm10, %v5252_v33, %v5254_v46  ;;  %v5097_v33 = vld [vmem:[#allocation3 + $0x498] sm:$0xff]  ;;  %v5101_v46 = vld [vmem:[#allocation3 + $0x4c8] sm:$0xff]  ;;  %v5102_v39 = vld [vmem:[#allocation3 + $0x4d0] sm:$0xff] }
 0xe40   :  { %5363 = vrot.lane.b32.xlu0 %v5082_v22, %s6340_s2  ;;  %5371 = vrot.lane.b32.xlu1 %v5086_v43, %s6340_s2 }
 0xe41   :  { %5550 = vmatprep.subr.bf16.mxu1 %v5423_v53 }
 0xe42   :  { %5551 = vmatpush1.bf16.msra.mxu1 %v5422_v36  ;;  %v5258_v52 = vpop.permute.xlu0 %5257  ;;  %v5260_v48 = vpop.permute.xlu1 %5259 }
 0xe43   :  { %v5425_v12 = vsel %vm5411_vm10, %v5258_v52, %v5260_v48 }
 0xe44   :  { %5373 = vrot.lane.b32.xlu0 %v5087_v47, %s6340_s2  ;;  %5369 = vrot.lane.b32.xlu1 %v5085_v8, %s6340_s2  ;;  %v5100_v8 = vld [vmem:[#allocation3 + $0x4c0] sm:$0xff] }
 0xe45   :  { %5552 = vmatprep.subr.bf16.mxu1 %v5425_v12 }
 0xe46   :  { %v5256_v57 = vpop.permute.xlu0 %5255  ;;  %v5264_v23 = vpop.permute.xlu1 %5263 }
 0xe47   :  { %v5424_v6 = vsel %vm5411_vm10, %v5256_v57, %v5258_v52  ;;  %v5104_v52 = vld [vmem:[#allocation3 + $0x4f0] sm:$0xff]  ;;  %v5105_v57 = vld [vmem:[#allocation3 + $0x4f8] sm:$0xff] }
 0xe48   :  { %5377 = vrot.lane.b32.xlu0 %v5089_v11, %s6340_s2  ;;  %5379 = vrot.lane.b32.xlu1 %v5090_v44, %s6340_s2 }
 0xe49   :  { %5553 = vmatpush1.bf16.msra.mxu1 %v5424_v6 }
 0xe4a   :  { %v5266_v61 = vpop.permute.xlu0 %5265  ;;  %v5262_v3 = vpop.permute.xlu1 %5261 }
 0xe4b   :  { %v5426_v21 = vsel %vm5411_vm10, %v5262_v3, %v5264_v23  ;;  %v5427_v59 = vsel %vm5411_vm10, %v5264_v23, %v5266_v61  ;;  %v5103_v23 = vld [vmem:[#allocation3 + $0x4e8] sm:$0xff] }
 0xe4c   :  { %5375 = vrot.lane.b32.xlu0 %v5088_v28, %s6340_s2  ;;  %5383 = vrot.lane.b32.xlu1 %v5092_v27, %s6340_s2 }
 0xe4d   :  { %5554 = vmatprep.subr.bf16.mxu1 %v5427_v59 }
 0xe4e   :  { %5555 = vmatpush1.bf16.msra.mxu1 %v5426_v21  ;;  %v5270_v50 = vpop.permute.xlu0 %5269  ;;  %v5272_v29 = vpop.permute.xlu1 %5271 }
 0xe4f   :  { %v5429_v20 = vsel %vm5411_vm10, %v5270_v50, %v5272_v29 }
 0xe50   :  { %5385 = vrot.lane.b32.xlu0 %v5093_v13, %s6340_s2  ;;  %5381 = vrot.lane.b32.xlu1 %v5091_v9, %s6340_s2 }
 0xe51   :  { %5556 = vmatprep.subr.bf16.mxu1 %v5429_v20 }
 0xe52   :  { %v5268_v54 = vpop.permute.xlu0 %5267  ;;  %v5276_v32 = vpop.permute.xlu1 %5275 }
 0xe53   :  { %v5428_v60 = vsel %vm5411_vm10, %v5268_v54, %v5270_v50 }
 0xe54   :  { %5389 = vrot.lane.b32.xlu0 %v5095_v62, %s6340_s2  ;;  %5391 = vrot.lane.b32.xlu1 %v5096_v10, %s6340_s2 }
 0xe55   :  { %5557 = vmatpush1.bf16.msra.mxu1 %v5428_v60 }
 0xe56   :  { %v5278_v26 = vpop.permute.xlu0 %5277  ;;  %v5274_v25 = vpop.permute.xlu1 %5273 }
 0xe57   :  { %v5430_v16 = vsel %vm5411_vm10, %v5274_v25, %v5276_v32  ;;  %v5431_v30 = vsel %vm5411_vm10, %v5276_v32, %v5278_v26 }
 0xe58   :  { %5387 = vrot.lane.b32.xlu0 %v5094_v2, %s6340_s2  ;;  %5395 = vrot.lane.b32.xlu1 %v5098_v19, %s6340_s2  ;;  %v8156_v2 = vld [vmem:[#allocation7 + $0x24] ss:$8 sm:$0xf] }
 0xe59   :  { %5558 = vmatprep.subr.bf16.mxu1 %v5431_v30 }
 0xe5a   :  { %5559 = vmatpush1.bf16.msra.mxu1 %v5430_v16  ;;  %v5282_v7 = vpop.permute.xlu0 %5281  ;;  %v5284_v22 = vpop.permute.xlu1 %5283 }
 0xe5b   :  { %v5433_v43 = vsel %vm5411_vm10, %v5282_v7, %v5284_v22 }
 0xe5c   :  { %5397 = vrot.lane.b32.xlu0 %v5099_v34, %s6340_s2  ;;  %5393 = vrot.lane.b32.xlu1 %v5097_v33, %s6340_s2 }
 0xe5d   :  { %5560 = vmatprep.subr.bf16.mxu1 %v5433_v43 }
 0xe5e   :  { %v5280_v36 = vpop.permute.xlu0 %5279  ;;  %v5288_v53 = vpop.permute.xlu1 %5287 }
 0xe5f   :  { %v5432_v47 = vsel %vm5411_vm10, %v5280_v36, %v5282_v7 }
 0xe60   :  { %5401 = vrot.lane.b32.xlu0 %v5101_v46, %s6340_s2  ;;  %5403 = vrot.lane.b32.xlu1 %v5102_v39, %s6340_s2 }
 0xe61   :  { %5561 = vmatpush1.bf16.msra.mxu1 %v5432_v47  ;;  %v4919_v47 = vrot.slane %v8156_v2, %v7342_v41 }
 0xe62   :  { %v5290_v48 = vpop.permute.xlu0 %5289  ;;  %v5286_v12 = vpop.permute.xlu1 %5285 }
 0xe63   :  { %v5434_v11 = vsel %vm5411_vm10, %v5286_v12, %v5288_v53  ;;  %v5435_v44 = vsel %vm5411_vm10, %v5288_v53, %v5290_v48 }
 0xe64   :  { %5399 = vrot.lane.b32.xlu0 %v5100_v8, %s6340_s2  ;;  %5407 = vrot.lane.b32.xlu1 %v5104_v52, %s6340_s2 }
 0xe65   :  { %5562 = vmatprep.subr.bf16.mxu1 %v5435_v44 }
 0xe66   :  { %5563 = vmatpush1.bf16.msra.mxu1 %v5434_v11  ;;  %v5294_v6 = vpop.permute.xlu0 %5293  ;;  %v5296_v28 = vpop.permute.xlu1 %5295 }
 0xe67   :  { %v5437_v27 = vsel %vm5411_vm10, %v5294_v6, %v5296_v28 }
 0xe68   :  { %5409 = vrot.lane.b32.xlu0 %v5105_v57, %s6340_s2  ;;  %5405 = vrot.lane.b32.xlu1 %v5103_v23, %s6340_s2 }
 0xe69   :  { %5564 = vmatprep.subr.bf16.mxu1 %v5437_v27 }
 0xe6a   :  { %v5292_v61 = vpop.permute.xlu0 %5291  ;;  %v5300_v3 = vpop.permute.xlu1 %5299 }
 0xe6b   :  { %v5436_v21 = vsel %vm5411_vm10, %v5292_v61, %v5294_v6 }
 0xe6c   :  { %5565 = vmatpush1.bf16.msra.mxu1 %v5436_v21  ;;  %5675 = vrot.lane.b32.xlu0 %v8003_v63, %s6340_s2 }
 0xe6d   :  { %5659 = vrot.lane.b32.xlu1 %v7952_v45, %s6340_s2 }
 0xe6e   :  { %v5302_v59 = vpop.permute.xlu0 %5301  ;;  %v5298_v13 = vpop.permute.xlu1 %5297 }
 0xe6f   :  { %v5438_v9 = vsel %vm5411_vm10, %v5298_v13, %v5300_v3  ;;  %v5439_v50 = vsel %vm5411_vm10, %v5300_v3, %v5302_v59 }
 0xe70   :  { %5566 = vmatprep.subr.bf16.mxu1 %v5439_v50  ;;  %5677 = vrot.lane.b32.xlu0 %v8010_v35, %s6340_s2 }
 0xe71   :  { %5567 = vmatpush1.bf16.msra.mxu1 %v5438_v9  ;;  %5661 = vrot.lane.b32.xlu1 %v7957_v31, %s6340_s2 }
 0xe72   :  { %v5306_v29 = vpop.permute.xlu0 %5305  ;;  %v5308_v20 = vpop.permute.xlu1 %5307 }
 0xe73   :  { %v5441_v63 = vsel %vm5411_vm10, %v5306_v29, %v5308_v20 }
 0xe74   :  { %5568 = vmatprep.subr.bf16.mxu1 %v5441_v63  ;;  %5679 = vrot.lane.b32.xlu0 %v8015_v0, %s6340_s2 }
 0xe75   :  { %5663 = vrot.lane.b32.xlu1 %v7964_v40, %s6340_s2 }
 0xe76   :  { %v5304_v45 = vpop.permute.xlu0 %5303  ;;  %v5312_v62 = vpop.permute.xlu1 %5311 }
 0xe77   :  { %v5440_v10 = vsel %vm5411_vm10, %v5304_v45, %v5306_v29 }
 0xe78   :  { %5569 = vmatpush1.bf16.msra.mxu1 %v5440_v10  ;;  %5681 = vrot.lane.b32.xlu0 %v8022_v17, %s6340_s2 }
 0xe79   :  { %5665 = vrot.lane.b32.xlu1 %v7972_v24, %s6340_s2 }
 0xe7a   :  { %v5314_v31 = vpop.permute.xlu0 %5313  ;;  %v5310_v35 = vpop.permute.xlu1 %5309 }
 0xe7b   :  { %v5442_v54 = vsel %vm5411_vm10, %v5310_v35, %v5312_v62  ;;  %v5443_v0 = vsel %vm5411_vm10, %v5312_v62, %v5314_v31 }
 0xe7c   :  { %5570 = vmatprep.subr.bf16.mxu1 %v5443_v0  ;;  %5683 = vrot.lane.b32.xlu0 %v8027_v4, %s6340_s2 }
 0xe7d   :  { %5571 = vmatpush1.bf16.msra.mxu1 %v5442_v54  ;;  %5667 = vrot.lane.b32.xlu1 %v7977_v49, %s6340_s2  ;;  %v4907_v49 = vrot.slane %v8156_v2, %v7340_v38 }
 0xe7e   :  { %v5318_v40 = vpop.permute.xlu0 %5317  ;;  %v5320_v32 = vpop.permute.xlu1 %5319 }
 0xe7f   :  { %v5445_v17 = vsel %vm5411_vm10, %v5318_v40, %v5320_v32 }
 0xe80   :  { %5581 = vmatprep.subr.bf16.mxu1 %v5445_v17  ;;  %5685 = vrot.lane.b32.xlu0 %v8034_v55, %s6340_s2  ;;  %v4911_v55 = vrot.slane %v8156_v2, %v7344_v42 }
 0xe81   :  { %5669 = vrot.lane.b32.xlu1 %v7986_v5, %s6340_s2 }
 0xe82   :  { %v5316_v24 = vpop.permute.xlu0 %5315  ;;  %v5324_v60 = vpop.permute.xlu1 %5323 }
 0xe83   :  { %v5444_v36 = vsel %vm5411_vm10, %v5316_v24, %v5318_v40 }
 0xe84   :  { %5687 = vrot.lane.b32.xlu0 %v8039_v56, %s6340_s2 }
 0xe85   :  { %5671 = vrot.lane.b32.xlu1 %v7991_v15, %s6340_s2 }
 0xe86   :  { %v5326_v4 = vpop.permute.xlu0 %5325  ;;  %v5322_v19 = vpop.permute.xlu1 %5321 }
 0xe87   :  { %v5446_v8 = vsel %vm5411_vm10, %v5322_v19, %v5324_v60 }
 0xe88   :  { %v4958_v26 = vpop.f32.mrb[48].mxu1  ;;  %5689 = vrot.lane.b32.xlu0 %v8046_v14, %s6340_s2  ;;  %v5447_v14 = vsel %vm5411_vm10, %v5324_v60, %v5326_v4 }
 0xe89   :  { %v4959_v5 = vadd.f32 %v4958_v26, %v4907_v49  ;;  %v4960_v25 = vpop.f32.mrb[49].mxu1  ;;  %5673 = vrot.lane.b32.xlu1 %v7998_v51, %s6340_s2 }
 0xe8a   :  { %v4961_v56 = vadd.f32 %v4960_v25, %v4911_v55  ;;  %v5330_v16 = vpop.permute.xlu0 %5329  ;;  %v5332_v30 = vpop.permute.xlu1 %5331 }
 0xe8b   :  { %v5006_v34 = vmax.f32 %v4959_v5, 0.0  ;;  %v4962_v33 = vpop.f32.mrb[50].mxu1  ;;  %v5449_v48 = vsel %vm5411_vm10, %v5330_v16, %v5332_v30 }
 0xe8c   :  { %v5007_v15 = vmax.f32 %v4961_v56, 0.0  ;;  %v4963_v7 = vpop.f32.mrb[51].mxu1 }
 0xe8d   :  { %v5106_v22 = vpack.c.bf16 %v5006_v34, %v5006_v34 }
 0xe8e   :  { %v5107_v43 = vpack.c.bf16 %v5007_v15, %v5007_v15  ;;  %v5328_v46 = vpop.permute.xlu0 %5327  ;;  %v5336_v39 = vpop.permute.xlu1 %5335 }
 0xe8f   :  { %v5448_v6 = vsel %vm5411_vm10, %v5328_v46, %v5330_v16 }
 0xe90   :  { %5572 = vmatprep.mubr.bf16.mxu1 %v5107_v43  ;;  %v8175_v52 = vpop.f32.mrb[52].mxu1 }
 0xe91   :  { %5573 = vmatmul.mubr.bf16.vlgmr.msra.gmra.mrb[56].mxu1 %v5106_v22  ;;  %v5001_v44 = vpop.f32.mrb[53].mxu1 }
 0xe92   :  { %5582 = vmatpush1.bf16.msra.mxu1 %v5444_v36  ;;  %v5338_v53 = vpop.permute.xlu0 %5337  ;;  %v5334_v51 = vpop.permute.xlu1 %5333  ;;  %v5002_v57 = vadd.f32 %v5001_v44, %v4919_v47 }
 0xe93   :  { %5583 = vmatprep.subr.bf16.mxu1 %v5447_v14  ;;  %v5003_v23 = vpop.f32.mrb[54].mxu1  ;;  %v5451_v27 = vsel %vm5411_vm10, %v5336_v39, %v5338_v53  ;;  %v5450_v59 = vsel %vm5411_vm10, %v5334_v51, %v5336_v39 }
 0xe94   :  { %v5004_v28 = vpop.f32.mrb[55].mxu1  ;;  %v5009_v3 = vmax.f32 %v5002_v57, 0.0 }
 0xe96   :  { %5584 = vmatpush1.bf16.msra.mxu1 %v5446_v8  ;;  %v5342_v12 = vpop.permute.xlu0 %5341  ;;  %v5344_v11 = vpop.permute.xlu1 %5343  ;;  %v5109_v21 = vpack.c.bf16 %v5009_v3, %v5009_v3 }
 0xe97   :  { %5585 = vmatprep.subr.bf16.mxu1 %v5449_v48  ;;  %v5453_v13 = vsel %vm5411_vm10, %v5342_v12, %v5344_v11 }
 0xe98   :  { %5613 = vmatprep.mubr.bf16.mxu1 %v5109_v21 }
 0xe9a   :  { %5586 = vmatpush1.bf16.msra.mxu1 %v5448_v6  ;;  %v5340_v41 = vpop.permute.xlu0 %5339  ;;  %v5348_v61 = vpop.permute.xlu1 %5347  ;;  %v4915_v6 = vrot.slane %v8156_v2, %v7338_v37 }
 0xe9b   :  { %5587 = vmatprep.subr.bf16.mxu1 %v5451_v27  ;;  %v5452_v20 = vsel %vm5411_vm10, %v5340_v41, %v5342_v12 }
 0xe9c   :  { %v5000_v27 = vadd.f32 %v8175_v52, %v4915_v6 }
 0xe9e   :  { %5588 = vmatpush1.bf16.msra.mxu1 %v5450_v59  ;;  %v5350_v9 = vpop.permute.xlu0 %5349  ;;  %v5346_v50 = vpop.permute.xlu1 %5345  ;;  %v5008_v21 = vmax.f32 %v5000_v27, 0.0 }
 0xe9f   :  { %5589 = vmatprep.subr.bf16.mxu1 %v5453_v13  ;;  %v5455_v29 = vsel %vm5411_vm10, %v5348_v61, %v5350_v9  ;;  %v5454_v10 = vsel %vm5411_vm10, %v5346_v50, %v5348_v61 }
 0xea0   :  { %v5108_v37 = vpack.c.bf16 %v5008_v21, %v5008_v21 }
 0xea2   :  { %5590 = vmatpush1.bf16.msra.mxu1 %v5452_v20  ;;  %v5354_v63 = vpop.permute.xlu0 %5353  ;;  %v5356_v45 = vpop.permute.xlu1 %5355 }
 0xea3   :  { %5591 = vmatprep.subr.bf16.mxu1 %v5455_v29  ;;  %v5457_v62 = vsel %vm5411_vm10, %v5354_v63, %v5356_v45 }
 0xea6   :  { %5592 = vmatpush1.bf16.msra.mxu1 %v5454_v10  ;;  %v5352_v31 = vpop.permute.xlu0 %5351  ;;  %v5360_v35 = vpop.permute.xlu1 %5359 }
 0xea7   :  { %5593 = vmatprep.subr.bf16.mxu1 %v5457_v62  ;;  %v5456_v54 = vsel %vm5411_vm10, %v5352_v31, %v5354_v63 }
 0xeaa   :  { %5594 = vmatpush1.bf16.msra.mxu1 %v5456_v54  ;;  %v5362_v0 = vpop.permute.xlu0 %5361  ;;  %v5358_v40 = vpop.permute.xlu1 %5357 }
 0xeab   :  { %v5458_v32 = vsel %vm5411_vm10, %v5358_v40, %v5360_v35  ;;  %v5459_v17 = vsel %vm5411_vm10, %v5360_v35, %v5362_v0 }
 0xeac   :  { %5595 = vmatprep.subr.bf16.mxu1 %v5459_v17 }
 0xeae   :  { %5596 = vmatpush1.bf16.msra.mxu1 %v5458_v32  ;;  %v5366_v24 = vpop.permute.xlu0 %5365  ;;  %v5368_v60 = vpop.permute.xlu1 %5367 }
 0xeaf   :  { %v5461_v49 = vsel %vm5411_vm10, %v5366_v24, %v5368_v60  ;;  %v5111_v60 = vld [vmem:[#allocation7 + $0x25] ss:$8 sm:$0x3] }
 0xeb0   :  { %5597 = vmatprep.subr.bf16.mxu1 %v5461_v49  ;;  %v5116_v49 = vrot.slane %v5111_v60, %v7340_v38 }
 0xeb2   :  { %v5364_v4 = vpop.permute.xlu0 %5363  ;;  %v5372_v19 = vpop.permute.xlu1 %5371 }
 0xeb3   :  { %v5460_v55 = vsel %vm5411_vm10, %v5364_v4, %v5366_v24  ;;  %v5120_v4 = vrot.slane %v5111_v60, %v7344_v42 }
 0xeb4   :  { %5598 = vmatpush1.bf16.msra.mxu1 %v5460_v55 }
 0xeb6   :  { %v5374_v26 = vpop.permute.xlu0 %5373  ;;  %v5370_v5 = vpop.permute.xlu1 %5369 }
 0xeb7   :  { %v5462_v25 = vsel %vm5411_vm10, %v5370_v5, %v5372_v19  ;;  %v5463_v56 = vsel %vm5411_vm10, %v5372_v19, %v5374_v26 }
 0xeb8   :  { %5599 = vmatprep.subr.bf16.mxu1 %v5463_v56 }
 0xeb9   :  { %5600 = vmatpush1.bf16.msra.mxu1 %v5462_v25 }
 0xeba   :  { %v5378_v16 = vpop.permute.xlu0 %5377  ;;  %v5380_v30 = vpop.permute.xlu1 %5379 }
 0xebb   :  { %v5465_v34 = vsel %vm5411_vm10, %v5378_v16, %v5380_v30 }
 0xebc   :  { %5601 = vmatprep.subr.bf16.mxu1 %v5465_v34 }
 0xebe   :  { %v5376_v33 = vpop.permute.xlu0 %5375  ;;  %v5384_v15 = vpop.permute.xlu1 %5383 }
 0xebf   :  { %v5464_v7 = vsel %vm5411_vm10, %v5376_v33, %v5378_v16 }
 0xec0   :  { %5602 = vmatpush1.bf16.msra.mxu1 %v5464_v7  ;;  %v5642_v7 = vld [vmem:[#allocation7 + $0x26] ss:$0 sm:$0xff] }
 0xec2   :  { %v5386_v22 = vpop.permute.xlu0 %5385  ;;  %v5382_v43 = vpop.permute.xlu1 %5381 }
 0xec3   :  { %v5466_v46 = vsel %vm5411_vm10, %v5382_v43, %v5384_v15  ;;  %v5467_v39 = vsel %vm5411_vm10, %v5384_v15, %v5386_v22 }
 0xec4   :  { %5603 = vmatprep.subr.bf16.mxu1 %v5467_v39 }
 0xec5   :  { %5604 = vmatpush1.bf16.msra.mxu1 %v5466_v46 }
 0xec6   :  { %v5390_v36 = vpop.permute.xlu0 %5389  ;;  %v5392_v14 = vpop.permute.xlu1 %5391 }
 0xec7   :  { %v5469_v53 = vsel %vm5411_vm10, %v5390_v36, %v5392_v14 }
 0xec8   :  { %5605 = vmatprep.subr.bf16.mxu1 %v5469_v53 }
 0xeca   :  { %v5388_v51 = vpop.permute.xlu0 %5387  ;;  %v5396_v47 = vpop.permute.xlu1 %5395 }
 0xecb   :  { %v5468_v8 = vsel %vm5411_vm10, %v5388_v51, %v5390_v36 }
 0xecc   :  { %5606 = vmatpush1.bf16.msra.mxu1 %v5468_v8 }
 0xece   :  { %v5398_v48 = vpop.permute.xlu0 %5397  ;;  %v5394_v12 = vpop.permute.xlu1 %5393 }
 0xecf   :  { %v5470_v11 = vsel %vm5411_vm10, %v5394_v12, %v5396_v47  ;;  %v5471_v44 = vsel %vm5411_vm10, %v5396_v47, %v5398_v48 }
 0xed0   :  { %5607 = vmatprep.subr.bf16.mxu1 %v5471_v44 }
 0xed1   :  { %5608 = vmatpush1.bf16.msra.mxu1 %v5470_v11 }
 0xed2   :  { %v5402_v57 = vpop.permute.xlu0 %5401  ;;  %v5404_v23 = vpop.permute.xlu1 %5403 }
 0xed3   :  { %v5473_v28 = vsel %vm5411_vm10, %v5402_v57, %v5404_v23 }
 0xed4   :  { %5609 = vmatprep.subr.bf16.mxu1 %v5473_v28 }
 0xed6   :  { %v5400_v41 = vpop.permute.xlu0 %5399  ;;  %v5408_v61 = vpop.permute.xlu1 %5407 }
 0xed7   :  { %v5472_v3 = vsel %vm5411_vm10, %v5400_v41, %v5402_v57 }
 0xed8   :  { %5610 = vmatpush1.bf16.msra.mxu1 %v5472_v3 }
 0xeda   :  { %v5410_v59 = vpop.permute.xlu0 %5409  ;;  %v5406_v13 = vpop.permute.xlu1 %5405 }
 0xedb   :  { %v5474_v9 = vsel %vm5411_vm10, %v5406_v13, %v5408_v61  ;;  %v5475_v50 = vsel %vm5411_vm10, %v5408_v61, %v5410_v59 }
 0xedc   :  { %5611 = vmatprep.subr.bf16.mxu1 %v5475_v50 }
 0xedd   :  { %5612 = vmatpush1.bf16.msra.mxu1 %v5474_v9 }
 0xede   :  { %v5676_v2 = vpop.permute.xlu0 %5675  ;;  %6157 = vmatprep.subr.mxu1 %v6338_v58 }
 0xedf   :  { %6133 = vmatprep.subr.bf16.mxu0 %v5676_v2  ;;  %v5660_v52 = vpop.permute.xlu1 %5659 }
 0xee0   :  { %5614 = vmatmul.mubr.bf16.vlgmr.msra.gmra.mrb[56].mxu1 %v5108_v37  ;;  %6134 = vmatpush3.bf16.msra.mxu0 %v5660_v52 }
 0xee1   :  { %6159 = vmatprep.mubr.msk.f32.mxu1 %vm6341_vm11, %v6338_v58 }
 0xee2   :  { %v5678_v29 = vpop.permute.xlu0 %5677 }
 0xee3   :  { %6135 = vmatprep.subr.bf16.mxu0 %v5678_v29  ;;  %v5662_v20 = vpop.permute.xlu1 %5661 }
 0xee4   :  { %6136 = vmatpush3.bf16.msra.mxu0 %v5662_v20 }
 0xee6   :  { %v5680_v63 = vpop.permute.xlu0 %5679 }
 0xee7   :  { %6137 = vmatprep.subr.bf16.mxu0 %v5680_v63  ;;  %v5664_v45 = vpop.permute.xlu1 %5663 }
 0xee8   :  { %6138 = vmatpush3.bf16.msra.mxu0 %v5664_v45 }
 0xeea   :  { %v5682_v62 = vpop.permute.xlu0 %5681 }
 0xeeb   :  { %6139 = vmatprep.subr.bf16.mxu0 %v5682_v62  ;;  %v5666_v10 = vpop.permute.xlu1 %5665 }
 0xeec   :  { %6140 = vmatpush3.bf16.msra.mxu0 %v5666_v10 }
 0xeee   :  { %v5684_v31 = vpop.permute.xlu0 %5683 }
 0xeef   :  { %6141 = vmatprep.subr.bf16.mxu0 %v5684_v31  ;;  %v5668_v35 = vpop.permute.xlu1 %5667 }
 0xef0   :  { %6142 = vmatpush3.bf16.msra.mxu0 %v5668_v35 }
 0xef2   :  { %v5686_v54 = vpop.permute.xlu0 %5685 }
 0xef3   :  { %6143 = vmatprep.subr.bf16.mxu0 %v5686_v54  ;;  %v5670_v0 = vpop.permute.xlu1 %5669 }
 0xef4   :  { %6144 = vmatpush3.bf16.msra.mxu0 %v5670_v0 }
 0xef6   :  { %v5688_v40 = vpop.permute.xlu0 %5687 }
 0xef7   :  { %6145 = vmatprep.subr.bf16.mxu0 %v5688_v40  ;;  %v5672_v32 = vpop.permute.xlu1 %5671 }
 0xef8   :  { %6146 = vmatpush3.bf16.msra.mxu0 %v5672_v32 }
 0xefa   :  { %v5690_v17 = vpop.permute.xlu0 %5689 }
 0xefb   :  { %6147 = vmatprep.subr.bf16.mxu0 %v5690_v17  ;;  %v5674_v24 = vpop.permute.xlu1 %5673 }
 0xefc   :  { %6148 = vmatpush3.bf16.msra.mxu0 %v5674_v24 }
 0xfb3   :  { %v5615_v19 = vpop.f32.mrb[56].mxu1 }
 0xfb4   :  { %v6180_v55 = vadd.f32 %v5615_v19, %v5116_v49  ;;  %v5617_v26 = vpop.f32.mrb[57].mxu1 }
 0xfb5   :  { %v6181_v5 = vadd.f32 %v5617_v26, %v5120_v4  ;;  %v5619_v25 = vpop.f32.mrb[58].mxu1 }
 0xfb6   :  { %v5622_v56 = vmax.f32 %v6180_v55, 0.0  ;;  %v5620_v16 = vpop.f32.mrb[59].mxu1 }
 0xfb7   :  { %v5623_v30 = vmax.f32 %v6181_v5, 0.0 }
 0xfb8   :  { %v5640_v33 = vpack.c.bf16 %v5622_v56, %v5622_v56 }
 0xfb9   :  { %v5641_v34 = vpack.c.bf16 %v5623_v30, %v5623_v30 }
 0xfbb   :  { %5739 = vmatprep.mubr.bf16.mxu0 %v5641_v34 }
 0xfbc   :  { %5740 = vmatmul.mubr.bf16.vlgmr.msra.gmra.mrb[44].mxu0 %v5640_v33 }
0x108f   :  { %v6149_v15 = vpop.f32.mrb[44].mxu0 }
0x1090   :  { %v6150_v22 = vpop.f32.mrb[45].mxu0 }
0x1091   :  { %v6151_v43 = vadd.f32 %v6150_v22, %v6149_v15  ;;  %v6152_v42 = vpop.f32.mrb[46].mxu0 }
0x1092   :  { %v6153_v46 = vpop.f32.mrb[47].mxu0 }
0x1093   :  { %v5742_v39 = vadd.f32 %v6151_v43, %v5642_v7 }
0x1095   :  { %v5747_v36 = vmul.f32 1.442695, %v5742_v39 }
0x1097   :  { %6158 = vmatpush3.xpose.msk.msra.mxu1 %vm2482_vm9, %v5747_v36  ;;  %v5748_v14 = vmul.f32 %v5747_v36, %v5747_v36 }
0x1099   :  { %v5749_v53 = vsel %vm2482_vm9, %v5748_v14, 0.0 }
0x109a   :  { %6160 = vmatmul.mubr.msk.f32.vlgmr.msra.gmra.mrb[60].mxu1 %vm2482_vm9, %v5747_v36  ;;  %5750 = vadd.xlane.f32.xlu0 %v5749_v53 }
0x10b0   :  { %5882 = vrot.lane.b32.xlu0 %v7621_v1, %s6319_s16 }
0x1127   :  { %v5751_v58 = vpop.xlane.xlu0 %5750 }
0x1128   :  { %5825 = vxpose.xlu1.b32.start.end [1/1] (short) (narrow) %v5751_v58, 8 }
0x112b   :  { %v5883_v37 = vpop.permute.xlu0 %5882 }
0x112c   :  { %v5889_v2 = vsel %vm1668_vm0, %v7944_v18, %v5883_v37 }
0x116d   :  { %v5821_v51 = vpop.f32.mrb[60].mxu1 }
0x116e   :  { %v6161_v47 = vpop.f32.mrb[61].mxu1  ;;  %v5862_v12 = vmul.f32 2.0, %v5821_v51 }
0x11a8   :  { %v5841_v8 = vpop.trf.xlu1 }
0x11a9   :  { %v5860_v48 = vrot.slane %v5841_v8, %v7340_v38 }
0x11ab   :  { %v5861_v11 = vadd.f32 %v5860_v48, %v5751_v58 }
0x11ad   :  { %v5863_v44 = vsub.f32 %v5861_v11, %v5862_v12 }
0x11af   :  { %v5864_v57 = vmax.f32 %v5863_v44, 0.0 }
0x11b1   :  { %6250 = vrsqrt.f32 %v5864_v57  ;;  %vm5867_vm12 = vcmp.eq.f32.partialorder %v5864_v57, inf  ;;  %v5870_v28 = vand.u32 2147483648, %v5864_v57  ;;  %vm5869_vm13 = vcmp.eq.f32.partialorder %v5864_v57, 0.0 }
0x11b2   :  { %v5874_v59 = vmul.f32 1.6666666, %v5864_v57 }
0x11bb   :  { %v6251_v23 = vpop.eup %6250 }
0x11bc   :  { %v5866_v6 = vmul.f32 %v6251_v23, %v5864_v57 }
0x11be   :  { %v5868_v27 = vsel %vm5867_vm12, %v5864_v57, %v5866_v6 }
0x11bf   :  { %v5871_v41 = vsel %vm5869_vm13, %v5870_v28, %v5868_v27 }
0x11c0   :  { %v5876_v1 = vmul.f32 -2.236068, %v5871_v41  ;;  %v5872_v3 = vmul.f32 2.236068, %v5871_v41 }
0x11c2   :  { %v5877_v61 = vmul.f32 1.442695, %v5876_v1  ;;  %v5873_v21 = vadd.f32 1.0, %v5872_v3 }
0x11c4   :  { %6252 = vpow2.f32 %v5877_v61  ;;  %v5875_v13 = vadd.f32 %v5874_v59, %v5873_v21 }
0x11ce   :  { %v6253_v38 = vpop.eup %6252 }
0x11cf   :  { %v5879_v9 = vmul.f32 %v6253_v38, %v5875_v13 }
0x11d1   :  { %v5880_v50 = vmul.f32 0.6931472, %v5879_v9 }
0x11d3   :  { %5886 = vrot.lane.b32.xlu1 %v5880_v50, %s6340_s2 }
0x1245   :  { %v5887_v52 = vpop.permute.xlu1 %5886 }
0x1246   :  { %v5891_v29 = vsel %vm5411_vm10, %v5889_v2, %v5887_v52 }
0x1247   :  { %v5893_v20 = vsel %vm5892_vm14, %v5891_v29, 0.0 }
0x1248   :  { %5895 = vst [vmem:[%s8229_s4 + $0x8] sm:$0xff] %v5893_v20 }
0x1249   :  { %5900 = vsyncpa [#allocation6], 1 }
0x124a   :  { %5901 = vsyncpa [#allocation8], 1 }
0x124b   :  { %5902 = vsyncmov [#allocation4] }
0x124e   :  { %s5903_s19 = vpop.sfrf %5902 }
0x124f   :  { %p5995_p2 = scmp.ne.s32.totalorder %s5903_s19, 0 }
0x1251   :  { %5907 = shalt.err (%p5995_p2)  }
0x1252   :  { %5909 = vsyncmov [#allocation4 + $0x1] }
0x1255   :  { %s5910_s21 = vpop.sfrf %5909 }
0x1256   :  { %p5996_p3 = scmp.ne.s32.totalorder %s5910_s21, 0 }
0x1258   :  { %5914 = shalt.err (%p5996_p3)  }
0x1259   :  { %5916 = vsyncmov [#allocation4 + $0x2] }
0x125c   :  { %s5917_s22 = vpop.sfrf %5916 }
0x125d   :  { %p5997_p4 = scmp.ne.s32.totalorder %s5917_s22, 0 }
0x125f   :  { %5921 = shalt.err (%p5997_p4)  }
0x1260   :  { %5923 = vsyncmov [#allocation4 + $0x3] }
0x1263   :  { %s5924_s30 = vpop.sfrf %5923 }
0x1264   :  { %p5998_p5 = scmp.ne.s32.totalorder %s5924_s30, 0 }
0x1266   :  { %5928 = shalt.err (%p5998_p5)  }
0x1267   :  { %5930 = vsyncmov [#allocation4 + $0x4] }
0x126a   :  { %s5931_s4 = vpop.sfrf %5930 }
0x126b   :  { %p5999_p6 = scmp.ne.s32.totalorder %s5931_s4, 0 }
0x126d   :  { %5935 = shalt.err (%p5999_p6)  }
0x126e   :  { %5937 = vsyncmov [#allocation4 + $0x5] }
0x1271   :  { %s5938_s5 = vpop.sfrf %5937 }
0x1272   :  { %p6000_p7 = scmp.ne.s32.totalorder %s5938_s5, 0 }
0x1274   :  { %5942 = shalt.err (%p6000_p7)  }

</bundles_post_ra>
